<compile_context>
chip_gen: v5e
topology: v5e:2x2
jax: 0.10.0
libtpu: 0.0.40
codegen_flags: <defaults>
</compile_context>

<pallas_src>
import jax
import jax.numpy as jnp
from jax import lax
from jax.experimental import pallas as pl
from jax.experimental.pallas import tpu as pltpu


# ----------------------------------------------------------------------------
# helpers
# ----------------------------------------------------------------------------
def _round_up(x, m):
    return ((x + m - 1) // m) * m


def _tile(dim, align, cap):
    """Return (padded_dim, tile): tile is a multiple of `align`, <= cap, and
    divides padded_dim (padded_dim is a multiple of `align`)."""
    p = _round_up(dim, align)
    if p <= cap:
        return p, p
    t = cap
    while p % t:
        t -= align
    return p, t


def _pad2(x, rows, cols):
    pr, pc = rows - x.shape[0], cols - x.shape[1]
    if pr == 0 and pc == 0:
        return x
    return jnp.pad(x, ((0, pr), (0, pc)))


# ----------------------------------------------------------------------------
# Tiled matmul kernel with fused (bias + residual + ReLU) epilogue
# ----------------------------------------------------------------------------
def _make_mm_kernel(relu, has_residual):
    def kernel(*refs):
        if has_residual:
            a_ref, b_ref, bias_ref, res_ref, o_ref, acc_ref = refs
        else:
            a_ref, b_ref, bias_ref, o_ref, acc_ref = refs
            res_ref = None
        k = pl.program_id(2)

        @pl.when(k == 0)
        def _init():
            acc_ref[...] = jnp.zeros_like(acc_ref)

        acc_ref[...] += jnp.dot(a_ref[...], b_ref[...],
                                preferred_element_type=jnp.float32)

        @pl.when(k == pl.num_programs(2) - 1)
        def _finalize():
            out = acc_ref[...] + bias_ref[...]
            if has_residual:
                out = out + res_ref[...].astype(jnp.float32)
            if relu:
                out = jnp.maximum(out, 0.0)
            o_ref[...] = out.astype(o_ref.dtype)

    return kernel


def fused_matmul(a, b, bias, *, residual=None, relu=False,
                 out_dtype=jnp.bfloat16):
    """(M, K) @ (K, N) + bias [+ residual] [-> relu], tiled K-reduction matmul.

    Inputs are cast to bf16 for the MXU; accumulation is float32 in VMEM.
    M/K/N are zero-padded to tile multiples; the result is sliced back.
    """
    M, K = a.shape
    K2, N = b.shape
    assert K == K2

    Mp, tm = _tile(M, 8, 256)      # sublane-aligned rows
    Kp, tk = _tile(K, 128, 512)    # lane-aligned reduction
    Np, tn = _tile(N, 128, 256)    # lane-dense output

    a_p = _pad2(a.astype(jnp.bfloat16), Mp, Kp)
    b_p = _pad2(b.astype(jnp.bfloat16), Kp, Np)
    bias_p = _pad2(bias.reshape(1, N).astype(jnp.float32), 1, Np)

    inputs = [a_p, b_p, bias_p]
    in_specs = [
        pl.BlockSpec((tm, tk), lambda i, j, k: (i, k)),
        pl.BlockSpec((tk, tn), lambda i, j, k: (k, j)),
        pl.BlockSpec((1, tn), lambda i, j, k: (0, j)),
    ]
    if residual is not None:
        res_p = _pad2(residual, Mp, Np)
        inputs.append(res_p)
        in_specs.append(pl.BlockSpec((tm, tn), lambda i, j, k: (i, j)))

    grid = (Mp // tm, Np // tn, Kp // tk)
    kernel = _make_mm_kernel(relu, residual is not None)

    out = pl.pallas_call(
        kernel,
        out_shape=jax.ShapeDtypeStruct((Mp, Np), out_dtype),
        grid=grid,
        in_specs=in_specs,
        out_specs=pl.BlockSpec((tm, tn), lambda i, j, k: (i, j)),
        scratch_shapes=[pltpu.VMEM((tm, tn), jnp.float32)],
        compiler_params=pltpu.CompilerParams(
            dimension_semantics=("parallel", "parallel", "arbitrary"),
            vmem_limit_bytes=48 * 1024 * 1024,
        ),
    )(*inputs)
    return out[:M, :N]


# ----------------------------------------------------------------------------
# Fused classification head kernel:
#   feat -> resnet.fc -> relu -> fc_out_1 -> relu -> fc_out_2 -> softmax
# ----------------------------------------------------------------------------
def _head_kernel(feat_ref, wfc_ref, bfc_ref, w1_ref, b1_ref, w2_ref, b2_ref,
                 o_ref):
    # resnet fc: (B,512) @ (512,1024-padded) ; then x = relu(resnet(x))
    logits = jnp.dot(feat_ref[...], wfc_ref[...],
                     preferred_element_type=jnp.float32) + bfc_ref[...]
    x = jnp.maximum(logits, 0.0)
    # x = relu(fc_out_1(x))   (1000->32; padded rows of w1 are zero)
    h = jnp.dot(x.astype(jnp.bfloat16), w1_ref[...],
                preferred_element_type=jnp.float32) + b1_ref[...]
    h = jnp.maximum(h, 0.0)
    # x = softmax(fc_out_2(x))  (32->2, lane-padded to 128; padded columns get
    # a -1e30 bias so their softmax contribution is exactly zero)
    z = jnp.dot(h.astype(jnp.bfloat16), w2_ref[...],
                preferred_element_type=jnp.float32) + b2_ref[...]
    z = z - jnp.max(z, axis=-1, keepdims=True)
    e = jnp.exp(z)
    o_ref[...] = e / jnp.sum(e, axis=-1, keepdims=True)


def fused_head(feat, p):
    """feat: (B, 512) float32 -> class probabilities (B, 2) float32."""
    B, D = feat.shape
    Bp = _round_up(B, 8)
    N1 = _round_up(1000, 128)          # 1024, lane-dense intermediate
    H = 32
    C_PAD = 128                        # lane-dense softmax output

    feat_p = jnp.zeros((Bp, D), jnp.bfloat16).at[:B].set(
        feat.astype(jnp.bfloat16))
    wfc_p = jnp.zeros((D, N1), jnp.bfloat16).at[:, :1000].set(
        p["fc_w"].astype(jnp.bfloat16))
    bfc_p = jnp.zeros((1, N1), jnp.float32).at[:, :1000].set(
        p["fc_b"].reshape(1, 1000).astype(jnp.float32))
    w1_p = jnp.zeros((N1, H), jnp.bfloat16).at[:1000].set(
        p["fc1_w"].astype(jnp.bfloat16))
    b1_p = p["fc1_b"].reshape(1, H).astype(jnp.float32)
    w2_p = jnp.zeros((H, C_PAD), jnp.bfloat16).at[:, :2].set(
        p["fc2_w"].astype(jnp.bfloat16))
    b2_p = jnp.full((1, C_PAD), -1e30, jnp.float32).at[:, :2].set(
        p["fc2_b"].reshape(1, 2).astype(jnp.float32))

    probs = pl.pallas_call(
        _head_kernel,
        out_shape=jax.ShapeDtypeStruct((Bp, C_PAD), jnp.float32),
        grid=(1,),
        in_specs=[
            pl.BlockSpec((Bp, D), lambda i: (0, 0)),
            pl.BlockSpec((D, N1), lambda i: (0, 0)),
            pl.BlockSpec((1, N1), lambda i: (0, 0)),
            pl.BlockSpec((N1, H), lambda i: (0, 0)),
            pl.BlockSpec((1, H), lambda i: (0, 0)),
            pl.BlockSpec((H, C_PAD), lambda i: (0, 0)),
            pl.BlockSpec((1, C_PAD), lambda i: (0, 0)),
        ],
        out_specs=pl.BlockSpec((Bp, C_PAD), lambda i: (0, 0)),
        compiler_params=pltpu.CompilerParams(
            vmem_limit_bytes=48 * 1024 * 1024),
    )(feat_p, wfc_p, bfc_p, w1_p, b1_p, w2_p, b2_p)
    return probs[:B, :2]


# ----------------------------------------------------------------------------
# Conv via im2col (static-stride JAX glue) + fused Pallas matmul
# ----------------------------------------------------------------------------
def _im2col(x, kh, kw, stride, pad):
    """x: (B, H, W, C) -> patches (B, oh, ow, kh*kw*C); (i, j, c) ordering.
    stride / pad / kh / kw are static Python ints."""
    x = jnp.pad(x, ((0, 0), (pad, pad), (pad, pad), (0, 0)))
    B, H, W, C = x.shape
    oh = (H - kh) // stride + 1
    ow = (W - kw) // stride + 1
    cols = []
    for i in range(kh):
        for j in range(kw):
            cols.append(x[:, i:i + stride * oh:stride,
                           j:j + stride * ow:stride, :])
    return jnp.concatenate(cols, axis=-1)


def conv2d_bn_act(x, w, bias, stride, pad, *, relu=True, residual=None):
    """x: (B,H,W,Cin) NHWC bf16, w: (kh,kw,Cin,Cout) BN-folded, bias: (Cout,).
    Bias + (optional residual add) + (optional ReLU) fused in the matmul."""
    kh, kw, cin, cout = w.shape
    patches = _im2col(x, kh, kw, stride, pad)
    B, oh, ow, K = patches.shape
    a = patches.reshape(B * oh * ow, K)
    b = w.reshape(kh * kw * cin, cout)
    res2d = None
    if residual is not None:
        res2d = residual.reshape(B * oh * ow, cout)
    out = fused_matmul(a, b, bias, residual=res2d, relu=relu,
                       out_dtype=jnp.bfloat16)
    return out.reshape(B, oh, ow, cout)


def maxpool_3x3_s2(x):
    # plain-JAX glue (3x3, stride 2, pad 1), eval semantics identical to torch
    init = jnp.asarray(-jnp.inf, dtype=x.dtype)
    return lax.reduce_window(x, init, lax.max,
                             (1, 3, 3, 1), (1, 2, 2, 1),
                             [(0, 0), (1, 1), (1, 1), (0, 0)])


# ----------------------------------------------------------------------------
# ResNet-18 backbone (synthetic deterministic weights, BN folded at build time)
# ----------------------------------------------------------------------------
STAGE_CFG = ((64, 64, 1), (64, 128, 2), (128, 256, 2), (256, 512, 2))


def _conv_init(key, kh, kw, cin, cout):
    std = (2.0 / (kh * kw * cin)) ** 0.5
    return jax.random.normal(key, (kh, kw, cin, cout), jnp.float32) * std


def _bn_init(c):
    return dict(gamma=jnp.ones((c,), jnp.float32),
                beta=jnp.zeros((c,), jnp.float32),
                mean=jnp.zeros((c,), jnp.float32),
                var=jnp.ones((c,), jnp.float32))


def _fold_bn(w, bn, eps=1e-5):
    """Fold eval-mode BatchNorm into the preceding conv weight + bias."""
    scale = bn["gamma"] / jnp.sqrt(bn["var"] + eps)           # (Cout,)
    w_f = (w * scale).astype(jnp.bfloat16)                    # bf16 MXU weights
    b_f = (bn["beta"] - bn["mean"] * scale).astype(jnp.float32)
    return w_f, b_f


def _linear_init(key, fin, fout):
    k1, k2 = jax.random.split(key)
    std = (1.0 / fin) ** 0.5
    w = jax.random.normal(k1, (fin, fout), jnp.float32) * std
    b = jax.random.normal(k2, (fout,), jnp.float32) * 0.01
    return w, b


def make_params(key):
    keys = iter(jax.random.split(key, 64))
    p = {}
    # stem (conv1 + bn1 folded)
    p["conv1_w"], p["conv1_b"] = _fold_bn(_conv_init(next(keys), 7, 7, 3, 64),
                                          _bn_init(64))
    # residual stages: 2 BasicBlocks each (ResNet-18)
    p["layers"] = []
    for cin, cout, stride in STAGE_CFG:
        blocks = []
        for b_idx in range(2):
            in_c = cin if b_idx == 0 else cout
            st = stride if b_idx == 0 else 1
            cw1, cb1 = _fold_bn(_conv_init(next(keys), 3, 3, in_c, cout),
                                _bn_init(cout))
            cw2, cb2 = _fold_bn(_conv_init(next(keys), 3, 3, cout, cout),
                                _bn_init(cout))
            blk = dict(conv1_w=cw1, conv1_b=cb1, conv2_w=cw2, conv2_b=cb2)
            if st != 1 or in_c != cout:
                blk["down_w"], blk["down_b"] = _fold_bn(
                    _conv_init(next(keys), 1, 1, in_c, cout), _bn_init(cout))
            blocks.append(blk)
        p["layers"].append(blocks)
    # resnet fc: 512 -> 1000 ; ClsNet head: 1000 -> 32 -> 2
    p["fc_w"], p["fc_b"] = _linear_init(next(keys), 512, 1000)
    p["fc1_w"], p["fc1_b"] = _linear_init(next(keys), 1000, 32)
    p["fc2_w"], p["fc2_b"] = _linear_init(next(keys), 32, 2)
    return p


def basic_block(x, blk, stride):
    # conv1 + folded-BN bias + relu (fused)
    out = conv2d_bn_act(x, blk["conv1_w"], blk["conv1_b"], stride, 1,
                        relu=True)
    # identity path (downsample conv is bias-only epilogue, no relu)
    if "down_w" in blk:
        identity = conv2d_bn_act(x, blk["down_w"], blk["down_b"], stride, 0,
                                 relu=False)
    else:
        identity = x
    # conv2 + folded-BN bias + residual add + relu, all fused in the epilogue
    return conv2d_bn_act(out, blk["conv2_w"], blk["conv2_b"], 1, 1,
                         relu=True, residual=identity)


def resnet18_features(x_nhwc, p):
    x = conv2d_bn_act(x_nhwc, p["conv1_w"], p["conv1_b"], 2, 3, relu=True)
    x = maxpool_3x3_s2(x)
    for blocks, (_, _, stage_stride) in zip(p["layers"], STAGE_CFG):
        for b_idx, blk in enumerate(blocks):
            st = stage_stride if b_idx == 0 else 1
            x = basic_block(x, blk, st)
    # adaptive average pool -> (B, 512), reduce in fp32
    return jnp.mean(x.astype(jnp.float32), axis=(1, 2))


# ----------------------------------------------------------------------------
# ClsNet forward
# ----------------------------------------------------------------------------
@jax.jit
def clsnet_forward(x_nchw, params):
    x_nhwc = jnp.transpose(x_nchw, (0, 2, 3, 1)).astype(jnp.bfloat16)
    feat = resnet18_features(x_nhwc, params)        # (B, 512) float32
    probs = fused_head(feat, params)                # (B, 2) float32, softmaxed
    return probs


if __name__ == "__main__":
    key = jax.random.PRNGKey(0)
    k_param, k_in = jax.random.split(key)
    params = make_params(k_param)
    x = jax.random.normal(k_in, (2, 3, 16, 16), jnp.float32)   # NCHW like PyTorch
    out = clsnet_forward(x, params)
    out = jax.block_until_ready(out)
    assert out.shape == (2, 2)
    assert bool(jnp.all(out >= 0.0))
    assert jnp.allclose(jnp.sum(out, axis=-1), 1.0, atol=1e-5)
    print("KERNEL_OK")
</pallas_src>

<mosaic_0001>
module attributes {stable_mosaic.version = 11 : i64} {
  func.func @kernel(%arg0: i32, %arg1: i32, %arg2: i32, %arg3: memref<128x256xbf16, #tpu.memory_space<vmem>>, %arg4: memref<256x128xbf16, #tpu.memory_space<vmem>>, %arg5: memref<1x128xf32, #tpu.memory_space<vmem>>, %arg6: memref<128x128xbf16, #tpu.memory_space<vmem>>, %arg7: memref<128x128xf32, #tpu.memory_space<vmem>>) attributes {dimension_semantics = [#tpu.dimension_semantics<parallel>, #tpu.dimension_semantics<parallel>, #tpu.dimension_semantics<arbitrary>], iteration_bounds = array<i64: 1, 1, 1>, scalar_prefetch = 0 : i64, scratch_operands = 1 : i64, tpu.core_type = #tpu.core_type<tc>, window_params = [{transform_indices = @transform_0, window_bounds = array<i64: 128, 256>}, {transform_indices = @transform_1, window_bounds = array<i64: 256, 128>}, {transform_indices = @transform_2, window_bounds = array<i64: 1, 128>}, {transform_indices = @transform_3, window_bounds = array<i64: 128, 128>}]} {
    %c0_i32 = arith.constant 0 : i32
    %0 = arith.cmpi eq, %arg2, %c0_i32 : i32
    %1 = arith.extui %0 : i1 to i32
    %c0_i32_0 = arith.constant 0 : i32
    %2 = arith.cmpi ne, %1, %c0_i32_0 : i32
    scf.if %2 {
      %cst_10 = arith.constant 0.000000e+00 : f32
      %12 = vector.broadcast %cst_10 : f32 to vector<128x128xf32>
      %c0_11 = arith.constant 0 : index
      %c0_12 = arith.constant 0 : index
      %13 = vector.load %arg7[%c0_11, %c0_12] : memref<128x128xf32, #tpu.memory_space<vmem>>, vector<128x128xf32>
      tpu.vector_store %arg7[%c0_11, %c0_12], %12 {strides = array<i32>} : memref<128x128xf32, #tpu.memory_space<vmem>>, vector<128x128xf32>,
    } else {
    }
    %c0 = arith.constant 0 : index
    %c0_1 = arith.constant 0 : index
    %3 = vector.load %arg7[%c0, %c0_1] : memref<128x128xf32, #tpu.memory_space<vmem>>, vector<128x128xf32>
    %c0_2 = arith.constant 0 : index
    %c0_3 = arith.constant 0 : index
    %4 = vector.load %arg3[%c0_2, %c0_3] : memref<128x256xbf16, #tpu.memory_space<vmem>>, vector<128x256xbf16>
    %c0_4 = arith.constant 0 : index
    %c0_5 = arith.constant 0 : index
    %5 = vector.load %arg4[%c0_4, %c0_5] : memref<256x128xbf16, #tpu.memory_space<vmem>>, vector<256x128xbf16>
    %cst = arith.constant dense<0.000000e+00> : vector<128x128xf32>
    %6 = tpu.matmul %4, %5, %cst {dimension_numbers = #tpu.dot_dimension_numbers<[1], [0], [0], [1], [0, 0, 1, 1], [], []>} : vector<128x256xbf16>, vector<256x128xbf16>, vector<128x128xf32> -> vector<128x128xf32>
    %7 = arith.addf %3, %6 : vector<128x128xf32>
    %c0_6 = arith.constant 0 : index
    %c0_7 = arith.constant 0 : index
    %8 = vector.load %arg7[%c0_6, %c0_7] : memref<128x128xf32, #tpu.memory_space<vmem>>, vector<128x128xf32>
    tpu.vector_store %arg7[%c0_6, %c0_7], %7 {strides = array<i32>} : memref<128x128xf32, #tpu.memory_space<vmem>>, vector<128x128xf32>,
    %c0_i32_8 = arith.constant 0 : i32
    %9 = arith.cmpi eq, %arg2, %c0_i32_8 : i32
    %10 = arith.extui %9 : i1 to i32
    %c0_i32_9 = arith.constant 0 : i32
    %11 = arith.cmpi ne, %10, %c0_i32_9 : i32
    scf.if %11 {
      %c0_10 = arith.constant 0 : index
      %c0_11 = arith.constant 0 : index
      %12 = vector.load %arg7[%c0_10, %c0_11] : memref<128x128xf32, #tpu.memory_space<vmem>>, vector<128x128xf32>
      %c0_12 = arith.constant 0 : index
      %c0_13 = arith.constant 0 : index
      %13 = vector.load %arg5[%c0_12, %c0_13] : memref<1x128xf32, #tpu.memory_space<vmem>>, vector<1x128xf32>
      %14 = vector.broadcast %13 : vector<1x128xf32> to vector<128x128xf32>
      %15 = arith.addf %12, %14 : vector<128x128xf32>
      %cst_14 = arith.constant 0.000000e+00 : f32
      %16 = vector.broadcast %cst_14 : f32 to vector<128x128xf32>
      %17 = arith.maximumf %15, %16 : vector<128x128xf32>
      %18 = arith.truncf %17 : vector<128x128xf32> to vector<128x128xbf16>
      %c0_15 = arith.constant 0 : index
      %c0_16 = arith.constant 0 : index
      %19 = vector.load %arg6[%c0_15, %c0_16] : memref<128x128xbf16, #tpu.memory_space<vmem>>, vector<128x128xbf16>
      tpu.vector_store %arg6[%c0_15, %c0_16], %18 {strides = array<i32>} : memref<128x128xbf16, #tpu.memory_space<vmem>>, vector<128x128xbf16>,
    } else {
    }
    return
  }
  func.func @transform_0(%arg0: i32, %arg1: i32, %arg2: i32) -> (i32, i32) {
    %c0_i32 = arith.constant 0 : i32
    return %arg0, %arg2 : i32, i32
  }
  func.func @transform_1(%arg0: i32, %arg1: i32, %arg2: i32) -> (i32, i32) {
    %c0_i32 = arith.constant 0 : i32
    return %arg2, %arg1 : i32, i32
  }
  func.func @transform_2(%arg0: i32, %arg1: i32, %arg2: i32) -> (i32, i32) {
    %c0_i32 = arith.constant 0 : i32
    %c0_i32_0 = arith.constant 0 : i32
    return %c0_i32, %arg1 : i32, i32
  }
  func.func @transform_3(%arg0: i32, %arg1: i32, %arg2: i32) -> (i32, i32) {
    %c0_i32 = arith.constant 0 : i32
    return %arg0, %arg1 : i32, i32
  }
}

module attributes {stable_mosaic.version = 11 : i64} {
  func.func @kernel(%arg0: i32, %arg1: i32, %arg2: i32, %arg3: memref<32x128xbf16, #tpu.memory_space<vmem>>, %arg4: memref<128x128xbf16, #tpu.memory_space<vmem>>, %arg5: memref<1x128xf32, #tpu.memory_space<vmem>>, %arg6: memref<32x128xbf16, #tpu.memory_space<vmem>>, %arg7: memref<32x128xf32, #tpu.memory_space<vmem>>) attributes {dimension_semantics = [#tpu.dimension_semantics<parallel>, #tpu.dimension_semantics<parallel>, #tpu.dimension_semantics<arbitrary>], iteration_bounds = array<i64: 1, 1, 5>, scalar_prefetch = 0 : i64, scratch_operands = 1 : i64, tpu.core_type = #tpu.core_type<tc>, window_params = [{transform_indices = @transform_0, window_bounds = array<i64: 32, 128>}, {transform_indices = @transform_1, window_bounds = array<i64: 128, 128>}, {transform_indices = @transform_2, window_bounds = array<i64: 1, 128>}, {transform_indices = @transform_3, window_bounds = array<i64: 32, 128>}]} {
    %c0_i32 = arith.constant 0 : i32
    %0 = arith.cmpi eq, %arg2, %c0_i32 : i32
    %1 = arith.extui %0 : i1 to i32
    %c0_i32_0 = arith.constant 0 : i32
    %2 = arith.cmpi ne, %1, %c0_i32_0 : i32
    scf.if %2 {
      %cst_9 = arith.constant 0.000000e+00 : f32
      %12 = vector.broadcast %cst_9 : f32 to vector<32x128xf32>
      %c0_10 = arith.constant 0 : index
      %c0_11 = arith.constant 0 : index
      %13 = vector.load %arg7[%c0_10, %c0_11] : memref<32x128xf32, #tpu.memory_space<vmem>>, vector<32x128xf32>
      tpu.vector_store %arg7[%c0_10, %c0_11], %12 {strides = array<i32>} : memref<32x128xf32, #tpu.memory_space<vmem>>, vector<32x128xf32>,
    } else {
    }
    %c0 = arith.constant 0 : index
    %c0_1 = arith.constant 0 : index
    %3 = vector.load %arg7[%c0, %c0_1] : memref<32x128xf32, #tpu.memory_space<vmem>>, vector<32x128xf32>
    %c0_2 = arith.constant 0 : index
    %c0_3 = arith.constant 0 : index
    %4 = vector.load %arg3[%c0_2, %c0_3] : memref<32x128xbf16, #tpu.memory_space<vmem>>, vector<32x128xbf16>
    %c0_4 = arith.constant 0 : index
    %c0_5 = arith.constant 0 : index
    %5 = vector.load %arg4[%c0_4, %c0_5] : memref<128x128xbf16, #tpu.memory_space<vmem>>, vector<128x128xbf16>
    %cst = arith.constant dense<0.000000e+00> : vector<32x128xf32>
    %6 = tpu.matmul %4, %5, %cst {dimension_numbers = #tpu.dot_dimension_numbers<[1], [0], [0], [1], [0, 0, 1, 1], [], []>} : vector<32x128xbf16>, vector<128x128xbf16>, vector<32x128xf32> -> vector<32x128xf32>
    %7 = arith.addf %3, %6 : vector<32x128xf32>
    %c0_6 = arith.constant 0 : index
    %c0_7 = arith.constant 0 : index
    %8 = vector.load %arg7[%c0_6, %c0_7] : memref<32x128xf32, #tpu.memory_space<vmem>>, vector<32x128xf32>
    tpu.vector_store %arg7[%c0_6, %c0_7], %7 {strides = array<i32>} : memref<32x128xf32, #tpu.memory_space<vmem>>, vector<32x128xf32>,
    %c4_i32 = arith.constant 4 : i32
    %9 = arith.cmpi eq, %arg2, %c4_i32 : i32
    %10 = arith.extui %9 : i1 to i32
    %c0_i32_8 = arith.constant 0 : i32
    %11 = arith.cmpi ne, %10, %c0_i32_8 : i32
    scf.if %11 {
      %c0_9 = arith.constant 0 : index
      %c0_10 = arith.constant 0 : index
      %12 = vector.load %arg7[%c0_9, %c0_10] : memref<32x128xf32, #tpu.memory_space<vmem>>, vector<32x128xf32>
      %c0_11 = arith.constant 0 : index
      %c0_12 = arith.constant 0 : index
      %13 = vector.load %arg5[%c0_11, %c0_12] : memref<1x128xf32, #tpu.memory_space<vmem>>, vector<1x128xf32>
      %14 = vector.broadcast %13 : vector<1x128xf32> to vector<32x128xf32>
      %15 = arith.addf %12, %14 : vector<32x128xf32>
      %cst_13 = arith.constant 0.000000e+00 : f32
      %16 = vector.broadcast %cst_13 : f32 to vector<32x128xf32>
      %17 = arith.maximumf %15, %16 : vector<32x128xf32>
      %18 = arith.truncf %17 : vector<32x128xf32> to vector<32x128xbf16>
      %c0_14 = arith.constant 0 : index
      %c0_15 = arith.constant 0 : index
      %19 = vector.load %arg6[%c0_14, %c0_15] : memref<32x128xbf16, #tpu.memory_space<vmem>>, vector<32x128xbf16>
      tpu.vector_store %arg6[%c0_14, %c0_15], %18 {strides = array<i32>} : memref<32x128xbf16, #tpu.memory_space<vmem>>, vector<32x128xbf16>,
    } else {
    }
    return
  }
  func.func @transform_0(%arg0: i32, %arg1: i32, %arg2: i32) -> (i32, i32) {
    %c0_i32 = arith.constant 0 : i32
    return %arg0, %arg2 : i32, i32
  }
  func.func @transform_1(%arg0: i32, %arg1: i32, %arg2: i32) -> (i32, i32) {
    %c0_i32 = arith.constant 0 : i32
    return %arg2, %arg1 : i32, i32
  }
  func.func @transform_2(%arg0: i32, %arg1: i32, %arg2: i32) -> (i32, i32) {
    %c0_i32 = arith.constant 0 : i32
    %c0_i32_0 = arith.constant 0 : i32
    return %c0_i32, %arg1 : i32, i32
  }
  func.func @transform_3(%arg0: i32, %arg1: i32, %arg2: i32) -> (i32, i32) {
    %c0_i32 = arith.constant 0 : i32
    return %arg0, %arg1 : i32, i32
  }
}

module attributes {stable_mosaic.version = 11 : i64} {
  func.func @kernel(%arg0: i32, %arg1: i32, %arg2: i32, %arg3: memref<32x128xbf16, #tpu.memory_space<vmem>>, %arg4: memref<128x128xbf16, #tpu.memory_space<vmem>>, %arg5: memref<1x128xf32, #tpu.memory_space<vmem>>, %arg6: memref<32x128xbf16, #tpu.memory_space<vmem>>, %arg7: memref<32x128xbf16, #tpu.memory_space<vmem>>, %arg8: memref<32x128xf32, #tpu.memory_space<vmem>>) attributes {dimension_semantics = [#tpu.dimension_semantics<parallel>, #tpu.dimension_semantics<parallel>, #tpu.dimension_semantics<arbitrary>], iteration_bounds = array<i64: 1, 1, 5>, scalar_prefetch = 0 : i64, scratch_operands = 1 : i64, tpu.core_type = #tpu.core_type<tc>, window_params = [{transform_indices = @transform_0, window_bounds = array<i64: 32, 128>}, {transform_indices = @transform_1, window_bounds = array<i64: 128, 128>}, {transform_indices = @transform_2, window_bounds = array<i64: 1, 128>}, {transform_indices = @transform_3, window_bounds = array<i64: 32, 128>}, {transform_indices = @transform_4, window_bounds = array<i64: 32, 128>}]} {
    %c0_i32 = arith.constant 0 : i32
    %0 = arith.cmpi eq, %arg2, %c0_i32 : i32
    %1 = arith.extui %0 : i1 to i32
    %c0_i32_0 = arith.constant 0 : i32
    %2 = arith.cmpi ne, %1, %c0_i32_0 : i32
    scf.if %2 {
      %cst_9 = arith.constant 0.000000e+00 : f32
      %12 = vector.broadcast %cst_9 : f32 to vector<32x128xf32>
      %c0_10 = arith.constant 0 : index
      %c0_11 = arith.constant 0 : index
      %13 = vector.load %arg8[%c0_10, %c0_11] : memref<32x128xf32, #tpu.memory_space<vmem>>, vector<32x128xf32>
      tpu.vector_store %arg8[%c0_10, %c0_11], %12 {strides = array<i32>} : memref<32x128xf32, #tpu.memory_space<vmem>>, vector<32x128xf32>,
    } else {
    }
    %c0 = arith.constant 0 : index
    %c0_1 = arith.constant 0 : index
    %3 = vector.load %arg8[%c0, %c0_1] : memref<32x128xf32, #tpu.memory_space<vmem>>, vector<32x128xf32>
    %c0_2 = arith.constant 0 : index
    %c0_3 = arith.constant 0 : index
    %4 = vector.load %arg3[%c0_2, %c0_3] : memref<32x128xbf16, #tpu.memory_space<vmem>>, vector<32x128xbf16>
    %c0_4 = arith.constant 0 : index
    %c0_5 = arith.constant 0 : index
    %5 = vector.load %arg4[%c0_4, %c0_5] : memref<128x128xbf16, #tpu.memory_space<vmem>>, vector<128x128xbf16>
    %cst = arith.constant dense<0.000000e+00> : vector<32x128xf32>
    %6 = tpu.matmul %4, %5, %cst {dimension_numbers = #tpu.dot_dimension_numbers<[1], [0], [0], [1], [0, 0, 1, 1], [], []>} : vector<32x128xbf16>, vector<128x128xbf16>, vector<32x128xf32> -> vector<32x128xf32>
    %7 = arith.addf %3, %6 : vector<32x128xf32>
    %c0_6 = arith.constant 0 : index
    %c0_7 = arith.constant 0 : index
    %8 = vector.load %arg8[%c0_6, %c0_7] : memref<32x128xf32, #tpu.memory_space<vmem>>, vector<32x128xf32>
    tpu.vector_store %arg8[%c0_6, %c0_7], %7 {strides = array<i32>} : memref<32x128xf32, #tpu.memory_space<vmem>>, vector<32x128xf32>,
    %c4_i32 = arith.constant 4 : i32
    %9 = arith.cmpi eq, %arg2, %c4_i32 : i32
    %10 = arith.extui %9 : i1 to i32
    %c0_i32_8 = arith.constant 0 : i32
    %11 = arith.cmpi ne, %10, %c0_i32_8 : i32
    scf.if %11 {
      %c0_9 = arith.constant 0 : index
      %c0_10 = arith.constant 0 : index
      %12 = vector.load %arg8[%c0_9, %c0_10] : memref<32x128xf32, #tpu.memory_space<vmem>>, vector<32x128xf32>
      %c0_11 = arith.constant 0 : index
      %c0_12 = arith.constant 0 : index
      %13 = vector.load %arg5[%c0_11, %c0_12] : memref<1x128xf32, #tpu.memory_space<vmem>>, vector<1x128xf32>
      %14 = vector.broadcast %13 : vector<1x128xf32> to vector<32x128xf32>
      %15 = arith.addf %12, %14 : vector<32x128xf32>
      %c0_13 = arith.constant 0 : index
      %c0_14 = arith.constant 0 : index
      %16 = vector.load %arg6[%c0_13, %c0_14] : memref<32x128xbf16, #tpu.memory_space<vmem>>, vector<32x128xbf16>
      %17 = arith.extf %16 : vector<32x128xbf16> to vector<32x128xf32>
      %18 = arith.addf %15, %17 : vector<32x128xf32>
      %cst_15 = arith.constant 0.000000e+00 : f32
      %19 = vector.broadcast %cst_15 : f32 to vector<32x128xf32>
      %20 = arith.maximumf %18, %19 : vector<32x128xf32>
      %21 = arith.truncf %20 : vector<32x128xf32> to vector<32x128xbf16>
      %c0_16 = arith.constant 0 : index
      %c0_17 = arith.constant 0 : index
      %22 = vector.load %arg7[%c0_16, %c0_17] : memref<32x128xbf16, #tpu.memory_space<vmem>>, vector<32x128xbf16>
      tpu.vector_store %arg7[%c0_16, %c0_17], %21 {strides = array<i32>} : memref<32x128xbf16, #tpu.memory_space<vmem>>, vector<32x128xbf16>,
    } else {
    }
    return
  }
  func.func @transform_0(%arg0: i32, %arg1: i32, %arg2: i32) -> (i32, i32) {
    %c0_i32 = arith.constant 0 : i32
    return %arg0, %arg2 : i32, i32
  }
  func.func @transform_1(%arg0: i32, %arg1: i32, %arg2: i32) -> (i32, i32) {
    %c0_i32 = arith.constant 0 : i32
    return %arg2, %arg1 : i32, i32
  }
  func.func @transform_2(%arg0: i32, %arg1: i32, %arg2: i32) -> (i32, i32) {
    %c0_i32 = arith.constant 0 : i32
    %c0_i32_0 = arith.constant 0 : i32
    return %c0_i32, %arg1 : i32, i32
  }
  func.func @transform_3(%arg0: i32, %arg1: i32, %arg2: i32) -> (i32, i32) {
    %c0_i32 = arith.constant 0 : i32
    return %arg0, %arg1 : i32, i32
  }
  func.func @transform_4(%arg0: i32, %arg1: i32, %arg2: i32) -> (i32, i32) {
    %c0_i32 = arith.constant 0 : i32
    return %arg0, %arg1 : i32, i32
  }
}

module attributes {stable_mosaic.version = 11 : i64} {
  func.func @kernel(%arg0: i32, %arg1: i32, %arg2: i32, %arg3: memref<8x128xbf16, #tpu.memory_space<vmem>>, %arg4: memref<128x128xbf16, #tpu.memory_space<vmem>>, %arg5: memref<1x128xf32, #tpu.memory_space<vmem>>, %arg6: memref<8x128xbf16, #tpu.memory_space<vmem>>, %arg7: memref<8x128xf32, #tpu.memory_space<vmem>>) attributes {dimension_semantics = [#tpu.dimension_semantics<parallel>, #tpu.dimension_semantics<parallel>, #tpu.dimension_semantics<arbitrary>], iteration_bounds = array<i64: 1, 1, 5>, scalar_prefetch = 0 : i64, scratch_operands = 1 : i64, tpu.core_type = #tpu.core_type<tc>, window_params = [{transform_indices = @transform_0, window_bounds = array<i64: 8, 128>}, {transform_indices = @transform_1, window_bounds = array<i64: 128, 128>}, {transform_indices = @transform_2, window_bounds = array<i64: 1, 128>}, {transform_indices = @transform_3, window_bounds = array<i64: 8, 128>}]} {
    %c0_i32 = arith.constant 0 : i32
    %0 = arith.cmpi eq, %arg2, %c0_i32 : i32
    %1 = arith.extui %0 : i1 to i32
    %c0_i32_0 = arith.constant 0 : i32
    %2 = arith.cmpi ne, %1, %c0_i32_0 : i32
    scf.if %2 {
      %cst_9 = arith.constant 0.000000e+00 : f32
      %12 = vector.broadcast %cst_9 : f32 to vector<8x128xf32>
      %c0_10 = arith.constant 0 : index
      %c0_11 = arith.constant 0 : index
      %13 = vector.load %arg7[%c0_10, %c0_11] : memref<8x128xf32, #tpu.memory_space<vmem>>, vector<8x128xf32>
      tpu.vector_store %arg7[%c0_10, %c0_11], %12 {strides = array<i32>} : memref<8x128xf32, #tpu.memory_space<vmem>>, vector<8x128xf32>,
    } else {
    }
    %c0 = arith.constant 0 : index
    %c0_1 = arith.constant 0 : index
    %3 = vector.load %arg7[%c0, %c0_1] : memref<8x128xf32, #tpu.memory_space<vmem>>, vector<8x128xf32>
    %c0_2 = arith.constant 0 : index
    %c0_3 = arith.constant 0 : index
    %4 = vector.load %arg3[%c0_2, %c0_3] : memref<8x128xbf16, #tpu.memory_space<vmem>>, vector<8x128xbf16>
    %c0_4 = arith.constant 0 : index
    %c0_5 = arith.constant 0 : index
    %5 = vector.load %arg4[%c0_4, %c0_5] : memref<128x128xbf16, #tpu.memory_space<vmem>>, vector<128x128xbf16>
    %cst = arith.constant dense<0.000000e+00> : vector<8x128xf32>
    %6 = tpu.matmul %4, %5, %cst {dimension_numbers = #tpu.dot_dimension_numbers<[1], [0], [0], [1], [0, 0, 1, 1], [], []>} : vector<8x128xbf16>, vector<128x128xbf16>, vector<8x128xf32> -> vector<8x128xf32>
    %7 = arith.addf %3, %6 : vector<8x128xf32>
    %c0_6 = arith.constant 0 : index
    %c0_7 = arith.constant 0 : index
    %8 = vector.load %arg7[%c0_6, %c0_7] : memref<8x128xf32, #tpu.memory_space<vmem>>, vector<8x128xf32>
    tpu.vector_store %arg7[%c0_6, %c0_7], %7 {strides = array<i32>} : memref<8x128xf32, #tpu.memory_space<vmem>>, vector<8x128xf32>,
    %c4_i32 = arith.constant 4 : i32
    %9 = arith.cmpi eq, %arg2, %c4_i32 : i32
    %10 = arith.extui %9 : i1 to i32
    %c0_i32_8 = arith.constant 0 : i32
    %11 = arith.cmpi ne, %10, %c0_i32_8 : i32
    scf.if %11 {
      %c0_9 = arith.constant 0 : index
      %c0_10 = arith.constant 0 : index
      %12 = vector.load %arg7[%c0_9, %c0_10] : memref<8x128xf32, #tpu.memory_space<vmem>>, vector<8x128xf32>
      %c0_11 = arith.constant 0 : index
      %c0_12 = arith.constant 0 : index
      %13 = vector.load %arg5[%c0_11, %c0_12] : memref<1x128xf32, #tpu.memory_space<vmem>>, vector<1x128xf32>
      %14 = vector.broadcast %13 : vector<1x128xf32> to vector<8x128xf32>
      %15 = arith.addf %12, %14 : vector<8x128xf32>
      %cst_13 = arith.constant 0.000000e+00 : f32
      %16 = vector.broadcast %cst_13 : f32 to vector<8x128xf32>
      %17 = arith.maximumf %15, %16 : vector<8x128xf32>
      %18 = arith.truncf %17 : vector<8x128xf32> to vector<8x128xbf16>
      %c0_14 = arith.constant 0 : index
      %c0_15 = arith.constant 0 : index
      %19 = vector.load %arg6[%c0_14, %c0_15] : memref<8x128xbf16, #tpu.memory_space<vmem>>, vector<8x128xbf16>
      tpu.vector_store %arg6[%c0_14, %c0_15], %18 {strides = array<i32>} : memref<8x128xbf16, #tpu.memory_space<vmem>>, vector<8x128xbf16>,
    } else {
    }
    return
  }
  func.func @transform_0(%arg0: i32, %arg1: i32, %arg2: i32) -> (i32, i32) {
    %c0_i32 = arith.constant 0 : i32
    return %arg0, %arg2 : i32, i32
  }
  func.func @transform_1(%arg0: i32, %arg1: i32, %arg2: i32) -> (i32, i32) {
    %c0_i32 = arith.constant 0 : i32
    return %arg2, %arg1 : i32, i32
  }
  func.func @transform_2(%arg0: i32, %arg1: i32, %arg2: i32) -> (i32, i32) {
    %c0_i32 = arith.constant 0 : i32
    %c0_i32_0 = arith.constant 0 : i32
    return %c0_i32, %arg1 : i32, i32
  }
  func.func @transform_3(%arg0: i32, %arg1: i32, %arg2: i32) -> (i32, i32) {
    %c0_i32 = arith.constant 0 : i32
    return %arg0, %arg1 : i32, i32
  }
}

module attributes {stable_mosaic.version = 11 : i64} {
  func.func @kernel(%arg0: i32, %arg1: i32, %arg2: i32, %arg3: memref<8x128xbf16, #tpu.memory_space<vmem>>, %arg4: memref<128x128xbf16, #tpu.memory_space<vmem>>, %arg5: memref<1x128xf32, #tpu.memory_space<vmem>>, %arg6: memref<8x128xbf16, #tpu.memory_space<vmem>>, %arg7: memref<8x128xf32, #tpu.memory_space<vmem>>) attributes {dimension_semantics = [#tpu.dimension_semantics<parallel>, #tpu.dimension_semantics<parallel>, #tpu.dimension_semantics<arbitrary>], iteration_bounds = array<i64: 1, 1, 1>, scalar_prefetch = 0 : i64, scratch_operands = 1 : i64, tpu.core_type = #tpu.core_type<tc>, window_params = [{transform_indices = @transform_0, window_bounds = array<i64: 8, 128>}, {transform_indices = @transform_1, window_bounds = array<i64: 128, 128>}, {transform_indices = @transform_2, window_bounds = array<i64: 1, 128>}, {transform_indices = @transform_3, window_bounds = array<i64: 8, 128>}]} {
    %c0_i32 = arith.constant 0 : i32
    %0 = arith.cmpi eq, %arg2, %c0_i32 : i32
    %1 = arith.extui %0 : i1 to i32
    %c0_i32_0 = arith.constant 0 : i32
    %2 = arith.cmpi ne, %1, %c0_i32_0 : i32
    scf.if %2 {
      %cst_10 = arith.constant 0.000000e+00 : f32
      %12 = vector.broadcast %cst_10 : f32 to vector<8x128xf32>
      %c0_11 = arith.constant 0 : index
      %c0_12 = arith.constant 0 : index
      %13 = vector.load %arg7[%c0_11, %c0_12] : memref<8x128xf32, #tpu.memory_space<vmem>>, vector<8x128xf32>
      tpu.vector_store %arg7[%c0_11, %c0_12], %12 {strides = array<i32>} : memref<8x128xf32, #tpu.memory_space<vmem>>, vector<8x128xf32>,
    } else {
    }
    %c0 = arith.constant 0 : index
    %c0_1 = arith.constant 0 : index
    %3 = vector.load %arg7[%c0, %c0_1] : memref<8x128xf32, #tpu.memory_space<vmem>>, vector<8x128xf32>
    %c0_2 = arith.constant 0 : index
    %c0_3 = arith.constant 0 : index
    %4 = vector.load %arg3[%c0_2, %c0_3] : memref<8x128xbf16, #tpu.memory_space<vmem>>, vector<8x128xbf16>
    %c0_4 = arith.constant 0 : index
    %c0_5 = arith.constant 0 : index
    %5 = vector.load %arg4[%c0_4, %c0_5] : memref<128x128xbf16, #tpu.memory_space<vmem>>, vector<128x128xbf16>
    %cst = arith.constant dense<0.000000e+00> : vector<8x128xf32>
    %6 = tpu.matmul %4, %5, %cst {dimension_numbers = #tpu.dot_dimension_numbers<[1], [0], [0], [1], [0, 0, 1, 1], [], []>} : vector<8x128xbf16>, vector<128x128xbf16>, vector<8x128xf32> -> vector<8x128xf32>
    %7 = arith.addf %3, %6 : vector<8x128xf32>
    %c0_6 = arith.constant 0 : index
    %c0_7 = arith.constant 0 : index
    %8 = vector.load %arg7[%c0_6, %c0_7] : memref<8x128xf32, #tpu.memory_space<vmem>>, vector<8x128xf32>
    tpu.vector_store %arg7[%c0_6, %c0_7], %7 {strides = array<i32>} : memref<8x128xf32, #tpu.memory_space<vmem>>, vector<8x128xf32>,
    %c0_i32_8 = arith.constant 0 : i32
    %9 = arith.cmpi eq, %arg2, %c0_i32_8 : i32
    %10 = arith.extui %9 : i1 to i32
    %c0_i32_9 = arith.constant 0 : i32
    %11 = arith.cmpi ne, %10, %c0_i32_9 : i32
    scf.if %11 {
      %c0_10 = arith.constant 0 : index
      %c0_11 = arith.constant 0 : index
      %12 = vector.load %arg7[%c0_10, %c0_11] : memref<8x128xf32, #tpu.memory_space<vmem>>, vector<8x128xf32>
      %c0_12 = arith.constant 0 : index
      %c0_13 = arith.constant 0 : index
      %13 = vector.load %arg5[%c0_12, %c0_13] : memref<1x128xf32, #tpu.memory_space<vmem>>, vector<1x128xf32>
      %14 = vector.broadcast %13 : vector<1x128xf32> to vector<8x128xf32>
      %15 = arith.addf %12, %14 : vector<8x128xf32>
      %16 = arith.truncf %15 : vector<8x128xf32> to vector<8x128xbf16>
      %c0_14 = arith.constant 0 : index
      %c0_15 = arith.constant 0 : index
      %17 = vector.load %arg6[%c0_14, %c0_15] : memref<8x128xbf16, #tpu.memory_space<vmem>>, vector<8x128xbf16>
      tpu.vector_store %arg6[%c0_14, %c0_15], %16 {strides = array<i32>} : memref<8x128xbf16, #tpu.memory_space<vmem>>, vector<8x128xbf16>,
    } else {
    }
    return
  }
  func.func @transform_0(%arg0: i32, %arg1: i32, %arg2: i32) -> (i32, i32) {
    %c0_i32 = arith.constant 0 : i32
    return %arg0, %arg2 : i32, i32
  }
  func.func @transform_1(%arg0: i32, %arg1: i32, %arg2: i32) -> (i32, i32) {
    %c0_i32 = arith.constant 0 : i32
    return %arg2, %arg1 : i32, i32
  }
  func.func @transform_2(%arg0: i32, %arg1: i32, %arg2: i32) -> (i32, i32) {
    %c0_i32 = arith.constant 0 : i32
    %c0_i32_0 = arith.constant 0 : i32
    return %c0_i32, %arg1 : i32, i32
  }
  func.func @transform_3(%arg0: i32, %arg1: i32, %arg2: i32) -> (i32, i32) {
    %c0_i32 = arith.constant 0 : i32
    return %arg0, %arg1 : i32, i32
  }
}

module attributes {stable_mosaic.version = 11 : i64} {
  func.func @kernel(%arg0: i32, %arg1: i32, %arg2: i32, %arg3: memref<8x384xbf16, #tpu.memory_space<vmem>>, %arg4: memref<384x128xbf16, #tpu.memory_space<vmem>>, %arg5: memref<1x128xf32, #tpu.memory_space<vmem>>, %arg6: memref<8x128xbf16, #tpu.memory_space<vmem>>, %arg7: memref<8x128xbf16, #tpu.memory_space<vmem>>, %arg8: memref<8x128xf32, #tpu.memory_space<vmem>>) attributes {dimension_semantics = [#tpu.dimension_semantics<parallel>, #tpu.dimension_semantics<parallel>, #tpu.dimension_semantics<arbitrary>], iteration_bounds = array<i64: 1, 1, 3>, scalar_prefetch = 0 : i64, scratch_operands = 1 : i64, tpu.core_type = #tpu.core_type<tc>, window_params = [{transform_indices = @transform_0, window_bounds = array<i64: 8, 384>}, {transform_indices = @transform_1, window_bounds = array<i64: 384, 128>}, {transform_indices = @transform_2, window_bounds = array<i64: 1, 128>}, {transform_indices = @transform_3, window_bounds = array<i64: 8, 128>}, {transform_indices = @transform_4, window_bounds = array<i64: 8, 128>}]} {
    %c0_i32 = arith.constant 0 : i32
    %0 = arith.cmpi eq, %arg2, %c0_i32 : i32
    %1 = arith.extui %0 : i1 to i32
    %c0_i32_0 = arith.constant 0 : i32
    %2 = arith.cmpi ne, %1, %c0_i32_0 : i32
    scf.if %2 {
      %cst_9 = arith.constant 0.000000e+00 : f32
      %12 = vector.broadcast %cst_9 : f32 to vector<8x128xf32>
      %c0_10 = arith.constant 0 : index
      %c0_11 = arith.constant 0 : index
      %13 = vector.load %arg8[%c0_10, %c0_11] : memref<8x128xf32, #tpu.memory_space<vmem>>, vector<8x128xf32>
      tpu.vector_store %arg8[%c0_10, %c0_11], %12 {strides = array<i32>} : memref<8x128xf32, #tpu.memory_space<vmem>>, vector<8x128xf32>,
    } else {
    }
    %c0 = arith.constant 0 : index
    %c0_1 = arith.constant 0 : index
    %3 = vector.load %arg8[%c0, %c0_1] : memref<8x128xf32, #tpu.memory_space<vmem>>, vector<8x128xf32>
    %c0_2 = arith.constant 0 : index
    %c0_3 = arith.constant 0 : index
    %4 = vector.load %arg3[%c0_2, %c0_3] : memref<8x384xbf16, #tpu.memory_space<vmem>>, vector<8x384xbf16>
    %c0_4 = arith.constant 0 : index
    %c0_5 = arith.constant 0 : index
    %5 = vector.load %arg4[%c0_4, %c0_5] : memref<384x128xbf16, #tpu.memory_space<vmem>>, vector<384x128xbf16>
    %cst = arith.constant dense<0.000000e+00> : vector<8x128xf32>
    %6 = tpu.matmul %4, %5, %cst {dimension_numbers = #tpu.dot_dimension_numbers<[1], [0], [0], [1], [0, 0, 1, 1], [], []>} : vector<8x384xbf16>, vector<384x128xbf16>, vector<8x128xf32> -> vector<8x128xf32>
    %7 = arith.addf %3, %6 : vector<8x128xf32>
    %c0_6 = arith.constant 0 : index
    %c0_7 = arith.constant 0 : index
    %8 = vector.load %arg8[%c0_6, %c0_7] : memref<8x128xf32, #tpu.memory_space<vmem>>, vector<8x128xf32>
    tpu.vector_store %arg8[%c0_6, %c0_7], %7 {strides = array<i32>} : memref<8x128xf32, #tpu.memory_space<vmem>>, vector<8x128xf32>,
    %c2_i32 = arith.constant 2 : i32
    %9 = arith.cmpi eq, %arg2, %c2_i32 : i32
    %10 = arith.extui %9 : i1 to i32
    %c0_i32_8 = arith.constant 0 : i32
    %11 = arith.cmpi ne, %10, %c0_i32_8 : i32
    scf.if %11 {
      %c0_9 = arith.constant 0 : index
      %c0_10 = arith.constant 0 : index
      %12 = vector.load %arg8[%c0_9, %c0_10] : memref<8x128xf32, #tpu.memory_space<vmem>>, vector<8x128xf32>
      %c0_11 = arith.constant 0 : index
      %c0_12 = arith.constant 0 : index
      %13 = vector.load %arg5[%c0_11, %c0_12] : memref<1x128xf32, #tpu.memory_space<vmem>>, vector<1x128xf32>
      %14 = vector.broadcast %13 : vector<1x128xf32> to vector<8x128xf32>
      %15 = arith.addf %12, %14 : vector<8x128xf32>
      %c0_13 = arith.constant 0 : index
      %c0_14 = arith.constant 0 : index
      %16 = vector.load %arg6[%c0_13, %c0_14] : memref<8x128xbf16, #tpu.memory_space<vmem>>, vector<8x128xbf16>
      %17 = arith.extf %16 : vector<8x128xbf16> to vector<8x128xf32>
      %18 = arith.addf %15, %17 : vector<8x128xf32>
      %cst_15 = arith.constant 0.000000e+00 : f32
      %19 = vector.broadcast %cst_15 : f32 to vector<8x128xf32>
      %20 = arith.maximumf %18, %19 : vector<8x128xf32>
      %21 = arith.truncf %20 : vector<8x128xf32> to vector<8x128xbf16>
      %c0_16 = arith.constant 0 : index
      %c0_17 = arith.constant 0 : index
      %22 = vector.load %arg7[%c0_16, %c0_17] : memref<8x128xbf16, #tpu.memory_space<vmem>>, vector<8x128xbf16>
      tpu.vector_store %arg7[%c0_16, %c0_17], %21 {strides = array<i32>} : memref<8x128xbf16, #tpu.memory_space<vmem>>, vector<8x128xbf16>,
    } else {
    }
    return
  }
  func.func @transform_0(%arg0: i32, %arg1: i32, %arg2: i32) -> (i32, i32) {
    %c0_i32 = arith.constant 0 : i32
    return %arg0, %arg2 : i32, i32
  }
  func.func @transform_1(%arg0: i32, %arg1: i32, %arg2: i32) -> (i32, i32) {
    %c0_i32 = arith.constant 0 : i32
    return %arg2, %arg1 : i32, i32
  }
  func.func @transform_2(%arg0: i32, %arg1: i32, %arg2: i32) -> (i32, i32) {
    %c0_i32 = arith.constant 0 : i32
    %c0_i32_0 = arith.constant 0 : i32
    return %c0_i32, %arg1 : i32, i32
  }
  func.func @transform_3(%arg0: i32, %arg1: i32, %arg2: i32) -> (i32, i32) {
    %c0_i32 = arith.constant 0 : i32
    return %arg0, %arg1 : i32, i32
  }
  func.func @transform_4(%arg0: i32, %arg1: i32, %arg2: i32) -> (i32, i32) {
    %c0_i32 = arith.constant 0 : i32
    return %arg0, %arg1 : i32, i32
  }
}

module attributes {stable_mosaic.version = 11 : i64} {
  func.func @kernel(%arg0: i32, %arg1: i32, %arg2: i32, %arg3: memref<8x384xbf16, #tpu.memory_space<vmem>>, %arg4: memref<384x128xbf16, #tpu.memory_space<vmem>>, %arg5: memref<1x128xf32, #tpu.memory_space<vmem>>, %arg6: memref<8x128xbf16, #tpu.memory_space<vmem>>, %arg7: memref<8x128xf32, #tpu.memory_space<vmem>>) attributes {dimension_semantics = [#tpu.dimension_semantics<parallel>, #tpu.dimension_semantics<parallel>, #tpu.dimension_semantics<arbitrary>], iteration_bounds = array<i64: 1, 1, 3>, scalar_prefetch = 0 : i64, scratch_operands = 1 : i64, tpu.core_type = #tpu.core_type<tc>, window_params = [{transform_indices = @transform_0, window_bounds = array<i64: 8, 384>}, {transform_indices = @transform_1, window_bounds = array<i64: 384, 128>}, {transform_indices = @transform_2, window_bounds = array<i64: 1, 128>}, {transform_indices = @transform_3, window_bounds = array<i64: 8, 128>}]} {
    %c0_i32 = arith.constant 0 : i32
    %0 = arith.cmpi eq, %arg2, %c0_i32 : i32
    %1 = arith.extui %0 : i1 to i32
    %c0_i32_0 = arith.constant 0 : i32
    %2 = arith.cmpi ne, %1, %c0_i32_0 : i32
    scf.if %2 {
      %cst_9 = arith.constant 0.000000e+00 : f32
      %12 = vector.broadcast %cst_9 : f32 to vector<8x128xf32>
      %c0_10 = arith.constant 0 : index
      %c0_11 = arith.constant 0 : index
      %13 = vector.load %arg7[%c0_10, %c0_11] : memref<8x128xf32, #tpu.memory_space<vmem>>, vector<8x128xf32>
      tpu.vector_store %arg7[%c0_10, %c0_11], %12 {strides = array<i32>} : memref<8x128xf32, #tpu.memory_space<vmem>>, vector<8x128xf32>,
    } else {
    }
    %c0 = arith.constant 0 : index
    %c0_1 = arith.constant 0 : index
    %3 = vector.load %arg7[%c0, %c0_1] : memref<8x128xf32, #tpu.memory_space<vmem>>, vector<8x128xf32>
    %c0_2 = arith.constant 0 : index
    %c0_3 = arith.constant 0 : index
    %4 = vector.load %arg3[%c0_2, %c0_3] : memref<8x384xbf16, #tpu.memory_space<vmem>>, vector<8x384xbf16>
    %c0_4 = arith.constant 0 : index
    %c0_5 = arith.constant 0 : index
    %5 = vector.load %arg4[%c0_4, %c0_5] : memref<384x128xbf16, #tpu.memory_space<vmem>>, vector<384x128xbf16>
    %cst = arith.constant dense<0.000000e+00> : vector<8x128xf32>
    %6 = tpu.matmul %4, %5, %cst {dimension_numbers = #tpu.dot_dimension_numbers<[1], [0], [0], [1], [0, 0, 1, 1], [], []>} : vector<8x384xbf16>, vector<384x128xbf16>, vector<8x128xf32> -> vector<8x128xf32>
    %7 = arith.addf %3, %6 : vector<8x128xf32>
    %c0_6 = arith.constant 0 : index
    %c0_7 = arith.constant 0 : index
    %8 = vector.load %arg7[%c0_6, %c0_7] : memref<8x128xf32, #tpu.memory_space<vmem>>, vector<8x128xf32>
    tpu.vector_store %arg7[%c0_6, %c0_7], %7 {strides = array<i32>} : memref<8x128xf32, #tpu.memory_space<vmem>>, vector<8x128xf32>,
    %c2_i32 = arith.constant 2 : i32
    %9 = arith.cmpi eq, %arg2, %c2_i32 : i32
    %10 = arith.extui %9 : i1 to i32
    %c0_i32_8 = arith.constant 0 : i32
    %11 = arith.cmpi ne, %10, %c0_i32_8 : i32
    scf.if %11 {
      %c0_9 = arith.constant 0 : index
      %c0_10 = arith.constant 0 : index
      %12 = vector.load %arg7[%c0_9, %c0_10] : memref<8x128xf32, #tpu.memory_space<vmem>>, vector<8x128xf32>
      %c0_11 = arith.constant 0 : index
      %c0_12 = arith.constant 0 : index
      %13 = vector.load %arg5[%c0_11, %c0_12] : memref<1x128xf32, #tpu.memory_space<vmem>>, vector<1x128xf32>
      %14 = vector.broadcast %13 : vector<1x128xf32> to vector<8x128xf32>
      %15 = arith.addf %12, %14 : vector<8x128xf32>
      %cst_13 = arith.constant 0.000000e+00 : f32
      %16 = vector.broadcast %cst_13 : f32 to vector<8x128xf32>
      %17 = arith.maximumf %15, %16 : vector<8x128xf32>
      %18 = arith.truncf %17 : vector<8x128xf32> to vector<8x128xbf16>
      %c0_14 = arith.constant 0 : index
      %c0_15 = arith.constant 0 : index
      %19 = vector.load %arg6[%c0_14, %c0_15] : memref<8x128xbf16, #tpu.memory_space<vmem>>, vector<8x128xbf16>
      tpu.vector_store %arg6[%c0_14, %c0_15], %18 {strides = array<i32>} : memref<8x128xbf16, #tpu.memory_space<vmem>>, vector<8x128xbf16>,
    } else {
    }
    return
  }
  func.func @transform_0(%arg0: i32, %arg1: i32, %arg2: i32) -> (i32, i32) {
    %c0_i32 = arith.constant 0 : i32
    return %arg0, %arg2 : i32, i32
  }
  func.func @transform_1(%arg0: i32, %arg1: i32, %arg2: i32) -> (i32, i32) {
    %c0_i32 = arith.constant 0 : i32
    return %arg2, %arg1 : i32, i32
  }
  func.func @transform_2(%arg0: i32, %arg1: i32, %arg2: i32) -> (i32, i32) {
    %c0_i32 = arith.constant 0 : i32
    %c0_i32_0 = arith.constant 0 : i32
    return %c0_i32, %arg1 : i32, i32
  }
  func.func @transform_3(%arg0: i32, %arg1: i32, %arg2: i32) -> (i32, i32) {
    %c0_i32 = arith.constant 0 : i32
    return %arg0, %arg1 : i32, i32
  }
}

module attributes {stable_mosaic.version = 11 : i64} {
  func.func @kernel(%arg0: i32, %arg1: i32, %arg2: i32, %arg3: memref<8x384xbf16, #tpu.memory_space<vmem>>, %arg4: memref<384x256xbf16, #tpu.memory_space<vmem>>, %arg5: memref<1x256xf32, #tpu.memory_space<vmem>>, %arg6: memref<8x256xbf16, #tpu.memory_space<vmem>>, %arg7: memref<8x256xf32, #tpu.memory_space<vmem>>) attributes {dimension_semantics = [#tpu.dimension_semantics<parallel>, #tpu.dimension_semantics<parallel>, #tpu.dimension_semantics<arbitrary>], iteration_bounds = array<i64: 1, 1, 3>, scalar_prefetch = 0 : i64, scratch_operands = 1 : i64, tpu.core_type = #tpu.core_type<tc>, window_params = [{transform_indices = @transform_0, window_bounds = array<i64: 8, 384>}, {transform_indices = @transform_1, window_bounds = array<i64: 384, 256>}, {transform_indices = @transform_2, window_bounds = array<i64: 1, 256>}, {transform_indices = @transform_3, window_bounds = array<i64: 8, 256>}]} {
    %c0_i32 = arith.constant 0 : i32
    %0 = arith.cmpi eq, %arg2, %c0_i32 : i32
    %1 = arith.extui %0 : i1 to i32
    %c0_i32_0 = arith.constant 0 : i32
    %2 = arith.cmpi ne, %1, %c0_i32_0 : i32
    scf.if %2 {
      %cst_9 = arith.constant 0.000000e+00 : f32
      %12 = vector.broadcast %cst_9 : f32 to vector<8x256xf32>
      %c0_10 = arith.constant 0 : index
      %c0_11 = arith.constant 0 : index
      %13 = vector.load %arg7[%c0_10, %c0_11] : memref<8x256xf32, #tpu.memory_space<vmem>>, vector<8x256xf32>
      tpu.vector_store %arg7[%c0_10, %c0_11], %12 {strides = array<i32>} : memref<8x256xf32, #tpu.memory_space<vmem>>, vector<8x256xf32>,
    } else {
    }
    %c0 = arith.constant 0 : index
    %c0_1 = arith.constant 0 : index
    %3 = vector.load %arg7[%c0, %c0_1] : memref<8x256xf32, #tpu.memory_space<vmem>>, vector<8x256xf32>
    %c0_2 = arith.constant 0 : index
    %c0_3 = arith.constant 0 : index
    %4 = vector.load %arg3[%c0_2, %c0_3] : memref<8x384xbf16, #tpu.memory_space<vmem>>, vector<8x384xbf16>
    %c0_4 = arith.constant 0 : index
    %c0_5 = arith.constant 0 : index
    %5 = vector.load %arg4[%c0_4, %c0_5] : memref<384x256xbf16, #tpu.memory_space<vmem>>, vector<384x256xbf16>
    %cst = arith.constant dense<0.000000e+00> : vector<8x256xf32>
    %6 = tpu.matmul %4, %5, %cst {dimension_numbers = #tpu.dot_dimension_numbers<[1], [0], [0], [1], [0, 0, 1, 1], [], []>} : vector<8x384xbf16>, vector<384x256xbf16>, vector<8x256xf32> -> vector<8x256xf32>
    %7 = arith.addf %3, %6 : vector<8x256xf32>
    %c0_6 = arith.constant 0 : index
    %c0_7 = arith.constant 0 : index
    %8 = vector.load %arg7[%c0_6, %c0_7] : memref<8x256xf32, #tpu.memory_space<vmem>>, vector<8x256xf32>
    tpu.vector_store %arg7[%c0_6, %c0_7], %7 {strides = array<i32>} : memref<8x256xf32, #tpu.memory_space<vmem>>, vector<8x256xf32>,
    %c2_i32 = arith.constant 2 : i32
    %9 = arith.cmpi eq, %arg2, %c2_i32 : i32
    %10 = arith.extui %9 : i1 to i32
    %c0_i32_8 = arith.constant 0 : i32
    %11 = arith.cmpi ne, %10, %c0_i32_8 : i32
    scf.if %11 {
      %c0_9 = arith.constant 0 : index
      %c0_10 = arith.constant 0 : index
      %12 = vector.load %arg7[%c0_9, %c0_10] : memref<8x256xf32, #tpu.memory_space<vmem>>, vector<8x256xf32>
      %c0_11 = arith.constant 0 : index
      %c0_12 = arith.constant 0 : index
      %13 = vector.load %arg5[%c0_11, %c0_12] : memref<1x256xf32, #tpu.memory_space<vmem>>, vector<1x256xf32>
      %14 = vector.broadcast %13 : vector<1x256xf32> to vector<8x256xf32>
      %15 = arith.addf %12, %14 : vector<8x256xf32>
      %cst_13 = arith.constant 0.000000e+00 : f32
      %16 = vector.broadcast %cst_13 : f32 to vector<8x256xf32>
      %17 = arith.maximumf %15, %16 : vector<8x256xf32>
      %18 = arith.truncf %17 : vector<8x256xf32> to vector<8x256xbf16>
      %c0_14 = arith.constant 0 : index
      %c0_15 = arith.constant 0 : index
      %19 = vector.load %arg6[%c0_14, %c0_15] : memref<8x256xbf16, #tpu.memory_space<vmem>>, vector<8x256xbf16>
      tpu.vector_store %arg6[%c0_14, %c0_15], %18 {strides = array<i32>} : memref<8x256xbf16, #tpu.memory_space<vmem>>, vector<8x256xbf16>,
    } else {
    }
    return
  }
  func.func @transform_0(%arg0: i32, %arg1: i32, %arg2: i32) -> (i32, i32) {
    %c0_i32 = arith.constant 0 : i32
    return %arg0, %arg2 : i32, i32
  }
  func.func @transform_1(%arg0: i32, %arg1: i32, %arg2: i32) -> (i32, i32) {
    %c0_i32 = arith.constant 0 : i32
    return %arg2, %arg1 : i32, i32
  }
  func.func @transform_2(%arg0: i32, %arg1: i32, %arg2: i32) -> (i32, i32) {
    %c0_i32 = arith.constant 0 : i32
    %c0_i32_0 = arith.constant 0 : i32
    return %c0_i32, %arg1 : i32, i32
  }
  func.func @transform_3(%arg0: i32, %arg1: i32, %arg2: i32) -> (i32, i32) {
    %c0_i32 = arith.constant 0 : i32
    return %arg0, %arg1 : i32, i32
  }
}

module attributes {stable_mosaic.version = 11 : i64} {
  func.func @kernel(%arg0: i32, %arg1: i32, %arg2: i32, %arg3: memref<8x128xbf16, #tpu.memory_space<vmem>>, %arg4: memref<128x256xbf16, #tpu.memory_space<vmem>>, %arg5: memref<1x256xf32, #tpu.memory_space<vmem>>, %arg6: memref<8x256xbf16, #tpu.memory_space<vmem>>, %arg7: memref<8x256xf32, #tpu.memory_space<vmem>>) attributes {dimension_semantics = [#tpu.dimension_semantics<parallel>, #tpu.dimension_semantics<parallel>, #tpu.dimension_semantics<arbitrary>], iteration_bounds = array<i64: 1, 1, 1>, scalar_prefetch = 0 : i64, scratch_operands = 1 : i64, tpu.core_type = #tpu.core_type<tc>, window_params = [{transform_indices = @transform_0, window_bounds = array<i64: 8, 128>}, {transform_indices = @transform_1, window_bounds = array<i64: 128, 256>}, {transform_indices = @transform_2, window_bounds = array<i64: 1, 256>}, {transform_indices = @transform_3, window_bounds = array<i64: 8, 256>}]} {
    %c0_i32 = arith.constant 0 : i32
    %0 = arith.cmpi eq, %arg2, %c0_i32 : i32
    %1 = arith.extui %0 : i1 to i32
    %c0_i32_0 = arith.constant 0 : i32
    %2 = arith.cmpi ne, %1, %c0_i32_0 : i32
    scf.if %2 {
      %cst_10 = arith.constant 0.000000e+00 : f32
      %12 = vector.broadcast %cst_10 : f32 to vector<8x256xf32>
      %c0_11 = arith.constant 0 : index
      %c0_12 = arith.constant 0 : index
      %13 = vector.load %arg7[%c0_11, %c0_12] : memref<8x256xf32, #tpu.memory_space<vmem>>, vector<8x256xf32>
      tpu.vector_store %arg7[%c0_11, %c0_12], %12 {strides = array<i32>} : memref<8x256xf32, #tpu.memory_space<vmem>>, vector<8x256xf32>,
    } else {
    }
    %c0 = arith.constant 0 : index
    %c0_1 = arith.constant 0 : index
    %3 = vector.load %arg7[%c0, %c0_1] : memref<8x256xf32, #tpu.memory_space<vmem>>, vector<8x256xf32>
    %c0_2 = arith.constant 0 : index
    %c0_3 = arith.constant 0 : index
    %4 = vector.load %arg3[%c0_2, %c0_3] : memref<8x128xbf16, #tpu.memory_space<vmem>>, vector<8x128xbf16>
    %c0_4 = arith.constant 0 : index
    %c0_5 = arith.constant 0 : index
    %5 = vector.load %arg4[%c0_4, %c0_5] : memref<128x256xbf16, #tpu.memory_space<vmem>>, vector<128x256xbf16>
    %cst = arith.constant dense<0.000000e+00> : vector<8x256xf32>
    %6 = tpu.matmul %4, %5, %cst {dimension_numbers = #tpu.dot_dimension_numbers<[1], [0], [0], [1], [0, 0, 1, 1], [], []>} : vector<8x128xbf16>, vector<128x256xbf16>, vector<8x256xf32> -> vector<8x256xf32>
    %7 = arith.addf %3, %6 : vector<8x256xf32>
    %c0_6 = arith.constant 0 : index
    %c0_7 = arith.constant 0 : index
    %8 = vector.load %arg7[%c0_6, %c0_7] : memref<8x256xf32, #tpu.memory_space<vmem>>, vector<8x256xf32>
    tpu.vector_store %arg7[%c0_6, %c0_7], %7 {strides = array<i32>} : memref<8x256xf32, #tpu.memory_space<vmem>>, vector<8x256xf32>,
    %c0_i32_8 = arith.constant 0 : i32
    %9 = arith.cmpi eq, %arg2, %c0_i32_8 : i32
    %10 = arith.extui %9 : i1 to i32
    %c0_i32_9 = arith.constant 0 : i32
    %11 = arith.cmpi ne, %10, %c0_i32_9 : i32
    scf.if %11 {
      %c0_10 = arith.constant 0 : index
      %c0_11 = arith.constant 0 : index
      %12 = vector.load %arg7[%c0_10, %c0_11] : memref<8x256xf32, #tpu.memory_space<vmem>>, vector<8x256xf32>
      %c0_12 = arith.constant 0 : index
      %c0_13 = arith.constant 0 : index
      %13 = vector.load %arg5[%c0_12, %c0_13] : memref<1x256xf32, #tpu.memory_space<vmem>>, vector<1x256xf32>
      %14 = vector.broadcast %13 : vector<1x256xf32> to vector<8x256xf32>
      %15 = arith.addf %12, %14 : vector<8x256xf32>
      %16 = arith.truncf %15 : vector<8x256xf32> to vector<8x256xbf16>
      %c0_14 = arith.constant 0 : index
      %c0_15 = arith.constant 0 : index
      %17 = vector.load %arg6[%c0_14, %c0_15] : memref<8x256xbf16, #tpu.memory_space<vmem>>, vector<8x256xbf16>
      tpu.vector_store %arg6[%c0_14, %c0_15], %16 {strides = array<i32>} : memref<8x256xbf16, #tpu.memory_space<vmem>>, vector<8x256xbf16>,
    } else {
    }
    return
  }
  func.func @transform_0(%arg0: i32, %arg1: i32, %arg2: i32) -> (i32, i32) {
    %c0_i32 = arith.constant 0 : i32
    return %arg0, %arg2 : i32, i32
  }
  func.func @transform_1(%arg0: i32, %arg1: i32, %arg2: i32) -> (i32, i32) {
    %c0_i32 = arith.constant 0 : i32
    return %arg2, %arg1 : i32, i32
  }
  func.func @transform_2(%arg0: i32, %arg1: i32, %arg2: i32) -> (i32, i32) {
    %c0_i32 = arith.constant 0 : i32
    %c0_i32_0 = arith.constant 0 : i32
    return %c0_i32, %arg1 : i32, i32
  }
  func.func @transform_3(%arg0: i32, %arg1: i32, %arg2: i32) -> (i32, i32) {
    %c0_i32 = arith.constant 0 : i32
    return %arg0, %arg1 : i32, i32
  }
}

module attributes {stable_mosaic.version = 11 : i64} {
  func.func @kernel(%arg0: i32, %arg1: i32, %arg2: i32, %arg3: memref<8x384xbf16, #tpu.memory_space<vmem>>, %arg4: memref<384x256xbf16, #tpu.memory_space<vmem>>, %arg5: memref<1x256xf32, #tpu.memory_space<vmem>>, %arg6: memref<8x256xbf16, #tpu.memory_space<vmem>>, %arg7: memref<8x256xbf16, #tpu.memory_space<vmem>>, %arg8: memref<8x256xf32, #tpu.memory_space<vmem>>) attributes {dimension_semantics = [#tpu.dimension_semantics<parallel>, #tpu.dimension_semantics<parallel>, #tpu.dimension_semantics<arbitrary>], iteration_bounds = array<i64: 1, 1, 6>, scalar_prefetch = 0 : i64, scratch_operands = 1 : i64, tpu.core_type = #tpu.core_type<tc>, window_params = [{transform_indices = @transform_0, window_bounds = array<i64: 8, 384>}, {transform_indices = @transform_1, window_bounds = array<i64: 384, 256>}, {transform_indices = @transform_2, window_bounds = array<i64: 1, 256>}, {transform_indices = @transform_3, window_bounds = array<i64: 8, 256>}, {transform_indices = @transform_4, window_bounds = array<i64: 8, 256>}]} {
    %c0_i32 = arith.constant 0 : i32
    %0 = arith.cmpi eq, %arg2, %c0_i32 : i32
    %1 = arith.extui %0 : i1 to i32
    %c0_i32_0 = arith.constant 0 : i32
    %2 = arith.cmpi ne, %1, %c0_i32_0 : i32
    scf.if %2 {
      %cst_9 = arith.constant 0.000000e+00 : f32
      %12 = vector.broadcast %cst_9 : f32 to vector<8x256xf32>
      %c0_10 = arith.constant 0 : index
      %c0_11 = arith.constant 0 : index
      %13 = vector.load %arg8[%c0_10, %c0_11] : memref<8x256xf32, #tpu.memory_space<vmem>>, vector<8x256xf32>
      tpu.vector_store %arg8[%c0_10, %c0_11], %12 {strides = array<i32>} : memref<8x256xf32, #tpu.memory_space<vmem>>, vector<8x256xf32>,
    } else {
    }
    %c0 = arith.constant 0 : index
    %c0_1 = arith.constant 0 : index
    %3 = vector.load %arg8[%c0, %c0_1] : memref<8x256xf32, #tpu.memory_space<vmem>>, vector<8x256xf32>
    %c0_2 = arith.constant 0 : index
    %c0_3 = arith.constant 0 : index
    %4 = vector.load %arg3[%c0_2, %c0_3] : memref<8x384xbf16, #tpu.memory_space<vmem>>, vector<8x384xbf16>
    %c0_4 = arith.constant 0 : index
    %c0_5 = arith.constant 0 : index
    %5 = vector.load %arg4[%c0_4, %c0_5] : memref<384x256xbf16, #tpu.memory_space<vmem>>, vector<384x256xbf16>
    %cst = arith.constant dense<0.000000e+00> : vector<8x256xf32>
    %6 = tpu.matmul %4, %5, %cst {dimension_numbers = #tpu.dot_dimension_numbers<[1], [0], [0], [1], [0, 0, 1, 1], [], []>} : vector<8x384xbf16>, vector<384x256xbf16>, vector<8x256xf32> -> vector<8x256xf32>
    %7 = arith.addf %3, %6 : vector<8x256xf32>
    %c0_6 = arith.constant 0 : index
    %c0_7 = arith.constant 0 : index
    %8 = vector.load %arg8[%c0_6, %c0_7] : memref<8x256xf32, #tpu.memory_space<vmem>>, vector<8x256xf32>
    tpu.vector_store %arg8[%c0_6, %c0_7], %7 {strides = array<i32>} : memref<8x256xf32, #tpu.memory_space<vmem>>, vector<8x256xf32>,
    %c5_i32 = arith.constant 5 : i32
    %9 = arith.cmpi eq, %arg2, %c5_i32 : i32
    %10 = arith.extui %9 : i1 to i32
    %c0_i32_8 = arith.constant 0 : i32
    %11 = arith.cmpi ne, %10, %c0_i32_8 : i32
    scf.if %11 {
      %c0_9 = arith.constant 0 : index
      %c0_10 = arith.constant 0 : index
      %12 = vector.load %arg8[%c0_9, %c0_10] : memref<8x256xf32, #tpu.memory_space<vmem>>, vector<8x256xf32>
      %c0_11 = arith.constant 0 : index
      %c0_12 = arith.constant 0 : index
      %13 = vector.load %arg5[%c0_11, %c0_12] : memref<1x256xf32, #tpu.memory_space<vmem>>, vector<1x256xf32>
      %14 = vector.broadcast %13 : vector<1x256xf32> to vector<8x256xf32>
      %15 = arith.addf %12, %14 : vector<8x256xf32>
      %c0_13 = arith.constant 0 : index
      %c0_14 = arith.constant 0 : index
      %16 = vector.load %arg6[%c0_13, %c0_14] : memref<8x256xbf16, #tpu.memory_space<vmem>>, vector<8x256xbf16>
      %17 = arith.extf %16 : vector<8x256xbf16> to vector<8x256xf32>
      %18 = arith.addf %15, %17 : vector<8x256xf32>
      %cst_15 = arith.constant 0.000000e+00 : f32
      %19 = vector.broadcast %cst_15 : f32 to vector<8x256xf32>
      %20 = arith.maximumf %18, %19 : vector<8x256xf32>
      %21 = arith.truncf %20 : vector<8x256xf32> to vector<8x256xbf16>
      %c0_16 = arith.constant 0 : index
      %c0_17 = arith.constant 0 : index
      %22 = vector.load %arg7[%c0_16, %c0_17] : memref<8x256xbf16, #tpu.memory_space<vmem>>, vector<8x256xbf16>
      tpu.vector_store %arg7[%c0_16, %c0_17], %21 {strides = array<i32>} : memref<8x256xbf16, #tpu.memory_space<vmem>>, vector<8x256xbf16>,
    } else {
    }
    return
  }
  func.func @transform_0(%arg0: i32, %arg1: i32, %arg2: i32) -> (i32, i32) {
    %c0_i32 = arith.constant 0 : i32
    return %arg0, %arg2 : i32, i32
  }
  func.func @transform_1(%arg0: i32, %arg1: i32, %arg2: i32) -> (i32, i32) {
    %c0_i32 = arith.constant 0 : i32
    return %arg2, %arg1 : i32, i32
  }
  func.func @transform_2(%arg0: i32, %arg1: i32, %arg2: i32) -> (i32, i32) {
    %c0_i32 = arith.constant 0 : i32
    %c0_i32_0 = arith.constant 0 : i32
    return %c0_i32, %arg1 : i32, i32
  }
  func.func @transform_3(%arg0: i32, %arg1: i32, %arg2: i32) -> (i32, i32) {
    %c0_i32 = arith.constant 0 : i32
    return %arg0, %arg1 : i32, i32
  }
  func.func @transform_4(%arg0: i32, %arg1: i32, %arg2: i32) -> (i32, i32) {
    %c0_i32 = arith.constant 0 : i32
    return %arg0, %arg1 : i32, i32
  }
}

module attributes {stable_mosaic.version = 11 : i64} {
  func.func @kernel(%arg0: i32, %arg1: i32, %arg2: i32, %arg3: memref<8x384xbf16, #tpu.memory_space<vmem>>, %arg4: memref<384x256xbf16, #tpu.memory_space<vmem>>, %arg5: memref<1x256xf32, #tpu.memory_space<vmem>>, %arg6: memref<8x256xbf16, #tpu.memory_space<vmem>>, %arg7: memref<8x256xf32, #tpu.memory_space<vmem>>) attributes {dimension_semantics = [#tpu.dimension_semantics<parallel>, #tpu.dimension_semantics<parallel>, #tpu.dimension_semantics<arbitrary>], iteration_bounds = array<i64: 1, 1, 6>, scalar_prefetch = 0 : i64, scratch_operands = 1 : i64, tpu.core_type = #tpu.core_type<tc>, window_params = [{transform_indices = @transform_0, window_bounds = array<i64: 8, 384>}, {transform_indices = @transform_1, window_bounds = array<i64: 384, 256>}, {transform_indices = @transform_2, window_bounds = array<i64: 1, 256>}, {transform_indices = @transform_3, window_bounds = array<i64: 8, 256>}]} {
    %c0_i32 = arith.constant 0 : i32
    %0 = arith.cmpi eq, %arg2, %c0_i32 : i32
    %1 = arith.extui %0 : i1 to i32
    %c0_i32_0 = arith.constant 0 : i32
    %2 = arith.cmpi ne, %1, %c0_i32_0 : i32
    scf.if %2 {
      %cst_9 = arith.constant 0.000000e+00 : f32
      %12 = vector.broadcast %cst_9 : f32 to vector<8x256xf32>
      %c0_10 = arith.constant 0 : index
      %c0_11 = arith.constant 0 : index
      %13 = vector.load %arg7[%c0_10, %c0_11] : memref<8x256xf32, #tpu.memory_space<vmem>>, vector<8x256xf32>
      tpu.vector_store %arg7[%c0_10, %c0_11], %12 {strides = array<i32>} : memref<8x256xf32, #tpu.memory_space<vmem>>, vector<8x256xf32>,
    } else {
    }
    %c0 = arith.constant 0 : index
    %c0_1 = arith.constant 0 : index
    %3 = vector.load %arg7[%c0, %c0_1] : memref<8x256xf32, #tpu.memory_space<vmem>>, vector<8x256xf32>
    %c0_2 = arith.constant 0 : index
    %c0_3 = arith.constant 0 : index
    %4 = vector.load %arg3[%c0_2, %c0_3] : memref<8x384xbf16, #tpu.memory_space<vmem>>, vector<8x384xbf16>
    %c0_4 = arith.constant 0 : index
    %c0_5 = arith.constant 0 : index
    %5 = vector.load %arg4[%c0_4, %c0_5] : memref<384x256xbf16, #tpu.memory_space<vmem>>, vector<384x256xbf16>
    %cst = arith.constant dense<0.000000e+00> : vector<8x256xf32>
    %6 = tpu.matmul %4, %5, %cst {dimension_numbers = #tpu.dot_dimension_numbers<[1], [0], [0], [1], [0, 0, 1, 1], [], []>} : vector<8x384xbf16>, vector<384x256xbf16>, vector<8x256xf32> -> vector<8x256xf32>
    %7 = arith.addf %3, %6 : vector<8x256xf32>
    %c0_6 = arith.constant 0 : index
    %c0_7 = arith.constant 0 : index
    %8 = vector.load %arg7[%c0_6, %c0_7] : memref<8x256xf32, #tpu.memory_space<vmem>>, vector<8x256xf32>
    tpu.vector_store %arg7[%c0_6, %c0_7], %7 {strides = array<i32>} : memref<8x256xf32, #tpu.memory_space<vmem>>, vector<8x256xf32>,
    %c5_i32 = arith.constant 5 : i32
    %9 = arith.cmpi eq, %arg2, %c5_i32 : i32
    %10 = arith.extui %9 : i1 to i32
    %c0_i32_8 = arith.constant 0 : i32
    %11 = arith.cmpi ne, %10, %c0_i32_8 : i32
    scf.if %11 {
      %c0_9 = arith.constant 0 : index
      %c0_10 = arith.constant 0 : index
      %12 = vector.load %arg7[%c0_9, %c0_10] : memref<8x256xf32, #tpu.memory_space<vmem>>, vector<8x256xf32>
      %c0_11 = arith.constant 0 : index
      %c0_12 = arith.constant 0 : index
      %13 = vector.load %arg5[%c0_11, %c0_12] : memref<1x256xf32, #tpu.memory_space<vmem>>, vector<1x256xf32>
      %14 = vector.broadcast %13 : vector<1x256xf32> to vector<8x256xf32>
      %15 = arith.addf %12, %14 : vector<8x256xf32>
      %cst_13 = arith.constant 0.000000e+00 : f32
      %16 = vector.broadcast %cst_13 : f32 to vector<8x256xf32>
      %17 = arith.maximumf %15, %16 : vector<8x256xf32>
      %18 = arith.truncf %17 : vector<8x256xf32> to vector<8x256xbf16>
      %c0_14 = arith.constant 0 : index
      %c0_15 = arith.constant 0 : index
      %19 = vector.load %arg6[%c0_14, %c0_15] : memref<8x256xbf16, #tpu.memory_space<vmem>>, vector<8x256xbf16>
      tpu.vector_store %arg6[%c0_14, %c0_15], %18 {strides = array<i32>} : memref<8x256xbf16, #tpu.memory_space<vmem>>, vector<8x256xbf16>,
    } else {
    }
    return
  }
  func.func @transform_0(%arg0: i32, %arg1: i32, %arg2: i32) -> (i32, i32) {
    %c0_i32 = arith.constant 0 : i32
    return %arg0, %arg2 : i32, i32
  }
  func.func @transform_1(%arg0: i32, %arg1: i32, %arg2: i32) -> (i32, i32) {
    %c0_i32 = arith.constant 0 : i32
    return %arg2, %arg1 : i32, i32
  }
  func.func @transform_2(%arg0: i32, %arg1: i32, %arg2: i32) -> (i32, i32) {
    %c0_i32 = arith.constant 0 : i32
    %c0_i32_0 = arith.constant 0 : i32
    return %c0_i32, %arg1 : i32, i32
  }
  func.func @transform_3(%arg0: i32, %arg1: i32, %arg2: i32) -> (i32, i32) {
    %c0_i32 = arith.constant 0 : i32
    return %arg0, %arg1 : i32, i32
  }
}

module attributes {stable_mosaic.version = 11 : i64} {
  func.func @kernel(%arg0: i32, %arg1: i32, %arg2: i32, %arg3: memref<8x384xbf16, #tpu.memory_space<vmem>>, %arg4: memref<384x256xbf16, #tpu.memory_space<vmem>>, %arg5: memref<1x256xf32, #tpu.memory_space<vmem>>, %arg6: memref<8x256xbf16, #tpu.memory_space<vmem>>, %arg7: memref<8x256xbf16, #tpu.memory_space<vmem>>, %arg8: memref<8x256xf32, #tpu.memory_space<vmem>>) attributes {dimension_semantics = [#tpu.dimension_semantics<parallel>, #tpu.dimension_semantics<parallel>, #tpu.dimension_semantics<arbitrary>], iteration_bounds = array<i64: 1, 1, 6>, scalar_prefetch = 0 : i64, scratch_operands = 1 : i64, tpu.core_type = #tpu.core_type<tc>, window_params = [{transform_indices = @transform_0, window_bounds = array<i64: 8, 384>}, {transform_indices = @transform_1, window_bounds = array<i64: 384, 256>}, {transform_indices = @transform_2, window_bounds = array<i64: 1, 256>}, {transform_indices = @transform_3, window_bounds = array<i64: 8, 256>}, {transform_indices = @transform_4, window_bounds = array<i64: 8, 256>}]} {
    %c0_i32 = arith.constant 0 : i32
    %0 = arith.cmpi eq, %arg2, %c0_i32 : i32
    %1 = arith.extui %0 : i1 to i32
    %c0_i32_0 = arith.constant 0 : i32
    %2 = arith.cmpi ne, %1, %c0_i32_0 : i32
    scf.if %2 {
      %cst_9 = arith.constant 0.000000e+00 : f32
      %12 = vector.broadcast %cst_9 : f32 to vector<8x256xf32>
      %c0_10 = arith.constant 0 : index
      %c0_11 = arith.constant 0 : index
      %13 = vector.load %arg8[%c0_10, %c0_11] : memref<8x256xf32, #tpu.memory_space<vmem>>, vector<8x256xf32>
      tpu.vector_store %arg8[%c0_10, %c0_11], %12 {strides = array<i32>} : memref<8x256xf32, #tpu.memory_space<vmem>>, vector<8x256xf32>,
    } else {
    }
    %c0 = arith.constant 0 : index
    %c0_1 = arith.constant 0 : index
    %3 = vector.load %arg8[%c0, %c0_1] : memref<8x256xf32, #tpu.memory_space<vmem>>, vector<8x256xf32>
    %c0_2 = arith.constant 0 : index
    %c0_3 = arith.constant 0 : index
    %4 = vector.load %arg3[%c0_2, %c0_3] : memref<8x384xbf16, #tpu.memory_space<vmem>>, vector<8x384xbf16>
    %c0_4 = arith.constant 0 : index
    %c0_5 = arith.constant 0 : index
    %5 = vector.load %arg4[%c0_4, %c0_5] : memref<384x256xbf16, #tpu.memory_space<vmem>>, vector<384x256xbf16>
    %cst = arith.constant dense<0.000000e+00> : vector<8x256xf32>
    %6 = tpu.matmul %4, %5, %cst {dimension_numbers = #tpu.dot_dimension_numbers<[1], [0], [0], [1], [0, 0, 1, 1], [], []>} : vector<8x384xbf16>, vector<384x256xbf16>, vector<8x256xf32> -> vector<8x256xf32>
    %7 = arith.addf %3, %6 : vector<8x256xf32>
    %c0_6 = arith.constant 0 : index
    %c0_7 = arith.constant 0 : index
    %8 = vector.load %arg8[%c0_6, %c0_7] : memref<8x256xf32, #tpu.memory_space<vmem>>, vector<8x256xf32>
    tpu.vector_store %arg8[%c0_6, %c0_7], %7 {strides = array<i32>} : memref<8x256xf32, #tpu.memory_space<vmem>>, vector<8x256xf32>,
    %c5_i32 = arith.constant 5 : i32
    %9 = arith.cmpi eq, %arg2, %c5_i32 : i32
    %10 = arith.extui %9 : i1 to i32
    %c0_i32_8 = arith.constant 0 : i32
    %11 = arith.cmpi ne, %10, %c0_i32_8 : i32
    scf.if %11 {
      %c0_9 = arith.constant 0 : index
      %c0_10 = arith.constant 0 : index
      %12 = vector.load %arg8[%c0_9, %c0_10] : memref<8x256xf32, #tpu.memory_space<vmem>>, vector<8x256xf32>
      %c0_11 = arith.constant 0 : index
      %c0_12 = arith.constant 0 : index
      %13 = vector.load %arg5[%c0_11, %c0_12] : memref<1x256xf32, #tpu.memory_space<vmem>>, vector<1x256xf32>
      %14 = vector.broadcast %13 : vector<1x256xf32> to vector<8x256xf32>
      %15 = arith.addf %12, %14 : vector<8x256xf32>
      %c0_13 = arith.constant 0 : index
      %c0_14 = arith.constant 0 : index
      %16 = vector.load %arg6[%c0_13, %c0_14] : memref<8x256xbf16, #tpu.memory_space<vmem>>, vector<8x256xbf16>
      %17 = arith.extf %16 : vector<8x256xbf16> to vector<8x256xf32>
      %18 = arith.addf %15, %17 : vector<8x256xf32>
      %cst_15 = arith.constant 0.000000e+00 : f32
      %19 = vector.broadcast %cst_15 : f32 to vector<8x256xf32>
      %20 = arith.maximumf %18, %19 : vector<8x256xf32>
      %21 = arith.truncf %20 : vector<8x256xf32> to vector<8x256xbf16>
      %c0_16 = arith.constant 0 : index
      %c0_17 = arith.constant 0 : index
      %22 = vector.load %arg7[%c0_16, %c0_17] : memref<8x256xbf16, #tpu.memory_space<vmem>>, vector<8x256xbf16>
      tpu.vector_store %arg7[%c0_16, %c0_17], %21 {strides = array<i32>} : memref<8x256xbf16, #tpu.memory_space<vmem>>, vector<8x256xbf16>,
    } else {
    }
    return
  }
  func.func @transform_0(%arg0: i32, %arg1: i32, %arg2: i32) -> (i32, i32) {
    %c0_i32 = arith.constant 0 : i32
    return %arg0, %arg2 : i32, i32
  }
  func.func @transform_1(%arg0: i32, %arg1: i32, %arg2: i32) -> (i32, i32) {
    %c0_i32 = arith.constant 0 : i32
    return %arg2, %arg1 : i32, i32
  }
  func.func @transform_2(%arg0: i32, %arg1: i32, %arg2: i32) -> (i32, i32) {
    %c0_i32 = arith.constant 0 : i32
    %c0_i32_0 = arith.constant 0 : i32
    return %c0_i32, %arg1 : i32, i32
  }
  func.func @transform_3(%arg0: i32, %arg1: i32, %arg2: i32) -> (i32, i32) {
    %c0_i32 = arith.constant 0 : i32
    return %arg0, %arg1 : i32, i32
  }
  func.func @transform_4(%arg0: i32, %arg1: i32, %arg2: i32) -> (i32, i32) {
    %c0_i32 = arith.constant 0 : i32
    return %arg0, %arg1 : i32, i32
  }
}

module attributes {stable_mosaic.version = 11 : i64} {
  func.func @kernel(%arg0: i32, %arg1: i32, %arg2: i32, %arg3: memref<8x384xbf16, #tpu.memory_space<vmem>>, %arg4: memref<384x256xbf16, #tpu.memory_space<vmem>>, %arg5: memref<1x256xf32, #tpu.memory_space<vmem>>, %arg6: memref<8x256xbf16, #tpu.memory_space<vmem>>, %arg7: memref<8x256xf32, #tpu.memory_space<vmem>>) attributes {dimension_semantics = [#tpu.dimension_semantics<parallel>, #tpu.dimension_semantics<parallel>, #tpu.dimension_semantics<arbitrary>], iteration_bounds = array<i64: 1, 2, 6>, scalar_prefetch = 0 : i64, scratch_operands = 1 : i64, tpu.core_type = #tpu.core_type<tc>, window_params = [{transform_indices = @transform_0, window_bounds = array<i64: 8, 384>}, {transform_indices = @transform_1, window_bounds = array<i64: 384, 256>}, {transform_indices = @transform_2, window_bounds = array<i64: 1, 256>}, {transform_indices = @transform_3, window_bounds = array<i64: 8, 256>}]} {
    %c0_i32 = arith.constant 0 : i32
    %0 = arith.cmpi eq, %arg2, %c0_i32 : i32
    %1 = arith.extui %0 : i1 to i32
    %c0_i32_0 = arith.constant 0 : i32
    %2 = arith.cmpi ne, %1, %c0_i32_0 : i32
    scf.if %2 {
      %cst_9 = arith.constant 0.000000e+00 : f32
      %12 = vector.broadcast %cst_9 : f32 to vector<8x256xf32>
      %c0_10 = arith.constant 0 : index
      %c0_11 = arith.constant 0 : index
      %13 = vector.load %arg7[%c0_10, %c0_11] : memref<8x256xf32, #tpu.memory_space<vmem>>, vector<8x256xf32>
      tpu.vector_store %arg7[%c0_10, %c0_11], %12 {strides = array<i32>} : memref<8x256xf32, #tpu.memory_space<vmem>>, vector<8x256xf32>,
    } else {
    }
    %c0 = arith.constant 0 : index
    %c0_1 = arith.constant 0 : index
    %3 = vector.load %arg7[%c0, %c0_1] : memref<8x256xf32, #tpu.memory_space<vmem>>, vector<8x256xf32>
    %c0_2 = arith.constant 0 : index
    %c0_3 = arith.constant 0 : index
    %4 = vector.load %arg3[%c0_2, %c0_3] : memref<8x384xbf16, #tpu.memory_space<vmem>>, vector<8x384xbf16>
    %c0_4 = arith.constant 0 : index
    %c0_5 = arith.constant 0 : index
    %5 = vector.load %arg4[%c0_4, %c0_5] : memref<384x256xbf16, #tpu.memory_space<vmem>>, vector<384x256xbf16>
    %cst = arith.constant dense<0.000000e+00> : vector<8x256xf32>
    %6 = tpu.matmul %4, %5, %cst {dimension_numbers = #tpu.dot_dimension_numbers<[1], [0], [0], [1], [0, 0, 1, 1], [], []>} : vector<8x384xbf16>, vector<384x256xbf16>, vector<8x256xf32> -> vector<8x256xf32>
    %7 = arith.addf %3, %6 : vector<8x256xf32>
    %c0_6 = arith.constant 0 : index
    %c0_7 = arith.constant 0 : index
    %8 = vector.load %arg7[%c0_6, %c0_7] : memref<8x256xf32, #tpu.memory_space<vmem>>, vector<8x256xf32>
    tpu.vector_store %arg7[%c0_6, %c0_7], %7 {strides = array<i32>} : memref<8x256xf32, #tpu.memory_space<vmem>>, vector<8x256xf32>,
    %c5_i32 = arith.constant 5 : i32
    %9 = arith.cmpi eq, %arg2, %c5_i32 : i32
    %10 = arith.extui %9 : i1 to i32
    %c0_i32_8 = arith.constant 0 : i32
    %11 = arith.cmpi ne, %10, %c0_i32_8 : i32
    scf.if %11 {
      %c0_9 = arith.constant 0 : index
      %c0_10 = arith.constant 0 : index
      %12 = vector.load %arg7[%c0_9, %c0_10] : memref<8x256xf32, #tpu.memory_space<vmem>>, vector<8x256xf32>
      %c0_11 = arith.constant 0 : index
      %c0_12 = arith.constant 0 : index
      %13 = vector.load %arg5[%c0_11, %c0_12] : memref<1x256xf32, #tpu.memory_space<vmem>>, vector<1x256xf32>
      %14 = vector.broadcast %13 : vector<1x256xf32> to vector<8x256xf32>
      %15 = arith.addf %12, %14 : vector<8x256xf32>
      %cst_13 = arith.constant 0.000000e+00 : f32
      %16 = vector.broadcast %cst_13 : f32 to vector<8x256xf32>
      %17 = arith.maximumf %15, %16 : vector<8x256xf32>
      %18 = arith.truncf %17 : vector<8x256xf32> to vector<8x256xbf16>
      %c0_14 = arith.constant 0 : index
      %c0_15 = arith.constant 0 : index
      %19 = vector.load %arg6[%c0_14, %c0_15] : memref<8x256xbf16, #tpu.memory_space<vmem>>, vector<8x256xbf16>
      tpu.vector_store %arg6[%c0_14, %c0_15], %18 {strides = array<i32>} : memref<8x256xbf16, #tpu.memory_space<vmem>>, vector<8x256xbf16>,
    } else {
    }
    return
  }
  func.func @transform_0(%arg0: i32, %arg1: i32, %arg2: i32) -> (i32, i32) {
    %c0_i32 = arith.constant 0 : i32
    return %arg0, %arg2 : i32, i32
  }
  func.func @transform_1(%arg0: i32, %arg1: i32, %arg2: i32) -> (i32, i32) {
    %c0_i32 = arith.constant 0 : i32
    return %arg2, %arg1 : i32, i32
  }
  func.func @transform_2(%arg0: i32, %arg1: i32, %arg2: i32) -> (i32, i32) {
    %c0_i32 = arith.constant 0 : i32
    %c0_i32_0 = arith.constant 0 : i32
    return %c0_i32, %arg1 : i32, i32
  }
  func.func @transform_3(%arg0: i32, %arg1: i32, %arg2: i32) -> (i32, i32) {
    %c0_i32 = arith.constant 0 : i32
    return %arg0, %arg1 : i32, i32
  }
}

module attributes {stable_mosaic.version = 11 : i64} {
  func.func @kernel(%arg0: i32, %arg1: i32, %arg2: i32, %arg3: memref<8x256xbf16, #tpu.memory_space<vmem>>, %arg4: memref<256x256xbf16, #tpu.memory_space<vmem>>, %arg5: memref<1x256xf32, #tpu.memory_space<vmem>>, %arg6: memref<8x256xbf16, #tpu.memory_space<vmem>>, %arg7: memref<8x256xf32, #tpu.memory_space<vmem>>) attributes {dimension_semantics = [#tpu.dimension_semantics<parallel>, #tpu.dimension_semantics<parallel>, #tpu.dimension_semantics<arbitrary>], iteration_bounds = array<i64: 1, 2, 1>, scalar_prefetch = 0 : i64, scratch_operands = 1 : i64, tpu.core_type = #tpu.core_type<tc>, window_params = [{transform_indices = @transform_0, window_bounds = array<i64: 8, 256>}, {transform_indices = @transform_1, window_bounds = array<i64: 256, 256>}, {transform_indices = @transform_2, window_bounds = array<i64: 1, 256>}, {transform_indices = @transform_3, window_bounds = array<i64: 8, 256>}]} {
    %c0_i32 = arith.constant 0 : i32
    %0 = arith.cmpi eq, %arg2, %c0_i32 : i32
    %1 = arith.extui %0 : i1 to i32
    %c0_i32_0 = arith.constant 0 : i32
    %2 = arith.cmpi ne, %1, %c0_i32_0 : i32
    scf.if %2 {
      %cst_10 = arith.constant 0.000000e+00 : f32
      %12 = vector.broadcast %cst_10 : f32 to vector<8x256xf32>
      %c0_11 = arith.constant 0 : index
      %c0_12 = arith.constant 0 : index
      %13 = vector.load %arg7[%c0_11, %c0_12] : memref<8x256xf32, #tpu.memory_space<vmem>>, vector<8x256xf32>
      tpu.vector_store %arg7[%c0_11, %c0_12], %12 {strides = array<i32>} : memref<8x256xf32, #tpu.memory_space<vmem>>, vector<8x256xf32>,
    } else {
    }
    %c0 = arith.constant 0 : index
    %c0_1 = arith.constant 0 : index
    %3 = vector.load %arg7[%c0, %c0_1] : memref<8x256xf32, #tpu.memory_space<vmem>>, vector<8x256xf32>
    %c0_2 = arith.constant 0 : index
    %c0_3 = arith.constant 0 : index
    %4 = vector.load %arg3[%c0_2, %c0_3] : memref<8x256xbf16, #tpu.memory_space<vmem>>, vector<8x256xbf16>
    %c0_4 = arith.constant 0 : index
    %c0_5 = arith.constant 0 : index
    %5 = vector.load %arg4[%c0_4, %c0_5] : memref<256x256xbf16, #tpu.memory_space<vmem>>, vector<256x256xbf16>
    %cst = arith.constant dense<0.000000e+00> : vector<8x256xf32>
    %6 = tpu.matmul %4, %5, %cst {dimension_numbers = #tpu.dot_dimension_numbers<[1], [0], [0], [1], [0, 0, 1, 1], [], []>} : vector<8x256xbf16>, vector<256x256xbf16>, vector<8x256xf32> -> vector<8x256xf32>
    %7 = arith.addf %3, %6 : vector<8x256xf32>
    %c0_6 = arith.constant 0 : index
    %c0_7 = arith.constant 0 : index
    %8 = vector.load %arg7[%c0_6, %c0_7] : memref<8x256xf32, #tpu.memory_space<vmem>>, vector<8x256xf32>
    tpu.vector_store %arg7[%c0_6, %c0_7], %7 {strides = array<i32>} : memref<8x256xf32, #tpu.memory_space<vmem>>, vector<8x256xf32>,
    %c0_i32_8 = arith.constant 0 : i32
    %9 = arith.cmpi eq, %arg2, %c0_i32_8 : i32
    %10 = arith.extui %9 : i1 to i32
    %c0_i32_9 = arith.constant 0 : i32
    %11 = arith.cmpi ne, %10, %c0_i32_9 : i32
    scf.if %11 {
      %c0_10 = arith.constant 0 : index
      %c0_11 = arith.constant 0 : index
      %12 = vector.load %arg7[%c0_10, %c0_11] : memref<8x256xf32, #tpu.memory_space<vmem>>, vector<8x256xf32>
      %c0_12 = arith.constant 0 : index
      %c0_13 = arith.constant 0 : index
      %13 = vector.load %arg5[%c0_12, %c0_13] : memref<1x256xf32, #tpu.memory_space<vmem>>, vector<1x256xf32>
      %14 = vector.broadcast %13 : vector<1x256xf32> to vector<8x256xf32>
      %15 = arith.addf %12, %14 : vector<8x256xf32>
      %16 = arith.truncf %15 : vector<8x256xf32> to vector<8x256xbf16>
      %c0_14 = arith.constant 0 : index
      %c0_15 = arith.constant 0 : index
      %17 = vector.load %arg6[%c0_14, %c0_15] : memref<8x256xbf16, #tpu.memory_space<vmem>>, vector<8x256xbf16>
      tpu.vector_store %arg6[%c0_14, %c0_15], %16 {strides = array<i32>} : memref<8x256xbf16, #tpu.memory_space<vmem>>, vector<8x256xbf16>,
    } else {
    }
    return
  }
  func.func @transform_0(%arg0: i32, %arg1: i32, %arg2: i32) -> (i32, i32) {
    %c0_i32 = arith.constant 0 : i32
    return %arg0, %arg2 : i32, i32
  }
  func.func @transform_1(%arg0: i32, %arg1: i32, %arg2: i32) -> (i32, i32) {
    %c0_i32 = arith.constant 0 : i32
    return %arg2, %arg1 : i32, i32
  }
  func.func @transform_2(%arg0: i32, %arg1: i32, %arg2: i32) -> (i32, i32) {
    %c0_i32 = arith.constant 0 : i32
    %c0_i32_0 = arith.constant 0 : i32
    return %c0_i32, %arg1 : i32, i32
  }
  func.func @transform_3(%arg0: i32, %arg1: i32, %arg2: i32) -> (i32, i32) {
    %c0_i32 = arith.constant 0 : i32
    return %arg0, %arg1 : i32, i32
  }
}

module attributes {stable_mosaic.version = 11 : i64} {
  func.func @kernel(%arg0: i32, %arg1: i32, %arg2: i32, %arg3: memref<8x512xbf16, #tpu.memory_space<vmem>>, %arg4: memref<512x256xbf16, #tpu.memory_space<vmem>>, %arg5: memref<1x256xf32, #tpu.memory_space<vmem>>, %arg6: memref<8x256xbf16, #tpu.memory_space<vmem>>, %arg7: memref<8x256xbf16, #tpu.memory_space<vmem>>, %arg8: memref<8x256xf32, #tpu.memory_space<vmem>>) attributes {dimension_semantics = [#tpu.dimension_semantics<parallel>, #tpu.dimension_semantics<parallel>, #tpu.dimension_semantics<arbitrary>], iteration_bounds = array<i64: 1, 2, 9>, scalar_prefetch = 0 : i64, scratch_operands = 1 : i64, tpu.core_type = #tpu.core_type<tc>, window_params = [{transform_indices = @transform_0, window_bounds = array<i64: 8, 512>}, {transform_indices = @transform_1, window_bounds = array<i64: 512, 256>}, {transform_indices = @transform_2, window_bounds = array<i64: 1, 256>}, {transform_indices = @transform_3, window_bounds = array<i64: 8, 256>}, {transform_indices = @transform_4, window_bounds = array<i64: 8, 256>}]} {
    %c0_i32 = arith.constant 0 : i32
    %0 = arith.cmpi eq, %arg2, %c0_i32 : i32
    %1 = arith.extui %0 : i1 to i32
    %c0_i32_0 = arith.constant 0 : i32
    %2 = arith.cmpi ne, %1, %c0_i32_0 : i32
    scf.if %2 {
      %cst_9 = arith.constant 0.000000e+00 : f32
      %12 = vector.broadcast %cst_9 : f32 to vector<8x256xf32>
      %c0_10 = arith.constant 0 : index
      %c0_11 = arith.constant 0 : index
      %13 = vector.load %arg8[%c0_10, %c0_11] : memref<8x256xf32, #tpu.memory_space<vmem>>, vector<8x256xf32>
      tpu.vector_store %arg8[%c0_10, %c0_11], %12 {strides = array<i32>} : memref<8x256xf32, #tpu.memory_space<vmem>>, vector<8x256xf32>,
    } else {
    }
    %c0 = arith.constant 0 : index
    %c0_1 = arith.constant 0 : index
    %3 = vector.load %arg8[%c0, %c0_1] : memref<8x256xf32, #tpu.memory_space<vmem>>, vector<8x256xf32>
    %c0_2 = arith.constant 0 : index
    %c0_3 = arith.constant 0 : index
    %4 = vector.load %arg3[%c0_2, %c0_3] : memref<8x512xbf16, #tpu.memory_space<vmem>>, vector<8x512xbf16>
    %c0_4 = arith.constant 0 : index
    %c0_5 = arith.constant 0 : index
    %5 = vector.load %arg4[%c0_4, %c0_5] : memref<512x256xbf16, #tpu.memory_space<vmem>>, vector<512x256xbf16>
    %cst = arith.constant dense<0.000000e+00> : vector<8x256xf32>
    %6 = tpu.matmul %4, %5, %cst {dimension_numbers = #tpu.dot_dimension_numbers<[1], [0], [0], [1], [0, 0, 1, 1], [], []>} : vector<8x512xbf16>, vector<512x256xbf16>, vector<8x256xf32> -> vector<8x256xf32>
    %7 = arith.addf %3, %6 : vector<8x256xf32>
    %c0_6 = arith.constant 0 : index
    %c0_7 = arith.constant 0 : index
    %8 = vector.load %arg8[%c0_6, %c0_7] : memref<8x256xf32, #tpu.memory_space<vmem>>, vector<8x256xf32>
    tpu.vector_store %arg8[%c0_6, %c0_7], %7 {strides = array<i32>} : memref<8x256xf32, #tpu.memory_space<vmem>>, vector<8x256xf32>,
    %c8_i32 = arith.constant 8 : i32
    %9 = arith.cmpi eq, %arg2, %c8_i32 : i32
    %10 = arith.extui %9 : i1 to i32
    %c0_i32_8 = arith.constant 0 : i32
    %11 = arith.cmpi ne, %10, %c0_i32_8 : i32
    scf.if %11 {
      %c0_9 = arith.constant 0 : index
      %c0_10 = arith.constant 0 : index
      %12 = vector.load %arg8[%c0_9, %c0_10] : memref<8x256xf32, #tpu.memory_space<vmem>>, vector<8x256xf32>
      %c0_11 = arith.constant 0 : index
      %c0_12 = arith.constant 0 : index
      %13 = vector.load %arg5[%c0_11, %c0_12] : memref<1x256xf32, #tpu.memory_space<vmem>>, vector<1x256xf32>
      %14 = vector.broadcast %13 : vector<1x256xf32> to vector<8x256xf32>
      %15 = arith.addf %12, %14 : vector<8x256xf32>
      %c0_13 = arith.constant 0 : index
      %c0_14 = arith.constant 0 : index
      %16 = vector.load %arg6[%c0_13, %c0_14] : memref<8x256xbf16, #tpu.memory_space<vmem>>, vector<8x256xbf16>
      %17 = arith.extf %16 : vector<8x256xbf16> to vector<8x256xf32>
      %18 = arith.addf %15, %17 : vector<8x256xf32>
      %cst_15 = arith.constant 0.000000e+00 : f32
      %19 = vector.broadcast %cst_15 : f32 to vector<8x256xf32>
      %20 = arith.maximumf %18, %19 : vector<8x256xf32>
      %21 = arith.truncf %20 : vector<8x256xf32> to vector<8x256xbf16>
      %c0_16 = arith.constant 0 : index
      %c0_17 = arith.constant 0 : index
      %22 = vector.load %arg7[%c0_16, %c0_17] : memref<8x256xbf16, #tpu.memory_space<vmem>>, vector<8x256xbf16>
      tpu.vector_store %arg7[%c0_16, %c0_17], %21 {strides = array<i32>} : memref<8x256xbf16, #tpu.memory_space<vmem>>, vector<8x256xbf16>,
    } else {
    }
    return
  }
  func.func @transform_0(%arg0: i32, %arg1: i32, %arg2: i32) -> (i32, i32) {
    %c0_i32 = arith.constant 0 : i32
    return %arg0, %arg2 : i32, i32
  }
  func.func @transform_1(%arg0: i32, %arg1: i32, %arg2: i32) -> (i32, i32) {
    %c0_i32 = arith.constant 0 : i32
    return %arg2, %arg1 : i32, i32
  }
  func.func @transform_2(%arg0: i32, %arg1: i32, %arg2: i32) -> (i32, i32) {
    %c0_i32 = arith.constant 0 : i32
    %c0_i32_0 = arith.constant 0 : i32
    return %c0_i32, %arg1 : i32, i32
  }
  func.func @transform_3(%arg0: i32, %arg1: i32, %arg2: i32) -> (i32, i32) {
    %c0_i32 = arith.constant 0 : i32
    return %arg0, %arg1 : i32, i32
  }
  func.func @transform_4(%arg0: i32, %arg1: i32, %arg2: i32) -> (i32, i32) {
    %c0_i32 = arith.constant 0 : i32
    return %arg0, %arg1 : i32, i32
  }
}

module attributes {stable_mosaic.version = 11 : i64} {
  func.func @kernel(%arg0: i32, %arg1: i32, %arg2: i32, %arg3: memref<8x512xbf16, #tpu.memory_space<vmem>>, %arg4: memref<512x256xbf16, #tpu.memory_space<vmem>>, %arg5: memref<1x256xf32, #tpu.memory_space<vmem>>, %arg6: memref<8x256xbf16, #tpu.memory_space<vmem>>, %arg7: memref<8x256xf32, #tpu.memory_space<vmem>>) attributes {dimension_semantics = [#tpu.dimension_semantics<parallel>, #tpu.dimension_semantics<parallel>, #tpu.dimension_semantics<arbitrary>], iteration_bounds = array<i64: 1, 2, 9>, scalar_prefetch = 0 : i64, scratch_operands = 1 : i64, tpu.core_type = #tpu.core_type<tc>, window_params = [{transform_indices = @transform_0, window_bounds = array<i64: 8, 512>}, {transform_indices = @transform_1, window_bounds = array<i64: 512, 256>}, {transform_indices = @transform_2, window_bounds = array<i64: 1, 256>}, {transform_indices = @transform_3, window_bounds = array<i64: 8, 256>}]} {
    %c0_i32 = arith.constant 0 : i32
    %0 = arith.cmpi eq, %arg2, %c0_i32 : i32
    %1 = arith.extui %0 : i1 to i32
    %c0_i32_0 = arith.constant 0 : i32
    %2 = arith.cmpi ne, %1, %c0_i32_0 : i32
    scf.if %2 {
      %cst_9 = arith.constant 0.000000e+00 : f32
      %12 = vector.broadcast %cst_9 : f32 to vector<8x256xf32>
      %c0_10 = arith.constant 0 : index
      %c0_11 = arith.constant 0 : index
      %13 = vector.load %arg7[%c0_10, %c0_11] : memref<8x256xf32, #tpu.memory_space<vmem>>, vector<8x256xf32>
      tpu.vector_store %arg7[%c0_10, %c0_11], %12 {strides = array<i32>} : memref<8x256xf32, #tpu.memory_space<vmem>>, vector<8x256xf32>,
    } else {
    }
    %c0 = arith.constant 0 : index
    %c0_1 = arith.constant 0 : index
    %3 = vector.load %arg7[%c0, %c0_1] : memref<8x256xf32, #tpu.memory_space<vmem>>, vector<8x256xf32>
    %c0_2 = arith.constant 0 : index
    %c0_3 = arith.constant 0 : index
    %4 = vector.load %arg3[%c0_2, %c0_3] : memref<8x512xbf16, #tpu.memory_space<vmem>>, vector<8x512xbf16>
    %c0_4 = arith.constant 0 : index
    %c0_5 = arith.constant 0 : index
    %5 = vector.load %arg4[%c0_4, %c0_5] : memref<512x256xbf16, #tpu.memory_space<vmem>>, vector<512x256xbf16>
    %cst = arith.constant dense<0.000000e+00> : vector<8x256xf32>
    %6 = tpu.matmul %4, %5, %cst {dimension_numbers = #tpu.dot_dimension_numbers<[1], [0], [0], [1], [0, 0, 1, 1], [], []>} : vector<8x512xbf16>, vector<512x256xbf16>, vector<8x256xf32> -> vector<8x256xf32>
    %7 = arith.addf %3, %6 : vector<8x256xf32>
    %c0_6 = arith.constant 0 : index
    %c0_7 = arith.constant 0 : index
    %8 = vector.load %arg7[%c0_6, %c0_7] : memref<8x256xf32, #tpu.memory_space<vmem>>, vector<8x256xf32>
    tpu.vector_store %arg7[%c0_6, %c0_7], %7 {strides = array<i32>} : memref<8x256xf32, #tpu.memory_space<vmem>>, vector<8x256xf32>,
    %c8_i32 = arith.constant 8 : i32
    %9 = arith.cmpi eq, %arg2, %c8_i32 : i32
    %10 = arith.extui %9 : i1 to i32
    %c0_i32_8 = arith.constant 0 : i32
    %11 = arith.cmpi ne, %10, %c0_i32_8 : i32
    scf.if %11 {
      %c0_9 = arith.constant 0 : index
      %c0_10 = arith.constant 0 : index
      %12 = vector.load %arg7[%c0_9, %c0_10] : memref<8x256xf32, #tpu.memory_space<vmem>>, vector<8x256xf32>
      %c0_11 = arith.constant 0 : index
      %c0_12 = arith.constant 0 : index
      %13 = vector.load %arg5[%c0_11, %c0_12] : memref<1x256xf32, #tpu.memory_space<vmem>>, vector<1x256xf32>
      %14 = vector.broadcast %13 : vector<1x256xf32> to vector<8x256xf32>
      %15 = arith.addf %12, %14 : vector<8x256xf32>
      %cst_13 = arith.constant 0.000000e+00 : f32
      %16 = vector.broadcast %cst_13 : f32 to vector<8x256xf32>
      %17 = arith.maximumf %15, %16 : vector<8x256xf32>
      %18 = arith.truncf %17 : vector<8x256xf32> to vector<8x256xbf16>
      %c0_14 = arith.constant 0 : index
      %c0_15 = arith.constant 0 : index
      %19 = vector.load %arg6[%c0_14, %c0_15] : memref<8x256xbf16, #tpu.memory_space<vmem>>, vector<8x256xbf16>
      tpu.vector_store %arg6[%c0_14, %c0_15], %18 {strides = array<i32>} : memref<8x256xbf16, #tpu.memory_space<vmem>>, vector<8x256xbf16>,
    } else {
    }
    return
  }
  func.func @transform_0(%arg0: i32, %arg1: i32, %arg2: i32) -> (i32, i32) {
    %c0_i32 = arith.constant 0 : i32
    return %arg0, %arg2 : i32, i32
  }
  func.func @transform_1(%arg0: i32, %arg1: i32, %arg2: i32) -> (i32, i32) {
    %c0_i32 = arith.constant 0 : i32
    return %arg2, %arg1 : i32, i32
  }
  func.func @transform_2(%arg0: i32, %arg1: i32, %arg2: i32) -> (i32, i32) {
    %c0_i32 = arith.constant 0 : i32
    %c0_i32_0 = arith.constant 0 : i32
    return %c0_i32, %arg1 : i32, i32
  }
  func.func @transform_3(%arg0: i32, %arg1: i32, %arg2: i32) -> (i32, i32) {
    %c0_i32 = arith.constant 0 : i32
    return %arg0, %arg1 : i32, i32
  }
}

module attributes {stable_mosaic.version = 11 : i64} {
  func.func @kernel(%arg0: i32, %arg1: i32, %arg2: i32, %arg3: memref<8x512xbf16, #tpu.memory_space<vmem>>, %arg4: memref<512x256xbf16, #tpu.memory_space<vmem>>, %arg5: memref<1x256xf32, #tpu.memory_space<vmem>>, %arg6: memref<8x256xbf16, #tpu.memory_space<vmem>>, %arg7: memref<8x256xbf16, #tpu.memory_space<vmem>>, %arg8: memref<8x256xf32, #tpu.memory_space<vmem>>) attributes {dimension_semantics = [#tpu.dimension_semantics<parallel>, #tpu.dimension_semantics<parallel>, #tpu.dimension_semantics<arbitrary>], iteration_bounds = array<i64: 1, 2, 9>, scalar_prefetch = 0 : i64, scratch_operands = 1 : i64, tpu.core_type = #tpu.core_type<tc>, window_params = [{transform_indices = @transform_0, window_bounds = array<i64: 8, 512>}, {transform_indices = @transform_1, window_bounds = array<i64: 512, 256>}, {transform_indices = @transform_2, window_bounds = array<i64: 1, 256>}, {transform_indices = @transform_3, window_bounds = array<i64: 8, 256>}, {transform_indices = @transform_4, window_bounds = array<i64: 8, 256>}]} {
    %c0_i32 = arith.constant 0 : i32
    %0 = arith.cmpi eq, %arg2, %c0_i32 : i32
    %1 = arith.extui %0 : i1 to i32
    %c0_i32_0 = arith.constant 0 : i32
    %2 = arith.cmpi ne, %1, %c0_i32_0 : i32
    scf.if %2 {
      %cst_9 = arith.constant 0.000000e+00 : f32
      %12 = vector.broadcast %cst_9 : f32 to vector<8x256xf32>
      %c0_10 = arith.constant 0 : index
      %c0_11 = arith.constant 0 : index
      %13 = vector.load %arg8[%c0_10, %c0_11] : memref<8x256xf32, #tpu.memory_space<vmem>>, vector<8x256xf32>
      tpu.vector_store %arg8[%c0_10, %c0_11], %12 {strides = array<i32>} : memref<8x256xf32, #tpu.memory_space<vmem>>, vector<8x256xf32>,
    } else {
    }
    %c0 = arith.constant 0 : index
    %c0_1 = arith.constant 0 : index
    %3 = vector.load %arg8[%c0, %c0_1] : memref<8x256xf32, #tpu.memory_space<vmem>>, vector<8x256xf32>
    %c0_2 = arith.constant 0 : index
    %c0_3 = arith.constant 0 : index
    %4 = vector.load %arg3[%c0_2, %c0_3] : memref<8x512xbf16, #tpu.memory_space<vmem>>, vector<8x512xbf16>
    %c0_4 = arith.constant 0 : index
    %c0_5 = arith.constant 0 : index
    %5 = vector.load %arg4[%c0_4, %c0_5] : memref<512x256xbf16, #tpu.memory_space<vmem>>, vector<512x256xbf16>
    %cst = arith.constant dense<0.000000e+00> : vector<8x256xf32>
    %6 = tpu.matmul %4, %5, %cst {dimension_numbers = #tpu.dot_dimension_numbers<[1], [0], [0], [1], [0, 0, 1, 1], [], []>} : vector<8x512xbf16>, vector<512x256xbf16>, vector<8x256xf32> -> vector<8x256xf32>
    %7 = arith.addf %3, %6 : vector<8x256xf32>
    %c0_6 = arith.constant 0 : index
    %c0_7 = arith.constant 0 : index
    %8 = vector.load %arg8[%c0_6, %c0_7] : memref<8x256xf32, #tpu.memory_space<vmem>>, vector<8x256xf32>
    tpu.vector_store %arg8[%c0_6, %c0_7], %7 {strides = array<i32>} : memref<8x256xf32, #tpu.memory_space<vmem>>, vector<8x256xf32>,
    %c8_i32 = arith.constant 8 : i32
    %9 = arith.cmpi eq, %arg2, %c8_i32 : i32
    %10 = arith.extui %9 : i1 to i32
    %c0_i32_8 = arith.constant 0 : i32
    %11 = arith.cmpi ne, %10, %c0_i32_8 : i32
    scf.if %11 {
      %c0_9 = arith.constant 0 : index
      %c0_10 = arith.constant 0 : index
      %12 = vector.load %arg8[%c0_9, %c0_10] : memref<8x256xf32, #tpu.memory_space<vmem>>, vector<8x256xf32>
      %c0_11 = arith.constant 0 : index
      %c0_12 = arith.constant 0 : index
      %13 = vector.load %arg5[%c0_11, %c0_12] : memref<1x256xf32, #tpu.memory_space<vmem>>, vector<1x256xf32>
      %14 = vector.broadcast %13 : vector<1x256xf32> to vector<8x256xf32>
      %15 = arith.addf %12, %14 : vector<8x256xf32>
      %c0_13 = arith.constant 0 : index
      %c0_14 = arith.constant 0 : index
      %16 = vector.load %arg6[%c0_13, %c0_14] : memref<8x256xbf16, #tpu.memory_space<vmem>>, vector<8x256xbf16>
      %17 = arith.extf %16 : vector<8x256xbf16> to vector<8x256xf32>
      %18 = arith.addf %15, %17 : vector<8x256xf32>
      %cst_15 = arith.constant 0.000000e+00 : f32
      %19 = vector.broadcast %cst_15 : f32 to vector<8x256xf32>
      %20 = arith.maximumf %18, %19 : vector<8x256xf32>
      %21 = arith.truncf %20 : vector<8x256xf32> to vector<8x256xbf16>
      %c0_16 = arith.constant 0 : index
      %c0_17 = arith.constant 0 : index
      %22 = vector.load %arg7[%c0_16, %c0_17] : memref<8x256xbf16, #tpu.memory_space<vmem>>, vector<8x256xbf16>
      tpu.vector_store %arg7[%c0_16, %c0_17], %21 {strides = array<i32>} : memref<8x256xbf16, #tpu.memory_space<vmem>>, vector<8x256xbf16>,
    } else {
    }
    return
  }
  func.func @transform_0(%arg0: i32, %arg1: i32, %arg2: i32) -> (i32, i32) {
    %c0_i32 = arith.constant 0 : i32
    return %arg0, %arg2 : i32, i32
  }
  func.func @transform_1(%arg0: i32, %arg1: i32, %arg2: i32) -> (i32, i32) {
    %c0_i32 = arith.constant 0 : i32
    return %arg2, %arg1 : i32, i32
  }
  func.func @transform_2(%arg0: i32, %arg1: i32, %arg2: i32) -> (i32, i32) {
    %c0_i32 = arith.constant 0 : i32
    %c0_i32_0 = arith.constant 0 : i32
    return %c0_i32, %arg1 : i32, i32
  }
  func.func @transform_3(%arg0: i32, %arg1: i32, %arg2: i32) -> (i32, i32) {
    %c0_i32 = arith.constant 0 : i32
    return %arg0, %arg1 : i32, i32
  }
  func.func @transform_4(%arg0: i32, %arg1: i32, %arg2: i32) -> (i32, i32) {
    %c0_i32 = arith.constant 0 : i32
    return %arg0, %arg1 : i32, i32
  }
}

module attributes {stable_mosaic.version = 11 : i64} {
  func.func @_head_kernel(%arg0: i32, %arg1: memref<8x512xbf16, #tpu.memory_space<vmem>>, %arg2: memref<512x1024xbf16, #tpu.memory_space<vmem>>, %arg3: memref<1x1024xf32, #tpu.memory_space<vmem>>, %arg4: memref<1024x32xbf16, #tpu.memory_space<vmem>>, %arg5: memref<1x32xf32, #tpu.memory_space<vmem>>, %arg6: memref<32x128xbf16, #tpu.memory_space<vmem>>, %arg7: memref<1x128xf32, #tpu.memory_space<vmem>>, %arg8: memref<8x128xf32, #tpu.memory_space<vmem>>) attributes {dimension_semantics = [#tpu.dimension_semantics<arbitrary>], iteration_bounds = array<i64: 1>, scalar_prefetch = 0 : i64, scratch_operands = 0 : i64, tpu.core_type = #tpu.core_type<tc>, window_params = [{pipeline_mode = #tpu.pipeline_mode<synchronous>, transform_indices = @transform_0, window_bounds = array<i64: 8, 512>}, {pipeline_mode = #tpu.pipeline_mode<synchronous>, transform_indices = @transform_1, window_bounds = array<i64: 512, 1024>}, {pipeline_mode = #tpu.pipeline_mode<synchronous>, transform_indices = @transform_2, window_bounds = array<i64: 1, 1024>}, {pipeline_mode = #tpu.pipeline_mode<synchronous>, transform_indices = @transform_3, window_bounds = array<i64: 1024, 32>}, {pipeline_mode = #tpu.pipeline_mode<synchronous>, transform_indices = @transform_4, window_bounds = array<i64: 1, 32>}, {pipeline_mode = #tpu.pipeline_mode<synchronous>, transform_indices = @transform_5, window_bounds = array<i64: 32, 128>}, {pipeline_mode = #tpu.pipeline_mode<synchronous>, transform_indices = @transform_6, window_bounds = array<i64: 1, 128>}, {pipeline_mode = #tpu.pipeline_mode<synchronous>, transform_indices = @transform_7, window_bounds = array<i64: 8, 128>}]} {
    %c0 = arith.constant 0 : index
    %c0_0 = arith.constant 0 : index
    %0 = vector.load %arg1[%c0, %c0_0] : memref<8x512xbf16, #tpu.memory_space<vmem>>, vector<8x512xbf16>
    %c0_1 = arith.constant 0 : index
    %c0_2 = arith.constant 0 : index
    %1 = vector.load %arg2[%c0_1, %c0_2] : memref<512x1024xbf16, #tpu.memory_space<vmem>>, vector<512x1024xbf16>
    %cst = arith.constant dense<0.000000e+00> : vector<8x1024xf32>
    %2 = tpu.matmul %0, %1, %cst {dimension_numbers = #tpu.dot_dimension_numbers<[1], [0], [0], [1], [0, 0, 1, 1], [], []>} : vector<8x512xbf16>, vector<512x1024xbf16>, vector<8x1024xf32> -> vector<8x1024xf32>
    %c0_3 = arith.constant 0 : index
    %c0_4 = arith.constant 0 : index
    %3 = vector.load %arg3[%c0_3, %c0_4] : memref<1x1024xf32, #tpu.memory_space<vmem>>, vector<1x1024xf32>
    %4 = vector.broadcast %3 : vector<1x1024xf32> to vector<8x1024xf32>
    %5 = arith.addf %2, %4 : vector<8x1024xf32>
    %cst_5 = arith.constant 0.000000e+00 : f32
    %6 = vector.broadcast %cst_5 : f32 to vector<8x1024xf32>
    %7 = arith.maximumf %5, %6 : vector<8x1024xf32>
    %8 = arith.truncf %7 : vector<8x1024xf32> to vector<8x1024xbf16>
    %c0_6 = arith.constant 0 : index
    %c0_7 = arith.constant 0 : index
    %9 = vector.load %arg4[%c0_6, %c0_7] : memref<1024x32xbf16, #tpu.memory_space<vmem>>, vector<1024x32xbf16>
    %cst_8 = arith.constant dense<0.000000e+00> : vector<8x32xf32>
    %10 = tpu.matmul %8, %9, %cst_8 {dimension_numbers = #tpu.dot_dimension_numbers<[1], [0], [0], [1], [0, 0, 1, 1], [], []>} : vector<8x1024xbf16>, vector<1024x32xbf16>, vector<8x32xf32> -> vector<8x32xf32>
    %c0_9 = arith.constant 0 : index
    %c0_10 = arith.constant 0 : index
    %11 = vector.load %arg5[%c0_9, %c0_10] : memref<1x32xf32, #tpu.memory_space<vmem>>, vector<1x32xf32>
    %12 = vector.broadcast %11 : vector<1x32xf32> to vector<8x32xf32>
    %13 = arith.addf %10, %12 : vector<8x32xf32>
    %cst_11 = arith.constant 0.000000e+00 : f32
    %14 = vector.broadcast %cst_11 : f32 to vector<8x32xf32>
    %15 = arith.maximumf %13, %14 : vector<8x32xf32>
    %16 = arith.truncf %15 : vector<8x32xf32> to vector<8x32xbf16>
    %c0_12 = arith.constant 0 : index
    %c0_13 = arith.constant 0 : index
    %17 = vector.load %arg6[%c0_12, %c0_13] : memref<32x128xbf16, #tpu.memory_space<vmem>>, vector<32x128xbf16>
    %cst_14 = arith.constant dense<0.000000e+00> : vector<8x128xf32>
    %18 = tpu.matmul %16, %17, %cst_14 {dimension_numbers = #tpu.dot_dimension_numbers<[1], [0], [0], [1], [0, 0, 1, 1], [], []>} : vector<8x32xbf16>, vector<32x128xbf16>, vector<8x128xf32> -> vector<8x128xf32>
    %c0_15 = arith.constant 0 : index
    %c0_16 = arith.constant 0 : index
    %19 = vector.load %arg7[%c0_15, %c0_16] : memref<1x128xf32, #tpu.memory_space<vmem>>, vector<1x128xf32>
    %20 = vector.broadcast %19 : vector<1x128xf32> to vector<8x128xf32>
    %21 = arith.addf %18, %20 : vector<8x128xf32>
    %cst_17 = arith.constant dense<0xFF800000> : vector<8xf32>
    %22 = vector.multi_reduction <maximumf>, %21, %cst_17 [1] : vector<8x128xf32> to vector<8xf32>
    %23 = vector.shape_cast %22 : vector<8xf32> to vector<8x1xf32>
    %24 = vector.broadcast %23 : vector<8x1xf32> to vector<8x128xf32>
    %25 = arith.subf %21, %24 : vector<8x128xf32>
    %26 = math.exp %25 : vector<8x128xf32>
    %cst_18 = arith.constant dense<0.000000e+00> : vector<8xf32>
    %27 = vector.multi_reduction <add>, %26, %cst_18 [1] : vector<8x128xf32> to vector<8xf32>
    %28 = vector.shape_cast %27 : vector<8xf32> to vector<8x1xf32>
    %29 = vector.broadcast %28 : vector<8x1xf32> to vector<8x128xf32>
    %30 = arith.divf %26, %29 : vector<8x128xf32>
    %c0_19 = arith.constant 0 : index
    %c0_20 = arith.constant 0 : index
    %31 = vector.load %arg8[%c0_19, %c0_20] : memref<8x128xf32, #tpu.memory_space<vmem>>, vector<8x128xf32>
    tpu.vector_store %arg8[%c0_19, %c0_20], %30 {strides = array<i32>} : memref<8x128xf32, #tpu.memory_space<vmem>>, vector<8x128xf32>,
    return
  }
  func.func @transform_0(%arg0: i32) -> (i32, i32) {
    %c0_i32 = arith.constant 0 : i32
    %c0_i32_0 = arith.constant 0 : i32
    %c0_i32_1 = arith.constant 0 : i32
    return %c0_i32, %c0_i32_0 : i32, i32
  }
  func.func @transform_1(%arg0: i32) -> (i32, i32) {
    %c0_i32 = arith.constant 0 : i32
    %c0_i32_0 = arith.constant 0 : i32
    %c0_i32_1 = arith.constant 0 : i32
    return %c0_i32, %c0_i32_0 : i32, i32
  }
  func.func @transform_2(%arg0: i32) -> (i32, i32) {
    %c0_i32 = arith.constant 0 : i32
    %c0_i32_0 = arith.constant 0 : i32
    %c0_i32_1 = arith.constant 0 : i32
    return %c0_i32, %c0_i32_0 : i32, i32
  }
  func.func @transform_3(%arg0: i32) -> (i32, i32) {
    %c0_i32 = arith.constant 0 : i32
    %c0_i32_0 = arith.constant 0 : i32
    %c0_i32_1 = arith.constant 0 : i32
    return %c0_i32, %c0_i32_0 : i32, i32
  }
  func.func @transform_4(%arg0: i32) -> (i32, i32) {
    %c0_i32 = arith.constant 0 : i32
    %c0_i32_0 = arith.constant 0 : i32
    %c0_i32_1 = arith.constant 0 : i32
    return %c0_i32, %c0_i32_0 : i32, i32
  }
  func.func @transform_5(%arg0: i32) -> (i32, i32) {
    %c0_i32 = arith.constant 0 : i32
    %c0_i32_0 = arith.constant 0 : i32
    %c0_i32_1 = arith.constant 0 : i32
    return %c0_i32, %c0_i32_0 : i32, i32
  }
  func.func @transform_6(%arg0: i32) -> (i32, i32) {
    %c0_i32 = arith.constant 0 : i32
    %c0_i32_0 = arith.constant 0 : i32
    %c0_i32_1 = arith.constant 0 : i32
    return %c0_i32, %c0_i32_0 : i32, i32
  }
  func.func @transform_7(%arg0: i32) -> (i32, i32) {
    %c0_i32 = arith.constant 0 : i32
    %c0_i32_0 = arith.constant 0 : i32
    %c0_i32_1 = arith.constant 0 : i32
    return %c0_i32, %c0_i32_0 : i32, i32
  }
}

</mosaic_0001>

<bundles_post_ra>
// kernel: clsnet_forward.21
= control target key start
LH: loop header
LB: loop body
LE: loop exit
PB: predicated region body
PF: predicated region fallthrough
CT: control target
= control target key end

     0   :  { %s928_s1 = inlined_call_operand.vmem [shape: bf16[256,128], index: 1, kind: input, shape index: {}]   ;;  %s929_s0 = inlined_call_operand.vmem [shape: bf16[128,256], index: 0, kind: input, shape index: {}]   ;;  %s930_s2 = inlined_call_operand.vmem [shape: f32[1,128], index: 2, kind: input, shape index: {}]   ;;  %s931_s3 = inlined_call_operand.vmem [shape: bf16[128,128], index: 3, kind: output, shape index: {}]  }
   0x1   :  { %v646_v0 = vld [vmem:[%s928_s1 + $0x38] sm:$0xff]  ;;  %v645_v2 = vld [vmem:[%s928_s1 + $0x30] sm:$0xff]  ;;  %v644_v4 = vld [vmem:[%s928_s1 + $0x28] sm:$0xff] }
   0x2   :  { %v654_v1 = vld [vmem:[%s928_s1 + $0x78] sm:$0xff]  ;;  %274 = vmatpush.bf16.msra.mxu0 %v646_v0  ;;  %702 = vmatpush.bf16.msra.mxu2 %v646_v0  ;;  %v653_v3 = vld [vmem:[%s928_s1 + $0x70] sm:$0xff]  ;;  %v652_v5 = vld [vmem:[%s928_s1 + $0x68] sm:$0xff] }
   0x3   :  { %323 = vmatpush.bf16.msra.mxu1 %v654_v1  ;;  %710 = vmatpush.bf16.msra.mxu3 %v654_v1  ;;  %v643_v6 = vld [vmem:[%s928_s1 + $0x20] sm:$0xff]  ;;  %v642_v8 = vld [vmem:[%s928_s1 + $0x18] sm:$0xff]  ;;  %v641_v10 = vld [vmem:[%s928_s1 + $0x10] sm:$0xff] }
   0x4   :  { %v651_v7 = vld [vmem:[%s928_s1 + $0x60] sm:$0xff]  ;;  %v650_v9 = vld [vmem:[%s928_s1 + $0x58] sm:$0xff]  ;;  %v649_v11 = vld [vmem:[%s928_s1 + $0x50] sm:$0xff] }
   0x5   :  { %v640_v12 = vld [vmem:[%s928_s1 + $0x8] sm:$0xff]  ;;  %v639_v14 = vld [vmem:[%s928_s1] sm:$0xff]  ;;  %v505_v28 = vld [vmem:[%s929_s0 + $0x10] sm:$0xf] }
   0x6   :  { %275 = vmatpush.bf16.msra.mxu0 %v645_v2  ;;  %703 = vmatpush.bf16.msra.mxu2 %v645_v2  ;;  %v648_v13 = vld [vmem:[%s928_s1 + $0x48] sm:$0xff]  ;;  %v647_v15 = vld [vmem:[%s928_s1 + $0x40] sm:$0xff]  ;;  %v626_v29 = vld [vmem:[%s929_s0 + $0x14] sm:$0xf0] }
   0x7   :  { %324 = vmatpush.bf16.msra.mxu1 %v653_v3  ;;  %711 = vmatpush.bf16.msra.mxu3 %v653_v3  ;;  %v497_v16 = vld [vmem:[%s929_s0] sm:$0xf]  ;;  %v624_v17 = vld [vmem:[%s929_s0 + $0x4] sm:$0xf0]  ;;  %v623_v20 = vld [vmem:[%s929_s0 + $0x4] sm:$0xf]  ;;  %v506_v36 = vor.u32 %v626_v29, %v505_v28 }
   0x8   :  { %v529_v18 = vld [vmem:[%s929_s0 + $0x40] sm:$0xf]  ;;  %v632_v19 = vld [vmem:[%s929_s0 + $0x44] sm:$0xf0]  ;;  %v499_v21 = vld [vmem:[%s929_s0 + $0x8] sm:$0xf0]  ;;  %v498_v24 = vor.u32 %v624_v17, %v497_v16 }
   0x9   :  { %v631_v22 = vld [vmem:[%s929_s0 + $0x44] sm:$0xf]  ;;  %v531_v23 = vld [vmem:[%s929_s0 + $0x48] sm:$0xf0]  ;;  %v530_v25 = vor.u32 %v632_v19, %v529_v18  ;;  %v502_v26 = vor.u32 %v623_v20, %v499_v21  ;;  %v537_v30 = vld [vmem:[%s929_s0 + $0x50] sm:$0xf] }
   0xa   :  { %276 = vmatpush.bf16.msra.mxu0 %v644_v4  ;;  %704 = vmatpush.bf16.msra.mxu2 %v644_v4  ;;  %v534_v27 = vor.u32 %v631_v22, %v531_v23  ;;  %v634_v31 = vld [vmem:[%s929_s0 + $0x54] sm:$0xf0]  ;;  %v625_v32 = vld [vmem:[%s929_s0 + $0x14] sm:$0xf]  ;;  %v507_v33 = vld [vmem:[%s929_s0 + $0x18] sm:$0xf0] }
   0xb   :  { %325 = vmatpush.bf16.msra.mxu1 %v652_v5  ;;  %712 = vmatpush.bf16.msra.mxu3 %v652_v5  ;;  %v633_v34 = vld [vmem:[%s929_s0 + $0x54] sm:$0xf]  ;;  %v539_v35 = vld [vmem:[%s929_s0 + $0x58] sm:$0xf0]  ;;  %v538_v37 = vor.u32 %v634_v31, %v537_v30  ;;  %v510_v38 = vor.u32 %v625_v32, %v507_v33  ;;  %v513_v40 = vld [vmem:[%s929_s0 + $0x20] sm:$0xf] }
   0xc   :  { %v542_v39 = vor.u32 %v633_v34, %v539_v35  ;;  %v628_v41 = vld [vmem:[%s929_s0 + $0x24] sm:$0xf0]  ;;  %v545_v42 = vld [vmem:[%s929_s0 + $0x60] sm:$0xf]  ;;  %v627_v44 = vld [vmem:[%s929_s0 + $0x24] sm:$0xf] }
   0xd   :  { %v636_v43 = vld [vmem:[%s929_s0 + $0x64] sm:$0xf0]  ;;  %v515_v45 = vld [vmem:[%s929_s0 + $0x28] sm:$0xf0]  ;;  %v635_v46 = vld [vmem:[%s929_s0 + $0x64] sm:$0xf]  ;;  %v514_v48 = vor.u32 %v628_v41, %v513_v40 }
   0xe   :  { %277 = vmatpush.bf16.msra.mxu0 %v643_v6  ;;  %705 = vmatpush.bf16.msra.mxu2 %v643_v6  ;;  %v547_v47 = vld [vmem:[%s929_s0 + $0x68] sm:$0xf0]  ;;  %v546_v49 = vor.u32 %v636_v43, %v545_v42  ;;  %v518_v50 = vor.u32 %v627_v44, %v515_v45  ;;  %v521_v52 = vld [vmem:[%s929_s0 + $0x30] sm:$0xf]  ;;  %v630_v53 = vld [vmem:[%s929_s0 + $0x34] sm:$0xf0] }
   0xf   :  { %326 = vmatpush.bf16.msra.mxu1 %v651_v7  ;;  %713 = vmatpush.bf16.msra.mxu3 %v651_v7  ;;  %v550_v51 = vor.u32 %v635_v46, %v547_v47  ;;  %v553_v54 = vld [vmem:[%s929_s0 + $0x70] sm:$0xf]  ;;  %v638_v55 = vld [vmem:[%s929_s0 + $0x74] sm:$0xf0]  ;;  %v629_v56 = vld [vmem:[%s929_s0 + $0x34] sm:$0xf]  ;;  %v522_v60 = vor.u32 %v630_v53, %v521_v52 }
  0x10   :  { %v523_v57 = vld [vmem:[%s929_s0 + $0x38] sm:$0xf0]  ;;  %v637_v58 = vld [vmem:[%s929_s0 + $0x74] sm:$0xf]  ;;  %v554_v61 = vor.u32 %v638_v55, %v553_v54  ;;  %v886_v3 = vld [vmem:[%s930_s2] ss:$0 sm:$0xff] }
  0x11   :  { %v555_v59 = vld [vmem:[%s929_s0 + $0x78] sm:$0xf0]  ;;  %v526_v62 = vor.u32 %v629_v56, %v523_v57 }
  0x12   :  { %278 = vmatpush.bf16.msra.mxu0 %v642_v8  ;;  %706 = vmatpush.bf16.msra.mxu2 %v642_v8  ;;  %v558_v63 = vor.u32 %v637_v58, %v555_v59 }
  0x13   :  { %327 = vmatpush.bf16.msra.mxu1 %v650_v9  ;;  %714 = vmatpush.bf16.msra.mxu3 %v650_v9 }
  0x16   :  { %279 = vmatpush.bf16.msra.mxu0 %v641_v10  ;;  %707 = vmatpush.bf16.msra.mxu2 %v641_v10 }
  0x17   :  { %328 = vmatpush.bf16.msra.mxu1 %v649_v11  ;;  %715 = vmatpush.bf16.msra.mxu3 %v649_v11 }
  0x1a   :  { %280 = vmatpush.bf16.msra.mxu0 %v640_v12  ;;  %708 = vmatpush.bf16.msra.mxu2 %v640_v12 }
  0x1b   :  { %329 = vmatpush.bf16.msra.mxu1 %v648_v13  ;;  %716 = vmatpush.bf16.msra.mxu3 %v648_v13 }
  0x1e   :  { %281 = vmatpush.bf16.msra.mxu0 %v639_v14  ;;  %709 = vmatpush.bf16.msra.mxu2 %v639_v14 }
  0x1f   :  { %330 = vmatpush.bf16.msra.mxu1 %v647_v15  ;;  %717 = vmatpush.bf16.msra.mxu3 %v647_v15 }
  0x21   :  { %282 = vmatmul.bf16.vlgmr.msra.gmra.mxu0 %v498_v24  ;;  %302 = vmatmul.bf16.vlgmr.msra.gmra.mxu2 %v530_v25 }
  0x22   :  { %331 = vmatmul.bf16.vlgmr.msra.gmra.mxu1 %v502_v26  ;;  %351 = vmatmul.bf16.vlgmr.msra.gmra.mxu3 %v534_v27 }
  0x31   :  { %287 = vmatmul.bf16.gmra.mxu0 %v506_v36  ;;  %307 = vmatmul.bf16.gmra.mxu2 %v538_v37 }
  0x32   :  { %336 = vmatmul.bf16.gmra.mxu1 %v510_v38  ;;  %356 = vmatmul.bf16.gmra.mxu3 %v542_v39 }
  0x41   :  { %292 = vmatmul.bf16.gmra.mxu0 %v514_v48  ;;  %312 = vmatmul.bf16.gmra.mxu2 %v546_v49 }
  0x42   :  { %341 = vmatmul.bf16.gmra.mxu1 %v518_v50  ;;  %361 = vmatmul.bf16.gmra.mxu3 %v550_v51 }
  0x51   :  { %297 = vmatmul.bf16.gmra.mxu0 %v522_v60  ;;  %317 = vmatmul.bf16.gmra.mxu2 %v554_v61 }
  0x52   :  { %346 = vmatmul.bf16.gmra.mxu1 %v526_v62  ;;  %366 = vmatmul.bf16.gmra.mxu3 %v558_v63 }
  0x9e   :  { %v283_v0 = vpop.f32.mrf.mxu0 }
  0x9f   :  { %v332_v1 = vpop.f32.mrf.mxu1 }
  0xa0   :  { %v333_v2 = vadd.f32 %v332_v1, %v283_v0 }
  0xa2   :  { %v427_v8 = vadd.f32 %v886_v3, %v333_v2 }
  0xa4   :  { %v303_v4 = vpop.f32.mrf.mxu2  ;;  %v443_v12 = vmax.f32 %v427_v8, 0.0 }
  0xa5   :  { %v352_v5 = vpop.f32.mrf.mxu3 }
  0xa6   :  { %v285_v6 = vpop.f32.mrf.mxu0  ;;  %v353_v10 = vadd.f32 %v352_v5, %v303_v4 }
  0xa7   :  { %v334_v7 = vpop.f32.mrf.mxu1 }
  0xa8   :  { %v335_v9 = vadd.f32 %v334_v7, %v285_v6  ;;  %v435_v16 = vadd.f32 %v886_v3, %v353_v10 }
  0xaa   :  { %v428_v11 = vadd.f32 %v886_v3, %v335_v9  ;;  %v451_v22 = vmax.f32 %v435_v16, 0.0 }
  0xac   :  { %v444_v13 = vmax.f32 %v428_v11, 0.0  ;;  %v305_v14 = vpop.f32.mrf.mxu2 }
  0xad   :  { %v354_v15 = vpop.f32.mrf.mxu3 }
  0xae   :  { %v658_v17 = vpack.c.bf16 %v444_v13, %v443_v12  ;;  %v355_v18 = vadd.f32 %v354_v15, %v305_v14  ;;  %v288_v19 = vpop.f32.mrf.mxu0 }
  0xaf   :  { %v337_v20 = vpop.f32.mrf.mxu1 }
  0xb0   :  { %659 = vst [vmem:[%s931_s3] sm:$0xff] %v658_v17   ;;  %v436_v21 = vadd.f32 %v886_v3, %v355_v18  ;;  %v338_v25 = vadd.f32 %v337_v20, %v288_v19 }
  0xb2   :  { %v452_v23 = vmax.f32 %v436_v21, 0.0  ;;  %v429_v30 = vadd.f32 %v886_v3, %v338_v25 }
  0xb4   :  { %v678_v24 = vpack.c.bf16 %v452_v23, %v451_v22  ;;  %v308_v26 = vpop.f32.mrf.mxu2  ;;  %v445_v34 = vmax.f32 %v429_v30, 0.0 }
  0xb5   :  { %v357_v27 = vpop.f32.mrf.mxu3 }
  0xb6   :  { %698 = vst [vmem:[%s931_s3 + $0x20] sm:$0xff] %v678_v24   ;;  %v290_v28 = vpop.f32.mrf.mxu0  ;;  %v358_v32 = vadd.f32 %v357_v27, %v308_v26 }
  0xb7   :  { %v339_v29 = vpop.f32.mrf.mxu1 }
  0xb8   :  { %v340_v31 = vadd.f32 %v339_v29, %v290_v28  ;;  %v437_v38 = vadd.f32 %v886_v3, %v358_v32 }
  0xba   :  { %v430_v33 = vadd.f32 %v886_v3, %v340_v31  ;;  %v453_v44 = vmax.f32 %v437_v38, 0.0 }
  0xbc   :  { %v446_v35 = vmax.f32 %v430_v33, 0.0  ;;  %v310_v36 = vpop.f32.mrf.mxu2 }
  0xbd   :  { %v359_v37 = vpop.f32.mrf.mxu3 }
  0xbe   :  { %v663_v39 = vpack.c.bf16 %v446_v35, %v445_v34  ;;  %v360_v40 = vadd.f32 %v359_v37, %v310_v36  ;;  %v293_v41 = vpop.f32.mrf.mxu0 }
  0xbf   :  { %v342_v42 = vpop.f32.mrf.mxu1 }
  0xc0   :  { %695 = vst [vmem:[%s931_s3 + $0x8] sm:$0xff] %v663_v39   ;;  %v438_v43 = vadd.f32 %v886_v3, %v360_v40  ;;  %v343_v47 = vadd.f32 %v342_v42, %v293_v41 }
  0xc2   :  { %v454_v45 = vmax.f32 %v438_v43, 0.0  ;;  %v431_v52 = vadd.f32 %v886_v3, %v343_v47 }
  0xc4   :  { %v683_v46 = vpack.c.bf16 %v454_v45, %v453_v44  ;;  %v313_v48 = vpop.f32.mrf.mxu2  ;;  %v447_v56 = vmax.f32 %v431_v52, 0.0 }
  0xc5   :  { %v362_v49 = vpop.f32.mrf.mxu3 }
  0xc6   :  { %699 = vst [vmem:[%s931_s3 + $0x28] sm:$0xff] %v683_v46   ;;  %v295_v50 = vpop.f32.mrf.mxu0  ;;  %v363_v54 = vadd.f32 %v362_v49, %v313_v48 }
  0xc7   :  { %v344_v51 = vpop.f32.mrf.mxu1 }
  0xc8   :  { %v345_v53 = vadd.f32 %v344_v51, %v295_v50  ;;  %v439_v60 = vadd.f32 %v886_v3, %v363_v54 }
  0xca   :  { %v432_v55 = vadd.f32 %v886_v3, %v345_v53  ;;  %v455_v2 = vmax.f32 %v439_v60, 0.0 }
  0xcc   :  { %v448_v57 = vmax.f32 %v432_v55, 0.0  ;;  %v315_v58 = vpop.f32.mrf.mxu2 }
  0xcd   :  { %v364_v59 = vpop.f32.mrf.mxu3 }
  0xce   :  { %v668_v61 = vpack.c.bf16 %v448_v57, %v447_v56  ;;  %v365_v62 = vadd.f32 %v364_v59, %v315_v58  ;;  %v298_v63 = vpop.f32.mrf.mxu0 }
  0xcf   :  { %v347_v0 = vpop.f32.mrf.mxu1 }
  0xd0   :  { %696 = vst [vmem:[%s931_s3 + $0x10] sm:$0xff] %v668_v61   ;;  %v440_v1 = vadd.f32 %v886_v3, %v365_v62  ;;  %v348_v6 = vadd.f32 %v347_v0, %v298_v63 }
  0xd2   :  { %v456_v4 = vmax.f32 %v440_v1, 0.0  ;;  %v433_v11 = vadd.f32 %v886_v3, %v348_v6 }
  0xd4   :  { %v688_v5 = vpack.c.bf16 %v456_v4, %v455_v2  ;;  %v318_v7 = vpop.f32.mrf.mxu2  ;;  %v449_v15 = vmax.f32 %v433_v11, 0.0 }
  0xd5   :  { %v367_v8 = vpop.f32.mrf.mxu3 }
  0xd6   :  { %700 = vst [vmem:[%s931_s3 + $0x30] sm:$0xff] %v688_v5   ;;  %v300_v9 = vpop.f32.mrf.mxu0  ;;  %v368_v13 = vadd.f32 %v367_v8, %v318_v7 }
  0xd7   :  { %v349_v10 = vpop.f32.mrf.mxu1 }
  0xd8   :  { %v350_v12 = vadd.f32 %v349_v10, %v300_v9  ;;  %v441_v19 = vadd.f32 %v886_v3, %v368_v13 }
  0xda   :  { %v434_v14 = vadd.f32 %v886_v3, %v350_v12  ;;  %v457_v23 = vmax.f32 %v441_v19, 0.0 }
  0xdc   :  { %v450_v16 = vmax.f32 %v434_v14, 0.0  ;;  %v320_v17 = vpop.f32.mrf.mxu2 }
  0xdd   :  { %v369_v18 = vpop.f32.mrf.mxu3 }
  0xde   :  { %v673_v20 = vpack.c.bf16 %v450_v16, %v449_v15  ;;  %v370_v21 = vadd.f32 %v369_v18, %v320_v17 }
  0xe0   :  { %697 = vst [vmem:[%s931_s3 + $0x18] sm:$0xff] %v673_v20   ;;  %v442_v22 = vadd.f32 %v886_v3, %v370_v21 }
  0xe2   :  { %v458_v24 = vmax.f32 %v442_v22, 0.0 }
  0xe4   :  { %v693_v25 = vpack.c.bf16 %v458_v24, %v457_v23 }
  0xe6   :  { %701 = vst [vmem:[%s931_s3 + $0x38] sm:$0xff] %v693_v25  }

// kernel: clsnet_forward.22
= control target key start
LH: loop header
LB: loop body
LE: loop exit
PB: predicated region body
PF: predicated region fallthrough
CT: control target
= control target key end

     0   :  { %s752_s12 = smov 0   ;;  %s754_s13 = smov 0   ;;  %s845_s0 = inlined_call_operand.vmem [shape: bf16[32,640], index: 0, kind: input, shape index: {}]   ;;  %s846_s1 = inlined_call_operand.vmem [shape: bf16[640,128], index: 1, kind: input, shape index: {}]   ;;  %s847_s2 = inlined_call_operand.vmem [shape: f32[1,128], index: 2, kind: input, shape index: {}]   ;;  %s848_s3 = inlined_call_operand.vmem [shape: bf16[32,128], index: 3, kind: output, shape index: {}]  }
   0x1   :  { %s756_s14 = smov 0   ;;  %s758_s15 = smov 0  }
   0x2   :  { %s760_s16 = smov 0  }
   0x3 LB: > { %s25_s17 = sadd.s32 1, %s725_s15  ;;  %p48_p1 = scmp.ne.s32.totalorder %s717_s13, %s713_s12  ;;  %s729_s16 = sphi %s760_s16, %s13_s16   ;;  %s725_s15 = sphi %s758_s15, %s852_s15   ;;  %s721_s14 = sphi %s756_s14, %s851_s14   ;;  %s717_s13 = sphi %s754_s13, %s850_s13   ;;  %s713_s12 = sphi %s752_s12, %s849_s12  }
   0x4   : > { %p26_p0 = scmp.ge.s32.totalorder %s25_s17, 5  ;;  %p49_p2 = scmp.eq.s32.totalorder %s729_s16, 0 }
   0x5   : > { %s41_s19 = sadd.s32 1, %s717_s13  ;;  %p567_p5 = scmp.ge.s32.totalorder %s729_s16, 5 }
   0x6   : > { %s854_s17 = smov (%p26_p0, %s25_s17), 0  ;;  %p50_p3 = por %p49_p2, %p48_p1 }
   0x7   : > { %s37_s18 = ssub.s32 %s725_s15, %s854_s17  ;;  %162 = sbr.rel (%p567_p5) target bundleno = 20 (0x14), region = 20 }
   0x8   : > { %p39_p4 = scmp.eq.s32.totalorder %s37_s18, 0 }
   0xa   : > { %s787_s20 = scalar_select %p39_p4, %s717_s13, %s41_s19  }
   0xc   : > { %165 = sbr.rel (!%p50_p3) target bundleno = 20 (0x14), region = 24  ;;  %s167_s21 = sand.u32 (%p50_p3), 1, %s717_s13  }
   0xd   : > { %s569_s22 = sshll.u32 (%p50_p3), %s725_s15, 2  ;;  %s568_s23 = sshll.u32 (%p50_p3), %s167_s21, 4 }
   0xe   : > { %s174_s26 = scalar_lea.vmem (%p50_p3), %s845_s0, %s569_s22  ;;  %s169_s27 = scalar_lea.vmem (%p50_p3), [#allocation3], %s568_s23 }
   0xf   : > { %v191_v0 = vld [vmem:[%s174_s26] sm:$0xf] (%p50_p3)  ;;  %v193_v1 = vld [vmem:[%s174_s26 + $0x14] sm:$0xf] (%p50_p3)  ;;  %v195_v2 = vld [vmem:[%s174_s26 + $0x28] sm:$0xf] (%p50_p3) }
  0x10   : > { %192 = vst [vmem:[%s169_s27] sm:$0xf] (%p50_p3), %v191_v0  ;;  %v197_v3 = vld [vmem:[%s174_s26 + $0x3c] sm:$0xf] (%p50_p3) }
  0x11   : > { %194 = vst [vmem:[%s169_s27 + $0x4] sm:$0xf] %v193_v1 }
  0x12   : > { %196 = vst [vmem:[%s169_s27 + $0x8] sm:$0xf] %v195_v2 }
  0x13   : > { %198 = vst [vmem:[%s169_s27 + $0xc] sm:$0xf] %v197_v3 }
  0x14 PF: > { %p570_p6 = scmp.ge.s32.totalorder %s729_s16, 1  ;;  %p241_p7 = scmp.lt.s32.totalorder %s729_s16, 6 }
  0x16   : > { %p242_p8 = pnand %p570_p6, %p241_p7 }
  0x17   : > { %s248_s28 = sand.u32 (!%p242_p8), 1, %s713_s12   ;;  %s572_s29 = sshll.u32 (!%p242_p8), %s721_s14, 4 }
  0x18   : > { %245 = sbr.rel (%p242_p8) target bundleno = 223 (0xdf), region = 69  ;;  %s799_s30 = sshll.u32 (!%p242_p8), %s248_s28, 4 }
  0x19   : > { %p287_p9 = scmp.lt.s32.totalorder (!%p242_p8), %s572_s29, 79  ;;  %s250_s8 = scalar_lea.vmem (!%p242_p8), [#allocation3], %s799_s30 }
  0x1a   : > { %p574_p10 = scmp.ne.s32.totalorder (!%p242_p8), %s721_s14, 0 }
  0x1d   : > { %s856_s29 = smov (!%p287_p9, %s572_s29), 79  ;;  %310 = sbr.rel (%p574_p10) target bundleno = 39 (0x27), region = 77 }
  0x1e   : > { %s573_s4 = sshll.u32 %s856_s29, 2 }
  0x1f   : > { %s804_s7 = scalar_lea.vmem %s846_s1, %s573_s4 }
  0x22   : > { %v731_v4 = vmov 0.0  }
  0x23   : > { %311 = vst [vmem:[#allocation2 + $0x10] sm:$0xff] %v731_v4 }
  0x24   : > { %312 = vst [vmem:[#allocation2] sm:$0xff] %v731_v4 }
  0x25   : > { %313 = vst [vmem:[#allocation2 + $0x18] sm:$0xff] %v731_v4 }
  0x26   : > { %314 = vst [vmem:[#allocation2 + $0x8] sm:$0xff] %v731_v4 }
  0x27 PF: > { %v629_v5 = vld [vmem:[%s804_s7 + $0x38] sm:$0xff]  ;;  %v628_v6 = vld [vmem:[%s804_s7 + $0x30] sm:$0xff]  ;;  %v627_v7 = vld [vmem:[%s804_s7 + $0x28] sm:$0xff]  ;;  %p615_p11 = scmp.ne.s32.totalorder %s721_s14, 4 }
  0x28   : > { %399 = vmatpush.bf16.msra.mxu0 %v629_v5  ;;  %641 = vmatpush.bf16.msra.mxu1 %v629_v5  ;;  %v626_v8 = vld [vmem:[%s804_s7 + $0x20] sm:$0xff]  ;;  %v625_v9 = vld [vmem:[%s804_s7 + $0x18] sm:$0xff]  ;;  %v624_v10 = vld [vmem:[%s804_s7 + $0x10] sm:$0xff] }
  0x29   : > { %v623_v11 = vld [vmem:[%s804_s7 + $0x8] sm:$0xff]  ;;  %v622_v12 = vld [vmem:[%s804_s7] sm:$0xff] }
  0x2a   : > { %v620_v13 = vld [vmem:[%s250_s8] sm:$0xff]  ;;  %v621_v14 = vld [vmem:[%s250_s8 + $0x8] sm:$0xff] }
  0x2b   : > { %v315_v15 = vld [vmem:[#allocation2 + $0x10] sm:$0xff]  ;;  %v316_v21 = vld [vmem:[#allocation2] sm:$0xff] }
  0x2c   : > { %400 = vmatpush.bf16.msra.mxu0 %v628_v6  ;;  %642 = vmatpush.bf16.msra.mxu1 %v628_v6  ;;  %v317_v16 = vld [vmem:[#allocation2 + $0x18] sm:$0xff] }
  0x2d   : > { %v318_v22 = vld [vmem:[#allocation2 + $0x8] sm:$0xff] }
  0x30   : > { %401 = vmatpush.bf16.msra.mxu0 %v627_v7  ;;  %643 = vmatpush.bf16.msra.mxu1 %v627_v7 }
  0x34   : > { %402 = vmatpush.bf16.msra.mxu0 %v626_v8  ;;  %644 = vmatpush.bf16.msra.mxu1 %v626_v8 }
  0x38   : > { %403 = vmatpush.bf16.msra.mxu0 %v625_v9  ;;  %645 = vmatpush.bf16.msra.mxu1 %v625_v9 }
  0x3c   : > { %404 = vmatpush.bf16.msra.mxu0 %v624_v10  ;;  %646 = vmatpush.bf16.msra.mxu1 %v624_v10 }
  0x40   : > { %405 = vmatpush.bf16.msra.mxu0 %v623_v11  ;;  %647 = vmatpush.bf16.msra.mxu1 %v623_v11 }
  0x44   : > { %406 = vmatpush.bf16.msra.mxu0 %v622_v12  ;;  %648 = vmatpush.bf16.msra.mxu1 %v622_v12 }
  0x47   : > { %407 = vmatmul.bf16.vlgmr.msra.gmra.mxu0 %v620_v13  ;;  %412 = vmatmul.bf16.vlgmr.msra.gmra.mxu1 %v621_v14 }
  0xc4   : > { %v408_v17 = vpop.f32.mrf.mxu0  ;;  %v413_v18 = vpop.f32.mrf.mxu1 }
  0xc5   : > { %v418_v19 = vadd.f32 %v408_v17, %v315_v15  ;;  %v420_v20 = vadd.f32 %v413_v18, %v317_v16 }
  0xc7   : > { %422 = vst [vmem:[#allocation2 + $0x10] sm:$0xff] %v418_v19 }
  0xc8   : > { %424 = vst [vmem:[#allocation2 + $0x18] sm:$0xff] %v420_v20 }
  0xcc   : > { %v410_v23 = vpop.f32.mrf.mxu0  ;;  %v415_v24 = vpop.f32.mrf.mxu1  ;;  %429 = sbr.rel (%p615_p11) target bundleno = 223 (0xdf), region = 81 }
  0xcd   : > { %v419_v25 = vadd.f32 %v410_v23, %v316_v21  ;;  %v421_v26 = vadd.f32 %v415_v24, %v318_v22 }
  0xcf   : > { %423 = vst [vmem:[#allocation2] sm:$0xff] %v419_v25 }
  0xd0   : > { %425 = vst [vmem:[#allocation2 + $0x8] sm:$0xff] %v421_v26 }
  0xd1   : > { %v430_v27 = vld [vmem:[#allocation2 + $0x10] sm:$0xff]  ;;  %v690_v29 = vld [vmem:[%s847_s2] ss:$0 sm:$0xff]  ;;  %v432_v30 = vld [vmem:[#allocation2 + $0x18] sm:$0xff] }
  0xd2   : > { %v438_v32 = vadd.f32 %v690_v29, %v430_v27  ;;  %v440_v34 = vadd.f32 %v690_v29, %v432_v30 }
  0xd4   : > { %v442_v36 = vmax.f32 %v438_v32, 0.0  ;;  %v444_v38 = vmax.f32 %v440_v34, 0.0 }
  0xd6   : > { %v431_v28 = vld [vmem:[#allocation2] sm:$0xff] }
  0xd7   : > { %v433_v31 = vld [vmem:[#allocation2 + $0x8] sm:$0xff]  ;;  %v439_v33 = vadd.f32 %v690_v29, %v431_v28 }
  0xd8   : > { %v441_v35 = vadd.f32 %v690_v29, %v433_v31 }
  0xd9   : > { %v443_v37 = vmax.f32 %v439_v33, 0.0 }
  0xda   : > { %v445_v39 = vmax.f32 %v441_v35, 0.0 }
  0xdb   : > { %v633_v40 = vpack.c.bf16 %v443_v37, %v442_v36 }
  0xdc   : > { %v638_v41 = vpack.c.bf16 %v445_v39, %v444_v38 }
  0xdd   : > { %634 = vst [vmem:[%s848_s3] sm:$0xff] %v633_v40  }
  0xde   : > { %640 = vst [vmem:[%s848_s3 + $0x8] sm:$0xff] %v638_v41  }
  0xdf PF: > { %s13_s16 = sadd.s32 1, %s729_s16   ;;  %s849_s12 = smov %s717_s13 }
  0xe0   : > { %p10_p12 = scmp.ge.s32.totalorder %s13_s16, 7   ;;  %s850_s13 = smov %s787_s20 }
  0xe1   : > { %s851_s14 = smov %s725_s15  ;;  %s852_s15 = smov %s854_s17 }
  0xe2   :  { %12 = sbr.rel (!%p10_p12) target bundleno = 3 (0x3), region = 122 }

// kernel: clsnet_forward.23
= control target key start
LH: loop header
LB: loop body
LE: loop exit
PB: predicated region body
PF: predicated region fallthrough
CT: control target
= control target key end

     0   :  { %s857_s15 = smov 0   ;;  %s859_s16 = smov 0   ;;  %s956_s0 = inlined_call_operand.vmem [shape: bf16[32,640], index: 0, kind: input, shape index: {}]   ;;  %s957_s1 = inlined_call_operand.vmem [shape: bf16[640,128], index: 1, kind: input, shape index: {}]   ;;  %s958_s2 = inlined_call_operand.vmem [shape: f32[1,128], index: 2, kind: input, shape index: {}]   ;;  %s959_s3 = inlined_call_operand.vmem [shape: bf16[32,128], index: 3, kind: input, shape index: {}]   ;;  %s960_s4 = inlined_call_operand.vmem [shape: bf16[32,128], index: 4, kind: output, shape index: {}]  }
   0x1   :  { %s861_s17 = smov 0   ;;  %s863_s18 = smov 0  }
   0x2   :  { %s865_s19 = smov 0  }
   0x3 LB: > { %s26_s20 = sadd.s32 1, %s825_s18  ;;  %p49_p1 = scmp.ne.s32.totalorder %s817_s16, %s813_s15  ;;  %s829_s19 = sphi %s865_s19, %s14_s19   ;;  %s825_s18 = sphi %s863_s18, %s964_s18   ;;  %s821_s17 = sphi %s861_s17, %s963_s17   ;;  %s817_s16 = sphi %s859_s16, %s962_s16   ;;  %s813_s15 = sphi %s857_s15, %s961_s15  }
   0x4   : > { %p27_p0 = scmp.ge.s32.totalorder %s26_s20, 5  ;;  %p50_p2 = scmp.eq.s32.totalorder %s829_s19, 0 }
   0x5   : > { %s42_s22 = sadd.s32 1, %s817_s16  ;;  %p658_p5 = scmp.ge.s32.totalorder %s829_s19, 5 }
   0x6   : > { %s966_s20 = smov (%p27_p0, %s26_s20), 0  ;;  %p51_p3 = por %p50_p2, %p49_p1 }
   0x7   : > { %s38_s21 = ssub.s32 %s825_s18, %s966_s20  ;;  %203 = sbr.rel (%p658_p5) target bundleno = 20 (0x14), region = 24 }
   0x8   : > { %p40_p4 = scmp.eq.s32.totalorder %s38_s21, 0 }
   0xa   : > { %s892_s23 = scalar_select %p40_p4, %s817_s16, %s42_s22  }
   0xc   : > { %206 = sbr.rel (!%p51_p3) target bundleno = 20 (0x14), region = 28  ;;  %s208_s24 = sand.u32 (%p51_p3), 1, %s817_s16  }
   0xd   : > { %s660_s25 = sshll.u32 (%p51_p3), %s825_s18, 2  ;;  %s659_s26 = sshll.u32 (%p51_p3), %s208_s24, 4 }
   0xe   : > { %s215_s29 = scalar_lea.vmem (%p51_p3), %s956_s0, %s660_s25  ;;  %s210_s30 = scalar_lea.vmem (%p51_p3), [#allocation3], %s659_s26 }
   0xf   : > { %v232_v0 = vld [vmem:[%s215_s29] sm:$0xf] (%p51_p3)  ;;  %v234_v1 = vld [vmem:[%s215_s29 + $0x14] sm:$0xf] (%p51_p3)  ;;  %v236_v2 = vld [vmem:[%s215_s29 + $0x28] sm:$0xf] (%p51_p3) }
  0x10   : > { %233 = vst [vmem:[%s210_s30] sm:$0xf] (%p51_p3), %v232_v0  ;;  %v238_v3 = vld [vmem:[%s215_s29 + $0x3c] sm:$0xf] (%p51_p3) }
  0x11   : > { %235 = vst [vmem:[%s210_s30 + $0x4] sm:$0xf] %v234_v1 }
  0x12   : > { %237 = vst [vmem:[%s210_s30 + $0x8] sm:$0xf] %v236_v2 }
  0x13   : > { %239 = vst [vmem:[%s210_s30 + $0xc] sm:$0xf] %v238_v3 }
  0x14 PF: > { %p661_p6 = scmp.ge.s32.totalorder %s829_s19, 1  ;;  %p282_p7 = scmp.lt.s32.totalorder %s829_s19, 6 }
  0x16   : > { %p283_p8 = pnand %p661_p6, %p282_p7 }
  0x17   : > { %s289_s5 = sand.u32 (!%p283_p8), 1, %s813_s15   ;;  %s663_s6 = sshll.u32 (!%p283_p8), %s821_s17, 4 }
  0x18   : > { %286 = sbr.rel (%p283_p8) target bundleno = 225 (0xe1), region = 73  ;;  %s904_s7 = sshll.u32 (!%p283_p8), %s289_s5, 4 }
  0x19   : > { %p338_p9 = scmp.lt.s32.totalorder (!%p283_p8), %s663_s6, 79  ;;  %s291_s12 = scalar_lea.vmem (!%p283_p8), [#allocation3], %s904_s7 }
  0x1a   : > { %p665_p10 = scmp.ne.s32.totalorder (!%p283_p8), %s821_s17, 0 }
  0x1d   : > { %s968_s6 = smov (!%p338_p9, %s663_s6), 79  ;;  %370 = sbr.rel (%p665_p10) target bundleno = 39 (0x27), region = 81 }
  0x1e   : > { %s664_s8 = sshll.u32 %s968_s6, 2 }
  0x1f   : > { %s909_s11 = scalar_lea.vmem %s957_s1, %s664_s8 }
  0x22   : > { %v831_v4 = vmov 0.0  }
  0x23   : > { %371 = vst [vmem:[#allocation2 + $0x10] sm:$0xff] %v831_v4 }
  0x24   : > { %372 = vst [vmem:[#allocation2] sm:$0xff] %v831_v4 }
  0x25   : > { %373 = vst [vmem:[#allocation2 + $0x18] sm:$0xff] %v831_v4 }
  0x26   : > { %374 = vst [vmem:[#allocation2 + $0x8] sm:$0xff] %v831_v4 }
  0x27 PF: > { %v720_v5 = vld [vmem:[%s909_s11 + $0x38] sm:$0xff]  ;;  %v719_v6 = vld [vmem:[%s909_s11 + $0x30] sm:$0xff]  ;;  %v718_v7 = vld [vmem:[%s909_s11 + $0x28] sm:$0xff]  ;;  %p706_p11 = scmp.ne.s32.totalorder %s821_s17, 4 }
  0x28   : > { %459 = vmatpush.bf16.msra.mxu0 %v720_v5  ;;  %741 = vmatpush.bf16.msra.mxu1 %v720_v5  ;;  %v717_v8 = vld [vmem:[%s909_s11 + $0x20] sm:$0xff]  ;;  %v716_v9 = vld [vmem:[%s909_s11 + $0x18] sm:$0xff]  ;;  %v715_v10 = vld [vmem:[%s909_s11 + $0x10] sm:$0xff] }
  0x29   : > { %v714_v11 = vld [vmem:[%s909_s11 + $0x8] sm:$0xff]  ;;  %v713_v12 = vld [vmem:[%s909_s11] sm:$0xff] }
  0x2a   : > { %v711_v13 = vld [vmem:[%s291_s12] sm:$0xff]  ;;  %v712_v14 = vld [vmem:[%s291_s12 + $0x8] sm:$0xff] }
  0x2b   : > { %v375_v15 = vld [vmem:[#allocation2 + $0x10] sm:$0xff]  ;;  %v376_v21 = vld [vmem:[#allocation2] sm:$0xff] }
  0x2c   : > { %460 = vmatpush.bf16.msra.mxu0 %v719_v6  ;;  %742 = vmatpush.bf16.msra.mxu1 %v719_v6  ;;  %v377_v16 = vld [vmem:[#allocation2 + $0x18] sm:$0xff] }
  0x2d   : > { %v378_v22 = vld [vmem:[#allocation2 + $0x8] sm:$0xff] }
  0x30   : > { %461 = vmatpush.bf16.msra.mxu0 %v718_v7  ;;  %743 = vmatpush.bf16.msra.mxu1 %v718_v7 }
  0x34   : > { %462 = vmatpush.bf16.msra.mxu0 %v717_v8  ;;  %744 = vmatpush.bf16.msra.mxu1 %v717_v8 }
  0x38   : > { %463 = vmatpush.bf16.msra.mxu0 %v716_v9  ;;  %745 = vmatpush.bf16.msra.mxu1 %v716_v9 }
  0x3c   : > { %464 = vmatpush.bf16.msra.mxu0 %v715_v10  ;;  %746 = vmatpush.bf16.msra.mxu1 %v715_v10 }
  0x40   : > { %465 = vmatpush.bf16.msra.mxu0 %v714_v11  ;;  %747 = vmatpush.bf16.msra.mxu1 %v714_v11 }
  0x44   : > { %466 = vmatpush.bf16.msra.mxu0 %v713_v12  ;;  %748 = vmatpush.bf16.msra.mxu1 %v713_v12 }
  0x47   : > { %467 = vmatmul.bf16.vlgmr.msra.gmra.mxu0 %v711_v13  ;;  %472 = vmatmul.bf16.vlgmr.msra.gmra.mxu1 %v712_v14 }
  0xc4   : > { %v468_v17 = vpop.f32.mrf.mxu0  ;;  %v473_v18 = vpop.f32.mrf.mxu1 }
  0xc5   : > { %v478_v19 = vadd.f32 %v468_v17, %v375_v15  ;;  %v480_v20 = vadd.f32 %v473_v18, %v377_v16 }
  0xc7   : > { %482 = vst [vmem:[#allocation2 + $0x10] sm:$0xff] %v478_v19 }
  0xc8   : > { %484 = vst [vmem:[#allocation2 + $0x18] sm:$0xff] %v480_v20 }
  0xcc   : > { %v470_v23 = vpop.f32.mrf.mxu0  ;;  %v475_v24 = vpop.f32.mrf.mxu1  ;;  %489 = sbr.rel (%p706_p11) target bundleno = 225 (0xe1), region = 85 }
  0xcd   : > { %v479_v25 = vadd.f32 %v470_v23, %v376_v21  ;;  %v481_v26 = vadd.f32 %v475_v24, %v378_v22 }
  0xcf   : > { %483 = vst [vmem:[#allocation2] sm:$0xff] %v479_v25 }
  0xd0   : > { %485 = vst [vmem:[#allocation2 + $0x8] sm:$0xff] %v481_v26 }
  0xd1   : > { %v490_v27 = vld [vmem:[#allocation2 + $0x10] sm:$0xff]  ;;  %v790_v29 = vld [vmem:[%s958_s2] ss:$0 sm:$0xff]  ;;  %v492_v31 = vld [vmem:[#allocation2 + $0x18] sm:$0xff] }
  0xd2   : > { %v722_v30 = vld [vmem:[%s959_s3] sm:$0xff]   ;;  %v739_v35 = vld [vmem:[%s959_s3 + $0x8] sm:$0xff]   ;;  %v498_v36 = vadd.f32 %v790_v29, %v490_v27  ;;  %v500_v38 = vadd.f32 %v790_v29, %v492_v31 }
  0xd3   : > { %v723_v32 = vunpack.c.l.bf16 %v722_v30  ;;  %v724_v33 = vunpack.c.h.bf16 %v722_v30  ;;  %v727_v40 = vunpack.c.l.bf16 %v739_v35  ;;  %v728_v41 = vunpack.c.h.bf16 %v739_v35 }
  0xd5   : > { %v510_v42 = vadd.f32 %v723_v32, %v498_v36  ;;  %v512_v44 = vadd.f32 %v727_v40, %v500_v38 }
  0xd6   : > { %v491_v28 = vld [vmem:[#allocation2] sm:$0xff] }
  0xd7   : > { %v493_v34 = vld [vmem:[#allocation2 + $0x8] sm:$0xff]  ;;  %v499_v37 = vadd.f32 %v790_v29, %v491_v28  ;;  %v514_v46 = vmax.f32 %v510_v42, 0.0  ;;  %v516_v48 = vmax.f32 %v512_v44, 0.0 }
  0xd8   : > { %v501_v39 = vadd.f32 %v790_v29, %v493_v34 }
  0xd9   : > { %v511_v43 = vadd.f32 %v724_v33, %v499_v37 }
  0xda   : > { %v513_v45 = vadd.f32 %v728_v41, %v501_v39 }
  0xdb   : > { %v515_v47 = vmax.f32 %v511_v43, 0.0 }
  0xdc   : > { %v517_v49 = vmax.f32 %v513_v45, 0.0 }
  0xdd   : > { %v732_v50 = vpack.c.bf16 %v515_v47, %v514_v46 }
  0xde   : > { %v737_v51 = vpack.c.bf16 %v517_v49, %v516_v48 }
  0xdf   : > { %733 = vst [vmem:[%s960_s4] sm:$0xff] %v732_v50  }
  0xe0   : > { %740 = vst [vmem:[%s960_s4 + $0x8] sm:$0xff] %v737_v51  }
  0xe1 PF: > { %s14_s19 = sadd.s32 1, %s829_s19   ;;  %s961_s15 = smov %s817_s16 }
  0xe2   : > { %p11_p12 = scmp.ge.s32.totalorder %s14_s19, 7   ;;  %s962_s16 = smov %s892_s23 }
  0xe3   : > { %s963_s17 = smov %s825_s18  ;;  %s964_s18 = smov %s966_s20 }
  0xe4   :  { %13 = sbr.rel (!%p11_p12) target bundleno = 3 (0x3), region = 129 }

// kernel: clsnet_forward.26
= control target key start
LH: loop header
LB: loop body
LE: loop exit
PB: predicated region body
PF: predicated region fallthrough
CT: control target
= control target key end

     0   :  { %s582_s12 = smov 0   ;;  %s584_s13 = smov 0   ;;  %s628_s0 = inlined_call_operand.vmem [shape: bf16[8,640], index: 0, kind: input, shape index: {}]   ;;  %s629_s1 = inlined_call_operand.vmem [shape: bf16[640,128], index: 1, kind: input, shape index: {}]   ;;  %s630_s2 = inlined_call_operand.vmem [shape: f32[1,128], index: 2, kind: input, shape index: {}]   ;;  %s631_s3 = inlined_call_operand.vmem [shape: bf16[8,128], index: 3, kind: output, shape index: {}]  }
   0x1   :  { %s586_s14 = smov 0  }
   0x2 LB: > { %s25_s15 = sadd.s32 1, %s555_s13  ;;  %p462_p0 = scmp.ge.s32.totalorder %s559_s14, 1  ;;  %s559_s14 = sphi %s586_s14, %s13_s14   ;;  %s555_s13 = sphi %s584_s13, %s633_s13   ;;  %s551_s12 = sphi %s582_s12, %s632_s12  }
   0x3   : > { %p26_p1 = scmp.ge.s32.totalorder %s25_s15, 5  ;;  %p187_p2 = scmp.lt.s32.totalorder %s559_s14, 6 }
   0x5   : > { %s635_s15 = smov (%p26_p1, %s25_s15), 0  ;;  %p188_p3 = pnand %p462_p0, %p187_p2 }
   0x6   : > { %p229_p4 = scmp.lt.s32.totalorder (!%p188_p3), %s551_s12, 4  ;;  %s464_s16 = sshll.u32 (!%p188_p3), %s551_s12, 4 }
   0x7   : > { %191 = sbr.rel (%p188_p3) target bundleno = 195 (0xc3), region = 32  ;;  %p236_p5 = scmp.lt.s32.totalorder (!%p188_p3), %s464_s16, 79 }
   0x8   : > { %p466_p6 = scmp.ne.s32.totalorder (!%p188_p3), %s551_s12, 0 }
   0xc   : > { %s230_s17 = scalar_select %p229_p4, %s551_s12, 4 }
   0xd   : > { %s637_s16 = smov (!%p236_p5, %s464_s16), 79  ;;  %257 = sbr.rel (%p466_p6) target bundleno = 20 (0x14), region = 36 }
   0xe   : > { %s463_s18 = sshll.u32 %s230_s17, 2  ;;  %s465_s22 = sshll.u32 %s637_s16, 2 }
   0xf   : > { %s234_s21 = scalar_lea.vmem %s628_s0, %s463_s18  ;;  %s242_s25 = scalar_lea.vmem %s629_s1, %s465_s22 }
  0x12   : > { %v561_v0 = vmov 0.0  }
  0x13   : > { %258 = vst [vmem:[#allocation2] sm:$0xff] %v561_v0 }
  0x14 PF: > { %v510_v1 = vld [vmem:[%s242_s25 + $0x38] sm:$0xff]  ;;  %v509_v2 = vld [vmem:[%s242_s25 + $0x30] sm:$0xff]  ;;  %v508_v3 = vld [vmem:[%s242_s25 + $0x28] sm:$0xff]  ;;  %p499_p7 = scmp.ne.s32.totalorder %s551_s12, 4 }
  0x15   : > { %325 = vmatpush.bf16.msra.mxu0 %v510_v1  ;;  %v507_v4 = vld [vmem:[%s242_s25 + $0x20] sm:$0xff]  ;;  %v506_v5 = vld [vmem:[%s242_s25 + $0x18] sm:$0xff]  ;;  %v505_v6 = vld [vmem:[%s242_s25 + $0x10] sm:$0xff] }
  0x16   : > { %v504_v7 = vld [vmem:[%s242_s25 + $0x8] sm:$0xff]  ;;  %v503_v8 = vld [vmem:[%s242_s25] sm:$0xff] }
  0x17   : > { %v260_v9 = vld [vmem:[%s234_s21] sm:$0xf] }
  0x19   : > { %326 = vmatpush.bf16.msra.mxu0 %v509_v2 }
  0x1a   : > { %v259_v10 = vld [vmem:[#allocation2] sm:$0xff] }
  0x1d   : > { %327 = vmatpush.bf16.msra.mxu0 %v508_v3 }
  0x21   : > { %328 = vmatpush.bf16.msra.mxu0 %v507_v4 }
  0x25   : > { %329 = vmatpush.bf16.msra.mxu0 %v506_v5 }
  0x29   : > { %330 = vmatpush.bf16.msra.mxu0 %v505_v6 }
  0x2d   : > { %331 = vmatpush.bf16.msra.mxu0 %v504_v7 }
  0x31   : > { %332 = vmatpush.bf16.msra.mxu0 %v503_v8 }
  0x34   : > { %333 = vmatmul.bf16.vlgmr.msra.gmra.mxu0 %v260_v9 }
  0xb1   : > { %v334_v11 = vpop.f32.mrf.mxu0 }
  0xb2   : > { %v338_v12 = vadd.f32 %v334_v11, %v259_v10 }
  0xb4   : > { %339 = vst [vmem:[#allocation2] sm:$0xff] %v338_v12 }
  0xb5   : > { %343 = sbr.rel (%p499_p7) target bundleno = 195 (0xc3), region = 40 }
  0xb9   : > { %v336_v13 = vpop.f32.mrf.mxu0 }
  0xba   : > { %v536_v15 = vld [vmem:[%s630_s2] ss:$0 sm:$0xff] }
  0xbb   : > { %v344_v14 = vld [vmem:[#allocation2] sm:$0xff] }
  0xbc   : > { %v349_v16 = vadd.f32 %v536_v15, %v344_v14 }
  0xbe   : > { %v350_v17 = vmax.f32 %v349_v16, 0.0 }
  0xc0   : > { %v351_v18 = vpack.c.bf16 %v350_v17, %v350_v17 }
  0xc2   : > { %352 = vst [vmem:[%s631_s3] sm:$0xf] %v351_v18 }
  0xc3 PF: > { %s13_s14 = sadd.s32 1, %s559_s14   ;;  %s632_s12 = smov %s555_s13 }
  0xc4   : > { %p10_p8 = scmp.ge.s32.totalorder %s13_s14, 7   ;;  %s633_s13 = smov %s635_s15 }
  0xc6   :  { %12 = sbr.rel (!%p10_p8) target bundleno = 2 (0x2), region = 76 }

// kernel: clsnet_forward.27
= control target key start
LH: loop header
LB: loop body
LE: loop exit
PB: predicated region body
PF: predicated region fallthrough
CT: control target
= control target key end

     0   :  { %s209_s1 = inlined_call_operand.vmem [shape: bf16[128,128], index: 1, kind: input, shape index: {}]   ;;  %s210_s2 = inlined_call_operand.vmem [shape: f32[1,128], index: 2, kind: input, shape index: {}]   ;;  %s211_s0 = inlined_call_operand.vmem [shape: bf16[8,128], index: 0, kind: input, shape index: {}]   ;;  %s212_s3 = inlined_call_operand.vmem [shape: bf16[8,128], index: 3, kind: output, shape index: {}]  }
   0x1   :  { %v154_v0 = vld [vmem:[%s209_s1 + $0x38] sm:$0xff]  ;;  %v153_v1 = vld [vmem:[%s209_s1 + $0x30] sm:$0xff]  ;;  %v152_v2 = vld [vmem:[%s209_s1 + $0x28] sm:$0xff] }
   0x2   :  { %85 = vmatpush.bf16.msra.mxu0 %v154_v0  ;;  %v151_v3 = vld [vmem:[%s209_s1 + $0x20] sm:$0xff]  ;;  %v150_v4 = vld [vmem:[%s209_s1 + $0x18] sm:$0xff]  ;;  %v149_v5 = vld [vmem:[%s209_s1 + $0x10] sm:$0xff] }
   0x3   :  { %v148_v6 = vld [vmem:[%s209_s1 + $0x8] sm:$0xff]  ;;  %v147_v7 = vld [vmem:[%s209_s1] sm:$0xff] }
   0x4   :  { %v20_v8 = vld [vmem:[%s211_s0] sm:$0xf] }
   0x5   :  { %v155_v9 = vld [vmem:[%s210_s2] ss:$0 sm:$0xff] }
   0x6   :  { %86 = vmatpush.bf16.msra.mxu0 %v153_v1 }
   0xa   :  { %87 = vmatpush.bf16.msra.mxu0 %v152_v2 }
   0xe   :  { %88 = vmatpush.bf16.msra.mxu0 %v151_v3 }
  0x12   :  { %89 = vmatpush.bf16.msra.mxu0 %v150_v4 }
  0x16   :  { %90 = vmatpush.bf16.msra.mxu0 %v149_v5 }
  0x1a   :  { %91 = vmatpush.bf16.msra.mxu0 %v148_v6 }
  0x1e   :  { %92 = vmatpush.bf16.msra.mxu0 %v147_v7 }
  0x21   :  { %93 = vmatmul.bf16.vlgmr.msra.gmra.mxu0 %v20_v8 }
  0x9e   :  { %v94_v10 = vpop.f32.mrf.mxu0 }
  0x9f   :  { %v108_v11 = vadd.f32 %v155_v9, %v94_v10 }
  0xa1   :  { %v109_v12 = vpack.c.bf16 %v108_v11, %v108_v11 }
  0xa3   :  { %110 = vst [vmem:[%s212_s3] sm:$0xf] %v109_v12 }
  0xa6   :  { %v96_v13 = vpop.f32.mrf.mxu0 }

// kernel: clsnet_forward.28
= control target key start
LH: loop header
LB: loop body
LE: loop exit
PB: predicated region body
PF: predicated region fallthrough
CT: control target
= control target key end

     0   :  { %9 = vsyncpa [#allocation4], 0  ;;  %s1155_s0 = inlined_call_operand.vmem [shape: bf16[8,1152], index: 0, kind: input, shape index: {}]   ;;  %s1156_s1 = inlined_call_operand.hbm [shape: bf16[1152,128], index: 1, kind: input, shape index: {}]   ;;  %s1157_s2 = inlined_call_operand.vmem [shape: f32[1,128], index: 2, kind: input, shape index: {}]   ;;  %s1158_s3 = inlined_call_operand.vmem [shape: bf16[8,128], index: 3, kind: input, shape index: {}]   ;;  %s1159_s4 = inlined_call_operand.vmem [shape: bf16[8,128], index: 4, kind: output, shape index: {}]  }
   0x1   :  { %11 = vsyncpa [#allocation4 + $0x1], 0  ;;  %s1033_s15 = smov 0   ;;  %s1035_s16 = smov 0  }
   0x2   :  { %s1037_s17 = smov 0   ;;  %s1039_s18 = smov 0  }
   0x3   :  { %s1041_s19 = smov 0   ;;  %s1043_s20 = smov 0  }
   0x4 LB: > { %s728_s21 = sadd.s32 4294967295, %s1003_s20   ;;  %s29_s22 = sadd.s32 1, %s999_s19  ;;  %s1003_s20 = sphi %s1043_s20, %s17_s20   ;;  %s999_s19 = sphi %s1041_s19, %s1165_s19   ;;  %s995_s18 = sphi %s1039_s18, %s1164_s18   ;;  %s991_s17 = sphi %s1037_s17, %s1163_s17   ;;  %s987_s16 = sphi %s1035_s16, %s1162_s16   ;;  %s983_s15 = sphi %s1033_s15, %s1161_s15  }
   0x5   : > { %p30_p0 = scmp.ge.s32.totalorder %s29_s22, 3  ;;  %s73_s23 = sadd.s32 1, %s991_s17 }
   0x6   : > { %p80_p1 = scmp.ne.s32.totalorder %s991_s17, %s987_s16  ;;  %p81_p2 = scmp.eq.s32.totalorder %s1003_s20, 0 }
   0x7   : > { %s1167_s22 = smov (%p30_p0, %s29_s22), 0  ;;  %p86_p4 = scmp.ne.s32.totalorder %s987_s16, %s983_s15 }
   0x8   : > { %p82_p3 = por %p81_p2, %p80_p1  ;;  %s68_s24 = ssub.s32 %s999_s19, %s1167_s22 }
   0x9   : > { %p87_p5 = scmp.eq.s32.totalorder %s728_s21, 0  ;;  %p71_p6 = scmp.eq.s32.totalorder %s68_s24, 0 }
   0xa   : > { %p870_p8 = scmp.lt.s32.totalorder %s1003_s20, 3  ;;  %s221_s27 = sand.u32 1, %s991_s17  }
   0xb   : > { %p1072_p7 = por %p87_p5, %p86_p4  ;;  %s837_s28 = smul.u32 192, %s999_s19 }
   0xc   : > { %s1078_s26 = scalar_select %p71_p6, %s991_s17, %s73_s23  }
   0xd   : > { %s862_s29 = smul.u32 192, %s221_s27  ;;  %s231_s6 = scalar_lea.hbm %s1156_s1, %s837_s28 }
   0xe   : > { %p867_p9 = pnand %p870_p8, %p82_p3  ;;  %s232_s7 = sshll.u32 %s231_s6, 4  ;;  %s233_s7 = int_to_ptr.hbm [resolvable:$true] %s232_s7 }
   0xf   : > { %s225_s8 = scalar_lea.vmem [#allocation3], %s862_s29  ;;  %s222_s10 = scalar_lea.sflag [#allocation4], %s221_s27 }
  0x10   : > { %s234_s9 = sshll.u32 %s225_s8, 4  ;;  %s1005_s11 = smov 64   ;;  %s235_s9 = int_to_ptr.vmem [resolvable:$true] %s234_s9 }
  0x11   : > { %s1006_s12 = smov 4   ;;  %p734_p10 = scmp.ge.s32.totalorder %s1003_s20, 1 }
  0x12   : > { %869 = dma.hbm_to_vmem [thread:$0]  (!%p867_p9), %s233_s7, 3072, %s235_s9, %s222_s10, %s1005_s11, %s1005_s11, %s1006_s12  }
  0x13   : > { %p242_p11 = scmp.lt.s32.totalorder %s1003_s20, 4 }
  0x15   : > { %p243_p12 = pnand %p734_p10, %p242_p11 }
  0x16   : > { %s248_s13 = sand.u32 (!%p243_p12), 1, %s987_s16  }
  0x17   : > { %246 = sbr.rel (%p243_p12) target bundleno = 225 (0xe1), region = 36  ;;  %s249_s15 = scalar_lea.sflag (!%p243_p12), [#allocation4], %s248_s13 }
  0x18   : > { %s863_s14 = smul.u32 (!%p243_p12), 192, %s248_s13 }
  0x1a   : > { %s1088_s21 = scalar_lea.vmem (!%p243_p12), [#allocation3], %s863_s14 }
  0x1c   : > { %978 = dma.done.wait (%p1072_p7), %s249_s15, 3072  }
  0x1d   : > { %980 = vsyncadd (%p1072_p7), %s249_s15, 4294964224  ;;  %s299_s23 = smul.u32 3, %s995_s18  ;;  %p736_p0 = scmp.ne.s32.totalorder %s995_s18, 0 }
  0x1f   : > { %p302_p13 = scmp.lt.s32.totalorder %s299_s23, 8  ;;  %330 = sbr.rel (%p736_p0) target bundleno = 38 (0x26), region = 44 }
  0x21   : > { %s1169_s23 = smov (!%p302_p13, %s299_s23), 8 }
  0x22   : > { %s735_s24 = sshll.u32 %s1169_s23, 2 }
  0x23   : > { %s1098_s29 = scalar_lea.vmem %s1155_s0, %s735_s24 }
  0x24   : > { %v1007_v0 = vmov 0.0  }
  0x25   : > { %331 = vst [vmem:[#allocation2] sm:$0xff] %v1007_v0 }
  0x26 PF: > { %v845_v1 = vld [vmem:[%s1088_s21 + $0x38] sm:$0xff]  ;;  %v844_v4 = vld [vmem:[%s1088_s21 + $0x30] sm:$0xff]  ;;  %v843_v7 = vld [vmem:[%s1088_s21 + $0x28] sm:$0xff]  ;;  %p833_p1 = scmp.ne.s32.totalorder %s995_s18, 2 }
  0x27   : > { %v853_v2 = vld [vmem:[%s1088_s21 + $0x78] sm:$0xff]  ;;  %538 = vmatpush.bf16.msra.mxu0 %v845_v1  ;;  %v852_v5 = vld [vmem:[%s1088_s21 + $0x70] sm:$0xff]  ;;  %v851_v8 = vld [vmem:[%s1088_s21 + $0x68] sm:$0xff] }
  0x28   : > { %v861_v3 = vld [vmem:[%s1088_s21 + $0xb8] sm:$0xff]  ;;  %551 = vmatpush.bf16.msra.mxu1 %v853_v2  ;;  %v860_v6 = vld [vmem:[%s1088_s21 + $0xb0] sm:$0xff]  ;;  %v859_v9 = vld [vmem:[%s1088_s21 + $0xa8] sm:$0xff] }
  0x29   : > { %564 = vmatpush.bf16.msra.mxu2 %v861_v3  ;;  %v842_v10 = vld [vmem:[%s1088_s21 + $0x20] sm:$0xff]  ;;  %v841_v13 = vld [vmem:[%s1088_s21 + $0x18] sm:$0xff]  ;;  %v840_v16 = vld [vmem:[%s1088_s21 + $0x10] sm:$0xff] }
  0x2a   : > { %v850_v11 = vld [vmem:[%s1088_s21 + $0x60] sm:$0xff]  ;;  %v849_v14 = vld [vmem:[%s1088_s21 + $0x58] sm:$0xff]  ;;  %v848_v17 = vld [vmem:[%s1088_s21 + $0x50] sm:$0xff] }
  0x2b   : > { %539 = vmatpush.bf16.msra.mxu0 %v844_v4  ;;  %v858_v12 = vld [vmem:[%s1088_s21 + $0xa0] sm:$0xff]  ;;  %v857_v15 = vld [vmem:[%s1088_s21 + $0x98] sm:$0xff]  ;;  %v856_v18 = vld [vmem:[%s1088_s21 + $0x90] sm:$0xff] }
  0x2c   : > { %552 = vmatpush.bf16.msra.mxu1 %v852_v5  ;;  %v839_v19 = vld [vmem:[%s1088_s21 + $0x8] sm:$0xff]  ;;  %v333_v21 = vld [vmem:[%s1098_s29] sm:$0xff]  ;;  %v334_v23 = vld [vmem:[%s1098_s29 + $0x8] sm:$0xf] }
  0x2d   : > { %565 = vmatpush.bf16.msra.mxu2 %v860_v6  ;;  %v847_v20 = vld [vmem:[%s1088_s21 + $0x48] sm:$0xff]  ;;  %v385_v24 = vunpack.c.l.b16 %v333_v21  ;;  %v386_v25 = vunpack.c.h.b16 %v333_v21  ;;  %v838_v26 = vld [vmem:[%s1088_s21] sm:$0xff]  ;;  %v387_v28 = vunpack.c.l.b16 %v334_v23  ;;  %v332_v36 = vld [vmem:[#allocation2] sm:$0xff] }
  0x2e   : > { %v855_v22 = vld [vmem:[%s1088_s21 + $0x88] sm:$0xff]  ;;  %v846_v27 = vld [vmem:[%s1088_s21 + $0x40] sm:$0xff] }
  0x2f   : > { %540 = vmatpush.bf16.msra.mxu0 %v843_v7  ;;  %v854_v29 = vld [vmem:[%s1088_s21 + $0x80] sm:$0xff]  ;;  %v388_v30 = vpack.c.b16 %v385_v24, %v385_v24  ;;  %v389_v31 = vpack.c.b16 %v386_v25, %v386_v25  ;;  %v390_v32 = vpack.c.b16 %v387_v28, %v387_v28 }
  0x30   : > { %553 = vmatpush.bf16.msra.mxu1 %v851_v8 }
  0x31   : > { %566 = vmatpush.bf16.msra.mxu2 %v859_v9 }
  0x33   : > { %541 = vmatpush.bf16.msra.mxu0 %v842_v10 }
  0x34   : > { %554 = vmatpush.bf16.msra.mxu1 %v850_v11 }
  0x35   : > { %567 = vmatpush.bf16.msra.mxu2 %v858_v12 }
  0x37   : > { %542 = vmatpush.bf16.msra.mxu0 %v841_v13 }
  0x38   : > { %555 = vmatpush.bf16.msra.mxu1 %v849_v14 }
  0x39   : > { %568 = vmatpush.bf16.msra.mxu2 %v857_v15 }
  0x3b   : > { %543 = vmatpush.bf16.msra.mxu0 %v840_v16 }
  0x3c   : > { %556 = vmatpush.bf16.msra.mxu1 %v848_v17 }
  0x3d   : > { %569 = vmatpush.bf16.msra.mxu2 %v856_v18 }
  0x3f   : > { %544 = vmatpush.bf16.msra.mxu0 %v839_v19 }
  0x40   : > { %557 = vmatpush.bf16.msra.mxu1 %v847_v20 }
  0x41   : > { %570 = vmatpush.bf16.msra.mxu2 %v855_v22 }
  0x43   : > { %545 = vmatpush.bf16.msra.mxu0 %v838_v26 }
  0x44   : > { %558 = vmatpush.bf16.msra.mxu1 %v846_v27 }
  0x45   : > { %571 = vmatpush.bf16.msra.mxu2 %v854_v29 }
  0x46   : > { %546 = vmatmul.bf16.vlgmr.msra.gmra.mxu0 %v388_v30 }
  0x47   : > { %559 = vmatmul.bf16.vlgmr.msra.gmra.mxu1 %v389_v31 }
  0x48   : > { %572 = vmatmul.bf16.vlgmr.msra.gmra.mxu2 %v390_v32 }
  0xc3   : > { %v547_v33 = vpop.f32.mrf.mxu0 }
  0xc4   : > { %v560_v34 = vpop.f32.mrf.mxu1 }
  0xc5   : > { %v561_v35 = vadd.f32 %v560_v34, %v547_v33 }
  0xcb   : > { %v573_v37 = vpop.f32.mrf.mxu2  ;;  %v549_v39 = vpop.f32.mrf.mxu0 }
  0xcc   : > { %v574_v38 = vadd.f32 %v573_v37, %v561_v35  ;;  %v562_v40 = vpop.f32.mrf.mxu1 }
  0xce   : > { %v577_v41 = vadd.f32 %v574_v38, %v332_v36 }
  0xcf   : > { %582 = sbr.rel (%p833_p1) target bundleno = 225 (0xe1), region = 48 }
  0xd0   : > { %578 = vst [vmem:[#allocation2] sm:$0xff] %v577_v41 }
  0xd3   : > { %v575_v42 = vpop.f32.mrf.mxu2 }
  0xd4   : > { %v922_v44 = vld [vmem:[%s1157_s2] ss:$0 sm:$0xff] }
  0xd5   : > { %v589_v45 = vld [vmem:[%s1158_s3] sm:$0xf] }
  0xd6   : > { %v590_v47 = vunpack.c.l.bf16 %v589_v45 }
  0xd7   : > { %v583_v43 = vld [vmem:[#allocation2] sm:$0xff] }
  0xd8   : > { %v588_v46 = vadd.f32 %v922_v44, %v583_v43 }
  0xda   : > { %v591_v48 = vadd.f32 %v590_v47, %v588_v46 }
  0xdc   : > { %v592_v49 = vmax.f32 %v591_v48, 0.0 }
  0xde   : > { %v593_v50 = vpack.c.bf16 %v592_v49, %v592_v49 }
  0xe0   : > { %594 = vst [vmem:[%s1159_s4] sm:$0xf] %v593_v50 }
  0xe1 PF: > { %s17_s20 = sadd.s32 1, %s1003_s20   ;;  %s1161_s15 = smov %s987_s16 }
  0xe2   : > { %p14_p2 = scmp.ge.s32.totalorder %s17_s20, 5   ;;  %s1162_s16 = smov %s991_s17 }
  0xe3   : > { %s1163_s17 = smov %s1078_s26  ;;  %s1164_s18 = smov %s999_s19 }
  0xe4   : > { %s1165_s19 = smov %s1167_s22  ;;  %16 = sbr.rel (!%p14_p2) target bundleno = 4 (0x4), region = 93 }
  0xe9   :  { %620 = vsyncpa [#allocation4], 1 }
  0xea   :  { %622 = vsyncpa [#allocation4 + $0x1], 1 }

// kernel: clsnet_forward.29
= control target key start
LH: loop header
LB: loop body
LE: loop exit
PB: predicated region body
PF: predicated region fallthrough
CT: control target
= control target key end

     0   :  { %8 = vsyncpa [#allocation4], 0  ;;  %s1070_s0 = inlined_call_operand.vmem [shape: bf16[8,1152], index: 0, kind: input, shape index: {}]   ;;  %s1071_s1 = inlined_call_operand.hbm [shape: bf16[1152,128], index: 1, kind: input, shape index: {}]   ;;  %s1072_s2 = inlined_call_operand.vmem [shape: f32[1,128], index: 2, kind: input, shape index: {}]   ;;  %s1073_s3 = inlined_call_operand.vmem [shape: bf16[8,128], index: 3, kind: output, shape index: {}]  }
   0x1   :  { %10 = vsyncpa [#allocation4 + $0x1], 0  ;;  %s951_s12 = smov 0   ;;  %s953_s13 = smov 0  }
   0x2   :  { %s955_s14 = smov 0   ;;  %s957_s15 = smov 0  }
   0x3   :  { %s959_s16 = smov 0   ;;  %s961_s17 = smov 0  }
   0x4 LB: > { %s652_s18 = sadd.s32 4294967295, %s926_s17   ;;  %s28_s19 = sadd.s32 1, %s922_s16  ;;  %s926_s17 = sphi %s961_s17, %s16_s17   ;;  %s922_s16 = sphi %s959_s16, %s1079_s16   ;;  %s918_s15 = sphi %s957_s15, %s1078_s15   ;;  %s914_s14 = sphi %s955_s14, %s1077_s14   ;;  %s910_s13 = sphi %s953_s13, %s1076_s13   ;;  %s906_s12 = sphi %s951_s12, %s1075_s12  }
   0x5   : > { %p29_p0 = scmp.ge.s32.totalorder %s28_s19, 3  ;;  %s72_s20 = sadd.s32 1, %s914_s14 }
   0x6   : > { %p79_p1 = scmp.ne.s32.totalorder %s914_s14, %s910_s13  ;;  %p80_p2 = scmp.eq.s32.totalorder %s926_s17, 0 }
   0x7   : > { %s1081_s19 = smov (%p29_p0, %s28_s19), 0  ;;  %p85_p4 = scmp.ne.s32.totalorder %s910_s13, %s906_s12 }
   0x8   : > { %p81_p3 = por %p80_p2, %p79_p1  ;;  %s67_s21 = ssub.s32 %s922_s16, %s1081_s19 }
   0x9   : > { %p86_p5 = scmp.eq.s32.totalorder %s652_s18, 0  ;;  %p70_p6 = scmp.eq.s32.totalorder %s67_s21, 0 }
   0xa   : > { %p793_p8 = scmp.lt.s32.totalorder %s926_s17, 3  ;;  %s182_s24 = sand.u32 1, %s914_s14  }
   0xb   : > { %p990_p7 = por %p86_p5, %p85_p4  ;;  %s760_s25 = smul.u32 192, %s922_s16 }
   0xc   : > { %s996_s23 = scalar_select %p70_p6, %s914_s14, %s72_s20  }
   0xd   : > { %s785_s26 = smul.u32 192, %s182_s24  ;;  %s192_s29 = scalar_lea.hbm %s1071_s1, %s760_s25 }
   0xe   : > { %p790_p9 = pnand %p793_p8, %p81_p3  ;;  %s193_s30 = sshll.u32 %s192_s29, 4  ;;  %s194_s30 = int_to_ptr.hbm [resolvable:$true] %s193_s30 }
   0xf   : > { %s186_s4 = scalar_lea.vmem [#allocation3], %s785_s26  ;;  %s183_s6 = scalar_lea.sflag [#allocation4], %s182_s24 }
  0x10   : > { %s195_s5 = sshll.u32 %s186_s4, 4  ;;  %s928_s7 = smov 64   ;;  %s196_s5 = int_to_ptr.vmem [resolvable:$true] %s195_s5 }
  0x11   : > { %s929_s8 = smov 4   ;;  %p657_p10 = scmp.ge.s32.totalorder %s926_s17, 1 }
  0x12   : > { %792 = dma.hbm_to_vmem [thread:$0]  (!%p790_p9), %s194_s30, 3072, %s196_s5, %s183_s6, %s928_s7, %s928_s7, %s929_s8  }
  0x13   : > { %p203_p11 = scmp.lt.s32.totalorder %s926_s17, 4 }
  0x15   : > { %p204_p12 = pnand %p657_p10, %p203_p11 }
  0x16   : > { %s209_s9 = sand.u32 (!%p204_p12), 1, %s910_s13  }
  0x17   : > { %207 = sbr.rel (%p204_p12) target bundleno = 223 (0xdf), region = 32  ;;  %s210_s11 = scalar_lea.sflag (!%p204_p12), [#allocation4], %s209_s9 }
  0x18   : > { %s786_s10 = smul.u32 (!%p204_p12), 192, %s209_s9 }
  0x1a   : > { %s1006_s12 = scalar_lea.vmem (!%p204_p12), [#allocation3], %s786_s10 }
  0x1c   : > { %901 = dma.done.wait (%p990_p7), %s210_s11, 3072  }
  0x1d   : > { %903 = vsyncadd (%p990_p7), %s210_s11, 4294964224  ;;  %s251_s18 = smul.u32 3, %s918_s15  ;;  %p659_p0 = scmp.ne.s32.totalorder %s918_s15, 0 }
  0x1f   : > { %p254_p13 = scmp.lt.s32.totalorder %s251_s18, 8  ;;  %275 = sbr.rel (%p659_p0) target bundleno = 38 (0x26), region = 40 }
  0x21   : > { %s1083_s18 = smov (!%p254_p13, %s251_s18), 8 }
  0x22   : > { %s658_s20 = sshll.u32 %s1083_s18, 2 }
  0x23   : > { %s1016_s25 = scalar_lea.vmem %s1070_s0, %s658_s20 }
  0x24   : > { %v930_v0 = vmov 0.0  }
  0x25   : > { %276 = vst [vmem:[#allocation2] sm:$0xff] %v930_v0 }
  0x26 PF: > { %v768_v1 = vld [vmem:[%s1006_s12 + $0x38] sm:$0xff]  ;;  %v767_v4 = vld [vmem:[%s1006_s12 + $0x30] sm:$0xff]  ;;  %v766_v7 = vld [vmem:[%s1006_s12 + $0x28] sm:$0xff]  ;;  %p756_p1 = scmp.ne.s32.totalorder %s918_s15, 2 }
  0x27   : > { %v776_v2 = vld [vmem:[%s1006_s12 + $0x78] sm:$0xff]  ;;  %483 = vmatpush.bf16.msra.mxu0 %v768_v1  ;;  %v775_v5 = vld [vmem:[%s1006_s12 + $0x70] sm:$0xff]  ;;  %v774_v8 = vld [vmem:[%s1006_s12 + $0x68] sm:$0xff] }
  0x28   : > { %v784_v3 = vld [vmem:[%s1006_s12 + $0xb8] sm:$0xff]  ;;  %496 = vmatpush.bf16.msra.mxu1 %v776_v2  ;;  %v783_v6 = vld [vmem:[%s1006_s12 + $0xb0] sm:$0xff]  ;;  %v782_v9 = vld [vmem:[%s1006_s12 + $0xa8] sm:$0xff] }
  0x29   : > { %509 = vmatpush.bf16.msra.mxu2 %v784_v3  ;;  %v765_v10 = vld [vmem:[%s1006_s12 + $0x20] sm:$0xff]  ;;  %v764_v13 = vld [vmem:[%s1006_s12 + $0x18] sm:$0xff]  ;;  %v763_v16 = vld [vmem:[%s1006_s12 + $0x10] sm:$0xff] }
  0x2a   : > { %v773_v11 = vld [vmem:[%s1006_s12 + $0x60] sm:$0xff]  ;;  %v772_v14 = vld [vmem:[%s1006_s12 + $0x58] sm:$0xff]  ;;  %v771_v17 = vld [vmem:[%s1006_s12 + $0x50] sm:$0xff] }
  0x2b   : > { %484 = vmatpush.bf16.msra.mxu0 %v767_v4  ;;  %v781_v12 = vld [vmem:[%s1006_s12 + $0xa0] sm:$0xff]  ;;  %v780_v15 = vld [vmem:[%s1006_s12 + $0x98] sm:$0xff]  ;;  %v779_v18 = vld [vmem:[%s1006_s12 + $0x90] sm:$0xff] }
  0x2c   : > { %497 = vmatpush.bf16.msra.mxu1 %v775_v5  ;;  %v762_v19 = vld [vmem:[%s1006_s12 + $0x8] sm:$0xff]  ;;  %v278_v21 = vld [vmem:[%s1016_s25] sm:$0xff]  ;;  %v279_v23 = vld [vmem:[%s1016_s25 + $0x8] sm:$0xf] }
  0x2d   : > { %510 = vmatpush.bf16.msra.mxu2 %v783_v6  ;;  %v770_v20 = vld [vmem:[%s1006_s12 + $0x48] sm:$0xff]  ;;  %v330_v24 = vunpack.c.l.b16 %v278_v21  ;;  %v331_v25 = vunpack.c.h.b16 %v278_v21  ;;  %v761_v26 = vld [vmem:[%s1006_s12] sm:$0xff]  ;;  %v332_v28 = vunpack.c.l.b16 %v279_v23  ;;  %v277_v36 = vld [vmem:[#allocation2] sm:$0xff] }
  0x2e   : > { %v778_v22 = vld [vmem:[%s1006_s12 + $0x88] sm:$0xff]  ;;  %v769_v27 = vld [vmem:[%s1006_s12 + $0x40] sm:$0xff] }
  0x2f   : > { %485 = vmatpush.bf16.msra.mxu0 %v766_v7  ;;  %v777_v29 = vld [vmem:[%s1006_s12 + $0x80] sm:$0xff]  ;;  %v333_v30 = vpack.c.b16 %v330_v24, %v330_v24  ;;  %v334_v31 = vpack.c.b16 %v331_v25, %v331_v25  ;;  %v335_v32 = vpack.c.b16 %v332_v28, %v332_v28 }
  0x30   : > { %498 = vmatpush.bf16.msra.mxu1 %v774_v8 }
  0x31   : > { %511 = vmatpush.bf16.msra.mxu2 %v782_v9 }
  0x33   : > { %486 = vmatpush.bf16.msra.mxu0 %v765_v10 }
  0x34   : > { %499 = vmatpush.bf16.msra.mxu1 %v773_v11 }
  0x35   : > { %512 = vmatpush.bf16.msra.mxu2 %v781_v12 }
  0x37   : > { %487 = vmatpush.bf16.msra.mxu0 %v764_v13 }
  0x38   : > { %500 = vmatpush.bf16.msra.mxu1 %v772_v14 }
  0x39   : > { %513 = vmatpush.bf16.msra.mxu2 %v780_v15 }
  0x3b   : > { %488 = vmatpush.bf16.msra.mxu0 %v763_v16 }
  0x3c   : > { %501 = vmatpush.bf16.msra.mxu1 %v771_v17 }
  0x3d   : > { %514 = vmatpush.bf16.msra.mxu2 %v779_v18 }
  0x3f   : > { %489 = vmatpush.bf16.msra.mxu0 %v762_v19 }
  0x40   : > { %502 = vmatpush.bf16.msra.mxu1 %v770_v20 }
  0x41   : > { %515 = vmatpush.bf16.msra.mxu2 %v778_v22 }
  0x43   : > { %490 = vmatpush.bf16.msra.mxu0 %v761_v26 }
  0x44   : > { %503 = vmatpush.bf16.msra.mxu1 %v769_v27 }
  0x45   : > { %516 = vmatpush.bf16.msra.mxu2 %v777_v29 }
  0x46   : > { %491 = vmatmul.bf16.vlgmr.msra.gmra.mxu0 %v333_v30 }
  0x47   : > { %504 = vmatmul.bf16.vlgmr.msra.gmra.mxu1 %v334_v31 }
  0x48   : > { %517 = vmatmul.bf16.vlgmr.msra.gmra.mxu2 %v335_v32 }
  0xc3   : > { %v492_v33 = vpop.f32.mrf.mxu0 }
  0xc4   : > { %v505_v34 = vpop.f32.mrf.mxu1 }
  0xc5   : > { %v506_v35 = vadd.f32 %v505_v34, %v492_v33 }
  0xcb   : > { %v518_v37 = vpop.f32.mrf.mxu2  ;;  %v494_v39 = vpop.f32.mrf.mxu0 }
  0xcc   : > { %v519_v38 = vadd.f32 %v518_v37, %v506_v35  ;;  %v507_v40 = vpop.f32.mrf.mxu1 }
  0xce   : > { %v522_v41 = vadd.f32 %v519_v38, %v277_v36 }
  0xcf   : > { %527 = sbr.rel (%p756_p1) target bundleno = 223 (0xdf), region = 44 }
  0xd0   : > { %523 = vst [vmem:[#allocation2] sm:$0xff] %v522_v41 }
  0xd3   : > { %v520_v42 = vpop.f32.mrf.mxu2 }
  0xd4   : > { %v845_v44 = vld [vmem:[%s1072_s2] ss:$0 sm:$0xff] }
  0xd7   : > { %v528_v43 = vld [vmem:[#allocation2] sm:$0xff] }
  0xd8   : > { %v533_v45 = vadd.f32 %v845_v44, %v528_v43 }
  0xda   : > { %v534_v46 = vmax.f32 %v533_v45, 0.0 }
  0xdc   : > { %v535_v47 = vpack.c.bf16 %v534_v46, %v534_v46 }
  0xde   : > { %536 = vst [vmem:[%s1073_s3] sm:$0xf] %v535_v47 }
  0xdf PF: > { %s16_s17 = sadd.s32 1, %s926_s17   ;;  %s1075_s12 = smov %s910_s13 }
  0xe0   : > { %p13_p2 = scmp.ge.s32.totalorder %s16_s17, 5   ;;  %s1076_s13 = smov %s914_s14 }
  0xe1   : > { %s1077_s14 = smov %s996_s23  ;;  %s1078_s15 = smov %s922_s16 }
  0xe2   : > { %s1079_s16 = smov %s1081_s19  ;;  %15 = sbr.rel (!%p13_p2) target bundleno = 4 (0x4), region = 86 }
  0xe7   :  { %562 = vsyncpa [#allocation4], 1 }
  0xe8   :  { %564 = vsyncpa [#allocation4 + $0x1], 1 }

// kernel: clsnet_forward.31
= control target key start
LH: loop header
LB: loop body
LE: loop exit
PB: predicated region body
PF: predicated region fallthrough
CT: control target
= control target key end

     0   :  { %s1128_s12 = smov 0   ;;  %s1130_s13 = smov 0   ;;  %s1279_s0 = inlined_call_operand.vmem [shape: bf16[8,1152], index: 0, kind: input, shape index: {}]   ;;  %s1280_s1 = inlined_call_operand.vmem [shape: bf16[1152,256], index: 1, kind: input, shape index: {}]   ;;  %s1281_s2 = inlined_call_operand.vmem [shape: f32[1,256], index: 2, kind: input, shape index: {}]   ;;  %s1282_s3 = inlined_call_operand.vmem [shape: bf16[8,256], index: 3, kind: output, shape index: {}]  }
   0x1   :  { %s1132_s14 = smov 0  }
   0x2 LB: > { %s25_s15 = sadd.s32 1, %s1101_s13  ;;  %p807_p0 = scmp.ge.s32.totalorder %s1105_s14, 1  ;;  %s1105_s14 = sphi %s1132_s14, %s13_s14   ;;  %s1101_s13 = sphi %s1130_s13, %s1284_s13   ;;  %s1097_s12 = sphi %s1128_s12, %s1283_s12  }
   0x3   : > { %p26_p1 = scmp.ge.s32.totalorder %s25_s15, 3  ;;  %p194_p2 = scmp.lt.s32.totalorder %s1105_s14, 4 }
   0x5   : > { %s1286_s15 = smov (%p26_p1, %s25_s15), 0  ;;  %p195_p3 = pnand %p807_p0, %p194_p2 }
   0x6   : > { %s240_s16 = smul.u32 (!%p195_p3), 3, %s1097_s12  ;;  %p811_p6 = scmp.ne.s32.totalorder (!%p195_p3), %s1097_s12, 0 }
   0x7   : > { %198 = sbr.rel (%p195_p3) target bundleno = 236 (0xec), region = 32 }
   0x8   : > { %s250_s17 = smul.u32 (!%p195_p3), 48, %s1097_s12  ;;  %p243_p4 = scmp.lt.s32.totalorder (!%p195_p3), %s240_s16, 8 }
   0xa   : > { %p252_p5 = scmp.lt.s32.totalorder (!%p195_p3), %s250_s17, 143 }
   0xc   : > { %s1288_s16 = smov (!%p243_p4, %s240_s16), 8  ;;  %s1290_s17 = smov (!%p252_p5, %s250_s17), 143 }
   0xd   : > { %s808_s18 = sshll.u32 %s1288_s16, 2  ;;  %s1009_s22 = sshll.u32 %s1290_s17, 3 }
   0xe   : > { %s1153_s21 = scalar_lea.vmem %s1279_s0, %s808_s18  ;;  %s1158_s25 = scalar_lea.vmem %s1280_s1, %s1009_s22 }
   0xf   : > { %280 = sbr.rel (%p811_p6) target bundleno = 23 (0x17), region = 36 }
  0x14   : > { %v1107_v0 = vmov 0.0  }
  0x15   : > { %281 = vst [vmem:[#allocation2] sm:$0xff] %v1107_v0 }
  0x16   : > { %282 = vst [vmem:[#allocation2 + $0x8] sm:$0xff] %v1107_v0 }
  0x17 PF: > { %v870_v1 = vld [vmem:[%s1158_s25 + $0x70] sm:$0xf]  ;;  %v1025_v2 = vld [vmem:[%s1158_s25 + $0x74] sm:$0xf0]  ;;  %v862_v6 = vld [vmem:[%s1158_s25 + $0x60] sm:$0xf] }
  0x18   : > { %v934_v3 = vld [vmem:[%s1158_s25 + $0xf0] sm:$0xf]  ;;  %v871_v4 = vor.u32 %v1025_v2, %v870_v1  ;;  %v1041_v5 = vld [vmem:[%s1158_s25 + $0xf4] sm:$0xf0]  ;;  %v1023_v7 = vld [vmem:[%s1158_s25 + $0x64] sm:$0xf0] }
  0x19   : > { %v935_v8 = vor.u32 %v1041_v5, %v934_v3  ;;  %v926_v9 = vld [vmem:[%s1158_s25 + $0xe0] sm:$0xf]  ;;  %v1039_v10 = vld [vmem:[%s1158_s25 + $0xe4] sm:$0xf0]  ;;  %v863_v11 = vor.u32 %v1023_v7, %v862_v6  ;;  %v854_v12 = vld [vmem:[%s1158_s25 + $0x50] sm:$0xf] }
  0x1a   : > { %586 = vmatpush.bf16.msra.mxu0 %v871_v4  ;;  %v927_v13 = vor.u32 %v1039_v10, %v926_v9  ;;  %v1021_v14 = vld [vmem:[%s1158_s25 + $0x54] sm:$0xf0]  ;;  %v998_v15 = vld [vmem:[%s1158_s25 + $0x170] sm:$0xf]  ;;  %v990_v20 = vld [vmem:[%s1158_s25 + $0x160] sm:$0xf] }
  0x1b   : > { %599 = vmatpush.bf16.msra.mxu1 %v935_v8  ;;  %v1057_v16 = vld [vmem:[%s1158_s25 + $0x174] sm:$0xf0]  ;;  %v918_v17 = vld [vmem:[%s1158_s25 + $0xd0] sm:$0xf]  ;;  %v1055_v21 = vld [vmem:[%s1158_s25 + $0x164] sm:$0xf0]  ;;  %v855_v23 = vor.u32 %v1021_v14, %v854_v12 }
  0x1c   : > { %v1037_v18 = vld [vmem:[%s1158_s25 + $0xd4] sm:$0xf0]  ;;  %v999_v19 = vor.u32 %v1057_v16, %v998_v15  ;;  %v1024_v22 = vld [vmem:[%s1158_s25 + $0x74] sm:$0xf]  ;;  %v846_v24 = vld [vmem:[%s1158_s25 + $0x40] sm:$0xf]  ;;  %v991_v26 = vor.u32 %v1055_v21, %v990_v20 }
  0x1d   : > { %v1019_v25 = vld [vmem:[%s1158_s25 + $0x44] sm:$0xf0]  ;;  %v872_v27 = vld [vmem:[%s1158_s25 + $0x78] sm:$0xf0]  ;;  %v919_v28 = vor.u32 %v1037_v18, %v918_v17  ;;  %v910_v29 = vld [vmem:[%s1158_s25 + $0xc0] sm:$0xf] }
  0x1e   : > { %587 = vmatpush.bf16.msra.mxu0 %v863_v11  ;;  %612 = vmatpush.bf16.msra.mxu2 %v999_v19  ;;  %v1035_v30 = vld [vmem:[%s1158_s25 + $0xc4] sm:$0xf0]  ;;  %v875_v31 = vor.u32 %v1024_v22, %v872_v27  ;;  %v982_v32 = vld [vmem:[%s1158_s25 + $0x150] sm:$0xf]  ;;  %v1053_v33 = vld [vmem:[%s1158_s25 + $0x154] sm:$0xf0]  ;;  %v847_v37 = vor.u32 %v1019_v25, %v846_v24 }
  0x1f   : > { %600 = vmatpush.bf16.msra.mxu1 %v927_v13  ;;  %v1022_v34 = vld [vmem:[%s1158_s25 + $0x64] sm:$0xf]  ;;  %v864_v35 = vld [vmem:[%s1158_s25 + $0x68] sm:$0xf0]  ;;  %v838_v38 = vld [vmem:[%s1158_s25 + $0x30] sm:$0xf]  ;;  %v983_v40 = vor.u32 %v1053_v33, %v982_v32  ;;  %v911_v42 = vor.u32 %v1035_v30, %v910_v29 }
  0x20   : > { %625 = vmatpush.bf16.msra.mxu3 %v875_v31  ;;  %v867_v36 = vor.u32 %v1022_v34, %v864_v35  ;;  %v1017_v39 = vld [vmem:[%s1158_s25 + $0x34] sm:$0xf0]  ;;  %v974_v41 = vld [vmem:[%s1158_s25 + $0x140] sm:$0xf]  ;;  %v1051_v43 = vld [vmem:[%s1158_s25 + $0x144] sm:$0xf0] }
  0x21   : > { %v1020_v44 = vld [vmem:[%s1158_s25 + $0x54] sm:$0xf]  ;;  %v856_v45 = vld [vmem:[%s1158_s25 + $0x58] sm:$0xf0]  ;;  %v902_v46 = vld [vmem:[%s1158_s25 + $0xb0] sm:$0xf]  ;;  %v839_v49 = vor.u32 %v1017_v39, %v838_v38  ;;  %v975_v51 = vor.u32 %v1051_v43, %v974_v41 }
  0x22   : > { %588 = vmatpush.bf16.msra.mxu0 %v855_v23  ;;  %613 = vmatpush.bf16.msra.mxu2 %v991_v26  ;;  %v1033_v47 = vld [vmem:[%s1158_s25 + $0xb4] sm:$0xf0]  ;;  %v859_v48 = vor.u32 %v1020_v44, %v856_v45  ;;  %v830_v50 = vld [vmem:[%s1158_s25 + $0x20] sm:$0xf]  ;;  %v1018_v52 = vld [vmem:[%s1158_s25 + $0x44] sm:$0xf] }
  0x23   : > { %601 = vmatpush.bf16.msra.mxu1 %v919_v28  ;;  %v848_v53 = vld [vmem:[%s1158_s25 + $0x48] sm:$0xf0]  ;;  %v903_v54 = vor.u32 %v1033_v47, %v902_v46  ;;  %v1015_v55 = vld [vmem:[%s1158_s25 + $0x24] sm:$0xf0]  ;;  %v966_v56 = vld [vmem:[%s1158_s25 + $0x130] sm:$0xf] }
  0x24   : > { %626 = vmatpush.bf16.msra.mxu3 %v867_v36  ;;  %v1049_v57 = vld [vmem:[%s1158_s25 + $0x134] sm:$0xf0]  ;;  %v894_v58 = vld [vmem:[%s1158_s25 + $0xa0] sm:$0xf]  ;;  %v1031_v59 = vld [vmem:[%s1158_s25 + $0xa4] sm:$0xf0]  ;;  %v851_v60 = vor.u32 %v1018_v52, %v848_v53  ;;  %v831_v61 = vor.u32 %v1015_v55, %v830_v50 }
  0x25   : > { %v822_v62 = vld [vmem:[%s1158_s25 + $0x10] sm:$0xf]  ;;  %v967_v63 = vor.u32 %v1049_v57, %v966_v56  ;;  %v1016_v0 = vld [vmem:[%s1158_s25 + $0x34] sm:$0xf]  ;;  %v840_v1 = vld [vmem:[%s1158_s25 + $0x38] sm:$0xf0]  ;;  %v895_v2 = vor.u32 %v1031_v59, %v894_v58 }
  0x26   : > { %589 = vmatpush.bf16.msra.mxu0 %v847_v37  ;;  %614 = vmatpush.bf16.msra.mxu2 %v983_v40  ;;  %v1013_v3 = vld [vmem:[%s1158_s25 + $0x14] sm:$0xf0]  ;;  %v958_v4 = vld [vmem:[%s1158_s25 + $0x120] sm:$0xf]  ;;  %v1047_v5 = vld [vmem:[%s1158_s25 + $0x124] sm:$0xf0]  ;;  %v843_v10 = vor.u32 %v1016_v0, %v840_v1 }
  0x27   : > { %602 = vmatpush.bf16.msra.mxu1 %v911_v42  ;;  %v886_v6 = vld [vmem:[%s1158_s25 + $0x90] sm:$0xf]  ;;  %v1029_v7 = vld [vmem:[%s1158_s25 + $0x94] sm:$0xf0]  ;;  %v814_v8 = vld [vmem:[%s1158_s25] sm:$0xf]  ;;  %v823_v11 = vor.u32 %v1013_v3, %v822_v62  ;;  %v959_v12 = vor.u32 %v1047_v5, %v958_v4 }
  0x28   : > { %627 = vmatpush.bf16.msra.mxu3 %v859_v48  ;;  %v1011_v9 = vld [vmem:[%s1158_s25 + $0x4] sm:$0xf0]  ;;  %v1014_v13 = vld [vmem:[%s1158_s25 + $0x24] sm:$0xf]  ;;  %v832_v14 = vld [vmem:[%s1158_s25 + $0x28] sm:$0xf0]  ;;  %v887_v16 = vor.u32 %v1029_v7, %v886_v6 }
  0x29   : > { %v285_v15 = vld [vmem:[%s1153_s21] sm:$0xff]  ;;  %v950_v18 = vld [vmem:[%s1158_s25 + $0x110] sm:$0xf]  ;;  %v1045_v19 = vld [vmem:[%s1158_s25 + $0x114] sm:$0xf0]  ;;  %v835_v25 = vor.u32 %v1014_v13, %v832_v14  ;;  %v815_v27 = vor.u32 %v1011_v9, %v814_v8  ;;  %p1004_p7 = scmp.ne.s32.totalorder %s1097_s12, 2 }
  0x2a   : > { %590 = vmatpush.bf16.msra.mxu0 %v839_v49  ;;  %615 = vmatpush.bf16.msra.mxu2 %v975_v51  ;;  %v878_v17 = vld [vmem:[%s1158_s25 + $0x80] sm:$0xf]  ;;  %v1027_v20 = vld [vmem:[%s1158_s25 + $0x84] sm:$0xf0]  ;;  %v1040_v21 = vld [vmem:[%s1158_s25 + $0xf4] sm:$0xf]  ;;  %v337_v26 = vunpack.c.l.b16 %v285_v15  ;;  %v951_v28 = vor.u32 %v1045_v19, %v950_v18  ;;  %v338_v29 = vunpack.c.h.b16 %v285_v15 }
  0x2b   : > { %603 = vmatpush.bf16.msra.mxu1 %v903_v54  ;;  %v936_v22 = vld [vmem:[%s1158_s25 + $0xf8] sm:$0xf0]  ;;  %v1056_v23 = vld [vmem:[%s1158_s25 + $0x174] sm:$0xf]  ;;  %v286_v32 = vld [vmem:[%s1153_s21 + $0x8] sm:$0xf]  ;;  %v879_v33 = vor.u32 %v1027_v20, %v878_v17 }
  0x2c   : > { %628 = vmatpush.bf16.msra.mxu3 %v851_v60  ;;  %v1000_v24 = vld [vmem:[%s1158_s25 + $0x178] sm:$0xf0]  ;;  %v1012_v30 = vld [vmem:[%s1158_s25 + $0x14] sm:$0xf]  ;;  %v939_v34 = vor.u32 %v1040_v21, %v936_v22  ;;  %v942_v35 = vld [vmem:[%s1158_s25 + $0x100] sm:$0xf]  ;;  %v340_v42 = vpack.c.b16 %v337_v26, %v337_v26  ;;  %v339_v44 = vunpack.c.l.b16 %v286_v32  ;;  %v1233_v45 = vpack.c.b16 %v338_v29, %v338_v29 }
  0x2d   : > { %v824_v31 = vld [vmem:[%s1158_s25 + $0x18] sm:$0xf0]  ;;  %v1043_v36 = vld [vmem:[%s1158_s25 + $0x104] sm:$0xf0]  ;;  %v1003_v37 = vor.u32 %v1056_v23, %v1000_v24  ;;  %v1038_v38 = vld [vmem:[%s1158_s25 + $0xe4] sm:$0xf] }
  0x2e   : > { %591 = vmatpush.bf16.msra.mxu0 %v831_v61  ;;  %616 = vmatpush.bf16.msra.mxu2 %v967_v63  ;;  %v928_v39 = vld [vmem:[%s1158_s25 + $0xe8] sm:$0xf0]  ;;  %v1054_v40 = vld [vmem:[%s1158_s25 + $0x164] sm:$0xf]  ;;  %v827_v43 = vor.u32 %v1012_v30, %v824_v31  ;;  %v943_v46 = vor.u32 %v1043_v36, %v942_v35  ;;  %v1036_v51 = vld [vmem:[%s1158_s25 + $0xd4] sm:$0xf]  ;;  %v342_v55 = vpack.c.b16 %v339_v44, %v339_v44 }
  0x2f   : > { %604 = vmatpush.bf16.msra.mxu1 %v895_v2  ;;  %v992_v41 = vld [vmem:[%s1158_s25 + $0x168] sm:$0xf0]  ;;  %v1010_v47 = vld [vmem:[%s1158_s25 + $0x4] sm:$0xf]  ;;  %v931_v49 = vor.u32 %v1038_v38, %v928_v39  ;;  %v920_v52 = vld [vmem:[%s1158_s25 + $0xd8] sm:$0xf0] }
  0x30   : > { %629 = vmatpush.bf16.msra.mxu3 %v843_v10  ;;  %v816_v48 = vld [vmem:[%s1158_s25 + $0x8] sm:$0xf0]  ;;  %v995_v50 = vor.u32 %v1054_v40, %v992_v41  ;;  %v1052_v53 = vld [vmem:[%s1158_s25 + $0x154] sm:$0xf]  ;;  %v984_v54 = vld [vmem:[%s1158_s25 + $0x158] sm:$0xf0]  ;;  %v923_v57 = vor.u32 %v1036_v51, %v920_v52 }
  0x31   : > { %v819_v56 = vor.u32 %v1010_v47, %v816_v48  ;;  %v987_v58 = vor.u32 %v1052_v53, %v984_v54  ;;  %v1034_v59 = vld [vmem:[%s1158_s25 + $0xc4] sm:$0xf]  ;;  %v912_v60 = vld [vmem:[%s1158_s25 + $0xc8] sm:$0xf0]  ;;  %v1032_v1 = vld [vmem:[%s1158_s25 + $0xb4] sm:$0xf] }
  0x32   : > { %592 = vmatpush.bf16.msra.mxu0 %v823_v11  ;;  %617 = vmatpush.bf16.msra.mxu2 %v959_v12  ;;  %v1050_v61 = vld [vmem:[%s1158_s25 + $0x144] sm:$0xf]  ;;  %v976_v62 = vld [vmem:[%s1158_s25 + $0x148] sm:$0xf0]  ;;  %v915_v63 = vor.u32 %v1034_v59, %v912_v60  ;;  %v904_v2 = vld [vmem:[%s1158_s25 + $0xb8] sm:$0xf0] }
  0x33   : > { %605 = vmatpush.bf16.msra.mxu1 %v887_v16  ;;  %v979_v0 = vor.u32 %v1050_v61, %v976_v62  ;;  %v1048_v3 = vld [vmem:[%s1158_s25 + $0x134] sm:$0xf]  ;;  %v968_v4 = vld [vmem:[%s1158_s25 + $0x138] sm:$0xf0]  ;;  %v907_v5 = vor.u32 %v1032_v1, %v904_v2  ;;  %v1030_v7 = vld [vmem:[%s1158_s25 + $0xa4] sm:$0xf] }
  0x34   : > { %630 = vmatpush.bf16.msra.mxu3 %v835_v25  ;;  %v971_v6 = vor.u32 %v1048_v3, %v968_v4  ;;  %v896_v8 = vld [vmem:[%s1158_s25 + $0xa8] sm:$0xf0]  ;;  %v1046_v9 = vld [vmem:[%s1158_s25 + $0x124] sm:$0xf]  ;;  %v1028_v13 = vld [vmem:[%s1158_s25 + $0x94] sm:$0xf] }
  0x35   : > { %v960_v10 = vld [vmem:[%s1158_s25 + $0x128] sm:$0xf0]  ;;  %v899_v11 = vor.u32 %v1030_v7, %v896_v8  ;;  %v888_v14 = vld [vmem:[%s1158_s25 + $0x98] sm:$0xf0]  ;;  %v1044_v15 = vld [vmem:[%s1158_s25 + $0x114] sm:$0xf] }
  0x36   : > { %593 = vmatpush.bf16.msra.mxu0 %v815_v27  ;;  %618 = vmatpush.bf16.msra.mxu2 %v951_v28  ;;  %v963_v12 = vor.u32 %v1046_v9, %v960_v10  ;;  %v952_v16 = vld [vmem:[%s1158_s25 + $0x118] sm:$0xf0]  ;;  %v891_v17 = vor.u32 %v1028_v13, %v888_v14  ;;  %v1026_v19 = vld [vmem:[%s1158_s25 + $0x84] sm:$0xf]  ;;  %v880_v20 = vld [vmem:[%s1158_s25 + $0x88] sm:$0xf0] }
  0x37   : > { %606 = vmatpush.bf16.msra.mxu1 %v879_v33  ;;  %v955_v18 = vor.u32 %v1044_v15, %v952_v16  ;;  %v1042_v21 = vld [vmem:[%s1158_s25 + $0x104] sm:$0xf]  ;;  %v944_v22 = vld [vmem:[%s1158_s25 + $0x108] sm:$0xf0]  ;;  %v883_v23 = vor.u32 %v1026_v19, %v880_v20 }
  0x38   : > { %631 = vmatpush.bf16.msra.mxu3 %v827_v43  ;;  %v947_v24 = vor.u32 %v1042_v21, %v944_v22  ;;  %v283_v30 = vld [vmem:[#allocation2] sm:$0xff]  ;;  %v284_v40 = vld [vmem:[#allocation2 + $0x8] sm:$0xff] }
  0x39   : > { %594 = vmatmul.bf16.vlgmr.msra.gmra.mxu0 %v340_v42 }
  0x3a   : > { %638 = vmatpush.bf16.msrb.mxu0 %v939_v34  ;;  %607 = vmatmul.bf16.vlgmr.msra.gmra.mxu1 %v1233_v45 }
  0x3b   : > { %651 = vmatpush.bf16.msrb.mxu1 %v1003_v37  ;;  %619 = vmatpush.bf16.msra.mxu2 %v943_v46 }
  0x3c   : > { %632 = vmatpush.bf16.msra.mxu3 %v819_v56 }
  0x3e   : > { %639 = vmatpush.bf16.msrb.mxu0 %v931_v49  ;;  %620 = vmatmul.bf16.vlgmr.msra.gmra.mxu2 %v342_v55 }
  0x3f   : > { %652 = vmatpush.bf16.msrb.mxu1 %v995_v50  ;;  %633 = vmatmul.bf16.vlgmr.msra.gmra.mxu3 %v340_v42 }
  0x42   : > { %640 = vmatpush.bf16.msrb.mxu0 %v923_v57 }
  0x43   : > { %653 = vmatpush.bf16.msrb.mxu1 %v987_v58 }
  0x46   : > { %641 = vmatpush.bf16.msrb.mxu0 %v915_v63 }
  0x47   : > { %654 = vmatpush.bf16.msrb.mxu1 %v979_v0 }
  0x4a   : > { %642 = vmatpush.bf16.msrb.mxu0 %v907_v5 }
  0x4b   : > { %655 = vmatpush.bf16.msrb.mxu1 %v971_v6 }
  0x4e   : > { %643 = vmatpush.bf16.msrb.mxu0 %v899_v11 }
  0x4f   : > { %656 = vmatpush.bf16.msrb.mxu1 %v963_v12 }
  0x52   : > { %644 = vmatpush.bf16.msrb.mxu0 %v891_v17 }
  0x53   : > { %657 = vmatpush.bf16.msrb.mxu1 %v955_v18 }
  0x56   : > { %645 = vmatpush.bf16.msrb.mxu0 %v883_v23 }
  0x57   : > { %658 = vmatpush.bf16.msrb.mxu1 %v947_v24 }
  0x59   : > { %646 = vmatmul.bf16.vlgmr.msrb.gmra.mxu0 %v1233_v45 }
  0x5a   : > { %659 = vmatmul.bf16.vlgmr.msrb.gmra.mxu1 %v342_v55 }
  0xb6   : > { %v595_v25 = vpop.f32.mrf.mxu0 }
  0xb7   : > { %v608_v26 = vpop.f32.mrf.mxu1 }
  0xb8   : > { %v609_v27 = vadd.f32 %v608_v26, %v595_v25 }
  0xbe   : > { %v597_v28 = vpop.f32.mrf.mxu0 }
  0xbf   : > { %v610_v29 = vpop.f32.mrf.mxu1 }
  0xc1   : > { %v621_v31 = vpop.f32.mrf.mxu2 }
  0xc2   : > { %v622_v32 = vadd.f32 %v621_v31, %v609_v27  ;;  %v634_v34 = vpop.f32.mrf.mxu3 }
  0xc4   : > { %v664_v33 = vadd.f32 %v622_v32, %v283_v30 }
  0xc6   : > { %666 = vst [vmem:[#allocation2] sm:$0xff] %v664_v33 }
  0xc9   : > { %v623_v35 = vpop.f32.mrf.mxu2 }
  0xca   : > { %v636_v36 = vpop.f32.mrf.mxu3 }
  0xd6   : > { %v647_v37 = vpop.f32.mrf.mxu0 }
  0xd7   : > { %v648_v38 = vadd.f32 %v647_v37, %v634_v34  ;;  %v660_v39 = vpop.f32.mrf.mxu1 }
  0xd9   : > { %v661_v41 = vadd.f32 %v660_v39, %v648_v38 }
  0xdb   : > { %v665_v42 = vadd.f32 %v661_v41, %v284_v40  ;;  %671 = sbr.rel (%p1004_p7) target bundleno = 236 (0xec), region = 40 }
  0xdd   : > { %667 = vst [vmem:[#allocation2 + $0x8] sm:$0xff] %v665_v42 }
  0xde   : > { %v649_v43 = vpop.f32.mrf.mxu0 }
  0xdf   : > { %v662_v44 = vpop.f32.mrf.mxu1 }
  0xe0   : > { %v672_v45 = vld [vmem:[#allocation2] sm:$0xff] }
  0xe1   : > { %v674_v47 = vld [vmem:[%s1281_s2] sm:$0x3] }
  0xe2   : > { %v676_v48 = vperm.slane %v674_v47, 0  ;;  %v677_v49 = vperm.slane %v674_v47, 1 }
  0xe4   : > { %v673_v46 = vld [vmem:[#allocation2 + $0x8] sm:$0xff]  ;;  %v680_v50 = vadd.f32 %v676_v48, %v672_v45 }
  0xe5   : > { %v681_v51 = vadd.f32 %v677_v49, %v673_v46 }
  0xe6   : > { %v682_v52 = vmax.f32 %v680_v50, 0.0 }
  0xe7   : > { %v683_v53 = vmax.f32 %v681_v51, 0.0 }
  0xe9   : > { %v684_v54 = vpack.c.bf16 %v683_v53, %v682_v52 }
  0xeb   : > { %685 = vst [vmem:[%s1282_s3] sm:$0xff] %v684_v54 }
  0xec PF: > { %s13_s14 = sadd.s32 1, %s1105_s14   ;;  %s1283_s12 = smov %s1101_s13 }
  0xed   : > { %p10_p8 = scmp.ge.s32.totalorder %s13_s14, 5   ;;  %s1284_s13 = smov %s1286_s15 }
  0xef   :  { %12 = sbr.rel (!%p10_p8) target bundleno = 2 (0x2), region = 76 }

// kernel: clsnet_forward.32
= control target key start
LH: loop header
LB: loop body
LE: loop exit
PB: predicated region body
PF: predicated region fallthrough
CT: control target
= control target key end

     0   :  { %s373_s1 = inlined_call_operand.vmem [shape: bf16[128,256], index: 1, kind: input, shape index: {}]   ;;  %s374_s0 = inlined_call_operand.vmem [shape: bf16[8,128], index: 0, kind: input, shape index: {}]   ;;  %s375_s2 = inlined_call_operand.vmem [shape: f32[1,256], index: 2, kind: input, shape index: {}]   ;;  %s376_s3 = inlined_call_operand.vmem [shape: bf16[8,256], index: 3, kind: output, shape index: {}]  }
   0x1   :  { %v226_v0 = vld [vmem:[%s373_s1 + $0x70] sm:$0xf]  ;;  %v247_v1 = vld [vmem:[%s373_s1 + $0x74] sm:$0xf0]  ;;  %v246_v2 = vld [vmem:[%s373_s1 + $0x74] sm:$0xf] }
   0x2   :  { %v227_v3 = vor.u32 %v247_v1, %v226_v0  ;;  %v228_v4 = vld [vmem:[%s373_s1 + $0x78] sm:$0xf0]  ;;  %v218_v5 = vld [vmem:[%s373_s1 + $0x60] sm:$0xf]  ;;  %v245_v6 = vld [vmem:[%s373_s1 + $0x64] sm:$0xf0] }
   0x3   :  { %v231_v7 = vor.u32 %v246_v2, %v228_v4  ;;  %v244_v8 = vld [vmem:[%s373_s1 + $0x64] sm:$0xf]  ;;  %v220_v9 = vld [vmem:[%s373_s1 + $0x68] sm:$0xf0]  ;;  %v219_v10 = vor.u32 %v245_v6, %v218_v5  ;;  %v210_v12 = vld [vmem:[%s373_s1 + $0x50] sm:$0xf] }
   0x4   :  { %119 = vmatpush.bf16.msra.mxu0 %v227_v3  ;;  %v223_v11 = vor.u32 %v244_v8, %v220_v9  ;;  %v243_v13 = vld [vmem:[%s373_s1 + $0x54] sm:$0xf0]  ;;  %v242_v14 = vld [vmem:[%s373_s1 + $0x54] sm:$0xf]  ;;  %v212_v15 = vld [vmem:[%s373_s1 + $0x58] sm:$0xf0] }
   0x5   :  { %132 = vmatpush.bf16.msra.mxu1 %v231_v7  ;;  %v211_v16 = vor.u32 %v243_v13, %v210_v12  ;;  %v215_v17 = vor.u32 %v242_v14, %v212_v15  ;;  %v202_v18 = vld [vmem:[%s373_s1 + $0x40] sm:$0xf]  ;;  %v241_v19 = vld [vmem:[%s373_s1 + $0x44] sm:$0xf0]  ;;  %v240_v20 = vld [vmem:[%s373_s1 + $0x44] sm:$0xf] }
   0x6   :  { %v204_v21 = vld [vmem:[%s373_s1 + $0x48] sm:$0xf0]  ;;  %v203_v22 = vor.u32 %v241_v19, %v202_v18  ;;  %v194_v24 = vld [vmem:[%s373_s1 + $0x30] sm:$0xf]  ;;  %v239_v25 = vld [vmem:[%s373_s1 + $0x34] sm:$0xf0] }
   0x7   :  { %v207_v23 = vor.u32 %v240_v20, %v204_v21  ;;  %v238_v26 = vld [vmem:[%s373_s1 + $0x34] sm:$0xf]  ;;  %v196_v27 = vld [vmem:[%s373_s1 + $0x38] sm:$0xf0]  ;;  %v195_v28 = vor.u32 %v239_v25, %v194_v24  ;;  %v186_v30 = vld [vmem:[%s373_s1 + $0x20] sm:$0xf] }
   0x8   :  { %120 = vmatpush.bf16.msra.mxu0 %v219_v10  ;;  %v199_v29 = vor.u32 %v238_v26, %v196_v27  ;;  %v237_v31 = vld [vmem:[%s373_s1 + $0x24] sm:$0xf0]  ;;  %v236_v32 = vld [vmem:[%s373_s1 + $0x24] sm:$0xf]  ;;  %v188_v33 = vld [vmem:[%s373_s1 + $0x28] sm:$0xf0] }
   0x9   :  { %133 = vmatpush.bf16.msra.mxu1 %v223_v11  ;;  %v187_v34 = vor.u32 %v237_v31, %v186_v30  ;;  %v191_v35 = vor.u32 %v236_v32, %v188_v33  ;;  %v178_v36 = vld [vmem:[%s373_s1 + $0x10] sm:$0xf]  ;;  %v235_v37 = vld [vmem:[%s373_s1 + $0x14] sm:$0xf0]  ;;  %v234_v38 = vld [vmem:[%s373_s1 + $0x14] sm:$0xf] }
   0xa   :  { %v180_v39 = vld [vmem:[%s373_s1 + $0x18] sm:$0xf0]  ;;  %v179_v40 = vor.u32 %v235_v37, %v178_v36  ;;  %v170_v42 = vld [vmem:[%s373_s1] sm:$0xf]  ;;  %v233_v43 = vld [vmem:[%s373_s1 + $0x4] sm:$0xf0] }
   0xb   :  { %v183_v41 = vor.u32 %v234_v38, %v180_v39  ;;  %v232_v44 = vld [vmem:[%s373_s1 + $0x4] sm:$0xf]  ;;  %v172_v45 = vld [vmem:[%s373_s1 + $0x8] sm:$0xf0]  ;;  %v171_v46 = vor.u32 %v233_v43, %v170_v42  ;;  %v22_v48 = vld [vmem:[%s374_s0] sm:$0xf] }
   0xc   :  { %121 = vmatpush.bf16.msra.mxu0 %v211_v16  ;;  %v175_v47 = vor.u32 %v232_v44, %v172_v45  ;;  %v154_v49 = vld [vmem:[%s375_s2] sm:$0x3] }
   0xd   :  { %134 = vmatpush.bf16.msra.mxu1 %v215_v17  ;;  %v156_v50 = vperm.slane %v154_v49, 0  ;;  %v157_v51 = vperm.slane %v154_v49, 1 }
  0x10   :  { %122 = vmatpush.bf16.msra.mxu0 %v203_v22 }
  0x11   :  { %135 = vmatpush.bf16.msra.mxu1 %v207_v23 }
  0x14   :  { %123 = vmatpush.bf16.msra.mxu0 %v195_v28 }
  0x15   :  { %136 = vmatpush.bf16.msra.mxu1 %v199_v29 }
  0x18   :  { %124 = vmatpush.bf16.msra.mxu0 %v187_v34 }
  0x19   :  { %137 = vmatpush.bf16.msra.mxu1 %v191_v35 }
  0x1c   :  { %125 = vmatpush.bf16.msra.mxu0 %v179_v40 }
  0x1d   :  { %138 = vmatpush.bf16.msra.mxu1 %v183_v41 }
  0x20   :  { %126 = vmatpush.bf16.msra.mxu0 %v171_v46 }
  0x21   :  { %139 = vmatpush.bf16.msra.mxu1 %v175_v47 }
  0x23   :  { %127 = vmatmul.bf16.vlgmr.msra.gmra.mxu0 %v22_v48 }
  0x24   :  { %140 = vmatmul.bf16.vlgmr.msra.gmra.mxu1 %v22_v48 }
  0xa0   :  { %v128_v52 = vpop.f32.mrf.mxu0 }
  0xa1   :  { %v160_v53 = vadd.f32 %v156_v50, %v128_v52  ;;  %v141_v54 = vpop.f32.mrf.mxu1 }
  0xa2   :  { %v161_v55 = vadd.f32 %v157_v51, %v141_v54 }
  0xa4   :  { %v162_v56 = vpack.c.bf16 %v161_v55, %v160_v53 }
  0xa6   :  { %163 = vst [vmem:[%s376_s3] sm:$0xff] %v162_v56 }
  0xa8   :  { %v130_v57 = vpop.f32.mrf.mxu0 }
  0xa9   :  { %v143_v58 = vpop.f32.mrf.mxu1 }

// kernel: clsnet_forward.33
= control target key start
LH: loop header
LB: loop body
LE: loop exit
PB: predicated region body
PF: predicated region fallthrough
CT: control target
= control target key end

     0   :  { %s1223_s15 = smov 0   ;;  %s1225_s16 = smov 0   ;;  %s1377_s0 = inlined_call_operand.vmem [shape: bf16[8,2304], index: 0, kind: input, shape index: {}]   ;;  %s1378_s1 = inlined_call_operand.vmem [shape: bf16[2304,256], index: 1, kind: input, shape index: {}]   ;;  %s1379_s2 = inlined_call_operand.vmem [shape: f32[1,256], index: 2, kind: input, shape index: {}]   ;;  %s1380_s3 = inlined_call_operand.vmem [shape: bf16[8,256], index: 3, kind: input, shape index: {}]   ;;  %s1381_s4 = inlined_call_operand.vmem [shape: bf16[8,256], index: 4, kind: output, shape index: {}]  }
   0x1   :  { %s1227_s17 = smov 0  }
   0x2 LB: > { %s26_s18 = sadd.s32 1, %s1191_s16  ;;  %p897_p0 = scmp.ge.s32.totalorder %s1195_s17, 1  ;;  %s1195_s17 = sphi %s1227_s17, %s14_s17   ;;  %s1191_s16 = sphi %s1225_s16, %s1383_s16   ;;  %s1187_s15 = sphi %s1223_s15, %s1382_s15  }
   0x3   : > { %p27_p1 = scmp.ge.s32.totalorder %s26_s18, 6  ;;  %p236_p2 = scmp.lt.s32.totalorder %s1195_s17, 7 }
   0x5   : > { %s1385_s18 = smov (%p27_p1, %s26_s18), 0  ;;  %p237_p3 = pnand %p897_p0, %p236_p2 }
   0x6   : > { %s293_s19 = smul.u32 (!%p237_p3), 3, %s1187_s15  ;;  %p901_p6 = scmp.ne.s32.totalorder (!%p237_p3), %s1187_s15, 0 }
   0x7   : > { %240 = sbr.rel (%p237_p3) target bundleno = 238 (0xee), region = 36 }
   0x8   : > { %s303_s20 = smul.u32 (!%p237_p3), 48, %s1187_s15  ;;  %p296_p4 = scmp.lt.s32.totalorder (!%p237_p3), %s293_s19, 17 }
   0xa   : > { %p305_p5 = scmp.lt.s32.totalorder (!%p237_p3), %s303_s20, 287 }
   0xc   : > { %s1387_s19 = smov (!%p296_p4, %s293_s19), 17  ;;  %s1389_s20 = smov (!%p305_p5, %s303_s20), 287 }
   0xd   : > { %s898_s21 = sshll.u32 %s1387_s19, 2  ;;  %s1099_s25 = sshll.u32 %s1389_s20, 3 }
   0xe   : > { %s1248_s24 = scalar_lea.vmem %s1377_s0, %s898_s21  ;;  %s1253_s28 = scalar_lea.vmem %s1378_s1, %s1099_s25 }
   0xf   : > { %343 = sbr.rel (%p901_p6) target bundleno = 23 (0x17), region = 40 }
  0x14   : > { %v1197_v0 = vmov 0.0  }
  0x15   : > { %344 = vst [vmem:[#allocation2] sm:$0xff] %v1197_v0 }
  0x16   : > { %345 = vst [vmem:[#allocation2 + $0x8] sm:$0xff] %v1197_v0 }
  0x17 PF: > { %v960_v1 = vld [vmem:[%s1253_s28 + $0x70] sm:$0xf]  ;;  %v1115_v2 = vld [vmem:[%s1253_s28 + $0x74] sm:$0xf0]  ;;  %v952_v6 = vld [vmem:[%s1253_s28 + $0x60] sm:$0xf] }
  0x18   : > { %v1024_v3 = vld [vmem:[%s1253_s28 + $0xf0] sm:$0xf]  ;;  %v961_v4 = vor.u32 %v1115_v2, %v960_v1  ;;  %v1131_v5 = vld [vmem:[%s1253_s28 + $0xf4] sm:$0xf0]  ;;  %v1113_v7 = vld [vmem:[%s1253_s28 + $0x64] sm:$0xf0] }
  0x19   : > { %v1025_v8 = vor.u32 %v1131_v5, %v1024_v3  ;;  %v1016_v9 = vld [vmem:[%s1253_s28 + $0xe0] sm:$0xf]  ;;  %v1129_v10 = vld [vmem:[%s1253_s28 + $0xe4] sm:$0xf0]  ;;  %v953_v11 = vor.u32 %v1113_v7, %v952_v6  ;;  %v944_v12 = vld [vmem:[%s1253_s28 + $0x50] sm:$0xf] }
  0x1a   : > { %649 = vmatpush.bf16.msra.mxu0 %v961_v4  ;;  %v1017_v13 = vor.u32 %v1129_v10, %v1016_v9  ;;  %v1111_v14 = vld [vmem:[%s1253_s28 + $0x54] sm:$0xf0]  ;;  %v1088_v15 = vld [vmem:[%s1253_s28 + $0x170] sm:$0xf]  ;;  %v1080_v20 = vld [vmem:[%s1253_s28 + $0x160] sm:$0xf] }
  0x1b   : > { %662 = vmatpush.bf16.msra.mxu1 %v1025_v8  ;;  %v1147_v16 = vld [vmem:[%s1253_s28 + $0x174] sm:$0xf0]  ;;  %v1008_v17 = vld [vmem:[%s1253_s28 + $0xd0] sm:$0xf]  ;;  %v1145_v21 = vld [vmem:[%s1253_s28 + $0x164] sm:$0xf0]  ;;  %v945_v23 = vor.u32 %v1111_v14, %v944_v12 }
  0x1c   : > { %v1127_v18 = vld [vmem:[%s1253_s28 + $0xd4] sm:$0xf0]  ;;  %v1089_v19 = vor.u32 %v1147_v16, %v1088_v15  ;;  %v1114_v22 = vld [vmem:[%s1253_s28 + $0x74] sm:$0xf]  ;;  %v936_v24 = vld [vmem:[%s1253_s28 + $0x40] sm:$0xf]  ;;  %v1081_v26 = vor.u32 %v1145_v21, %v1080_v20 }
  0x1d   : > { %v1109_v25 = vld [vmem:[%s1253_s28 + $0x44] sm:$0xf0]  ;;  %v962_v27 = vld [vmem:[%s1253_s28 + $0x78] sm:$0xf0]  ;;  %v1009_v28 = vor.u32 %v1127_v18, %v1008_v17  ;;  %v1000_v29 = vld [vmem:[%s1253_s28 + $0xc0] sm:$0xf] }
  0x1e   : > { %650 = vmatpush.bf16.msra.mxu0 %v953_v11  ;;  %675 = vmatpush.bf16.msra.mxu2 %v1089_v19  ;;  %v1125_v30 = vld [vmem:[%s1253_s28 + $0xc4] sm:$0xf0]  ;;  %v965_v31 = vor.u32 %v1114_v22, %v962_v27  ;;  %v1072_v32 = vld [vmem:[%s1253_s28 + $0x150] sm:$0xf]  ;;  %v1143_v33 = vld [vmem:[%s1253_s28 + $0x154] sm:$0xf0]  ;;  %v937_v37 = vor.u32 %v1109_v25, %v936_v24 }
  0x1f   : > { %663 = vmatpush.bf16.msra.mxu1 %v1017_v13  ;;  %v1112_v34 = vld [vmem:[%s1253_s28 + $0x64] sm:$0xf]  ;;  %v954_v35 = vld [vmem:[%s1253_s28 + $0x68] sm:$0xf0]  ;;  %v928_v38 = vld [vmem:[%s1253_s28 + $0x30] sm:$0xf]  ;;  %v1073_v40 = vor.u32 %v1143_v33, %v1072_v32  ;;  %v1001_v42 = vor.u32 %v1125_v30, %v1000_v29 }
  0x20   : > { %688 = vmatpush.bf16.msra.mxu3 %v965_v31  ;;  %v957_v36 = vor.u32 %v1112_v34, %v954_v35  ;;  %v1107_v39 = vld [vmem:[%s1253_s28 + $0x34] sm:$0xf0]  ;;  %v1064_v41 = vld [vmem:[%s1253_s28 + $0x140] sm:$0xf]  ;;  %v1141_v43 = vld [vmem:[%s1253_s28 + $0x144] sm:$0xf0] }
  0x21   : > { %v1110_v44 = vld [vmem:[%s1253_s28 + $0x54] sm:$0xf]  ;;  %v946_v45 = vld [vmem:[%s1253_s28 + $0x58] sm:$0xf0]  ;;  %v992_v46 = vld [vmem:[%s1253_s28 + $0xb0] sm:$0xf]  ;;  %v929_v49 = vor.u32 %v1107_v39, %v928_v38  ;;  %v1065_v51 = vor.u32 %v1141_v43, %v1064_v41 }
  0x22   : > { %651 = vmatpush.bf16.msra.mxu0 %v945_v23  ;;  %676 = vmatpush.bf16.msra.mxu2 %v1081_v26  ;;  %v1123_v47 = vld [vmem:[%s1253_s28 + $0xb4] sm:$0xf0]  ;;  %v949_v48 = vor.u32 %v1110_v44, %v946_v45  ;;  %v920_v50 = vld [vmem:[%s1253_s28 + $0x20] sm:$0xf]  ;;  %v1108_v52 = vld [vmem:[%s1253_s28 + $0x44] sm:$0xf] }
  0x23   : > { %664 = vmatpush.bf16.msra.mxu1 %v1009_v28  ;;  %v938_v53 = vld [vmem:[%s1253_s28 + $0x48] sm:$0xf0]  ;;  %v993_v54 = vor.u32 %v1123_v47, %v992_v46  ;;  %v1105_v55 = vld [vmem:[%s1253_s28 + $0x24] sm:$0xf0]  ;;  %v1056_v56 = vld [vmem:[%s1253_s28 + $0x130] sm:$0xf] }
  0x24   : > { %689 = vmatpush.bf16.msra.mxu3 %v957_v36  ;;  %v1139_v57 = vld [vmem:[%s1253_s28 + $0x134] sm:$0xf0]  ;;  %v984_v58 = vld [vmem:[%s1253_s28 + $0xa0] sm:$0xf]  ;;  %v1121_v59 = vld [vmem:[%s1253_s28 + $0xa4] sm:$0xf0]  ;;  %v941_v60 = vor.u32 %v1108_v52, %v938_v53  ;;  %v921_v61 = vor.u32 %v1105_v55, %v920_v50 }
  0x25   : > { %v912_v62 = vld [vmem:[%s1253_s28 + $0x10] sm:$0xf]  ;;  %v1057_v63 = vor.u32 %v1139_v57, %v1056_v56  ;;  %v1106_v0 = vld [vmem:[%s1253_s28 + $0x34] sm:$0xf]  ;;  %v930_v1 = vld [vmem:[%s1253_s28 + $0x38] sm:$0xf0]  ;;  %v985_v2 = vor.u32 %v1121_v59, %v984_v58 }
  0x26   : > { %652 = vmatpush.bf16.msra.mxu0 %v937_v37  ;;  %677 = vmatpush.bf16.msra.mxu2 %v1073_v40  ;;  %v1103_v3 = vld [vmem:[%s1253_s28 + $0x14] sm:$0xf0]  ;;  %v1048_v4 = vld [vmem:[%s1253_s28 + $0x120] sm:$0xf]  ;;  %v1137_v5 = vld [vmem:[%s1253_s28 + $0x124] sm:$0xf0]  ;;  %v933_v10 = vor.u32 %v1106_v0, %v930_v1 }
  0x27   : > { %665 = vmatpush.bf16.msra.mxu1 %v1001_v42  ;;  %v976_v6 = vld [vmem:[%s1253_s28 + $0x90] sm:$0xf]  ;;  %v1119_v7 = vld [vmem:[%s1253_s28 + $0x94] sm:$0xf0]  ;;  %v904_v8 = vld [vmem:[%s1253_s28] sm:$0xf]  ;;  %v913_v11 = vor.u32 %v1103_v3, %v912_v62  ;;  %v1049_v12 = vor.u32 %v1137_v5, %v1048_v4 }
  0x28   : > { %690 = vmatpush.bf16.msra.mxu3 %v949_v48  ;;  %v1101_v9 = vld [vmem:[%s1253_s28 + $0x4] sm:$0xf0]  ;;  %v1104_v13 = vld [vmem:[%s1253_s28 + $0x24] sm:$0xf]  ;;  %v922_v14 = vld [vmem:[%s1253_s28 + $0x28] sm:$0xf0]  ;;  %v977_v16 = vor.u32 %v1119_v7, %v976_v6 }
  0x29   : > { %v348_v15 = vld [vmem:[%s1248_s24] sm:$0xff]  ;;  %v1040_v18 = vld [vmem:[%s1253_s28 + $0x110] sm:$0xf]  ;;  %v1135_v19 = vld [vmem:[%s1253_s28 + $0x114] sm:$0xf0]  ;;  %v925_v25 = vor.u32 %v1104_v13, %v922_v14  ;;  %v905_v27 = vor.u32 %v1101_v9, %v904_v8  ;;  %p1094_p7 = scmp.ne.s32.totalorder %s1187_s15, 5 }
  0x2a   : > { %653 = vmatpush.bf16.msra.mxu0 %v929_v49  ;;  %678 = vmatpush.bf16.msra.mxu2 %v1065_v51  ;;  %v968_v17 = vld [vmem:[%s1253_s28 + $0x80] sm:$0xf]  ;;  %v1117_v20 = vld [vmem:[%s1253_s28 + $0x84] sm:$0xf0]  ;;  %v1130_v21 = vld [vmem:[%s1253_s28 + $0xf4] sm:$0xf]  ;;  %v400_v26 = vunpack.c.l.b16 %v348_v15  ;;  %v1041_v28 = vor.u32 %v1135_v19, %v1040_v18  ;;  %v401_v29 = vunpack.c.h.b16 %v348_v15 }
  0x2b   : > { %666 = vmatpush.bf16.msra.mxu1 %v993_v54  ;;  %v1026_v22 = vld [vmem:[%s1253_s28 + $0xf8] sm:$0xf0]  ;;  %v1146_v23 = vld [vmem:[%s1253_s28 + $0x174] sm:$0xf]  ;;  %v349_v32 = vld [vmem:[%s1248_s24 + $0x8] sm:$0xf]  ;;  %v969_v33 = vor.u32 %v1117_v20, %v968_v17 }
  0x2c   : > { %691 = vmatpush.bf16.msra.mxu3 %v941_v60  ;;  %v1090_v24 = vld [vmem:[%s1253_s28 + $0x178] sm:$0xf0]  ;;  %v1102_v30 = vld [vmem:[%s1253_s28 + $0x14] sm:$0xf]  ;;  %v1029_v34 = vor.u32 %v1130_v21, %v1026_v22  ;;  %v1032_v35 = vld [vmem:[%s1253_s28 + $0x100] sm:$0xf]  ;;  %v403_v42 = vpack.c.b16 %v400_v26, %v400_v26  ;;  %v402_v44 = vunpack.c.l.b16 %v349_v32  ;;  %v1328_v45 = vpack.c.b16 %v401_v29, %v401_v29 }
  0x2d   : > { %v914_v31 = vld [vmem:[%s1253_s28 + $0x18] sm:$0xf0]  ;;  %v1133_v36 = vld [vmem:[%s1253_s28 + $0x104] sm:$0xf0]  ;;  %v1093_v37 = vor.u32 %v1146_v23, %v1090_v24  ;;  %v1128_v38 = vld [vmem:[%s1253_s28 + $0xe4] sm:$0xf] }
  0x2e   : > { %654 = vmatpush.bf16.msra.mxu0 %v921_v61  ;;  %679 = vmatpush.bf16.msra.mxu2 %v1057_v63  ;;  %v1018_v39 = vld [vmem:[%s1253_s28 + $0xe8] sm:$0xf0]  ;;  %v1144_v40 = vld [vmem:[%s1253_s28 + $0x164] sm:$0xf]  ;;  %v917_v43 = vor.u32 %v1102_v30, %v914_v31  ;;  %v1033_v46 = vor.u32 %v1133_v36, %v1032_v35  ;;  %v1126_v51 = vld [vmem:[%s1253_s28 + $0xd4] sm:$0xf]  ;;  %v405_v55 = vpack.c.b16 %v402_v44, %v402_v44 }
  0x2f   : > { %667 = vmatpush.bf16.msra.mxu1 %v985_v2  ;;  %v1082_v41 = vld [vmem:[%s1253_s28 + $0x168] sm:$0xf0]  ;;  %v1100_v47 = vld [vmem:[%s1253_s28 + $0x4] sm:$0xf]  ;;  %v1021_v49 = vor.u32 %v1128_v38, %v1018_v39  ;;  %v1010_v52 = vld [vmem:[%s1253_s28 + $0xd8] sm:$0xf0] }
  0x30   : > { %692 = vmatpush.bf16.msra.mxu3 %v933_v10  ;;  %v906_v48 = vld [vmem:[%s1253_s28 + $0x8] sm:$0xf0]  ;;  %v1085_v50 = vor.u32 %v1144_v40, %v1082_v41  ;;  %v1142_v53 = vld [vmem:[%s1253_s28 + $0x154] sm:$0xf]  ;;  %v1074_v54 = vld [vmem:[%s1253_s28 + $0x158] sm:$0xf0]  ;;  %v1013_v57 = vor.u32 %v1126_v51, %v1010_v52 }
  0x31   : > { %v909_v56 = vor.u32 %v1100_v47, %v906_v48  ;;  %v1077_v58 = vor.u32 %v1142_v53, %v1074_v54  ;;  %v1124_v59 = vld [vmem:[%s1253_s28 + $0xc4] sm:$0xf]  ;;  %v1002_v60 = vld [vmem:[%s1253_s28 + $0xc8] sm:$0xf0]  ;;  %v1122_v1 = vld [vmem:[%s1253_s28 + $0xb4] sm:$0xf] }
  0x32   : > { %655 = vmatpush.bf16.msra.mxu0 %v913_v11  ;;  %680 = vmatpush.bf16.msra.mxu2 %v1049_v12  ;;  %v1140_v61 = vld [vmem:[%s1253_s28 + $0x144] sm:$0xf]  ;;  %v1066_v62 = vld [vmem:[%s1253_s28 + $0x148] sm:$0xf0]  ;;  %v1005_v63 = vor.u32 %v1124_v59, %v1002_v60  ;;  %v994_v2 = vld [vmem:[%s1253_s28 + $0xb8] sm:$0xf0] }
  0x33   : > { %668 = vmatpush.bf16.msra.mxu1 %v977_v16  ;;  %v1069_v0 = vor.u32 %v1140_v61, %v1066_v62  ;;  %v1138_v3 = vld [vmem:[%s1253_s28 + $0x134] sm:$0xf]  ;;  %v1058_v4 = vld [vmem:[%s1253_s28 + $0x138] sm:$0xf0]  ;;  %v997_v5 = vor.u32 %v1122_v1, %v994_v2  ;;  %v1120_v7 = vld [vmem:[%s1253_s28 + $0xa4] sm:$0xf] }
  0x34   : > { %693 = vmatpush.bf16.msra.mxu3 %v925_v25  ;;  %v1061_v6 = vor.u32 %v1138_v3, %v1058_v4  ;;  %v986_v8 = vld [vmem:[%s1253_s28 + $0xa8] sm:$0xf0]  ;;  %v1136_v9 = vld [vmem:[%s1253_s28 + $0x124] sm:$0xf]  ;;  %v1118_v13 = vld [vmem:[%s1253_s28 + $0x94] sm:$0xf] }
  0x35   : > { %v1050_v10 = vld [vmem:[%s1253_s28 + $0x128] sm:$0xf0]  ;;  %v989_v11 = vor.u32 %v1120_v7, %v986_v8  ;;  %v978_v14 = vld [vmem:[%s1253_s28 + $0x98] sm:$0xf0]  ;;  %v1134_v15 = vld [vmem:[%s1253_s28 + $0x114] sm:$0xf] }
  0x36   : > { %656 = vmatpush.bf16.msra.mxu0 %v905_v27  ;;  %681 = vmatpush.bf16.msra.mxu2 %v1041_v28  ;;  %v1053_v12 = vor.u32 %v1136_v9, %v1050_v10  ;;  %v1042_v16 = vld [vmem:[%s1253_s28 + $0x118] sm:$0xf0]  ;;  %v981_v17 = vor.u32 %v1118_v13, %v978_v14  ;;  %v1116_v19 = vld [vmem:[%s1253_s28 + $0x84] sm:$0xf]  ;;  %v970_v20 = vld [vmem:[%s1253_s28 + $0x88] sm:$0xf0] }
  0x37   : > { %669 = vmatpush.bf16.msra.mxu1 %v969_v33  ;;  %v1045_v18 = vor.u32 %v1134_v15, %v1042_v16  ;;  %v1132_v21 = vld [vmem:[%s1253_s28 + $0x104] sm:$0xf]  ;;  %v1034_v22 = vld [vmem:[%s1253_s28 + $0x108] sm:$0xf0]  ;;  %v973_v23 = vor.u32 %v1116_v19, %v970_v20 }
  0x38   : > { %694 = vmatpush.bf16.msra.mxu3 %v917_v43  ;;  %v1037_v24 = vor.u32 %v1132_v21, %v1034_v22  ;;  %v346_v30 = vld [vmem:[#allocation2] sm:$0xff]  ;;  %v347_v40 = vld [vmem:[#allocation2 + $0x8] sm:$0xff] }
  0x39   : > { %657 = vmatmul.bf16.vlgmr.msra.gmra.mxu0 %v403_v42 }
  0x3a   : > { %701 = vmatpush.bf16.msrb.mxu0 %v1029_v34  ;;  %670 = vmatmul.bf16.vlgmr.msra.gmra.mxu1 %v1328_v45 }
  0x3b   : > { %714 = vmatpush.bf16.msrb.mxu1 %v1093_v37  ;;  %682 = vmatpush.bf16.msra.mxu2 %v1033_v46 }
  0x3c   : > { %695 = vmatpush.bf16.msra.mxu3 %v909_v56 }
  0x3e   : > { %702 = vmatpush.bf16.msrb.mxu0 %v1021_v49  ;;  %683 = vmatmul.bf16.vlgmr.msra.gmra.mxu2 %v405_v55 }
  0x3f   : > { %715 = vmatpush.bf16.msrb.mxu1 %v1085_v50  ;;  %696 = vmatmul.bf16.vlgmr.msra.gmra.mxu3 %v403_v42 }
  0x42   : > { %703 = vmatpush.bf16.msrb.mxu0 %v1013_v57 }
  0x43   : > { %716 = vmatpush.bf16.msrb.mxu1 %v1077_v58 }
  0x46   : > { %704 = vmatpush.bf16.msrb.mxu0 %v1005_v63 }
  0x47   : > { %717 = vmatpush.bf16.msrb.mxu1 %v1069_v0 }
  0x4a   : > { %705 = vmatpush.bf16.msrb.mxu0 %v997_v5 }
  0x4b   : > { %718 = vmatpush.bf16.msrb.mxu1 %v1061_v6 }
  0x4e   : > { %706 = vmatpush.bf16.msrb.mxu0 %v989_v11 }
  0x4f   : > { %719 = vmatpush.bf16.msrb.mxu1 %v1053_v12 }
  0x52   : > { %707 = vmatpush.bf16.msrb.mxu0 %v981_v17 }
  0x53   : > { %720 = vmatpush.bf16.msrb.mxu1 %v1045_v18 }
  0x56   : > { %708 = vmatpush.bf16.msrb.mxu0 %v973_v23 }
  0x57   : > { %721 = vmatpush.bf16.msrb.mxu1 %v1037_v24 }
  0x59   : > { %709 = vmatmul.bf16.vlgmr.msrb.gmra.mxu0 %v1328_v45 }
  0x5a   : > { %722 = vmatmul.bf16.vlgmr.msrb.gmra.mxu1 %v405_v55 }
  0xb6   : > { %v658_v25 = vpop.f32.mrf.mxu0 }
  0xb7   : > { %v671_v26 = vpop.f32.mrf.mxu1 }
  0xb8   : > { %v672_v27 = vadd.f32 %v671_v26, %v658_v25 }
  0xbe   : > { %v660_v28 = vpop.f32.mrf.mxu0 }
  0xbf   : > { %v673_v29 = vpop.f32.mrf.mxu1 }
  0xc1   : > { %v684_v31 = vpop.f32.mrf.mxu2 }
  0xc2   : > { %v685_v32 = vadd.f32 %v684_v31, %v672_v27  ;;  %v697_v34 = vpop.f32.mrf.mxu3 }
  0xc4   : > { %v727_v33 = vadd.f32 %v685_v32, %v346_v30 }
  0xc6   : > { %729 = vst [vmem:[#allocation2] sm:$0xff] %v727_v33 }
  0xc9   : > { %v686_v35 = vpop.f32.mrf.mxu2 }
  0xca   : > { %v699_v36 = vpop.f32.mrf.mxu3 }
  0xd6   : > { %v710_v37 = vpop.f32.mrf.mxu0 }
  0xd7   : > { %v711_v38 = vadd.f32 %v710_v37, %v697_v34  ;;  %v723_v39 = vpop.f32.mrf.mxu1 }
  0xd9   : > { %v724_v41 = vadd.f32 %v723_v39, %v711_v38 }
  0xdb   : > { %v728_v42 = vadd.f32 %v724_v41, %v347_v40  ;;  %734 = sbr.rel (%p1094_p7) target bundleno = 238 (0xee), region = 44 }
  0xdd   : > { %730 = vst [vmem:[#allocation2 + $0x8] sm:$0xff] %v728_v42 }
  0xde   : > { %v712_v43 = vpop.f32.mrf.mxu0 }
  0xdf   : > { %v725_v44 = vpop.f32.mrf.mxu1 }
  0xe0   : > { %v735_v45 = vld [vmem:[#allocation2] sm:$0xff] }
  0xe1   : > { %v737_v47 = vld [vmem:[%s1379_s2] sm:$0x3] }
  0xe2   : > { %v739_v48 = vperm.slane %v737_v47, 0  ;;  %v740_v49 = vperm.slane %v737_v47, 1  ;;  %v745_v50 = vld [vmem:[%s1380_s3] sm:$0xff] }
  0xe3   : > { %v746_v51 = vunpack.c.l.bf16 %v745_v50  ;;  %v747_v52 = vunpack.c.h.bf16 %v745_v50 }
  0xe4   : > { %v736_v46 = vld [vmem:[#allocation2 + $0x8] sm:$0xff]  ;;  %v743_v53 = vadd.f32 %v739_v48, %v735_v45 }
  0xe5   : > { %v744_v54 = vadd.f32 %v740_v49, %v736_v46 }
  0xe6   : > { %v748_v55 = vadd.f32 %v746_v51, %v743_v53 }
  0xe7   : > { %v749_v56 = vadd.f32 %v747_v52, %v744_v54 }
  0xe8   : > { %v750_v57 = vmax.f32 %v748_v55, 0.0 }
  0xe9   : > { %v751_v58 = vmax.f32 %v749_v56, 0.0 }
  0xeb   : > { %v752_v59 = vpack.c.bf16 %v751_v58, %v750_v57 }
  0xed   : > { %753 = vst [vmem:[%s1381_s4] sm:$0xff] %v752_v59 }
  0xee PF: > { %s14_s17 = sadd.s32 1, %s1195_s17   ;;  %s1382_s15 = smov %s1191_s16 }
  0xef   : > { %p11_p8 = scmp.ge.s32.totalorder %s14_s17, 8   ;;  %s1383_s16 = smov %s1385_s18 }
  0xf1   :  { %13 = sbr.rel (!%p11_p8) target bundleno = 2 (0x2), region = 83 }

// kernel: clsnet_forward.34
= control target key start
LH: loop header
LB: loop body
LE: loop exit
PB: predicated region body
PF: predicated region fallthrough
CT: control target
= control target key end

     0   :  { %8 = vsyncpa [#allocation4], 0  ;;  %s1436_s0 = inlined_call_operand.vmem [shape: bf16[8,2304], index: 0, kind: input, shape index: {}]   ;;  %s1437_s1 = inlined_call_operand.hbm [shape: bf16[2304,256], index: 1, kind: input, shape index: {}]   ;;  %s1438_s2 = inlined_call_operand.vmem [shape: f32[1,256], index: 2, kind: input, shape index: {}]   ;;  %s1439_s3 = inlined_call_operand.vmem [shape: bf16[8,256], index: 3, kind: output, shape index: {}]  }
   0x1   :  { %10 = vsyncpa [#allocation4 + $0x1], 0  ;;  %s1241_s12 = smov 0   ;;  %s1243_s13 = smov 0  }
   0x2   :  { %s1245_s14 = smov 0   ;;  %s1247_s15 = smov 0  }
   0x3   :  { %s1249_s16 = smov 0   ;;  %s1251_s17 = smov 0  }
   0x4 LB: > { %s819_s18 = sadd.s32 4294967295, %s1216_s17   ;;  %s28_s19 = sadd.s32 1, %s1212_s16  ;;  %s1216_s17 = sphi %s1251_s17, %s16_s17   ;;  %s1212_s16 = sphi %s1249_s16, %s1445_s16   ;;  %s1208_s15 = sphi %s1247_s15, %s1444_s15   ;;  %s1204_s14 = sphi %s1245_s14, %s1443_s14   ;;  %s1200_s13 = sphi %s1243_s13, %s1442_s13   ;;  %s1196_s12 = sphi %s1241_s12, %s1441_s12  }
   0x5   : > { %p29_p0 = scmp.ge.s32.totalorder %s28_s19, 6  ;;  %s72_s20 = sadd.s32 1, %s1204_s14 }
   0x6   : > { %p79_p1 = scmp.ne.s32.totalorder %s1204_s14, %s1200_s13  ;;  %p80_p2 = scmp.eq.s32.totalorder %s1216_s17, 0 }
   0x7   : > { %s1447_s19 = smov (%p29_p0, %s28_s19), 0  ;;  %p85_p4 = scmp.ne.s32.totalorder %s1200_s13, %s1196_s12 }
   0x8   : > { %p81_p3 = por %p80_p2, %p79_p1  ;;  %s67_s21 = ssub.s32 %s1212_s16, %s1447_s19 }
   0x9   : > { %p86_p5 = scmp.eq.s32.totalorder %s819_s18, 0  ;;  %p70_p6 = scmp.eq.s32.totalorder %s67_s21, 0 }
   0xa   : > { %p1084_p8 = scmp.lt.s32.totalorder %s1216_s17, 6  ;;  %s184_s24 = sand.u32 1, %s1204_s14  }
   0xb   : > { %p1280_p7 = por %p86_p5, %p85_p4  ;;  %s1075_s25 = smul.u32 384, %s1212_s16 }
   0xc   : > { %s1286_s23 = scalar_select %p70_p6, %s1204_s14, %s72_s20  }
   0xd   : > { %s1076_s26 = smul.u32 384, %s184_s24  ;;  %s196_s29 = scalar_lea.hbm %s1437_s1, %s1075_s25 }
   0xe   : > { %p1081_p9 = pnand %p1084_p8, %p81_p3  ;;  %s197_s30 = sshll.u32 %s196_s29, 4  ;;  %s198_s30 = int_to_ptr.hbm [resolvable:$true] %s197_s30 }
   0xf   : > { %s188_s4 = scalar_lea.vmem [#allocation3], %s1076_s26  ;;  %s185_s6 = scalar_lea.sflag [#allocation4], %s184_s24 }
  0x10   : > { %s199_s5 = sshll.u32 %s188_s4, 4  ;;  %s1218_s7 = smov 128   ;;  %s200_s5 = int_to_ptr.vmem [resolvable:$true] %s199_s5 }
  0x11   : > { %s1219_s8 = smov 8   ;;  %p825_p10 = scmp.ge.s32.totalorder %s1216_s17, 1 }
  0x12   : > { %1083 = dma.hbm_to_vmem [thread:$0]  (!%p1081_p9), %s198_s30, 6144, %s200_s5, %s185_s6, %s1218_s7, %s1218_s7, %s1219_s8  }
  0x13   : > { %p207_p11 = scmp.lt.s32.totalorder %s1216_s17, 7 }
  0x15   : > { %p208_p12 = pnand %p825_p10, %p207_p11 }
  0x16   : > { %s213_s9 = sand.u32 (!%p208_p12), 1, %s1200_s13  }
  0x17   : > { %211 = sbr.rel (%p208_p12) target bundleno = 252 (0xfc), region = 32  ;;  %s214_s11 = scalar_lea.sflag (!%p208_p12), [#allocation4], %s213_s9 }
  0x18   : > { %s1077_s10 = smul.u32 (!%p208_p12), 384, %s213_s9 }
  0x1a   : > { %s1296_s12 = scalar_lea.vmem (!%p208_p12), [#allocation3], %s1077_s10 }
  0x1c   : > { %1191 = dma.done.wait (%p1280_p7), %s214_s11, 6144  }
  0x1d   : > { %1193 = vsyncadd (%p1280_p7), %s214_s11, 4294961152  ;;  %s258_s18 = smul.u32 3, %s1208_s15  ;;  %p827_p0 = scmp.ne.s32.totalorder %s1208_s15, 0 }
  0x1f   : > { %p261_p13 = scmp.lt.s32.totalorder %s258_s18, 17  ;;  %288 = sbr.rel (%p827_p0) target bundleno = 39 (0x27), region = 40 }
  0x21   : > { %s1449_s18 = smov (!%p261_p13, %s258_s18), 17 }
  0x22   : > { %s826_s20 = sshll.u32 %s1449_s18, 2 }
  0x23   : > { %s1306_s25 = scalar_lea.vmem %s1436_s0, %s826_s20 }
  0x24   : > { %v1220_v0 = vmov 0.0  }
  0x25   : > { %289 = vst [vmem:[#allocation2] sm:$0xff] %v1220_v0 }
  0x26   : > { %290 = vst [vmem:[#allocation2 + $0x8] sm:$0xff] %v1220_v0 }
  0x27 PF: > { %v886_v1 = vld [vmem:[%s1296_s12 + $0x70] sm:$0xf]  ;;  %v1042_v2 = vld [vmem:[%s1296_s12 + $0x74] sm:$0xf0]  ;;  %v878_v6 = vld [vmem:[%s1296_s12 + $0x60] sm:$0xf] }
  0x28   : > { %v950_v3 = vld [vmem:[%s1296_s12 + $0xf0] sm:$0xf]  ;;  %v887_v4 = vor.u32 %v1042_v2, %v886_v1  ;;  %v1058_v5 = vld [vmem:[%s1296_s12 + $0xf4] sm:$0xf0]  ;;  %v1040_v7 = vld [vmem:[%s1296_s12 + $0x64] sm:$0xf0] }
  0x29   : > { %v951_v8 = vor.u32 %v1058_v5, %v950_v3  ;;  %v942_v9 = vld [vmem:[%s1296_s12 + $0xe0] sm:$0xf]  ;;  %v1056_v10 = vld [vmem:[%s1296_s12 + $0xe4] sm:$0xf0]  ;;  %v879_v11 = vor.u32 %v1040_v7, %v878_v6  ;;  %v870_v12 = vld [vmem:[%s1296_s12 + $0x50] sm:$0xf] }
  0x2a   : > { %594 = vmatpush.bf16.msra.mxu0 %v887_v4  ;;  %v943_v13 = vor.u32 %v1056_v10, %v942_v9  ;;  %v1038_v14 = vld [vmem:[%s1296_s12 + $0x54] sm:$0xf0]  ;;  %v1014_v15 = vld [vmem:[%s1296_s12 + $0x170] sm:$0xf]  ;;  %v1006_v20 = vld [vmem:[%s1296_s12 + $0x160] sm:$0xf] }
  0x2b   : > { %607 = vmatpush.bf16.msra.mxu1 %v951_v8  ;;  %v1074_v16 = vld [vmem:[%s1296_s12 + $0x174] sm:$0xf0]  ;;  %v934_v17 = vld [vmem:[%s1296_s12 + $0xd0] sm:$0xf]  ;;  %v1072_v21 = vld [vmem:[%s1296_s12 + $0x164] sm:$0xf0]  ;;  %v871_v23 = vor.u32 %v1038_v14, %v870_v12 }
  0x2c   : > { %v1054_v18 = vld [vmem:[%s1296_s12 + $0xd4] sm:$0xf0]  ;;  %v1015_v19 = vor.u32 %v1074_v16, %v1014_v15  ;;  %v1041_v22 = vld [vmem:[%s1296_s12 + $0x74] sm:$0xf]  ;;  %v862_v24 = vld [vmem:[%s1296_s12 + $0x40] sm:$0xf]  ;;  %v1007_v26 = vor.u32 %v1072_v21, %v1006_v20 }
  0x2d   : > { %v1036_v25 = vld [vmem:[%s1296_s12 + $0x44] sm:$0xf0]  ;;  %v888_v27 = vld [vmem:[%s1296_s12 + $0x78] sm:$0xf0]  ;;  %v935_v28 = vor.u32 %v1054_v18, %v934_v17  ;;  %v926_v29 = vld [vmem:[%s1296_s12 + $0xc0] sm:$0xf] }
  0x2e   : > { %595 = vmatpush.bf16.msra.mxu0 %v879_v11  ;;  %620 = vmatpush.bf16.msra.mxu2 %v1015_v19  ;;  %v1052_v30 = vld [vmem:[%s1296_s12 + $0xc4] sm:$0xf0]  ;;  %v891_v31 = vor.u32 %v1041_v22, %v888_v27  ;;  %v998_v32 = vld [vmem:[%s1296_s12 + $0x150] sm:$0xf]  ;;  %v1070_v33 = vld [vmem:[%s1296_s12 + $0x154] sm:$0xf0]  ;;  %v863_v37 = vor.u32 %v1036_v25, %v862_v24 }
  0x2f   : > { %608 = vmatpush.bf16.msra.mxu1 %v943_v13  ;;  %v1039_v34 = vld [vmem:[%s1296_s12 + $0x64] sm:$0xf]  ;;  %v880_v35 = vld [vmem:[%s1296_s12 + $0x68] sm:$0xf0]  ;;  %v854_v38 = vld [vmem:[%s1296_s12 + $0x30] sm:$0xf]  ;;  %v999_v40 = vor.u32 %v1070_v33, %v998_v32  ;;  %v927_v42 = vor.u32 %v1052_v30, %v926_v29 }
  0x30   : > { %633 = vmatpush.bf16.msra.mxu3 %v891_v31  ;;  %v883_v36 = vor.u32 %v1039_v34, %v880_v35  ;;  %v1034_v39 = vld [vmem:[%s1296_s12 + $0x34] sm:$0xf0]  ;;  %v990_v41 = vld [vmem:[%s1296_s12 + $0x140] sm:$0xf]  ;;  %v1068_v43 = vld [vmem:[%s1296_s12 + $0x144] sm:$0xf0] }
  0x31   : > { %v1037_v44 = vld [vmem:[%s1296_s12 + $0x54] sm:$0xf]  ;;  %v872_v45 = vld [vmem:[%s1296_s12 + $0x58] sm:$0xf0]  ;;  %v918_v46 = vld [vmem:[%s1296_s12 + $0xb0] sm:$0xf]  ;;  %v855_v49 = vor.u32 %v1034_v39, %v854_v38  ;;  %v991_v51 = vor.u32 %v1068_v43, %v990_v41 }
  0x32   : > { %596 = vmatpush.bf16.msra.mxu0 %v871_v23  ;;  %621 = vmatpush.bf16.msra.mxu2 %v1007_v26  ;;  %v1050_v47 = vld [vmem:[%s1296_s12 + $0xb4] sm:$0xf0]  ;;  %v875_v48 = vor.u32 %v1037_v44, %v872_v45  ;;  %v846_v50 = vld [vmem:[%s1296_s12 + $0x20] sm:$0xf]  ;;  %v1035_v52 = vld [vmem:[%s1296_s12 + $0x44] sm:$0xf] }
  0x33   : > { %609 = vmatpush.bf16.msra.mxu1 %v935_v28  ;;  %v864_v53 = vld [vmem:[%s1296_s12 + $0x48] sm:$0xf0]  ;;  %v919_v54 = vor.u32 %v1050_v47, %v918_v46  ;;  %v1032_v55 = vld [vmem:[%s1296_s12 + $0x24] sm:$0xf0]  ;;  %v982_v56 = vld [vmem:[%s1296_s12 + $0x130] sm:$0xf] }
  0x34   : > { %634 = vmatpush.bf16.msra.mxu3 %v883_v36  ;;  %v1066_v57 = vld [vmem:[%s1296_s12 + $0x134] sm:$0xf0]  ;;  %v910_v58 = vld [vmem:[%s1296_s12 + $0xa0] sm:$0xf]  ;;  %v1048_v59 = vld [vmem:[%s1296_s12 + $0xa4] sm:$0xf0]  ;;  %v867_v60 = vor.u32 %v1035_v52, %v864_v53  ;;  %v847_v61 = vor.u32 %v1032_v55, %v846_v50 }
  0x35   : > { %v838_v62 = vld [vmem:[%s1296_s12 + $0x10] sm:$0xf]  ;;  %v983_v63 = vor.u32 %v1066_v57, %v982_v56  ;;  %v1033_v0 = vld [vmem:[%s1296_s12 + $0x34] sm:$0xf]  ;;  %v856_v1 = vld [vmem:[%s1296_s12 + $0x38] sm:$0xf0]  ;;  %v911_v2 = vor.u32 %v1048_v59, %v910_v58 }
  0x36   : > { %597 = vmatpush.bf16.msra.mxu0 %v863_v37  ;;  %622 = vmatpush.bf16.msra.mxu2 %v999_v40  ;;  %v1030_v3 = vld [vmem:[%s1296_s12 + $0x14] sm:$0xf0]  ;;  %v974_v4 = vld [vmem:[%s1296_s12 + $0x120] sm:$0xf]  ;;  %v1064_v5 = vld [vmem:[%s1296_s12 + $0x124] sm:$0xf0]  ;;  %v859_v10 = vor.u32 %v1033_v0, %v856_v1 }
  0x37   : > { %610 = vmatpush.bf16.msra.mxu1 %v927_v42  ;;  %v902_v6 = vld [vmem:[%s1296_s12 + $0x90] sm:$0xf]  ;;  %v1046_v7 = vld [vmem:[%s1296_s12 + $0x94] sm:$0xf0]  ;;  %v830_v8 = vld [vmem:[%s1296_s12] sm:$0xf]  ;;  %v839_v11 = vor.u32 %v1030_v3, %v838_v62  ;;  %v975_v12 = vor.u32 %v1064_v5, %v974_v4 }
  0x38   : > { %635 = vmatpush.bf16.msra.mxu3 %v875_v48  ;;  %v1028_v9 = vld [vmem:[%s1296_s12 + $0x4] sm:$0xf0]  ;;  %v1031_v13 = vld [vmem:[%s1296_s12 + $0x24] sm:$0xf]  ;;  %v848_v14 = vld [vmem:[%s1296_s12 + $0x28] sm:$0xf0]  ;;  %v903_v16 = vor.u32 %v1046_v7, %v902_v6 }
  0x39   : > { %v293_v15 = vld [vmem:[%s1306_s25] sm:$0xff]  ;;  %v894_v17 = vld [vmem:[%s1296_s12 + $0x80] sm:$0xf]  ;;  %v1062_v19 = vld [vmem:[%s1296_s12 + $0x114] sm:$0xf0]  ;;  %v851_v25 = vor.u32 %v1031_v13, %v848_v14  ;;  %v831_v27 = vor.u32 %v1028_v9, %v830_v8  ;;  %p1020_p1 = scmp.ne.s32.totalorder %s1208_s15, 5 }
  0x3a   : > { %598 = vmatpush.bf16.msra.mxu0 %v855_v49  ;;  %623 = vmatpush.bf16.msra.mxu2 %v991_v51  ;;  %v966_v18 = vld [vmem:[%s1296_s12 + $0x110] sm:$0xf]  ;;  %v1044_v20 = vld [vmem:[%s1296_s12 + $0x84] sm:$0xf0]  ;;  %v1057_v21 = vld [vmem:[%s1296_s12 + $0xf4] sm:$0xf]  ;;  %v345_v26 = vunpack.c.l.b16 %v293_v15  ;;  %v346_v29 = vunpack.c.h.b16 %v293_v15 }
  0x3b   : > { %611 = vmatpush.bf16.msra.mxu1 %v919_v54  ;;  %v952_v22 = vld [vmem:[%s1296_s12 + $0xf8] sm:$0xf0]  ;;  %v1073_v23 = vld [vmem:[%s1296_s12 + $0x174] sm:$0xf]  ;;  %v967_v28 = vor.u32 %v1062_v19, %v966_v18  ;;  %v294_v32 = vld [vmem:[%s1306_s25 + $0x8] sm:$0xf]  ;;  %v895_v33 = vor.u32 %v1044_v20, %v894_v17 }
  0x3c   : > { %636 = vmatpush.bf16.msra.mxu3 %v867_v60  ;;  %v1016_v24 = vld [vmem:[%s1296_s12 + $0x178] sm:$0xf0]  ;;  %v1029_v30 = vld [vmem:[%s1296_s12 + $0x14] sm:$0xf]  ;;  %v955_v34 = vor.u32 %v1057_v21, %v952_v22  ;;  %v958_v35 = vld [vmem:[%s1296_s12 + $0x100] sm:$0xf]  ;;  %v348_v42 = vpack.c.b16 %v345_v26, %v345_v26  ;;  %v347_v44 = vunpack.c.l.b16 %v294_v32  ;;  %v1381_v45 = vpack.c.b16 %v346_v29, %v346_v29 }
  0x3d   : > { %v840_v31 = vld [vmem:[%s1296_s12 + $0x18] sm:$0xf0]  ;;  %v1060_v36 = vld [vmem:[%s1296_s12 + $0x104] sm:$0xf0]  ;;  %v1019_v37 = vor.u32 %v1073_v23, %v1016_v24  ;;  %v1055_v38 = vld [vmem:[%s1296_s12 + $0xe4] sm:$0xf] }
  0x3e   : > { %599 = vmatpush.bf16.msra.mxu0 %v847_v61  ;;  %624 = vmatpush.bf16.msra.mxu2 %v983_v63  ;;  %v944_v39 = vld [vmem:[%s1296_s12 + $0xe8] sm:$0xf0]  ;;  %v1071_v40 = vld [vmem:[%s1296_s12 + $0x164] sm:$0xf]  ;;  %v843_v43 = vor.u32 %v1029_v30, %v840_v31  ;;  %v959_v46 = vor.u32 %v1060_v36, %v958_v35  ;;  %v1053_v51 = vld [vmem:[%s1296_s12 + $0xd4] sm:$0xf]  ;;  %v350_v55 = vpack.c.b16 %v347_v44, %v347_v44 }
  0x3f   : > { %612 = vmatpush.bf16.msra.mxu1 %v911_v2  ;;  %v1008_v41 = vld [vmem:[%s1296_s12 + $0x168] sm:$0xf0]  ;;  %v1027_v47 = vld [vmem:[%s1296_s12 + $0x4] sm:$0xf]  ;;  %v947_v49 = vor.u32 %v1055_v38, %v944_v39  ;;  %v936_v52 = vld [vmem:[%s1296_s12 + $0xd8] sm:$0xf0] }
  0x40   : > { %637 = vmatpush.bf16.msra.mxu3 %v859_v10  ;;  %v832_v48 = vld [vmem:[%s1296_s12 + $0x8] sm:$0xf0]  ;;  %v1011_v50 = vor.u32 %v1071_v40, %v1008_v41  ;;  %v1069_v53 = vld [vmem:[%s1296_s12 + $0x154] sm:$0xf]  ;;  %v1000_v54 = vld [vmem:[%s1296_s12 + $0x158] sm:$0xf0]  ;;  %v939_v57 = vor.u32 %v1053_v51, %v936_v52 }
  0x41   : > { %v835_v56 = vor.u32 %v1027_v47, %v832_v48  ;;  %v1003_v58 = vor.u32 %v1069_v53, %v1000_v54  ;;  %v1051_v59 = vld [vmem:[%s1296_s12 + $0xc4] sm:$0xf]  ;;  %v928_v60 = vld [vmem:[%s1296_s12 + $0xc8] sm:$0xf0]  ;;  %v1049_v1 = vld [vmem:[%s1296_s12 + $0xb4] sm:$0xf] }
  0x42   : > { %600 = vmatpush.bf16.msra.mxu0 %v839_v11  ;;  %625 = vmatpush.bf16.msra.mxu2 %v975_v12  ;;  %v1067_v61 = vld [vmem:[%s1296_s12 + $0x144] sm:$0xf]  ;;  %v992_v62 = vld [vmem:[%s1296_s12 + $0x148] sm:$0xf0]  ;;  %v931_v63 = vor.u32 %v1051_v59, %v928_v60  ;;  %v920_v2 = vld [vmem:[%s1296_s12 + $0xb8] sm:$0xf0] }
  0x43   : > { %613 = vmatpush.bf16.msra.mxu1 %v903_v16  ;;  %v995_v0 = vor.u32 %v1067_v61, %v992_v62  ;;  %v1065_v3 = vld [vmem:[%s1296_s12 + $0x134] sm:$0xf]  ;;  %v984_v4 = vld [vmem:[%s1296_s12 + $0x138] sm:$0xf0]  ;;  %v923_v5 = vor.u32 %v1049_v1, %v920_v2  ;;  %v1047_v7 = vld [vmem:[%s1296_s12 + $0xa4] sm:$0xf] }
  0x44   : > { %638 = vmatpush.bf16.msra.mxu3 %v851_v25  ;;  %v987_v6 = vor.u32 %v1065_v3, %v984_v4  ;;  %v912_v8 = vld [vmem:[%s1296_s12 + $0xa8] sm:$0xf0]  ;;  %v1063_v9 = vld [vmem:[%s1296_s12 + $0x124] sm:$0xf]  ;;  %v1045_v13 = vld [vmem:[%s1296_s12 + $0x94] sm:$0xf] }
  0x45   : > { %v976_v10 = vld [vmem:[%s1296_s12 + $0x128] sm:$0xf0]  ;;  %v915_v11 = vor.u32 %v1047_v7, %v912_v8  ;;  %v904_v14 = vld [vmem:[%s1296_s12 + $0x98] sm:$0xf0]  ;;  %v1061_v15 = vld [vmem:[%s1296_s12 + $0x114] sm:$0xf] }
  0x46   : > { %601 = vmatpush.bf16.msra.mxu0 %v831_v27  ;;  %626 = vmatpush.bf16.msra.mxu2 %v967_v28  ;;  %v979_v12 = vor.u32 %v1063_v9, %v976_v10  ;;  %v968_v16 = vld [vmem:[%s1296_s12 + $0x118] sm:$0xf0]  ;;  %v907_v17 = vor.u32 %v1045_v13, %v904_v14  ;;  %v1043_v19 = vld [vmem:[%s1296_s12 + $0x84] sm:$0xf]  ;;  %v896_v20 = vld [vmem:[%s1296_s12 + $0x88] sm:$0xf0] }
  0x47   : > { %614 = vmatpush.bf16.msra.mxu1 %v895_v33  ;;  %v971_v18 = vor.u32 %v1061_v15, %v968_v16  ;;  %v1059_v21 = vld [vmem:[%s1296_s12 + $0x104] sm:$0xf]  ;;  %v960_v22 = vld [vmem:[%s1296_s12 + $0x108] sm:$0xf0]  ;;  %v899_v23 = vor.u32 %v1043_v19, %v896_v20  ;;  %v291_v30 = vld [vmem:[#allocation2] sm:$0xff] }
  0x48   : > { %639 = vmatpush.bf16.msra.mxu3 %v843_v43  ;;  %v963_v24 = vor.u32 %v1059_v21, %v960_v22  ;;  %v292_v40 = vld [vmem:[#allocation2 + $0x8] sm:$0xff] }
  0x49   : > { %602 = vmatmul.bf16.vlgmr.msra.gmra.mxu0 %v348_v42 }
  0x4a   : > { %646 = vmatpush.bf16.msrb.mxu0 %v955_v34  ;;  %615 = vmatmul.bf16.vlgmr.msra.gmra.mxu1 %v1381_v45 }
  0x4b   : > { %659 = vmatpush.bf16.msrb.mxu1 %v1019_v37  ;;  %627 = vmatpush.bf16.msra.mxu2 %v959_v46 }
  0x4c   : > { %640 = vmatpush.bf16.msra.mxu3 %v835_v56 }
  0x4e   : > { %647 = vmatpush.bf16.msrb.mxu0 %v947_v49  ;;  %628 = vmatmul.bf16.vlgmr.msra.gmra.mxu2 %v350_v55 }
  0x4f   : > { %660 = vmatpush.bf16.msrb.mxu1 %v1011_v50  ;;  %641 = vmatmul.bf16.vlgmr.msra.gmra.mxu3 %v348_v42 }
  0x52   : > { %648 = vmatpush.bf16.msrb.mxu0 %v939_v57 }
  0x53   : > { %661 = vmatpush.bf16.msrb.mxu1 %v1003_v58 }
  0x56   : > { %649 = vmatpush.bf16.msrb.mxu0 %v931_v63 }
  0x57   : > { %662 = vmatpush.bf16.msrb.mxu1 %v995_v0 }
  0x5a   : > { %650 = vmatpush.bf16.msrb.mxu0 %v923_v5 }
  0x5b   : > { %663 = vmatpush.bf16.msrb.mxu1 %v987_v6 }
  0x5e   : > { %651 = vmatpush.bf16.msrb.mxu0 %v915_v11 }
  0x5f   : > { %664 = vmatpush.bf16.msrb.mxu1 %v979_v12 }
  0x62   : > { %652 = vmatpush.bf16.msrb.mxu0 %v907_v17 }
  0x63   : > { %665 = vmatpush.bf16.msrb.mxu1 %v971_v18 }
  0x66   : > { %653 = vmatpush.bf16.msrb.mxu0 %v899_v23 }
  0x67   : > { %666 = vmatpush.bf16.msrb.mxu1 %v963_v24 }
  0x69   : > { %654 = vmatmul.bf16.vlgmr.msrb.gmra.mxu0 %v1381_v45 }
  0x6a   : > { %667 = vmatmul.bf16.vlgmr.msrb.gmra.mxu1 %v350_v55 }
  0xc6   : > { %v603_v25 = vpop.f32.mrf.mxu0 }
  0xc7   : > { %v616_v26 = vpop.f32.mrf.mxu1 }
  0xc8   : > { %v617_v27 = vadd.f32 %v616_v26, %v603_v25 }
  0xce   : > { %v605_v28 = vpop.f32.mrf.mxu0 }
  0xcf   : > { %v618_v29 = vpop.f32.mrf.mxu1 }
  0xd1   : > { %v629_v31 = vpop.f32.mrf.mxu2 }
  0xd2   : > { %v630_v32 = vadd.f32 %v629_v31, %v617_v27  ;;  %v642_v34 = vpop.f32.mrf.mxu3 }
  0xd4   : > { %v672_v33 = vadd.f32 %v630_v32, %v291_v30 }
  0xd6   : > { %674 = vst [vmem:[#allocation2] sm:$0xff] %v672_v33 }
  0xd9   : > { %v631_v35 = vpop.f32.mrf.mxu2 }
  0xda   : > { %v644_v36 = vpop.f32.mrf.mxu3 }
  0xe6   : > { %v655_v37 = vpop.f32.mrf.mxu0 }
  0xe7   : > { %v656_v38 = vadd.f32 %v655_v37, %v642_v34  ;;  %v668_v39 = vpop.f32.mrf.mxu1 }
  0xe9   : > { %v669_v41 = vadd.f32 %v668_v39, %v656_v38 }
  0xeb   : > { %v673_v42 = vadd.f32 %v669_v41, %v292_v40  ;;  %679 = sbr.rel (%p1020_p1) target bundleno = 252 (0xfc), region = 44 }
  0xed   : > { %675 = vst [vmem:[#allocation2 + $0x8] sm:$0xff] %v673_v42 }
  0xee   : > { %v657_v43 = vpop.f32.mrf.mxu0 }
  0xef   : > { %v670_v44 = vpop.f32.mrf.mxu1 }
  0xf0   : > { %v680_v45 = vld [vmem:[#allocation2] sm:$0xff] }
  0xf1   : > { %v682_v47 = vld [vmem:[%s1438_s2] sm:$0x3] }
  0xf2   : > { %v684_v48 = vperm.slane %v682_v47, 0  ;;  %v685_v49 = vperm.slane %v682_v47, 1 }
  0xf4   : > { %v681_v46 = vld [vmem:[#allocation2 + $0x8] sm:$0xff]  ;;  %v688_v50 = vadd.f32 %v684_v48, %v680_v45 }
  0xf5   : > { %v689_v51 = vadd.f32 %v685_v49, %v681_v46 }
  0xf6   : > { %v690_v52 = vmax.f32 %v688_v50, 0.0 }
  0xf7   : > { %v691_v53 = vmax.f32 %v689_v51, 0.0 }
  0xf9   : > { %v692_v54 = vpack.c.bf16 %v691_v53, %v690_v52 }
  0xfb   : > { %693 = vst [vmem:[%s1439_s3] sm:$0xff] %v692_v54 }
  0xfc PF: > { %s16_s17 = sadd.s32 1, %s1216_s17   ;;  %s1441_s12 = smov %s1200_s13 }
  0xfd   : > { %p13_p2 = scmp.ge.s32.totalorder %s16_s17, 8   ;;  %s1442_s13 = smov %s1204_s14 }
  0xfe   : > { %s1443_s14 = smov %s1286_s23  ;;  %s1444_s15 = smov %s1212_s16 }
  0xff   : > { %s1445_s16 = smov %s1447_s19  ;;  %15 = sbr.rel (!%p13_p2) target bundleno = 4 (0x4), region = 86 }
 0x104   :  { %724 = vsyncpa [#allocation4], 1 }
 0x105   :  { %726 = vsyncpa [#allocation4 + $0x1], 1 }

// kernel: clsnet_forward.35
= control target key start
LH: loop header
LB: loop body
LE: loop exit
PB: predicated region body
PF: predicated region fallthrough
CT: control target
= control target key end

     0   :  { %9 = vsyncpa [#allocation4], 0  ;;  %s1534_s0 = inlined_call_operand.vmem [shape: bf16[8,2304], index: 0, kind: input, shape index: {}]   ;;  %s1535_s1 = inlined_call_operand.hbm [shape: bf16[2304,256], index: 1, kind: input, shape index: {}]   ;;  %s1536_s2 = inlined_call_operand.vmem [shape: f32[1,256], index: 2, kind: input, shape index: {}]   ;;  %s1537_s3 = inlined_call_operand.vmem [shape: bf16[8,256], index: 3, kind: input, shape index: {}]   ;;  %s1538_s4 = inlined_call_operand.vmem [shape: bf16[8,256], index: 4, kind: output, shape index: {}]  }
   0x1   :  { %11 = vsyncpa [#allocation4 + $0x1], 0  ;;  %s1336_s15 = smov 0   ;;  %s1338_s16 = smov 0  }
   0x2   :  { %s1340_s17 = smov 0   ;;  %s1342_s18 = smov 0  }
   0x3   :  { %s1344_s19 = smov 0   ;;  %s1346_s20 = smov 0  }
   0x4 LB: > { %s908_s21 = sadd.s32 4294967295, %s1306_s20   ;;  %s29_s22 = sadd.s32 1, %s1302_s19  ;;  %s1306_s20 = sphi %s1346_s20, %s17_s20   ;;  %s1302_s19 = sphi %s1344_s19, %s1544_s19   ;;  %s1298_s18 = sphi %s1342_s18, %s1543_s18   ;;  %s1294_s17 = sphi %s1340_s17, %s1542_s17   ;;  %s1290_s16 = sphi %s1338_s16, %s1541_s16   ;;  %s1286_s15 = sphi %s1336_s15, %s1540_s15  }
   0x5   : > { %p30_p0 = scmp.ge.s32.totalorder %s29_s22, 6  ;;  %s73_s23 = sadd.s32 1, %s1294_s17 }
   0x6   : > { %p80_p1 = scmp.ne.s32.totalorder %s1294_s17, %s1290_s16  ;;  %p81_p2 = scmp.eq.s32.totalorder %s1306_s20, 0 }
   0x7   : > { %s1546_s22 = smov (%p30_p0, %s29_s22), 0  ;;  %p86_p4 = scmp.ne.s32.totalorder %s1290_s16, %s1286_s15 }
   0x8   : > { %p82_p3 = por %p81_p2, %p80_p1  ;;  %s68_s24 = ssub.s32 %s1302_s19, %s1546_s22 }
   0x9   : > { %p87_p5 = scmp.eq.s32.totalorder %s908_s21, 0  ;;  %p71_p6 = scmp.eq.s32.totalorder %s68_s24, 0 }
   0xa   : > { %p1174_p8 = scmp.lt.s32.totalorder %s1306_s20, 6  ;;  %s226_s27 = sand.u32 1, %s1294_s17  }
   0xb   : > { %p1375_p7 = por %p87_p5, %p86_p4  ;;  %s1165_s28 = smul.u32 384, %s1302_s19 }
   0xc   : > { %s1381_s26 = scalar_select %p71_p6, %s1294_s17, %s73_s23  }
   0xd   : > { %s1166_s29 = smul.u32 384, %s226_s27  ;;  %s238_s6 = scalar_lea.hbm %s1535_s1, %s1165_s28 }
   0xe   : > { %p1171_p9 = pnand %p1174_p8, %p82_p3  ;;  %s239_s7 = sshll.u32 %s238_s6, 4  ;;  %s240_s7 = int_to_ptr.hbm [resolvable:$true] %s239_s7 }
   0xf   : > { %s230_s8 = scalar_lea.vmem [#allocation3], %s1166_s29  ;;  %s227_s10 = scalar_lea.sflag [#allocation4], %s226_s27 }
  0x10   : > { %s241_s9 = sshll.u32 %s230_s8, 4  ;;  %s1308_s11 = smov 128   ;;  %s242_s9 = int_to_ptr.vmem [resolvable:$true] %s241_s9 }
  0x11   : > { %s1309_s12 = smov 8   ;;  %p915_p10 = scmp.ge.s32.totalorder %s1306_s20, 1 }
  0x12   : > { %1173 = dma.hbm_to_vmem [thread:$0]  (!%p1171_p9), %s240_s7, 6144, %s242_s9, %s227_s10, %s1308_s11, %s1308_s11, %s1309_s12  }
  0x13   : > { %p249_p11 = scmp.lt.s32.totalorder %s1306_s20, 7 }
  0x15   : > { %p250_p12 = pnand %p915_p10, %p249_p11 }
  0x16   : > { %s255_s13 = sand.u32 (!%p250_p12), 1, %s1290_s16  }
  0x17   : > { %253 = sbr.rel (%p250_p12) target bundleno = 254 (0xfe), region = 36  ;;  %s256_s15 = scalar_lea.sflag (!%p250_p12), [#allocation4], %s255_s13 }
  0x18   : > { %s1167_s14 = smul.u32 (!%p250_p12), 384, %s255_s13 }
  0x1a   : > { %s1391_s21 = scalar_lea.vmem (!%p250_p12), [#allocation3], %s1167_s14 }
  0x1c   : > { %1281 = dma.done.wait (%p1375_p7), %s256_s15, 6144  }
  0x1d   : > { %1283 = vsyncadd (%p1375_p7), %s256_s15, 4294961152  ;;  %s311_s23 = smul.u32 3, %s1298_s18  ;;  %p917_p0 = scmp.ne.s32.totalorder %s1298_s18, 0 }
  0x1f   : > { %p314_p13 = scmp.lt.s32.totalorder %s311_s23, 17  ;;  %351 = sbr.rel (%p917_p0) target bundleno = 39 (0x27), region = 44 }
  0x21   : > { %s1548_s23 = smov (!%p314_p13, %s311_s23), 17 }
  0x22   : > { %s916_s24 = sshll.u32 %s1548_s23, 2 }
  0x23   : > { %s1401_s29 = scalar_lea.vmem %s1534_s0, %s916_s24 }
  0x24   : > { %v1310_v0 = vmov 0.0  }
  0x25   : > { %352 = vst [vmem:[#allocation2] sm:$0xff] %v1310_v0 }
  0x26   : > { %353 = vst [vmem:[#allocation2 + $0x8] sm:$0xff] %v1310_v0 }
  0x27 PF: > { %v976_v1 = vld [vmem:[%s1391_s21 + $0x70] sm:$0xf]  ;;  %v1132_v2 = vld [vmem:[%s1391_s21 + $0x74] sm:$0xf0]  ;;  %v968_v6 = vld [vmem:[%s1391_s21 + $0x60] sm:$0xf] }
  0x28   : > { %v1040_v3 = vld [vmem:[%s1391_s21 + $0xf0] sm:$0xf]  ;;  %v977_v4 = vor.u32 %v1132_v2, %v976_v1  ;;  %v1148_v5 = vld [vmem:[%s1391_s21 + $0xf4] sm:$0xf0]  ;;  %v1130_v7 = vld [vmem:[%s1391_s21 + $0x64] sm:$0xf0] }
  0x29   : > { %v1041_v8 = vor.u32 %v1148_v5, %v1040_v3  ;;  %v1032_v9 = vld [vmem:[%s1391_s21 + $0xe0] sm:$0xf]  ;;  %v1146_v10 = vld [vmem:[%s1391_s21 + $0xe4] sm:$0xf0]  ;;  %v969_v11 = vor.u32 %v1130_v7, %v968_v6  ;;  %v960_v12 = vld [vmem:[%s1391_s21 + $0x50] sm:$0xf] }
  0x2a   : > { %657 = vmatpush.bf16.msra.mxu0 %v977_v4  ;;  %v1033_v13 = vor.u32 %v1146_v10, %v1032_v9  ;;  %v1128_v14 = vld [vmem:[%s1391_s21 + $0x54] sm:$0xf0]  ;;  %v1104_v15 = vld [vmem:[%s1391_s21 + $0x170] sm:$0xf]  ;;  %v1096_v20 = vld [vmem:[%s1391_s21 + $0x160] sm:$0xf] }
  0x2b   : > { %670 = vmatpush.bf16.msra.mxu1 %v1041_v8  ;;  %v1164_v16 = vld [vmem:[%s1391_s21 + $0x174] sm:$0xf0]  ;;  %v1024_v17 = vld [vmem:[%s1391_s21 + $0xd0] sm:$0xf]  ;;  %v1162_v21 = vld [vmem:[%s1391_s21 + $0x164] sm:$0xf0]  ;;  %v961_v23 = vor.u32 %v1128_v14, %v960_v12 }
  0x2c   : > { %v1144_v18 = vld [vmem:[%s1391_s21 + $0xd4] sm:$0xf0]  ;;  %v1105_v19 = vor.u32 %v1164_v16, %v1104_v15  ;;  %v1131_v22 = vld [vmem:[%s1391_s21 + $0x74] sm:$0xf]  ;;  %v952_v24 = vld [vmem:[%s1391_s21 + $0x40] sm:$0xf]  ;;  %v1097_v26 = vor.u32 %v1162_v21, %v1096_v20 }
  0x2d   : > { %v1126_v25 = vld [vmem:[%s1391_s21 + $0x44] sm:$0xf0]  ;;  %v978_v27 = vld [vmem:[%s1391_s21 + $0x78] sm:$0xf0]  ;;  %v1025_v28 = vor.u32 %v1144_v18, %v1024_v17  ;;  %v1016_v29 = vld [vmem:[%s1391_s21 + $0xc0] sm:$0xf] }
  0x2e   : > { %658 = vmatpush.bf16.msra.mxu0 %v969_v11  ;;  %683 = vmatpush.bf16.msra.mxu2 %v1105_v19  ;;  %v1142_v30 = vld [vmem:[%s1391_s21 + $0xc4] sm:$0xf0]  ;;  %v981_v31 = vor.u32 %v1131_v22, %v978_v27  ;;  %v1088_v32 = vld [vmem:[%s1391_s21 + $0x150] sm:$0xf]  ;;  %v1160_v33 = vld [vmem:[%s1391_s21 + $0x154] sm:$0xf0]  ;;  %v953_v37 = vor.u32 %v1126_v25, %v952_v24 }
  0x2f   : > { %671 = vmatpush.bf16.msra.mxu1 %v1033_v13  ;;  %v1129_v34 = vld [vmem:[%s1391_s21 + $0x64] sm:$0xf]  ;;  %v970_v35 = vld [vmem:[%s1391_s21 + $0x68] sm:$0xf0]  ;;  %v944_v38 = vld [vmem:[%s1391_s21 + $0x30] sm:$0xf]  ;;  %v1089_v40 = vor.u32 %v1160_v33, %v1088_v32  ;;  %v1017_v42 = vor.u32 %v1142_v30, %v1016_v29 }
  0x30   : > { %696 = vmatpush.bf16.msra.mxu3 %v981_v31  ;;  %v973_v36 = vor.u32 %v1129_v34, %v970_v35  ;;  %v1124_v39 = vld [vmem:[%s1391_s21 + $0x34] sm:$0xf0]  ;;  %v1080_v41 = vld [vmem:[%s1391_s21 + $0x140] sm:$0xf]  ;;  %v1158_v43 = vld [vmem:[%s1391_s21 + $0x144] sm:$0xf0] }
  0x31   : > { %v1127_v44 = vld [vmem:[%s1391_s21 + $0x54] sm:$0xf]  ;;  %v962_v45 = vld [vmem:[%s1391_s21 + $0x58] sm:$0xf0]  ;;  %v1008_v46 = vld [vmem:[%s1391_s21 + $0xb0] sm:$0xf]  ;;  %v945_v49 = vor.u32 %v1124_v39, %v944_v38  ;;  %v1081_v51 = vor.u32 %v1158_v43, %v1080_v41 }
  0x32   : > { %659 = vmatpush.bf16.msra.mxu0 %v961_v23  ;;  %684 = vmatpush.bf16.msra.mxu2 %v1097_v26  ;;  %v1140_v47 = vld [vmem:[%s1391_s21 + $0xb4] sm:$0xf0]  ;;  %v965_v48 = vor.u32 %v1127_v44, %v962_v45  ;;  %v936_v50 = vld [vmem:[%s1391_s21 + $0x20] sm:$0xf]  ;;  %v1125_v52 = vld [vmem:[%s1391_s21 + $0x44] sm:$0xf] }
  0x33   : > { %672 = vmatpush.bf16.msra.mxu1 %v1025_v28  ;;  %v954_v53 = vld [vmem:[%s1391_s21 + $0x48] sm:$0xf0]  ;;  %v1009_v54 = vor.u32 %v1140_v47, %v1008_v46  ;;  %v1122_v55 = vld [vmem:[%s1391_s21 + $0x24] sm:$0xf0]  ;;  %v1072_v56 = vld [vmem:[%s1391_s21 + $0x130] sm:$0xf] }
  0x34   : > { %697 = vmatpush.bf16.msra.mxu3 %v973_v36  ;;  %v1156_v57 = vld [vmem:[%s1391_s21 + $0x134] sm:$0xf0]  ;;  %v1000_v58 = vld [vmem:[%s1391_s21 + $0xa0] sm:$0xf]  ;;  %v1138_v59 = vld [vmem:[%s1391_s21 + $0xa4] sm:$0xf0]  ;;  %v957_v60 = vor.u32 %v1125_v52, %v954_v53  ;;  %v937_v61 = vor.u32 %v1122_v55, %v936_v50 }
  0x35   : > { %v928_v62 = vld [vmem:[%s1391_s21 + $0x10] sm:$0xf]  ;;  %v1073_v63 = vor.u32 %v1156_v57, %v1072_v56  ;;  %v1123_v0 = vld [vmem:[%s1391_s21 + $0x34] sm:$0xf]  ;;  %v946_v1 = vld [vmem:[%s1391_s21 + $0x38] sm:$0xf0]  ;;  %v1001_v2 = vor.u32 %v1138_v59, %v1000_v58 }
  0x36   : > { %660 = vmatpush.bf16.msra.mxu0 %v953_v37  ;;  %685 = vmatpush.bf16.msra.mxu2 %v1089_v40  ;;  %v1120_v3 = vld [vmem:[%s1391_s21 + $0x14] sm:$0xf0]  ;;  %v1064_v4 = vld [vmem:[%s1391_s21 + $0x120] sm:$0xf]  ;;  %v1154_v5 = vld [vmem:[%s1391_s21 + $0x124] sm:$0xf0]  ;;  %v949_v10 = vor.u32 %v1123_v0, %v946_v1 }
  0x37   : > { %673 = vmatpush.bf16.msra.mxu1 %v1017_v42  ;;  %v992_v6 = vld [vmem:[%s1391_s21 + $0x90] sm:$0xf]  ;;  %v1136_v7 = vld [vmem:[%s1391_s21 + $0x94] sm:$0xf0]  ;;  %v920_v8 = vld [vmem:[%s1391_s21] sm:$0xf]  ;;  %v929_v11 = vor.u32 %v1120_v3, %v928_v62  ;;  %v1065_v12 = vor.u32 %v1154_v5, %v1064_v4 }
  0x38   : > { %698 = vmatpush.bf16.msra.mxu3 %v965_v48  ;;  %v1118_v9 = vld [vmem:[%s1391_s21 + $0x4] sm:$0xf0]  ;;  %v1121_v13 = vld [vmem:[%s1391_s21 + $0x24] sm:$0xf]  ;;  %v938_v14 = vld [vmem:[%s1391_s21 + $0x28] sm:$0xf0]  ;;  %v993_v16 = vor.u32 %v1136_v7, %v992_v6 }
  0x39   : > { %v356_v15 = vld [vmem:[%s1401_s29] sm:$0xff]  ;;  %v984_v17 = vld [vmem:[%s1391_s21 + $0x80] sm:$0xf]  ;;  %v1152_v19 = vld [vmem:[%s1391_s21 + $0x114] sm:$0xf0]  ;;  %v941_v25 = vor.u32 %v1121_v13, %v938_v14  ;;  %v921_v27 = vor.u32 %v1118_v9, %v920_v8  ;;  %p1110_p1 = scmp.ne.s32.totalorder %s1298_s18, 5 }
  0x3a   : > { %661 = vmatpush.bf16.msra.mxu0 %v945_v49  ;;  %686 = vmatpush.bf16.msra.mxu2 %v1081_v51  ;;  %v1056_v18 = vld [vmem:[%s1391_s21 + $0x110] sm:$0xf]  ;;  %v1134_v20 = vld [vmem:[%s1391_s21 + $0x84] sm:$0xf0]  ;;  %v1147_v21 = vld [vmem:[%s1391_s21 + $0xf4] sm:$0xf]  ;;  %v408_v26 = vunpack.c.l.b16 %v356_v15  ;;  %v409_v29 = vunpack.c.h.b16 %v356_v15 }
  0x3b   : > { %674 = vmatpush.bf16.msra.mxu1 %v1009_v54  ;;  %v1042_v22 = vld [vmem:[%s1391_s21 + $0xf8] sm:$0xf0]  ;;  %v1163_v23 = vld [vmem:[%s1391_s21 + $0x174] sm:$0xf]  ;;  %v1057_v28 = vor.u32 %v1152_v19, %v1056_v18  ;;  %v357_v32 = vld [vmem:[%s1401_s29 + $0x8] sm:$0xf]  ;;  %v985_v33 = vor.u32 %v1134_v20, %v984_v17 }
  0x3c   : > { %699 = vmatpush.bf16.msra.mxu3 %v957_v60  ;;  %v1106_v24 = vld [vmem:[%s1391_s21 + $0x178] sm:$0xf0]  ;;  %v1119_v30 = vld [vmem:[%s1391_s21 + $0x14] sm:$0xf]  ;;  %v1045_v34 = vor.u32 %v1147_v21, %v1042_v22  ;;  %v1048_v35 = vld [vmem:[%s1391_s21 + $0x100] sm:$0xf]  ;;  %v411_v42 = vpack.c.b16 %v408_v26, %v408_v26  ;;  %v410_v44 = vunpack.c.l.b16 %v357_v32  ;;  %v1476_v45 = vpack.c.b16 %v409_v29, %v409_v29 }
  0x3d   : > { %v930_v31 = vld [vmem:[%s1391_s21 + $0x18] sm:$0xf0]  ;;  %v1150_v36 = vld [vmem:[%s1391_s21 + $0x104] sm:$0xf0]  ;;  %v1109_v37 = vor.u32 %v1163_v23, %v1106_v24  ;;  %v1145_v38 = vld [vmem:[%s1391_s21 + $0xe4] sm:$0xf] }
  0x3e   : > { %662 = vmatpush.bf16.msra.mxu0 %v937_v61  ;;  %687 = vmatpush.bf16.msra.mxu2 %v1073_v63  ;;  %v1034_v39 = vld [vmem:[%s1391_s21 + $0xe8] sm:$0xf0]  ;;  %v1161_v40 = vld [vmem:[%s1391_s21 + $0x164] sm:$0xf]  ;;  %v933_v43 = vor.u32 %v1119_v30, %v930_v31  ;;  %v1049_v46 = vor.u32 %v1150_v36, %v1048_v35  ;;  %v1143_v51 = vld [vmem:[%s1391_s21 + $0xd4] sm:$0xf]  ;;  %v413_v55 = vpack.c.b16 %v410_v44, %v410_v44 }
  0x3f   : > { %675 = vmatpush.bf16.msra.mxu1 %v1001_v2  ;;  %v1098_v41 = vld [vmem:[%s1391_s21 + $0x168] sm:$0xf0]  ;;  %v1117_v47 = vld [vmem:[%s1391_s21 + $0x4] sm:$0xf]  ;;  %v1037_v49 = vor.u32 %v1145_v38, %v1034_v39  ;;  %v1026_v52 = vld [vmem:[%s1391_s21 + $0xd8] sm:$0xf0] }
  0x40   : > { %700 = vmatpush.bf16.msra.mxu3 %v949_v10  ;;  %v922_v48 = vld [vmem:[%s1391_s21 + $0x8] sm:$0xf0]  ;;  %v1101_v50 = vor.u32 %v1161_v40, %v1098_v41  ;;  %v1159_v53 = vld [vmem:[%s1391_s21 + $0x154] sm:$0xf]  ;;  %v1090_v54 = vld [vmem:[%s1391_s21 + $0x158] sm:$0xf0]  ;;  %v1029_v57 = vor.u32 %v1143_v51, %v1026_v52 }
  0x41   : > { %v925_v56 = vor.u32 %v1117_v47, %v922_v48  ;;  %v1093_v58 = vor.u32 %v1159_v53, %v1090_v54  ;;  %v1141_v59 = vld [vmem:[%s1391_s21 + $0xc4] sm:$0xf]  ;;  %v1018_v60 = vld [vmem:[%s1391_s21 + $0xc8] sm:$0xf0]  ;;  %v1139_v1 = vld [vmem:[%s1391_s21 + $0xb4] sm:$0xf] }
  0x42   : > { %663 = vmatpush.bf16.msra.mxu0 %v929_v11  ;;  %688 = vmatpush.bf16.msra.mxu2 %v1065_v12  ;;  %v1157_v61 = vld [vmem:[%s1391_s21 + $0x144] sm:$0xf]  ;;  %v1082_v62 = vld [vmem:[%s1391_s21 + $0x148] sm:$0xf0]  ;;  %v1021_v63 = vor.u32 %v1141_v59, %v1018_v60  ;;  %v1010_v2 = vld [vmem:[%s1391_s21 + $0xb8] sm:$0xf0] }
  0x43   : > { %676 = vmatpush.bf16.msra.mxu1 %v993_v16  ;;  %v1085_v0 = vor.u32 %v1157_v61, %v1082_v62  ;;  %v1155_v3 = vld [vmem:[%s1391_s21 + $0x134] sm:$0xf]  ;;  %v1074_v4 = vld [vmem:[%s1391_s21 + $0x138] sm:$0xf0]  ;;  %v1013_v5 = vor.u32 %v1139_v1, %v1010_v2  ;;  %v1137_v7 = vld [vmem:[%s1391_s21 + $0xa4] sm:$0xf] }
  0x44   : > { %701 = vmatpush.bf16.msra.mxu3 %v941_v25  ;;  %v1077_v6 = vor.u32 %v1155_v3, %v1074_v4  ;;  %v1002_v8 = vld [vmem:[%s1391_s21 + $0xa8] sm:$0xf0]  ;;  %v1153_v9 = vld [vmem:[%s1391_s21 + $0x124] sm:$0xf]  ;;  %v1135_v13 = vld [vmem:[%s1391_s21 + $0x94] sm:$0xf] }
  0x45   : > { %v1066_v10 = vld [vmem:[%s1391_s21 + $0x128] sm:$0xf0]  ;;  %v1005_v11 = vor.u32 %v1137_v7, %v1002_v8  ;;  %v994_v14 = vld [vmem:[%s1391_s21 + $0x98] sm:$0xf0]  ;;  %v1151_v15 = vld [vmem:[%s1391_s21 + $0x114] sm:$0xf] }
  0x46   : > { %664 = vmatpush.bf16.msra.mxu0 %v921_v27  ;;  %689 = vmatpush.bf16.msra.mxu2 %v1057_v28  ;;  %v1069_v12 = vor.u32 %v1153_v9, %v1066_v10  ;;  %v1058_v16 = vld [vmem:[%s1391_s21 + $0x118] sm:$0xf0]  ;;  %v997_v17 = vor.u32 %v1135_v13, %v994_v14  ;;  %v1133_v19 = vld [vmem:[%s1391_s21 + $0x84] sm:$0xf]  ;;  %v986_v20 = vld [vmem:[%s1391_s21 + $0x88] sm:$0xf0] }
  0x47   : > { %677 = vmatpush.bf16.msra.mxu1 %v985_v33  ;;  %v1061_v18 = vor.u32 %v1151_v15, %v1058_v16  ;;  %v1149_v21 = vld [vmem:[%s1391_s21 + $0x104] sm:$0xf]  ;;  %v1050_v22 = vld [vmem:[%s1391_s21 + $0x108] sm:$0xf0]  ;;  %v989_v23 = vor.u32 %v1133_v19, %v986_v20  ;;  %v354_v30 = vld [vmem:[#allocation2] sm:$0xff] }
  0x48   : > { %702 = vmatpush.bf16.msra.mxu3 %v933_v43  ;;  %v1053_v24 = vor.u32 %v1149_v21, %v1050_v22  ;;  %v355_v40 = vld [vmem:[#allocation2 + $0x8] sm:$0xff] }
  0x49   : > { %665 = vmatmul.bf16.vlgmr.msra.gmra.mxu0 %v411_v42 }
  0x4a   : > { %709 = vmatpush.bf16.msrb.mxu0 %v1045_v34  ;;  %678 = vmatmul.bf16.vlgmr.msra.gmra.mxu1 %v1476_v45 }
  0x4b   : > { %722 = vmatpush.bf16.msrb.mxu1 %v1109_v37  ;;  %690 = vmatpush.bf16.msra.mxu2 %v1049_v46 }
  0x4c   : > { %703 = vmatpush.bf16.msra.mxu3 %v925_v56 }
  0x4e   : > { %710 = vmatpush.bf16.msrb.mxu0 %v1037_v49  ;;  %691 = vmatmul.bf16.vlgmr.msra.gmra.mxu2 %v413_v55 }
  0x4f   : > { %723 = vmatpush.bf16.msrb.mxu1 %v1101_v50  ;;  %704 = vmatmul.bf16.vlgmr.msra.gmra.mxu3 %v411_v42 }
  0x52   : > { %711 = vmatpush.bf16.msrb.mxu0 %v1029_v57 }
  0x53   : > { %724 = vmatpush.bf16.msrb.mxu1 %v1093_v58 }
  0x56   : > { %712 = vmatpush.bf16.msrb.mxu0 %v1021_v63 }
  0x57   : > { %725 = vmatpush.bf16.msrb.mxu1 %v1085_v0 }
  0x5a   : > { %713 = vmatpush.bf16.msrb.mxu0 %v1013_v5 }
  0x5b   : > { %726 = vmatpush.bf16.msrb.mxu1 %v1077_v6 }
  0x5e   : > { %714 = vmatpush.bf16.msrb.mxu0 %v1005_v11 }
  0x5f   : > { %727 = vmatpush.bf16.msrb.mxu1 %v1069_v12 }
  0x62   : > { %715 = vmatpush.bf16.msrb.mxu0 %v997_v17 }
  0x63   : > { %728 = vmatpush.bf16.msrb.mxu1 %v1061_v18 }
  0x66   : > { %716 = vmatpush.bf16.msrb.mxu0 %v989_v23 }
  0x67   : > { %729 = vmatpush.bf16.msrb.mxu1 %v1053_v24 }
  0x69   : > { %717 = vmatmul.bf16.vlgmr.msrb.gmra.mxu0 %v1476_v45 }
  0x6a   : > { %730 = vmatmul.bf16.vlgmr.msrb.gmra.mxu1 %v413_v55 }
  0xc6   : > { %v666_v25 = vpop.f32.mrf.mxu0 }
  0xc7   : > { %v679_v26 = vpop.f32.mrf.mxu1 }
  0xc8   : > { %v680_v27 = vadd.f32 %v679_v26, %v666_v25 }
  0xce   : > { %v668_v28 = vpop.f32.mrf.mxu0 }
  0xcf   : > { %v681_v29 = vpop.f32.mrf.mxu1 }
  0xd1   : > { %v692_v31 = vpop.f32.mrf.mxu2 }
  0xd2   : > { %v693_v32 = vadd.f32 %v692_v31, %v680_v27  ;;  %v705_v34 = vpop.f32.mrf.mxu3 }
  0xd4   : > { %v735_v33 = vadd.f32 %v693_v32, %v354_v30 }
  0xd6   : > { %737 = vst [vmem:[#allocation2] sm:$0xff] %v735_v33 }
  0xd9   : > { %v694_v35 = vpop.f32.mrf.mxu2 }
  0xda   : > { %v707_v36 = vpop.f32.mrf.mxu3 }
  0xe6   : > { %v718_v37 = vpop.f32.mrf.mxu0 }
  0xe7   : > { %v719_v38 = vadd.f32 %v718_v37, %v705_v34  ;;  %v731_v39 = vpop.f32.mrf.mxu1 }
  0xe9   : > { %v732_v41 = vadd.f32 %v731_v39, %v719_v38 }
  0xeb   : > { %v736_v42 = vadd.f32 %v732_v41, %v355_v40  ;;  %742 = sbr.rel (%p1110_p1) target bundleno = 254 (0xfe), region = 48 }
  0xed   : > { %738 = vst [vmem:[#allocation2 + $0x8] sm:$0xff] %v736_v42 }
  0xee   : > { %v720_v43 = vpop.f32.mrf.mxu0 }
  0xef   : > { %v733_v44 = vpop.f32.mrf.mxu1 }
  0xf0   : > { %v743_v45 = vld [vmem:[#allocation2] sm:$0xff] }
  0xf1   : > { %v745_v47 = vld [vmem:[%s1536_s2] sm:$0x3] }
  0xf2   : > { %v747_v48 = vperm.slane %v745_v47, 0  ;;  %v748_v49 = vperm.slane %v745_v47, 1  ;;  %v753_v50 = vld [vmem:[%s1537_s3] sm:$0xff] }
  0xf3   : > { %v754_v51 = vunpack.c.l.bf16 %v753_v50  ;;  %v755_v52 = vunpack.c.h.bf16 %v753_v50 }
  0xf4   : > { %v744_v46 = vld [vmem:[#allocation2 + $0x8] sm:$0xff]  ;;  %v751_v53 = vadd.f32 %v747_v48, %v743_v45 }
  0xf5   : > { %v752_v54 = vadd.f32 %v748_v49, %v744_v46 }
  0xf6   : > { %v756_v55 = vadd.f32 %v754_v51, %v751_v53 }
  0xf7   : > { %v757_v56 = vadd.f32 %v755_v52, %v752_v54 }
  0xf8   : > { %v758_v57 = vmax.f32 %v756_v55, 0.0 }
  0xf9   : > { %v759_v58 = vmax.f32 %v757_v56, 0.0 }
  0xfb   : > { %v760_v59 = vpack.c.bf16 %v759_v58, %v758_v57 }
  0xfd   : > { %761 = vst [vmem:[%s1538_s4] sm:$0xff] %v760_v59 }
  0xfe PF: > { %s17_s20 = sadd.s32 1, %s1306_s20   ;;  %s1540_s15 = smov %s1290_s16 }
  0xff   : > { %p14_p2 = scmp.ge.s32.totalorder %s17_s20, 8   ;;  %s1541_s16 = smov %s1294_s17 }
 0x100   : > { %s1542_s17 = smov %s1381_s26  ;;  %s1543_s18 = smov %s1302_s19 }
 0x101   : > { %s1544_s19 = smov %s1546_s22  ;;  %16 = sbr.rel (!%p14_p2) target bundleno = 4 (0x4), region = 93 }
 0x106   :  { %792 = vsyncpa [#allocation4], 1 }
 0x107   :  { %794 = vsyncpa [#allocation4 + $0x1], 1 }

// kernel: clsnet_forward.36
= control target key start
LH: loop header
LB: loop body
LE: loop exit
PB: predicated region body
PF: predicated region fallthrough
CT: control target
= control target key end

     0   :  { %8 = vsyncpa [#allocation4], 0  ;;  %s1515_s0 = inlined_call_operand.vmem [shape: bf16[8,2304], index: 0, kind: input, shape index: {}]   ;;  %s1516_s1 = inlined_call_operand.hbm [shape: bf16[2304,512], index: 1, kind: input, shape index: {}]   ;;  %s1517_s2 = inlined_call_operand.vmem [shape: f32[1,512], index: 2, kind: input, shape index: {}]   ;;  %s1518_s3 = inlined_call_operand.vmem [shape: bf16[8,512], index: 3, kind: output, shape index: {}]  }
   0x1   :  { %10 = vsyncpa [#allocation4 + $0x1], 0  ;;  %s1278_s12 = smov 0   ;;  %s1280_s13 = smov 0  }
   0x2   :  { %s1282_s14 = smov 0   ;;  %s1284_s15 = smov 0  }
   0x3   :  { %s1286_s16 = smov 0   ;;  %s1288_s17 = smov 0  }
   0x4   :  { %s1290_s18 = smov 0   ;;  %s1292_s19 = smov 0  }
   0x5 LB: > { %s822_s20 = sadd.s32 4294967295, %s1252_s19   ;;  %s28_s21 = sadd.s32 1, %s1244_s17  ;;  %s1252_s19 = sphi %s1292_s19, %s16_s19   ;;  %s1248_s18 = sphi %s1290_s18, %s1530_s18   ;;  %s1244_s17 = sphi %s1288_s17, %s1529_s17   ;;  %s1240_s16 = sphi %s1286_s16, %s1528_s16   ;;  %s1236_s15 = sphi %s1284_s15, %s1527_s15   ;;  %s1232_s14 = sphi %s1282_s14, %s1526_s14   ;;  %s1228_s13 = sphi %s1280_s13, %s1525_s13   ;;  %s1224_s12 = sphi %s1278_s12, %s1524_s12  }
   0x6   : > { %p29_p0 = scmp.ge.s32.totalorder %s28_s21, 6  ;;  %s31_s22 = sadd.s32 1, %s1248_s18 }
   0x7   : > { %s72_s23 = sadd.s32 1, %s1232_s14  ;;  %p79_p1 = scmp.ne.s32.totalorder %s1232_s14, %s1228_s13 }
   0x8   : > { %s1532_s21 = smov (%p29_p0, %s28_s21), 0  ;;  %s1534_s22 = smov (!%p29_p0, %s31_s22), %s1248_s18 }
   0x9   : > { %s67_s24 = ssub.s32 %s1244_s17, %s1532_s21  ;;  %p80_p2 = scmp.eq.s32.totalorder %s1252_s19, 0 }
   0xa   : > { %p33_p3 = scmp.ge.s32.totalorder %s1534_s22, 2  ;;  %p85_p4 = scmp.ne.s32.totalorder %s1228_s13, %s1224_s12 }
   0xb   : > { %p1329_p5 = por %p80_p2, %p79_p1  ;;  %p86_p6 = scmp.eq.s32.totalorder %s822_s20, 0 }
   0xc   : > { %s1536_s22 = smov (%p33_p3, %s1534_s22), 0  ;;  %p1087_p8 = scmp.lt.s32.totalorder %s1252_s19, 12 }
   0xd   : > { %1521 = sst [smem:[#allocation6_spill]] %s1536_s22  ;;  %p1335_p7 = por %p86_p6, %p85_p4 }
   0xe   : > { %s68_s27 = ssub.s32 %s1248_s18, %s1536_s22  ;;  %s176_s29 = sand.u32 1, %s1232_s14  }
   0xf   : > { %s69_s28 = sor.u32 %s68_s27, %s67_s24  ;;  %s1079_s30 = smul.u32 384, %s176_s29 }
  0x10   : > { %p70_p9 = scmp.eq.s32.totalorder %s69_s28, 0  ;;  %s826_s4 = sshll.u32 %s1248_s18, 1 }
  0x11   : > { %s1030_s6 = smul.u32 192, %s1244_s17  ;;  %s180_s7 = scalar_lea.vmem [#allocation3], %s1079_s30 }
  0x12   : > { %s1345_s5 = scalar_select %p70_p9, %s1232_s14, %s72_s23  }
  0x13   : > { %s191_s8 = sshll.u32 %s180_s7, 4  ;;  %p1084_p10 = pnand %p1087_p8, %p1329_p5  ;;  %s192_s8 = int_to_ptr.vmem [resolvable:$true] %s191_s8 }
  0x14   : > { %s186_s9 = sadd.s32 %s1030_s6, %s826_s4  ;;  %s177_s27 = scalar_lea.sflag [#allocation4], %s176_s29 }
  0x15   : > { %s828_s10 = sshll.u32 %s186_s9, 2  ;;  %s1254_s28 = smov 256  }
  0x16   : > { %s188_s20 = scalar_lea.hbm %s1516_s1, %s828_s10  ;;  %s1255_s23 = smov 128  }
  0x17   : > { %s189_s24 = sshll.u32 %s188_s20, 4  ;;  %s1256_s22 = smov 8   ;;  %s190_s24 = int_to_ptr.hbm [resolvable:$true] %s189_s24 }
  0x18   : > { %1086 = dma.hbm_to_vmem [thread:$0]  (!%p1084_p10), %s190_s24, 6144, %s192_s8, %s177_s27, %s1254_s28, %s1255_s23, %s1256_s22  }
  0x19   : > { %p829_p11 = scmp.ge.s32.totalorder %s1252_s19, 1  ;;  %p207_p12 = scmp.lt.s32.totalorder %s1252_s19, 13 }
  0x1b   : > { %p208_p13 = pnand %p829_p11, %p207_p12 }
  0x1c   : > { %s213_s25 = sand.u32 (!%p208_p13), 1, %s1228_s13  }
  0x1d   : > { %211 = sbr.rel (%p208_p13) target bundleno = 259 (0x103), region = 32  ;;  %s214_s4 = scalar_lea.sflag (!%p208_p13), [#allocation4], %s213_s25 }
  0x1e   : > { %s1080_s30 = smul.u32 (!%p208_p13), 384, %s213_s25 }
  0x20   : > { %s1356_s6 = scalar_lea.vmem (!%p208_p13), [#allocation3], %s1080_s30 }
  0x22   : > { %1219 = dma.done.wait (%p1335_p7), %s214_s4, 6144  }
  0x23   : > { %1221 = vsyncadd (%p1335_p7), %s214_s4, 4294961152  ;;  %s258_s29 = smul.u32 3, %s1236_s15  ;;  %s831_s22 = sshll.u32 %s1240_s16, 1 }
  0x24   : > { %p271_p0 = scmp.lt.s32.totalorder %s831_s22, 3  ;;  %p834_p2 = scmp.ne.s32.totalorder %s1236_s15, 0 }
  0x25   : > { %p261_p1 = scmp.lt.s32.totalorder %s258_s29, 17 }
  0x26   : > { %s1538_s22 = smov (!%p271_p0, %s831_s22), 3  ;;  %288 = sbr.rel (%p834_p2) target bundleno = 46 (0x2e), region = 40 }
  0x27   : > { %s1540_s29 = smov (!%p261_p1, %s258_s29), 17  ;;  %s273_s9 = scalar_lea.vmem %s1517_s2, %s1538_s22 }
  0x28   : > { %s833_s10 = sshll.u32 %s1538_s22, 2  ;;  %s830_s11 = sshll.u32 %s1540_s29, 2 }
  0x29   : > { %s1374_s20 = scalar_lea.vmem %s1518_s3, %s833_s10  ;;  %s1379_s27 = scalar_lea.vmem %s1515_s0, %s830_s11 }
  0x2b   : > { %v1257_v0 = vmov 0.0  }
  0x2c   : > { %289 = vst [vmem:[#allocation2] sm:$0xff] %v1257_v0 }
  0x2d   : > { %290 = vst [vmem:[#allocation2 + $0x8] sm:$0xff] %v1257_v0 }
  0x2e PF: > { %v893_v1 = vld [vmem:[%s1356_s6 + $0x70] sm:$0xf]  ;;  %v1046_v2 = vld [vmem:[%s1356_s6 + $0x74] sm:$0xf0]  ;;  %v885_v6 = vld [vmem:[%s1356_s6 + $0x60] sm:$0xf] }
  0x2f   : > { %v957_v3 = vld [vmem:[%s1356_s6 + $0xf0] sm:$0xf]  ;;  %v894_v4 = vor.u32 %v1046_v2, %v893_v1  ;;  %v1062_v5 = vld [vmem:[%s1356_s6 + $0xf4] sm:$0xf0]  ;;  %v1044_v7 = vld [vmem:[%s1356_s6 + $0x64] sm:$0xf0] }
  0x30   : > { %v958_v8 = vor.u32 %v1062_v5, %v957_v3  ;;  %v949_v9 = vld [vmem:[%s1356_s6 + $0xe0] sm:$0xf]  ;;  %v1060_v10 = vld [vmem:[%s1356_s6 + $0xe4] sm:$0xf0]  ;;  %v886_v11 = vor.u32 %v1044_v7, %v885_v6  ;;  %v877_v12 = vld [vmem:[%s1356_s6 + $0x50] sm:$0xf] }
  0x31   : > { %594 = vmatpush.bf16.msra.mxu0 %v894_v4  ;;  %v950_v13 = vor.u32 %v1060_v10, %v949_v9  ;;  %v1042_v14 = vld [vmem:[%s1356_s6 + $0x54] sm:$0xf0]  ;;  %v1021_v15 = vld [vmem:[%s1356_s6 + $0x170] sm:$0xf]  ;;  %v1013_v20 = vld [vmem:[%s1356_s6 + $0x160] sm:$0xf] }
  0x32   : > { %607 = vmatpush.bf16.msra.mxu1 %v958_v8  ;;  %v1078_v16 = vld [vmem:[%s1356_s6 + $0x174] sm:$0xf0]  ;;  %v941_v17 = vld [vmem:[%s1356_s6 + $0xd0] sm:$0xf]  ;;  %v1076_v21 = vld [vmem:[%s1356_s6 + $0x164] sm:$0xf0]  ;;  %v878_v23 = vor.u32 %v1042_v14, %v877_v12 }
  0x33   : > { %v1058_v18 = vld [vmem:[%s1356_s6 + $0xd4] sm:$0xf0]  ;;  %v1022_v19 = vor.u32 %v1078_v16, %v1021_v15  ;;  %v1045_v22 = vld [vmem:[%s1356_s6 + $0x74] sm:$0xf]  ;;  %v869_v24 = vld [vmem:[%s1356_s6 + $0x40] sm:$0xf]  ;;  %v1014_v26 = vor.u32 %v1076_v21, %v1013_v20 }
  0x34   : > { %v1040_v25 = vld [vmem:[%s1356_s6 + $0x44] sm:$0xf0]  ;;  %v895_v27 = vld [vmem:[%s1356_s6 + $0x78] sm:$0xf0]  ;;  %v942_v28 = vor.u32 %v1058_v18, %v941_v17  ;;  %v933_v29 = vld [vmem:[%s1356_s6 + $0xc0] sm:$0xf] }
  0x35   : > { %595 = vmatpush.bf16.msra.mxu0 %v886_v11  ;;  %620 = vmatpush.bf16.msra.mxu2 %v1022_v19  ;;  %v1056_v30 = vld [vmem:[%s1356_s6 + $0xc4] sm:$0xf0]  ;;  %v898_v31 = vor.u32 %v1045_v22, %v895_v27  ;;  %v1005_v32 = vld [vmem:[%s1356_s6 + $0x150] sm:$0xf]  ;;  %v1074_v33 = vld [vmem:[%s1356_s6 + $0x154] sm:$0xf0]  ;;  %v870_v37 = vor.u32 %v1040_v25, %v869_v24 }
  0x36   : > { %608 = vmatpush.bf16.msra.mxu1 %v950_v13  ;;  %v1043_v34 = vld [vmem:[%s1356_s6 + $0x64] sm:$0xf]  ;;  %v887_v35 = vld [vmem:[%s1356_s6 + $0x68] sm:$0xf0]  ;;  %v861_v38 = vld [vmem:[%s1356_s6 + $0x30] sm:$0xf]  ;;  %v1006_v40 = vor.u32 %v1074_v33, %v1005_v32  ;;  %v934_v42 = vor.u32 %v1056_v30, %v933_v29 }
  0x37   : > { %633 = vmatpush.bf16.msra.mxu3 %v898_v31  ;;  %v890_v36 = vor.u32 %v1043_v34, %v887_v35  ;;  %v1038_v39 = vld [vmem:[%s1356_s6 + $0x34] sm:$0xf0]  ;;  %v997_v41 = vld [vmem:[%s1356_s6 + $0x140] sm:$0xf]  ;;  %v1072_v43 = vld [vmem:[%s1356_s6 + $0x144] sm:$0xf0] }
  0x38   : > { %v1041_v44 = vld [vmem:[%s1356_s6 + $0x54] sm:$0xf]  ;;  %v879_v45 = vld [vmem:[%s1356_s6 + $0x58] sm:$0xf0]  ;;  %v925_v46 = vld [vmem:[%s1356_s6 + $0xb0] sm:$0xf]  ;;  %v862_v49 = vor.u32 %v1038_v39, %v861_v38  ;;  %v998_v51 = vor.u32 %v1072_v43, %v997_v41 }
  0x39   : > { %596 = vmatpush.bf16.msra.mxu0 %v878_v23  ;;  %621 = vmatpush.bf16.msra.mxu2 %v1014_v26  ;;  %v1054_v47 = vld [vmem:[%s1356_s6 + $0xb4] sm:$0xf0]  ;;  %v882_v48 = vor.u32 %v1041_v44, %v879_v45  ;;  %v853_v50 = vld [vmem:[%s1356_s6 + $0x20] sm:$0xf]  ;;  %v1039_v52 = vld [vmem:[%s1356_s6 + $0x44] sm:$0xf] }
  0x3a   : > { %609 = vmatpush.bf16.msra.mxu1 %v942_v28  ;;  %v871_v53 = vld [vmem:[%s1356_s6 + $0x48] sm:$0xf0]  ;;  %v926_v54 = vor.u32 %v1054_v47, %v925_v46  ;;  %v1036_v55 = vld [vmem:[%s1356_s6 + $0x24] sm:$0xf0]  ;;  %v989_v56 = vld [vmem:[%s1356_s6 + $0x130] sm:$0xf] }
  0x3b   : > { %634 = vmatpush.bf16.msra.mxu3 %v890_v36  ;;  %v1070_v57 = vld [vmem:[%s1356_s6 + $0x134] sm:$0xf0]  ;;  %v917_v58 = vld [vmem:[%s1356_s6 + $0xa0] sm:$0xf]  ;;  %v1052_v59 = vld [vmem:[%s1356_s6 + $0xa4] sm:$0xf0]  ;;  %v874_v60 = vor.u32 %v1039_v52, %v871_v53  ;;  %v854_v61 = vor.u32 %v1036_v55, %v853_v50 }
  0x3c   : > { %v845_v62 = vld [vmem:[%s1356_s6 + $0x10] sm:$0xf]  ;;  %v990_v63 = vor.u32 %v1070_v57, %v989_v56  ;;  %v1037_v0 = vld [vmem:[%s1356_s6 + $0x34] sm:$0xf]  ;;  %v863_v1 = vld [vmem:[%s1356_s6 + $0x38] sm:$0xf0]  ;;  %v918_v2 = vor.u32 %v1052_v59, %v917_v58 }
  0x3d   : > { %597 = vmatpush.bf16.msra.mxu0 %v870_v37  ;;  %622 = vmatpush.bf16.msra.mxu2 %v1006_v40  ;;  %v1034_v3 = vld [vmem:[%s1356_s6 + $0x14] sm:$0xf0]  ;;  %v981_v4 = vld [vmem:[%s1356_s6 + $0x120] sm:$0xf]  ;;  %v1068_v5 = vld [vmem:[%s1356_s6 + $0x124] sm:$0xf0]  ;;  %v866_v10 = vor.u32 %v1037_v0, %v863_v1 }
  0x3e   : > { %610 = vmatpush.bf16.msra.mxu1 %v934_v42  ;;  %v909_v6 = vld [vmem:[%s1356_s6 + $0x90] sm:$0xf]  ;;  %v1050_v7 = vld [vmem:[%s1356_s6 + $0x94] sm:$0xf0]  ;;  %v837_v8 = vld [vmem:[%s1356_s6] sm:$0xf]  ;;  %v846_v11 = vor.u32 %v1034_v3, %v845_v62  ;;  %v982_v12 = vor.u32 %v1068_v5, %v981_v4 }
  0x3f   : > { %635 = vmatpush.bf16.msra.mxu3 %v882_v48  ;;  %v1032_v9 = vld [vmem:[%s1356_s6 + $0x4] sm:$0xf0]  ;;  %v1035_v13 = vld [vmem:[%s1356_s6 + $0x24] sm:$0xf]  ;;  %v855_v14 = vld [vmem:[%s1356_s6 + $0x28] sm:$0xf0]  ;;  %v910_v16 = vor.u32 %v1050_v7, %v909_v6 }
  0x40   : > { %v293_v15 = vld [vmem:[%s1379_s27] sm:$0xff]  ;;  %v901_v17 = vld [vmem:[%s1356_s6 + $0x80] sm:$0xf]  ;;  %v1066_v19 = vld [vmem:[%s1356_s6 + $0x114] sm:$0xf0]  ;;  %v858_v25 = vor.u32 %v1035_v13, %v855_v14  ;;  %v838_v27 = vor.u32 %v1032_v9, %v837_v8  ;;  %p1027_p3 = scmp.ne.s32.totalorder %s1236_s15, 5 }
  0x41   : > { %598 = vmatpush.bf16.msra.mxu0 %v862_v49  ;;  %623 = vmatpush.bf16.msra.mxu2 %v998_v51  ;;  %v973_v18 = vld [vmem:[%s1356_s6 + $0x110] sm:$0xf]  ;;  %v1048_v20 = vld [vmem:[%s1356_s6 + $0x84] sm:$0xf0]  ;;  %v1061_v21 = vld [vmem:[%s1356_s6 + $0xf4] sm:$0xf]  ;;  %v345_v26 = vunpack.c.l.b16 %v293_v15  ;;  %v346_v29 = vunpack.c.h.b16 %v293_v15 }
  0x42   : > { %611 = vmatpush.bf16.msra.mxu1 %v926_v54  ;;  %v959_v22 = vld [vmem:[%s1356_s6 + $0xf8] sm:$0xf0]  ;;  %v1077_v23 = vld [vmem:[%s1356_s6 + $0x174] sm:$0xf]  ;;  %v974_v28 = vor.u32 %v1066_v19, %v973_v18  ;;  %v294_v32 = vld [vmem:[%s1379_s27 + $0x8] sm:$0xf]  ;;  %v902_v33 = vor.u32 %v1048_v20, %v901_v17 }
  0x43   : > { %636 = vmatpush.bf16.msra.mxu3 %v874_v60  ;;  %v1023_v24 = vld [vmem:[%s1356_s6 + $0x178] sm:$0xf0]  ;;  %v1033_v30 = vld [vmem:[%s1356_s6 + $0x14] sm:$0xf]  ;;  %v962_v34 = vor.u32 %v1061_v21, %v959_v22  ;;  %v965_v35 = vld [vmem:[%s1356_s6 + $0x100] sm:$0xf]  ;;  %v348_v42 = vpack.c.b16 %v345_v26, %v345_v26  ;;  %v347_v44 = vunpack.c.l.b16 %v294_v32  ;;  %v1454_v45 = vpack.c.b16 %v346_v29, %v346_v29 }
  0x44   : > { %v847_v31 = vld [vmem:[%s1356_s6 + $0x18] sm:$0xf0]  ;;  %v1064_v36 = vld [vmem:[%s1356_s6 + $0x104] sm:$0xf0]  ;;  %v1026_v37 = vor.u32 %v1077_v23, %v1023_v24  ;;  %v1059_v38 = vld [vmem:[%s1356_s6 + $0xe4] sm:$0xf] }
  0x45   : > { %599 = vmatpush.bf16.msra.mxu0 %v854_v61  ;;  %624 = vmatpush.bf16.msra.mxu2 %v990_v63  ;;  %v951_v39 = vld [vmem:[%s1356_s6 + $0xe8] sm:$0xf0]  ;;  %v1075_v40 = vld [vmem:[%s1356_s6 + $0x164] sm:$0xf]  ;;  %v850_v43 = vor.u32 %v1033_v30, %v847_v31  ;;  %v966_v46 = vor.u32 %v1064_v36, %v965_v35  ;;  %v1057_v51 = vld [vmem:[%s1356_s6 + $0xd4] sm:$0xf]  ;;  %v350_v55 = vpack.c.b16 %v347_v44, %v347_v44 }
  0x46   : > { %612 = vmatpush.bf16.msra.mxu1 %v918_v2  ;;  %v1015_v41 = vld [vmem:[%s1356_s6 + $0x168] sm:$0xf0]  ;;  %v1031_v47 = vld [vmem:[%s1356_s6 + $0x4] sm:$0xf]  ;;  %v954_v49 = vor.u32 %v1059_v38, %v951_v39  ;;  %v943_v52 = vld [vmem:[%s1356_s6 + $0xd8] sm:$0xf0] }
  0x47   : > { %637 = vmatpush.bf16.msra.mxu3 %v866_v10  ;;  %v839_v48 = vld [vmem:[%s1356_s6 + $0x8] sm:$0xf0]  ;;  %v1018_v50 = vor.u32 %v1075_v40, %v1015_v41  ;;  %v1073_v53 = vld [vmem:[%s1356_s6 + $0x154] sm:$0xf]  ;;  %v1007_v54 = vld [vmem:[%s1356_s6 + $0x158] sm:$0xf0]  ;;  %v946_v57 = vor.u32 %v1057_v51, %v943_v52 }
  0x48   : > { %v842_v56 = vor.u32 %v1031_v47, %v839_v48  ;;  %v1010_v58 = vor.u32 %v1073_v53, %v1007_v54  ;;  %v1055_v59 = vld [vmem:[%s1356_s6 + $0xc4] sm:$0xf]  ;;  %v935_v60 = vld [vmem:[%s1356_s6 + $0xc8] sm:$0xf0]  ;;  %v1053_v1 = vld [vmem:[%s1356_s6 + $0xb4] sm:$0xf] }
  0x49   : > { %600 = vmatpush.bf16.msra.mxu0 %v846_v11  ;;  %625 = vmatpush.bf16.msra.mxu2 %v982_v12  ;;  %v1071_v61 = vld [vmem:[%s1356_s6 + $0x144] sm:$0xf]  ;;  %v999_v62 = vld [vmem:[%s1356_s6 + $0x148] sm:$0xf0]  ;;  %v938_v63 = vor.u32 %v1055_v59, %v935_v60  ;;  %v927_v2 = vld [vmem:[%s1356_s6 + $0xb8] sm:$0xf0] }
  0x4a   : > { %613 = vmatpush.bf16.msra.mxu1 %v910_v16  ;;  %v1002_v0 = vor.u32 %v1071_v61, %v999_v62  ;;  %v1069_v3 = vld [vmem:[%s1356_s6 + $0x134] sm:$0xf]  ;;  %v991_v4 = vld [vmem:[%s1356_s6 + $0x138] sm:$0xf0]  ;;  %v930_v5 = vor.u32 %v1053_v1, %v927_v2  ;;  %v1051_v7 = vld [vmem:[%s1356_s6 + $0xa4] sm:$0xf] }
  0x4b   : > { %638 = vmatpush.bf16.msra.mxu3 %v858_v25  ;;  %v994_v6 = vor.u32 %v1069_v3, %v991_v4  ;;  %v919_v8 = vld [vmem:[%s1356_s6 + $0xa8] sm:$0xf0]  ;;  %v1067_v9 = vld [vmem:[%s1356_s6 + $0x124] sm:$0xf]  ;;  %v1049_v13 = vld [vmem:[%s1356_s6 + $0x94] sm:$0xf] }
  0x4c   : > { %v983_v10 = vld [vmem:[%s1356_s6 + $0x128] sm:$0xf0]  ;;  %v922_v11 = vor.u32 %v1051_v7, %v919_v8  ;;  %v911_v14 = vld [vmem:[%s1356_s6 + $0x98] sm:$0xf0]  ;;  %v1065_v15 = vld [vmem:[%s1356_s6 + $0x114] sm:$0xf] }
  0x4d   : > { %601 = vmatpush.bf16.msra.mxu0 %v838_v27  ;;  %626 = vmatpush.bf16.msra.mxu2 %v974_v28  ;;  %v986_v12 = vor.u32 %v1067_v9, %v983_v10  ;;  %v975_v16 = vld [vmem:[%s1356_s6 + $0x118] sm:$0xf0]  ;;  %v914_v17 = vor.u32 %v1049_v13, %v911_v14  ;;  %v1047_v19 = vld [vmem:[%s1356_s6 + $0x84] sm:$0xf]  ;;  %v903_v20 = vld [vmem:[%s1356_s6 + $0x88] sm:$0xf0] }
  0x4e   : > { %614 = vmatpush.bf16.msra.mxu1 %v902_v33  ;;  %v978_v18 = vor.u32 %v1065_v15, %v975_v16  ;;  %v1063_v21 = vld [vmem:[%s1356_s6 + $0x104] sm:$0xf]  ;;  %v967_v22 = vld [vmem:[%s1356_s6 + $0x108] sm:$0xf0]  ;;  %v906_v23 = vor.u32 %v1047_v19, %v903_v20  ;;  %v291_v30 = vld [vmem:[#allocation2] sm:$0xff] }
  0x4f   : > { %639 = vmatpush.bf16.msra.mxu3 %v850_v43  ;;  %v970_v24 = vor.u32 %v1063_v21, %v967_v22  ;;  %v292_v40 = vld [vmem:[#allocation2 + $0x8] sm:$0xff] }
  0x50   : > { %602 = vmatmul.bf16.vlgmr.msra.gmra.mxu0 %v348_v42 }
  0x51   : > { %646 = vmatpush.bf16.msrb.mxu0 %v962_v34  ;;  %615 = vmatmul.bf16.vlgmr.msra.gmra.mxu1 %v1454_v45 }
  0x52   : > { %659 = vmatpush.bf16.msrb.mxu1 %v1026_v37  ;;  %627 = vmatpush.bf16.msra.mxu2 %v966_v46 }
  0x53   : > { %640 = vmatpush.bf16.msra.mxu3 %v842_v56 }
  0x55   : > { %647 = vmatpush.bf16.msrb.mxu0 %v954_v49  ;;  %628 = vmatmul.bf16.vlgmr.msra.gmra.mxu2 %v350_v55 }
  0x56   : > { %660 = vmatpush.bf16.msrb.mxu1 %v1018_v50  ;;  %641 = vmatmul.bf16.vlgmr.msra.gmra.mxu3 %v348_v42 }
  0x59   : > { %648 = vmatpush.bf16.msrb.mxu0 %v946_v57 }
  0x5a   : > { %661 = vmatpush.bf16.msrb.mxu1 %v1010_v58 }
  0x5d   : > { %649 = vmatpush.bf16.msrb.mxu0 %v938_v63 }
  0x5e   : > { %662 = vmatpush.bf16.msrb.mxu1 %v1002_v0 }
  0x61   : > { %650 = vmatpush.bf16.msrb.mxu0 %v930_v5 }
  0x62   : > { %663 = vmatpush.bf16.msrb.mxu1 %v994_v6 }
  0x65   : > { %651 = vmatpush.bf16.msrb.mxu0 %v922_v11 }
  0x66   : > { %664 = vmatpush.bf16.msrb.mxu1 %v986_v12 }
  0x69   : > { %652 = vmatpush.bf16.msrb.mxu0 %v914_v17 }
  0x6a   : > { %665 = vmatpush.bf16.msrb.mxu1 %v978_v18 }
  0x6d   : > { %653 = vmatpush.bf16.msrb.mxu0 %v906_v23 }
  0x6e   : > { %666 = vmatpush.bf16.msrb.mxu1 %v970_v24 }
  0x70   : > { %654 = vmatmul.bf16.vlgmr.msrb.gmra.mxu0 %v1454_v45 }
  0x71   : > { %667 = vmatmul.bf16.vlgmr.msrb.gmra.mxu1 %v350_v55 }
  0xcd   : > { %v603_v25 = vpop.f32.mrf.mxu0 }
  0xce   : > { %v616_v26 = vpop.f32.mrf.mxu1 }
  0xcf   : > { %v617_v27 = vadd.f32 %v616_v26, %v603_v25 }
  0xd5   : > { %v605_v28 = vpop.f32.mrf.mxu0 }
  0xd6   : > { %v618_v29 = vpop.f32.mrf.mxu1 }
  0xd8   : > { %v629_v31 = vpop.f32.mrf.mxu2 }
  0xd9   : > { %v630_v32 = vadd.f32 %v629_v31, %v617_v27  ;;  %v642_v34 = vpop.f32.mrf.mxu3 }
  0xdb   : > { %v672_v33 = vadd.f32 %v630_v32, %v291_v30 }
  0xdd   : > { %674 = vst [vmem:[#allocation2] sm:$0xff] %v672_v33 }
  0xe0   : > { %v631_v35 = vpop.f32.mrf.mxu2 }
  0xe1   : > { %v644_v36 = vpop.f32.mrf.mxu3 }
  0xed   : > { %v655_v37 = vpop.f32.mrf.mxu0 }
  0xee   : > { %v656_v38 = vadd.f32 %v655_v37, %v642_v34  ;;  %v668_v39 = vpop.f32.mrf.mxu1 }
  0xf0   : > { %v669_v41 = vadd.f32 %v668_v39, %v656_v38 }
  0xf2   : > { %v673_v42 = vadd.f32 %v669_v41, %v292_v40  ;;  %679 = sbr.rel (%p1027_p3) target bundleno = 259 (0x103), region = 44 }
  0xf4   : > { %675 = vst [vmem:[#allocation2 + $0x8] sm:$0xff] %v673_v42 }
  0xf5   : > { %v657_v43 = vpop.f32.mrf.mxu0 }
  0xf6   : > { %v670_v44 = vpop.f32.mrf.mxu1 }
  0xf7   : > { %v680_v45 = vld [vmem:[#allocation2] sm:$0xff] }
  0xf8   : > { %v682_v47 = vld [vmem:[%s273_s9] sm:$0x3] }
  0xf9   : > { %v684_v48 = vperm.slane %v682_v47, 0  ;;  %v685_v49 = vperm.slane %v682_v47, 1 }
  0xfb   : > { %v681_v46 = vld [vmem:[#allocation2 + $0x8] sm:$0xff]  ;;  %v688_v50 = vadd.f32 %v684_v48, %v680_v45 }
  0xfc   : > { %v689_v51 = vadd.f32 %v685_v49, %v681_v46 }
  0xfd   : > { %v690_v52 = vmax.f32 %v688_v50, 0.0 }
  0xfe   : > { %v691_v53 = vmax.f32 %v689_v51, 0.0 }
 0x100   : > { %v692_v54 = vpack.c.bf16 %v691_v53, %v690_v52 }
 0x102   : > { %693 = vst [vmem:[%s1374_s20] sm:$0xff] %v692_v54 }
 0x103 PF: > { %s16_s19 = sadd.s32 1, %s1252_s19   ;;  %s1523_s25 = sld [smem:[#allocation6_spill]] }
 0x104   : > { %p13_p4 = scmp.ge.s32.totalorder %s16_s19, 14   ;;  %s1524_s12 = smov %s1228_s13 }
 0x105   : > { %s1525_s13 = smov %s1232_s14  ;;  %s1526_s14 = smov %s1345_s5 }
 0x106   : > { %s1527_s15 = smov %s1244_s17  ;;  %s1528_s16 = smov %s1248_s18 }
 0x107   : > { %s1529_s17 = smov %s1532_s21  ;;  %15 = sbr.rel (!%p13_p4) target bundleno = 5 (0x5), region = 86 }
 0x109   : > { %s1530_s18 = smov %s1523_s25 }
 0x10c   :  { %724 = vsyncpa [#allocation4], 1 }
 0x10d   :  { %726 = vsyncpa [#allocation4 + $0x1], 1 }

// kernel: clsnet_forward.37
= control target key start
LH: loop header
LB: loop body
LE: loop exit
PB: predicated region body
PF: predicated region fallthrough
CT: control target
= control target key end

     0   :  { %8 = vsyncpa [#allocation4], 0  ;;  %s1190_s0 = inlined_call_operand.vmem [shape: bf16[8,256], index: 0, kind: input, shape index: {}]   ;;  %s1191_s1 = inlined_call_operand.hbm [shape: bf16[256,512], index: 1, kind: input, shape index: {}]   ;;  %s1192_s2 = inlined_call_operand.vmem [shape: f32[1,512], index: 2, kind: input, shape index: {}]   ;;  %s1193_s3 = inlined_call_operand.vmem [shape: bf16[8,512], index: 3, kind: output, shape index: {}]  }
   0x1   :  { %10 = vsyncpa [#allocation4 + $0x1], 0  ;;  %s1031_s12 = smov 0   ;;  %s1033_s13 = smov 0  }
   0x2   :  { %s1035_s14 = smov 0   ;;  %s1037_s15 = smov 0  }
   0x3   :  { %s1039_s16 = smov 0   ;;  %s1041_s17 = smov 0  }
   0x4 LB: > { %s692_s18 = sadd.s32 4294967295, %s1006_s17   ;;  %s31_s19 = sadd.s32 1, %s1002_s16  ;;  %s1006_s17 = sphi %s1041_s17, %s16_s17   ;;  %s1002_s16 = sphi %s1039_s16, %s1200_s16   ;;  %s998_s15 = sphi %s1037_s15, %s1199_s15   ;;  %s994_s14 = sphi %s1035_s14, %s1198_s14   ;;  %s990_s13 = sphi %s1033_s13, %s1197_s13   ;;  %s986_s12 = sphi %s1031_s12, %s1196_s12  }
   0x5   : > { %p33_p0 = scmp.ge.s32.totalorder %s31_s19, 2  ;;  %s72_s20 = sadd.s32 1, %s994_s14 }
   0x6   : > { %p79_p1 = scmp.ne.s32.totalorder %s994_s14, %s990_s13  ;;  %p80_p2 = scmp.eq.s32.totalorder %s1006_s17, 0 }
   0x7   : > { %s1202_s19 = smov (%p33_p0, %s31_s19), 0  ;;  %p85_p4 = scmp.ne.s32.totalorder %s990_s13, %s986_s12 }
   0x8   : > { %p1067_p3 = por %p80_p2, %p79_p1  ;;  %s68_s22 = ssub.s32 %s1002_s16, %s1202_s19 }
   0x9   : > { %p86_p5 = scmp.eq.s32.totalorder %s692_s18, 0  ;;  %p70_p6 = scmp.eq.s32.totalorder %s68_s22, 0 }
   0xa   : > { %p874_p8 = scmp.lt.s32.totalorder %s1006_s17, 2  ;;  %s176_s25 = sand.u32 1, %s994_s14  }
   0xb   : > { %p1074_p7 = por %p86_p5, %p85_p4  ;;  %s835_s26 = sshll.u32 %s1002_s16, 3 }
   0xc   : > { %s1080_s24 = scalar_select %p70_p6, %s994_s14, %s72_s20  }
   0xd   : > { %s697_s27 = sshll.u32 %s176_s25, 8  ;;  %s188_s30 = scalar_lea.hbm %s1191_s1, %s835_s26 }
   0xe   : > { %s189_s4 = sshll.u32 %s188_s30, 4  ;;  %s180_s5 = scalar_lea.vmem [#allocation3], %s697_s27  ;;  %s190_s4 = int_to_ptr.hbm [resolvable:$true] %s189_s4 }
   0xf   : > { %s191_s6 = sshll.u32 %s180_s5, 4  ;;  %p871_p9 = pnand %p874_p8, %p1067_p3  ;;  %s192_s6 = int_to_ptr.vmem [resolvable:$true] %s191_s6 }
  0x10   : > { %p700_p10 = scmp.ge.s32.totalorder %s1006_s17, 1  ;;  %s177_s7 = scalar_lea.sflag [#allocation4], %s176_s25 }
  0x11   : > { %s1008_s8 = smov 256   ;;  %s1009_s9 = smov 128  }
  0x12   : > { %s1010_s10 = smov 8   ;;  %p207_p11 = scmp.lt.s32.totalorder %s1006_s17, 3 }
  0x13   : > { %873 = dma.hbm_to_vmem [thread:$0]  (!%p871_p9), %s190_s4, 4096, %s192_s6, %s177_s7, %s1008_s8, %s1009_s9, %s1010_s10  }
  0x14   : > { %p208_p12 = pnand %p700_p10, %p207_p11 }
  0x15   : > { %s213_s11 = sand.u32 (!%p208_p12), 1, %s990_s13  }
  0x16   : > { %211 = sbr.rel (%p208_p12) target bundleno = 205 (0xcd), region = 32  ;;  %s701_s12 = sshll.u32 (!%p208_p12), %s213_s11, 8 }
  0x17   : > { %s214_s18 = scalar_lea.sflag (!%p208_p12), [#allocation4], %s213_s11  ;;  %s1092_s20 = scalar_lea.vmem (!%p208_p12), [#allocation3], %s701_s12 }
  0x1b   : > { %981 = dma.done.wait (%p1074_p7), %s214_s18, 4096  }
  0x1c   : > { %983 = vsyncadd (%p1074_p7), %s214_s18, 4294963200  ;;  %v763_v0 = vld [vmem:[%s1092_s20 + $0x70] sm:$0xf]  ;;  %v851_v1 = vld [vmem:[%s1092_s20 + $0x74] sm:$0xf0]  ;;  %s702_s23 = sshll.u32 %s998_s15, 1 }
  0x1d   : > { %v827_v2 = vld [vmem:[%s1092_s20 + $0xf0] sm:$0xf]  ;;  %v764_v3 = vor.u32 %v851_v1, %v763_v0  ;;  %v867_v4 = vld [vmem:[%s1092_s20 + $0xf4] sm:$0xf0]  ;;  %v850_v5 = vld [vmem:[%s1092_s20 + $0x74] sm:$0xf] }
  0x1e   : > { %v765_v6 = vld [vmem:[%s1092_s20 + $0x78] sm:$0xf0]  ;;  %v828_v7 = vor.u32 %v867_v4, %v827_v2  ;;  %v866_v9 = vld [vmem:[%s1092_s20 + $0xf4] sm:$0xf]  ;;  %v755_v11 = vld [vmem:[%s1092_s20 + $0x60] sm:$0xf] }
  0x1f   : > { %v768_v8 = vor.u32 %v850_v5, %v765_v6  ;;  %v829_v10 = vld [vmem:[%s1092_s20 + $0xf8] sm:$0xf0]  ;;  %493 = vmatpush.bf16.msra.mxu0 %v764_v3  ;;  %v849_v13 = vld [vmem:[%s1092_s20 + $0x64] sm:$0xf0]  ;;  %v819_v14 = vld [vmem:[%s1092_s20 + $0xe0] sm:$0xf] }
  0x20   : > { %v832_v12 = vor.u32 %v866_v9, %v829_v10  ;;  %v865_v15 = vld [vmem:[%s1092_s20 + $0xe4] sm:$0xf0]  ;;  %506 = vmatpush.bf16.msra.mxu1 %v828_v7  ;;  %v756_v16 = vor.u32 %v849_v13, %v755_v11  ;;  %v848_v18 = vld [vmem:[%s1092_s20 + $0x64] sm:$0xf]  ;;  %v757_v19 = vld [vmem:[%s1092_s20 + $0x68] sm:$0xf0] }
  0x21   : > { %519 = vmatpush.bf16.msra.mxu2 %v768_v8  ;;  %v820_v17 = vor.u32 %v865_v15, %v819_v14  ;;  %v864_v20 = vld [vmem:[%s1092_s20 + $0xe4] sm:$0xf]  ;;  %v760_v21 = vor.u32 %v848_v18, %v757_v19  ;;  %v821_v22 = vld [vmem:[%s1092_s20 + $0xe8] sm:$0xf0]  ;;  %v747_v23 = vld [vmem:[%s1092_s20 + $0x50] sm:$0xf] }
  0x22   : > { %532 = vmatpush.bf16.msra.mxu3 %v832_v12  ;;  %v847_v24 = vld [vmem:[%s1092_s20 + $0x54] sm:$0xf0]  ;;  %v824_v25 = vor.u32 %v864_v20, %v821_v22  ;;  %v811_v26 = vld [vmem:[%s1092_s20 + $0xd0] sm:$0xf]  ;;  %v846_v28 = vld [vmem:[%s1092_s20 + $0x54] sm:$0xf] }
  0x23   : > { %v863_v27 = vld [vmem:[%s1092_s20 + $0xd4] sm:$0xf0]  ;;  %494 = vmatpush.bf16.msra.mxu0 %v756_v16  ;;  %v748_v29 = vor.u32 %v847_v24, %v747_v23  ;;  %v749_v30 = vld [vmem:[%s1092_s20 + $0x58] sm:$0xf0]  ;;  %v862_v31 = vld [vmem:[%s1092_s20 + $0xd4] sm:$0xf] }
  0x24   : > { %v813_v32 = vld [vmem:[%s1092_s20 + $0xd8] sm:$0xf0]  ;;  %507 = vmatpush.bf16.msra.mxu1 %v820_v17  ;;  %v812_v33 = vor.u32 %v863_v27, %v811_v26  ;;  %v752_v34 = vor.u32 %v846_v28, %v749_v30  ;;  %v739_v35 = vld [vmem:[%s1092_s20 + $0x40] sm:$0xf]  ;;  %v845_v36 = vld [vmem:[%s1092_s20 + $0x44] sm:$0xf0] }
  0x25   : > { %520 = vmatpush.bf16.msra.mxu2 %v760_v21  ;;  %v803_v37 = vld [vmem:[%s1092_s20 + $0xc0] sm:$0xf]  ;;  %v816_v38 = vor.u32 %v862_v31, %v813_v32  ;;  %v861_v39 = vld [vmem:[%s1092_s20 + $0xc4] sm:$0xf0]  ;;  %v844_v40 = vld [vmem:[%s1092_s20 + $0x44] sm:$0xf]  ;;  %v740_v44 = vor.u32 %v845_v36, %v739_v35 }
  0x26   : > { %533 = vmatpush.bf16.msra.mxu3 %v824_v25  ;;  %v741_v41 = vld [vmem:[%s1092_s20 + $0x48] sm:$0xf0]  ;;  %v860_v42 = vld [vmem:[%s1092_s20 + $0xc4] sm:$0xf]  ;;  %v804_v45 = vor.u32 %v861_v39, %v803_v37  ;;  %v731_v47 = vld [vmem:[%s1092_s20 + $0x30] sm:$0xf] }
  0x27   : > { %v805_v43 = vld [vmem:[%s1092_s20 + $0xc8] sm:$0xf0]  ;;  %495 = vmatpush.bf16.msra.mxu0 %v748_v29  ;;  %v744_v46 = vor.u32 %v844_v40, %v741_v41  ;;  %v843_v48 = vld [vmem:[%s1092_s20 + $0x34] sm:$0xf0]  ;;  %v795_v49 = vld [vmem:[%s1092_s20 + $0xb0] sm:$0xf] }
  0x28   : > { %508 = vmatpush.bf16.msra.mxu1 %v812_v33  ;;  %v808_v50 = vor.u32 %v860_v42, %v805_v43  ;;  %v859_v51 = vld [vmem:[%s1092_s20 + $0xb4] sm:$0xf0]  ;;  %v842_v52 = vld [vmem:[%s1092_s20 + $0x34] sm:$0xf]  ;;  %v733_v53 = vld [vmem:[%s1092_s20 + $0x38] sm:$0xf0]  ;;  %v732_v56 = vor.u32 %v843_v48, %v731_v47 }
  0x29   : > { %521 = vmatpush.bf16.msra.mxu2 %v752_v34  ;;  %v858_v54 = vld [vmem:[%s1092_s20 + $0xb4] sm:$0xf]  ;;  %v797_v55 = vld [vmem:[%s1092_s20 + $0xb8] sm:$0xf0]  ;;  %v796_v57 = vor.u32 %v859_v51, %v795_v49  ;;  %v736_v58 = vor.u32 %v842_v52, %v733_v53  ;;  %v723_v59 = vld [vmem:[%s1092_s20 + $0x20] sm:$0xf] }
  0x2a   : > { %534 = vmatpush.bf16.msra.mxu3 %v816_v38  ;;  %v841_v60 = vld [vmem:[%s1092_s20 + $0x24] sm:$0xf0]  ;;  %v787_v61 = vld [vmem:[%s1092_s20 + $0xa0] sm:$0xf]  ;;  %v800_v62 = vor.u32 %v858_v54, %v797_v55  ;;  %v840_v0 = vld [vmem:[%s1092_s20 + $0x24] sm:$0xf] }
  0x2b   : > { %496 = vmatpush.bf16.msra.mxu0 %v740_v44  ;;  %v857_v63 = vld [vmem:[%s1092_s20 + $0xa4] sm:$0xf0]  ;;  %v725_v1 = vld [vmem:[%s1092_s20 + $0x28] sm:$0xf0]  ;;  %v856_v2 = vld [vmem:[%s1092_s20 + $0xa4] sm:$0xf]  ;;  %v724_v4 = vor.u32 %v841_v60, %v723_v59 }
  0x2c   : > { %509 = vmatpush.bf16.msra.mxu1 %v804_v45  ;;  %v789_v3 = vld [vmem:[%s1092_s20 + $0xa8] sm:$0xf0]  ;;  %v788_v5 = vor.u32 %v857_v63, %v787_v61  ;;  %v728_v6 = vor.u32 %v840_v0, %v725_v1  ;;  %v715_v7 = vld [vmem:[%s1092_s20 + $0x10] sm:$0xf]  ;;  %v839_v8 = vld [vmem:[%s1092_s20 + $0x14] sm:$0xf0] }
  0x2d   : > { %522 = vmatpush.bf16.msra.mxu2 %v744_v46  ;;  %v779_v9 = vld [vmem:[%s1092_s20 + $0x90] sm:$0xf]  ;;  %v792_v10 = vor.u32 %v856_v2, %v789_v3  ;;  %v855_v11 = vld [vmem:[%s1092_s20 + $0x94] sm:$0xf0]  ;;  %v838_v12 = vld [vmem:[%s1092_s20 + $0x14] sm:$0xf]  ;;  %v716_v16 = vor.u32 %v839_v8, %v715_v7 }
  0x2e   : > { %535 = vmatpush.bf16.msra.mxu3 %v808_v50  ;;  %v717_v13 = vld [vmem:[%s1092_s20 + $0x18] sm:$0xf0]  ;;  %v854_v14 = vld [vmem:[%s1092_s20 + $0x94] sm:$0xf]  ;;  %v293_v17 = vld [vmem:[%s1190_s0] sm:$0xff]  ;;  %v780_v18 = vor.u32 %v855_v11, %v779_v9  ;;  %p271_p13 = scmp.lt.s32.totalorder %s702_s23, 3 }
  0x2f   : > { %497 = vmatpush.bf16.msra.mxu0 %v732_v56  ;;  %v781_v15 = vld [vmem:[%s1092_s20 + $0x98] sm:$0xf0]  ;;  %v720_v19 = vor.u32 %v838_v12, %v717_v13  ;;  %v707_v20 = vld [vmem:[%s1092_s20] sm:$0xf]  ;;  %v837_v21 = vld [vmem:[%s1092_s20 + $0x4] sm:$0xf0]  ;;  %v327_v29 = vunpack.c.l.b16 %v293_v17  ;;  %v328_v31 = vunpack.c.h.b16 %v293_v17 }
  0x30   : > { %510 = vmatpush.bf16.msra.mxu1 %v796_v57  ;;  %v771_v22 = vld [vmem:[%s1092_s20 + $0x80] sm:$0xf]  ;;  %v784_v23 = vor.u32 %v854_v14, %v781_v15  ;;  %v853_v24 = vld [vmem:[%s1092_s20 + $0x84] sm:$0xf0]  ;;  %v836_v25 = vld [vmem:[%s1092_s20 + $0x4] sm:$0xf]  ;;  %v708_v30 = vor.u32 %v837_v21, %v707_v20 }
  0x31   : > { %523 = vmatpush.bf16.msra.mxu2 %v736_v58  ;;  %v709_v26 = vld [vmem:[%s1092_s20 + $0x8] sm:$0xf0]  ;;  %v852_v27 = vld [vmem:[%s1092_s20 + $0x84] sm:$0xf]  ;;  %v772_v32 = vor.u32 %v853_v24, %v771_v22  ;;  %v329_v35 = vpack.c.b16 %v327_v29, %v327_v29  ;;  %v330_v36 = vpack.c.b16 %v328_v31, %v328_v31  ;;  %s1204_s23 = smov (!%p271_p13, %s702_s23), 3 }
  0x32   : > { %536 = vmatpush.bf16.msra.mxu3 %v800_v62  ;;  %v773_v28 = vld [vmem:[%s1092_s20 + $0x88] sm:$0xf0]  ;;  %v712_v33 = vor.u32 %v836_v25, %v709_v26  ;;  %s273_s27 = scalar_lea.vmem %s1192_s2, %s1204_s23  ;;  %s704_s28 = sshll.u32 %s1204_s23, 2 }
  0x33   : > { %498 = vmatpush.bf16.msra.mxu0 %v724_v4  ;;  %v776_v34 = vor.u32 %v852_v27, %v773_v28  ;;  %v554_v39 = vld [vmem:[%s273_s27] sm:$0x3]  ;;  %s283_s30 = scalar_lea.vmem %s1193_s3, %s704_s28 }
  0x34   : > { %511 = vmatpush.bf16.msra.mxu1 %v788_v5  ;;  %v556_v41 = vperm.slane %v554_v39, 0  ;;  %v557_v43 = vperm.slane %v554_v39, 1 }
  0x35   : > { %524 = vmatpush.bf16.msra.mxu2 %v728_v6 }
  0x36   : > { %537 = vmatpush.bf16.msra.mxu3 %v792_v10 }
  0x37   : > { %499 = vmatpush.bf16.msra.mxu0 %v716_v16 }
  0x38   : > { %512 = vmatpush.bf16.msra.mxu1 %v780_v18 }
  0x39   : > { %525 = vmatpush.bf16.msra.mxu2 %v720_v19 }
  0x3a   : > { %538 = vmatpush.bf16.msra.mxu3 %v784_v23 }
  0x3b   : > { %500 = vmatpush.bf16.msra.mxu0 %v708_v30 }
  0x3c   : > { %513 = vmatpush.bf16.msra.mxu1 %v772_v32 }
  0x3d   : > { %526 = vmatpush.bf16.msra.mxu2 %v712_v33 }
  0x3e   : > { %539 = vmatpush.bf16.msra.mxu3 %v776_v34  ;;  %501 = vmatmul.bf16.vlgmr.msra.gmra.mxu0 %v329_v35 }
  0x3f   : > { %514 = vmatmul.bf16.vlgmr.msra.gmra.mxu1 %v330_v36 }
  0x40   : > { %527 = vmatmul.bf16.vlgmr.msra.gmra.mxu2 %v329_v35 }
  0x41   : > { %540 = vmatmul.bf16.vlgmr.msra.gmra.mxu3 %v330_v36 }
  0xbb   : > { %v502_v37 = vpop.f32.mrf.mxu0 }
  0xbc   : > { %v515_v38 = vpop.f32.mrf.mxu1 }
  0xbd   : > { %v516_v40 = vadd.f32 %v515_v38, %v502_v37 }
  0xbf   : > { %v560_v46 = vadd.f32 %v556_v41, %v516_v40 }
  0xc3   : > { %v528_v42 = vpop.f32.mrf.mxu2  ;;  %v504_v45 = vpop.f32.mrf.mxu0 }
  0xc4   : > { %v541_v44 = vpop.f32.mrf.mxu3  ;;  %v517_v48 = vpop.f32.mrf.mxu1 }
  0xc5   : > { %v542_v47 = vadd.f32 %v541_v44, %v528_v42 }
  0xc7   : > { %v561_v49 = vadd.f32 %v557_v43, %v542_v47 }
  0xc9   : > { %v562_v50 = vpack.c.bf16 %v561_v49, %v560_v46 }
  0xcb   : > { %563 = vst [vmem:[%s283_s30] sm:$0xff] %v562_v50  ;;  %v530_v51 = vpop.f32.mrf.mxu2 }
  0xcc   : > { %v543_v52 = vpop.f32.mrf.mxu3 }
  0xcd PF: > { %s16_s17 = sadd.s32 1, %s1006_s17   ;;  %s1196_s12 = smov %s990_s13 }
  0xce   : > { %p13_p0 = scmp.ge.s32.totalorder %s16_s17, 4   ;;  %s1197_s13 = smov %s994_s14 }
  0xcf   : > { %s1198_s14 = smov %s1080_s24  ;;  %s1199_s15 = smov %s1002_s16 }
  0xd0   : > { %s1200_s16 = smov %s1202_s19  ;;  %15 = sbr.rel (!%p13_p0) target bundleno = 4 (0x4), region = 86 }
  0xd5   :  { %594 = vsyncpa [#allocation4], 1 }
  0xd6   :  { %596 = vsyncpa [#allocation4 + $0x1], 1 }

// kernel: clsnet_forward.38
= control target key start
LH: loop header
LB: loop body
LE: loop exit
PB: predicated region body
PF: predicated region fallthrough
CT: control target
= control target key end

     0   :  { %s1776_s15 = smov 0   ;;  %s1778_s16 = smov 0   ;;  %s2173_s0 = inlined_call_operand.vmem [shape: bf16[8,4608], index: 0, kind: input, shape index: {}]   ;;  %s2174_s1 = inlined_call_operand.vmem [shape: bf16[4608,512], index: 1, kind: input, shape index: {}]   ;;  %s2175_s2 = inlined_call_operand.vmem [shape: f32[1,512], index: 2, kind: input, shape index: {}]   ;;  %s2176_s3 = inlined_call_operand.vmem [shape: bf16[8,512], index: 3, kind: input, shape index: {}]   ;;  %s2177_s4 = inlined_call_operand.vmem [shape: bf16[8,512], index: 4, kind: output, shape index: {}]  }
   0x1   :  { %s1780_s17 = smov 0   ;;  %s1782_s18 = smov 0  }
   0x2   :  { %s1784_s19 = smov 0   ;;  %s1786_s20 = smov 0  }
   0x3   :  { %s1788_s21 = smov 0  }
   0x4 LB: > { %s26_s22 = sadd.s32 1, %s1740_s19  ;;  %s29_s23 = sadd.s32 1, %s1744_s20  ;;  %s1748_s21 = sphi %s1788_s21, %s14_s21   ;;  %s1744_s20 = sphi %s1786_s20, %s2183_s20   ;;  %s1740_s19 = sphi %s1784_s19, %s2182_s19   ;;  %s1736_s18 = sphi %s1782_s18, %s2181_s18   ;;  %s1732_s17 = sphi %s1780_s17, %s2180_s17   ;;  %s1728_s16 = sphi %s1778_s16, %s2179_s16   ;;  %s1724_s15 = sphi %s1776_s15, %s2178_s15  }
   0x5   : > { %p27_p0 = scmp.ge.s32.totalorder %s26_s22, 9  ;;  %p77_p1 = scmp.ne.s32.totalorder %s1728_s16, %s1724_s15 }
   0x6   : > { %p78_p2 = scmp.eq.s32.totalorder %s1748_s21, 0  ;;  %s70_s27 = sadd.s32 1, %s1728_s16 }
   0x7   : > { %s2185_s22 = smov (%p27_p0, %s26_s22), 0  ;;  %s2187_s23 = smov (!%p27_p0, %s29_s23), %s1744_s20 }
   0x8   : > { %p79_p3 = por %p78_p2, %p77_p1  ;;  %p31_p4 = scmp.ge.s32.totalorder %s2187_s23, 2 }
   0x9   : > { %s65_s24 = ssub.s32 %s1740_s19, %s2185_s22  ;;  %p1297_p6 = scmp.ge.s32.totalorder %s1748_s21, 18 }
   0xa   : > { %s2189_s23 = smov (%p31_p4, %s2187_s23), 0 }
   0xb   : > { %s66_s25 = ssub.s32 %s1744_s20, %s2189_s23  ;;  %185 = sbr.rel (%p1297_p6) target bundleno = 87 (0x57), region = 16 }
   0xc   : > { %s67_s26 = sor.u32 %s66_s25, %s65_s24 }
   0xd   : > { %p68_p5 = scmp.eq.s32.totalorder %s67_s26, 0 }
   0xf   : > { %s1827_s28 = scalar_select %p68_p5, %s1728_s16, %s70_s27  }
  0x10   : > { %201 = sbr.rel (!%p79_p3) target bundleno = 87 (0x57), region = 24  ;;  %s203_s29 = sand.u32 (%p79_p3), 1, %s1728_s16  }
  0x11   : > { %s1300_s30 = sshll.u32 (%p79_p3), %s1744_s20, 1  ;;  %s1298_s5 = sshll.u32 (%p79_p3), %s203_s29, 9 }
  0x12   : > { %s1572_s6 = sshll.u32 (%p79_p3), %s1740_s19, 8  ;;  %s1841_s12 = scalar_lea.vmem (%p79_p3), [#allocation3], %s1298_s5 }
  0x13   : > { %s209_s7 = sadd.s32 (%p79_p3), %s1572_s6, %s1300_s30 }
  0x14   : > { %s1302_s8 = sshll.u32 (%p79_p3), %s209_s7, 2 }
  0x15   : > { %s1836_s11 = scalar_lea.vmem %s2174_s1, %s1302_s8 }
  0x16   : > { %v366_v0 = vld [vmem:[%s1836_s11] sm:$0xff]  ;;  %v368_v1 = vld [vmem:[%s1836_s11 + $0x10] sm:$0xff] }
  0x17   : > { %v370_v2 = vld [vmem:[%s1836_s11 + $0x20] sm:$0xff]  ;;  %367 = vst [vmem:[%s1841_s12] sm:$0xff] %v366_v0  ;;  %v372_v3 = vld [vmem:[%s1836_s11 + $0x30] sm:$0xff] }
  0x18   : > { %369 = vst [vmem:[%s1841_s12 + $0x8] sm:$0xff] %v368_v1  ;;  %v374_v4 = vld [vmem:[%s1836_s11 + $0x40] sm:$0xff]  ;;  %v376_v5 = vld [vmem:[%s1836_s11 + $0x50] sm:$0xff] }
  0x19   : > { %371 = vst [vmem:[%s1841_s12 + $0x10] sm:$0xff] %v370_v2  ;;  %v378_v6 = vld [vmem:[%s1836_s11 + $0x60] sm:$0xff]  ;;  %v380_v7 = vld [vmem:[%s1836_s11 + $0x70] sm:$0xff] }
  0x1a   : > { %373 = vst [vmem:[%s1841_s12 + $0x18] sm:$0xff] %v372_v3  ;;  %v382_v8 = vld [vmem:[%s1836_s11 + $0x80] sm:$0xff]  ;;  %v384_v9 = vld [vmem:[%s1836_s11 + $0x90] sm:$0xff] }
  0x1b   : > { %375 = vst [vmem:[%s1841_s12 + $0x20] sm:$0xff] %v374_v4  ;;  %v386_v10 = vld [vmem:[%s1836_s11 + $0xa0] sm:$0xff]  ;;  %v388_v11 = vld [vmem:[%s1836_s11 + $0xb0] sm:$0xff] }
  0x1c   : > { %377 = vst [vmem:[%s1841_s12 + $0x28] sm:$0xff] %v376_v5  ;;  %v390_v12 = vld [vmem:[%s1836_s11 + $0xc0] sm:$0xff]  ;;  %v392_v13 = vld [vmem:[%s1836_s11 + $0xd0] sm:$0xff] }
  0x1d   : > { %379 = vst [vmem:[%s1841_s12 + $0x30] sm:$0xff] %v378_v6  ;;  %v394_v14 = vld [vmem:[%s1836_s11 + $0xe0] sm:$0xff]  ;;  %v396_v15 = vld [vmem:[%s1836_s11 + $0xf0] sm:$0xff] }
  0x1e   : > { %381 = vst [vmem:[%s1841_s12 + $0x38] sm:$0xff] %v380_v7  ;;  %v398_v16 = vld [vmem:[%s1836_s11 + $0x100] sm:$0xff]  ;;  %v400_v17 = vld [vmem:[%s1836_s11 + $0x110] sm:$0xff] }
  0x1f   : > { %383 = vst [vmem:[%s1841_s12 + $0x40] sm:$0xff] %v382_v8  ;;  %v402_v18 = vld [vmem:[%s1836_s11 + $0x120] sm:$0xff]  ;;  %v404_v19 = vld [vmem:[%s1836_s11 + $0x130] sm:$0xff] }
  0x20   : > { %385 = vst [vmem:[%s1841_s12 + $0x48] sm:$0xff] %v384_v9  ;;  %v406_v20 = vld [vmem:[%s1836_s11 + $0x140] sm:$0xff]  ;;  %v408_v21 = vld [vmem:[%s1836_s11 + $0x150] sm:$0xff] }
  0x21   : > { %387 = vst [vmem:[%s1841_s12 + $0x50] sm:$0xff] %v386_v10  ;;  %v410_v22 = vld [vmem:[%s1836_s11 + $0x160] sm:$0xff]  ;;  %v412_v23 = vld [vmem:[%s1836_s11 + $0x170] sm:$0xff] }
  0x22   : > { %389 = vst [vmem:[%s1841_s12 + $0x58] sm:$0xff] %v388_v11  ;;  %v414_v24 = vld [vmem:[%s1836_s11 + $0x180] sm:$0xff]  ;;  %v416_v25 = vld [vmem:[%s1836_s11 + $0x190] sm:$0xff] }
  0x23   : > { %391 = vst [vmem:[%s1841_s12 + $0x60] sm:$0xff] %v390_v12  ;;  %v418_v26 = vld [vmem:[%s1836_s11 + $0x1a0] sm:$0xff]  ;;  %v420_v27 = vld [vmem:[%s1836_s11 + $0x1b0] sm:$0xff] }
  0x24   : > { %393 = vst [vmem:[%s1841_s12 + $0x68] sm:$0xff] %v392_v13  ;;  %v422_v28 = vld [vmem:[%s1836_s11 + $0x1c0] sm:$0xff]  ;;  %v424_v29 = vld [vmem:[%s1836_s11 + $0x1d0] sm:$0xff] }
  0x25   : > { %395 = vst [vmem:[%s1841_s12 + $0x70] sm:$0xff] %v394_v14  ;;  %v426_v30 = vld [vmem:[%s1836_s11 + $0x1e0] sm:$0xff]  ;;  %v428_v31 = vld [vmem:[%s1836_s11 + $0x1f0] sm:$0xff] }
  0x26   : > { %397 = vst [vmem:[%s1841_s12 + $0x78] sm:$0xff] %v396_v15  ;;  %v430_v32 = vld [vmem:[%s1836_s11 + $0x200] sm:$0xff]  ;;  %v432_v33 = vld [vmem:[%s1836_s11 + $0x210] sm:$0xff] }
  0x27   : > { %399 = vst [vmem:[%s1841_s12 + $0x80] sm:$0xff] %v398_v16  ;;  %v434_v34 = vld [vmem:[%s1836_s11 + $0x220] sm:$0xff]  ;;  %v436_v35 = vld [vmem:[%s1836_s11 + $0x230] sm:$0xff] }
  0x28   : > { %401 = vst [vmem:[%s1841_s12 + $0x88] sm:$0xff] %v400_v17  ;;  %v438_v36 = vld [vmem:[%s1836_s11 + $0x240] sm:$0xff]  ;;  %v440_v37 = vld [vmem:[%s1836_s11 + $0x250] sm:$0xff] }
  0x29   : > { %403 = vst [vmem:[%s1841_s12 + $0x90] sm:$0xff] %v402_v18  ;;  %v442_v38 = vld [vmem:[%s1836_s11 + $0x260] sm:$0xff]  ;;  %v444_v39 = vld [vmem:[%s1836_s11 + $0x270] sm:$0xff] }
  0x2a   : > { %405 = vst [vmem:[%s1841_s12 + $0x98] sm:$0xff] %v404_v19  ;;  %v446_v40 = vld [vmem:[%s1836_s11 + $0x280] sm:$0xff]  ;;  %v448_v41 = vld [vmem:[%s1836_s11 + $0x290] sm:$0xff] }
  0x2b   : > { %407 = vst [vmem:[%s1841_s12 + $0xa0] sm:$0xff] %v406_v20  ;;  %v450_v42 = vld [vmem:[%s1836_s11 + $0x2a0] sm:$0xff]  ;;  %v452_v43 = vld [vmem:[%s1836_s11 + $0x2b0] sm:$0xff] }
  0x2c   : > { %409 = vst [vmem:[%s1841_s12 + $0xa8] sm:$0xff] %v408_v21  ;;  %v454_v44 = vld [vmem:[%s1836_s11 + $0x2c0] sm:$0xff]  ;;  %v456_v45 = vld [vmem:[%s1836_s11 + $0x2d0] sm:$0xff] }
  0x2d   : > { %411 = vst [vmem:[%s1841_s12 + $0xb0] sm:$0xff] %v410_v22  ;;  %v458_v46 = vld [vmem:[%s1836_s11 + $0x2e0] sm:$0xff]  ;;  %v460_v47 = vld [vmem:[%s1836_s11 + $0x2f0] sm:$0xff] }
  0x2e   : > { %413 = vst [vmem:[%s1841_s12 + $0xb8] sm:$0xff] %v412_v23  ;;  %v462_v48 = vld [vmem:[%s1836_s11 + $0x300] sm:$0xff]  ;;  %v464_v49 = vld [vmem:[%s1836_s11 + $0x310] sm:$0xff] }
  0x2f   : > { %415 = vst [vmem:[%s1841_s12 + $0xc0] sm:$0xff] %v414_v24  ;;  %v466_v50 = vld [vmem:[%s1836_s11 + $0x320] sm:$0xff]  ;;  %v468_v51 = vld [vmem:[%s1836_s11 + $0x330] sm:$0xff] }
  0x30   : > { %417 = vst [vmem:[%s1841_s12 + $0xc8] sm:$0xff] %v416_v25  ;;  %v470_v52 = vld [vmem:[%s1836_s11 + $0x340] sm:$0xff]  ;;  %v472_v53 = vld [vmem:[%s1836_s11 + $0x350] sm:$0xff] }
  0x31   : > { %419 = vst [vmem:[%s1841_s12 + $0xd0] sm:$0xff] %v418_v26  ;;  %v474_v54 = vld [vmem:[%s1836_s11 + $0x360] sm:$0xff]  ;;  %v476_v55 = vld [vmem:[%s1836_s11 + $0x370] sm:$0xff] }
  0x32   : > { %421 = vst [vmem:[%s1841_s12 + $0xd8] sm:$0xff] %v420_v27  ;;  %v478_v56 = vld [vmem:[%s1836_s11 + $0x380] sm:$0xff]  ;;  %v480_v57 = vld [vmem:[%s1836_s11 + $0x390] sm:$0xff] }
  0x33   : > { %423 = vst [vmem:[%s1841_s12 + $0xe0] sm:$0xff] %v422_v28  ;;  %v482_v58 = vld [vmem:[%s1836_s11 + $0x3a0] sm:$0xff]  ;;  %v484_v59 = vld [vmem:[%s1836_s11 + $0x3b0] sm:$0xff] }
  0x34   : > { %425 = vst [vmem:[%s1841_s12 + $0xe8] sm:$0xff] %v424_v29  ;;  %v486_v60 = vld [vmem:[%s1836_s11 + $0x3c0] sm:$0xff]  ;;  %v488_v61 = vld [vmem:[%s1836_s11 + $0x3d0] sm:$0xff] }
  0x35   : > { %427 = vst [vmem:[%s1841_s12 + $0xf0] sm:$0xff] %v426_v30  ;;  %v490_v62 = vld [vmem:[%s1836_s11 + $0x3e0] sm:$0xff]  ;;  %v492_v63 = vld [vmem:[%s1836_s11 + $0x3f0] sm:$0xff] }
  0x36   : > { %429 = vst [vmem:[%s1841_s12 + $0xf8] sm:$0xff] %v428_v31 }
  0x37   : > { %431 = vst [vmem:[%s1841_s12 + $0x100] sm:$0xff] %v430_v32 }
  0x38   : > { %433 = vst [vmem:[%s1841_s12 + $0x108] sm:$0xff] %v432_v33 }
  0x39   : > { %435 = vst [vmem:[%s1841_s12 + $0x110] sm:$0xff] %v434_v34 }
  0x3a   : > { %437 = vst [vmem:[%s1841_s12 + $0x118] sm:$0xff] %v436_v35 }
  0x3b   : > { %439 = vst [vmem:[%s1841_s12 + $0x120] sm:$0xff] %v438_v36 }
  0x3c   : > { %441 = vst [vmem:[%s1841_s12 + $0x128] sm:$0xff] %v440_v37 }
  0x3d   : > { %443 = vst [vmem:[%s1841_s12 + $0x130] sm:$0xff] %v442_v38 }
  0x3e   : > { %445 = vst [vmem:[%s1841_s12 + $0x138] sm:$0xff] %v444_v39 }
  0x3f   : > { %447 = vst [vmem:[%s1841_s12 + $0x140] sm:$0xff] %v446_v40 }
  0x40   : > { %449 = vst [vmem:[%s1841_s12 + $0x148] sm:$0xff] %v448_v41 }
  0x41   : > { %451 = vst [vmem:[%s1841_s12 + $0x150] sm:$0xff] %v450_v42 }
  0x42   : > { %453 = vst [vmem:[%s1841_s12 + $0x158] sm:$0xff] %v452_v43 }
  0x43   : > { %455 = vst [vmem:[%s1841_s12 + $0x160] sm:$0xff] %v454_v44 }
  0x44   : > { %457 = vst [vmem:[%s1841_s12 + $0x168] sm:$0xff] %v456_v45 }
  0x45   : > { %459 = vst [vmem:[%s1841_s12 + $0x170] sm:$0xff] %v458_v46 }
  0x46   : > { %461 = vst [vmem:[%s1841_s12 + $0x178] sm:$0xff] %v460_v47 }
  0x47   : > { %463 = vst [vmem:[%s1841_s12 + $0x180] sm:$0xff] %v462_v48 }
  0x48   : > { %465 = vst [vmem:[%s1841_s12 + $0x188] sm:$0xff] %v464_v49 }
  0x49   : > { %467 = vst [vmem:[%s1841_s12 + $0x190] sm:$0xff] %v466_v50 }
  0x4a   : > { %469 = vst [vmem:[%s1841_s12 + $0x198] sm:$0xff] %v468_v51 }
  0x4b   : > { %471 = vst [vmem:[%s1841_s12 + $0x1a0] sm:$0xff] %v470_v52 }
  0x4c   : > { %473 = vst [vmem:[%s1841_s12 + $0x1a8] sm:$0xff] %v472_v53 }
  0x4d   : > { %475 = vst [vmem:[%s1841_s12 + $0x1b0] sm:$0xff] %v474_v54 }
  0x4e   : > { %477 = vst [vmem:[%s1841_s12 + $0x1b8] sm:$0xff] %v476_v55 }
  0x4f   : > { %479 = vst [vmem:[%s1841_s12 + $0x1c0] sm:$0xff] %v478_v56 }
  0x50   : > { %481 = vst [vmem:[%s1841_s12 + $0x1c8] sm:$0xff] %v480_v57 }
  0x51   : > { %483 = vst [vmem:[%s1841_s12 + $0x1d0] sm:$0xff] %v482_v58 }
  0x52   : > { %485 = vst [vmem:[%s1841_s12 + $0x1d8] sm:$0xff] %v484_v59 }
  0x53   : > { %487 = vst [vmem:[%s1841_s12 + $0x1e0] sm:$0xff] %v486_v60 }
  0x54   : > { %489 = vst [vmem:[%s1841_s12 + $0x1e8] sm:$0xff] %v488_v61 }
  0x55   : > { %491 = vst [vmem:[%s1841_s12 + $0x1f0] sm:$0xff] %v490_v62 }
  0x56   : > { %493 = vst [vmem:[%s1841_s12 + $0x1f8] sm:$0xff] %v492_v63 }
  0x57 PF: > { %p1303_p7 = scmp.ge.s32.totalorder %s1748_s21, 1  ;;  %p519_p8 = scmp.lt.s32.totalorder %s1748_s21, 19 }
  0x59   : > { %p520_p9 = pnand %p1303_p7, %p519_p8 }
  0x5a   : > { %s526_s13 = sand.u32 (!%p520_p9), 1, %s1724_s15   ;;  %s1305_s14 = sshll.u32 (!%p520_p9), %s1732_s17, 2 }
  0x5b   : > { %523 = sbr.rel (%p520_p9) target bundleno = 331 (0x14b), region = 70  ;;  %s1304_s24 = sshll.u32 (!%p520_p9), %s526_s13, 9 }
  0x5c   : > { %p580_p10 = scmp.lt.s32.totalorder (!%p520_p9), %s1305_s14, 35  ;;  %s1307_s25 = sshll.u32 (!%p520_p9), %s1736_s18, 1 }
  0x5d   : > { %p590_p11 = scmp.lt.s32.totalorder (!%p520_p9), %s1307_s25, 3  ;;  %s1995_s13 = scalar_lea.vmem (!%p520_p9), [#allocation3], %s1304_s24 }
  0x5e   : > { %p1312_p12 = scmp.ne.s32.totalorder (!%p520_p9), %s1732_s17, 0 }
  0x60   : > { %s2191_s14 = smov (!%p580_p10, %s1305_s14), 35  ;;  %s2193_s25 = smov (!%p590_p11, %s1307_s25), 3 }
  0x61   : > { %s1306_s26 = sshll.u32 %s2191_s14, 2  ;;  %s592_s15 = scalar_lea.vmem %s2175_s2, %s2193_s25 }
  0x62   : > { %s1976_s30 = scalar_lea.vmem %s2173_s0, %s1306_s26  ;;  %s1309_s7 = sshll.u32 %s2193_s25, 2 }
  0x63   : > { %s1988_s18 = scalar_lea.vmem %s2176_s3, %s1309_s7  ;;  %s1993_s12 = scalar_lea.vmem %s2177_s4, %s1309_s7 }
  0x64   : > { %617 = sbr.rel (%p1312_p12) target bundleno = 108 (0x6c), region = 78 }
  0x69   : > { %v1750_v0 = vmov 0.0  }
  0x6a   : > { %618 = vst [vmem:[#allocation2] sm:$0xff] %v1750_v0 }
  0x6b   : > { %619 = vst [vmem:[#allocation2 + $0x8] sm:$0xff] %v1750_v0 }
  0x6c PF: > { %v1371_v1 = vld [vmem:[%s1995_s13 + $0x70] sm:$0xf]  ;;  %v1588_v2 = vld [vmem:[%s1995_s13 + $0x74] sm:$0xf0]  ;;  %v1363_v12 = vld [vmem:[%s1995_s13 + $0x60] sm:$0xf] }
  0x6d   : > { %v1435_v3 = vld [vmem:[%s1995_s13 + $0xf0] sm:$0xf]  ;;  %v1372_v4 = vor.u32 %v1588_v2, %v1371_v1  ;;  %v1604_v5 = vld [vmem:[%s1995_s13 + $0xf4] sm:$0xf0]  ;;  %v1586_v14 = vld [vmem:[%s1995_s13 + $0x64] sm:$0xf0] }
  0x6e   : > { %v1499_v6 = vld [vmem:[%s1995_s13 + $0x170] sm:$0xf]  ;;  %v1620_v7 = vld [vmem:[%s1995_s13 + $0x174] sm:$0xf0]  ;;  %v1436_v8 = vor.u32 %v1604_v5, %v1435_v3  ;;  %v1427_v15 = vld [vmem:[%s1995_s13 + $0xe0] sm:$0xf]  ;;  %v1364_v17 = vor.u32 %v1586_v14, %v1363_v12 }
  0x6f   : > { %v1500_v9 = vor.u32 %v1620_v7, %v1499_v6  ;;  %v1563_v10 = vld [vmem:[%s1995_s13 + $0x1f0] sm:$0xf]  ;;  %v1636_v11 = vld [vmem:[%s1995_s13 + $0x1f4] sm:$0xf0]  ;;  %1022 = vmatpush.bf16.msra.mxu0 %v1372_v4  ;;  %v1602_v16 = vld [vmem:[%s1995_s13 + $0xe4] sm:$0xf0] }
  0x70   : > { %v1564_v13 = vor.u32 %v1636_v11, %v1563_v10  ;;  %1035 = vmatpush.bf16.msra.mxu1 %v1436_v8  ;;  %v1428_v18 = vor.u32 %v1602_v16, %v1427_v15  ;;  %v1491_v19 = vld [vmem:[%s1995_s13 + $0x160] sm:$0xf]  ;;  %v1618_v20 = vld [vmem:[%s1995_s13 + $0x164] sm:$0xf0]  ;;  %v1355_v24 = vld [vmem:[%s1995_s13 + $0x50] sm:$0xf] }
  0x71   : > { %1048 = vmatpush.bf16.msra.mxu2 %v1500_v9  ;;  %v1555_v21 = vld [vmem:[%s1995_s13 + $0x1e0] sm:$0xf]  ;;  %v1492_v22 = vor.u32 %v1618_v20, %v1491_v19  ;;  %v1634_v23 = vld [vmem:[%s1995_s13 + $0x1e4] sm:$0xf0]  ;;  %v1584_v25 = vld [vmem:[%s1995_s13 + $0x54] sm:$0xf0] }
  0x72   : > { %1061 = vmatpush.bf16.msra.mxu3 %v1564_v13  ;;  %v1556_v26 = vor.u32 %v1634_v23, %v1555_v21  ;;  %v1419_v27 = vld [vmem:[%s1995_s13 + $0xd0] sm:$0xf]  ;;  %v1600_v28 = vld [vmem:[%s1995_s13 + $0xd4] sm:$0xf0]  ;;  %v1356_v30 = vor.u32 %v1584_v25, %v1355_v24  ;;  %v1347_v36 = vld [vmem:[%s1995_s13 + $0x40] sm:$0xf] }
  0x73   : > { %v1483_v29 = vld [vmem:[%s1995_s13 + $0x150] sm:$0xf]  ;;  %1023 = vmatpush.bf16.msra.mxu0 %v1364_v17  ;;  %v1616_v31 = vld [vmem:[%s1995_s13 + $0x154] sm:$0xf0]  ;;  %v1420_v34 = vor.u32 %v1600_v28, %v1419_v27  ;;  %v1582_v37 = vld [vmem:[%s1995_s13 + $0x44] sm:$0xf0] }
  0x74   : > { %v1547_v32 = vld [vmem:[%s1995_s13 + $0x1d0] sm:$0xf]  ;;  %v1632_v33 = vld [vmem:[%s1995_s13 + $0x1d4] sm:$0xf0]  ;;  %1036 = vmatpush.bf16.msra.mxu1 %v1428_v18  ;;  %v1484_v35 = vor.u32 %v1616_v31, %v1483_v29  ;;  %v1411_v38 = vld [vmem:[%s1995_s13 + $0xc0] sm:$0xf]  ;;  %v1348_v45 = vor.u32 %v1582_v37, %v1347_v36 }
  0x75   : > { %1049 = vmatpush.bf16.msra.mxu2 %v1492_v22  ;;  %v1548_v39 = vor.u32 %v1632_v33, %v1547_v32  ;;  %v1598_v40 = vld [vmem:[%s1995_s13 + $0xc4] sm:$0xf0]  ;;  %v1475_v41 = vld [vmem:[%s1995_s13 + $0x140] sm:$0xf]  ;;  %v1339_v48 = vld [vmem:[%s1995_s13 + $0x30] sm:$0xf] }
  0x76   : > { %1062 = vmatpush.bf16.msra.mxu3 %v1556_v26  ;;  %v1614_v42 = vld [vmem:[%s1995_s13 + $0x144] sm:$0xf0]  ;;  %v1539_v43 = vld [vmem:[%s1995_s13 + $0x1c0] sm:$0xf]  ;;  %v1412_v46 = vor.u32 %v1598_v40, %v1411_v38  ;;  %v1580_v49 = vld [vmem:[%s1995_s13 + $0x34] sm:$0xf0] }
  0x77   : > { %v1630_v44 = vld [vmem:[%s1995_s13 + $0x1c4] sm:$0xf0]  ;;  %1024 = vmatpush.bf16.msra.mxu0 %v1356_v30  ;;  %v1476_v47 = vor.u32 %v1614_v42, %v1475_v41  ;;  %v1403_v50 = vld [vmem:[%s1995_s13 + $0xb0] sm:$0xf]  ;;  %v1596_v52 = vld [vmem:[%s1995_s13 + $0xb4] sm:$0xf0]  ;;  %v1340_v57 = vor.u32 %v1580_v49, %v1339_v48 }
  0x78   : > { %1037 = vmatpush.bf16.msra.mxu1 %v1420_v34  ;;  %v1540_v51 = vor.u32 %v1630_v44, %v1539_v43  ;;  %v1467_v53 = vld [vmem:[%s1995_s13 + $0x130] sm:$0xf]  ;;  %v1612_v54 = vld [vmem:[%s1995_s13 + $0x134] sm:$0xf0]  ;;  %v1404_v58 = vor.u32 %v1596_v52, %v1403_v50  ;;  %v1331_v60 = vld [vmem:[%s1995_s13 + $0x20] sm:$0xf] }
  0x79   : > { %1050 = vmatpush.bf16.msra.mxu2 %v1484_v35  ;;  %v1531_v55 = vld [vmem:[%s1995_s13 + $0x1b0] sm:$0xf]  ;;  %v1628_v56 = vld [vmem:[%s1995_s13 + $0x1b4] sm:$0xf0]  ;;  %v1468_v59 = vor.u32 %v1612_v54, %v1467_v53  ;;  %v1578_v61 = vld [vmem:[%s1995_s13 + $0x24] sm:$0xf0] }
  0x7a   : > { %1063 = vmatpush.bf16.msra.mxu3 %v1548_v39  ;;  %v1395_v62 = vld [vmem:[%s1995_s13 + $0xa0] sm:$0xf]  ;;  %v1532_v63 = vor.u32 %v1628_v56, %v1531_v55  ;;  %v1594_v0 = vld [vmem:[%s1995_s13 + $0xa4] sm:$0xf0]  ;;  %v1332_v5 = vor.u32 %v1578_v61, %v1331_v60  ;;  %v1323_v8 = vld [vmem:[%s1995_s13 + $0x10] sm:$0xf] }
  0x7b   : > { %1025 = vmatpush.bf16.msra.mxu0 %v1348_v45  ;;  %v1459_v1 = vld [vmem:[%s1995_s13 + $0x120] sm:$0xf]  ;;  %v1610_v2 = vld [vmem:[%s1995_s13 + $0x124] sm:$0xf0]  ;;  %v1396_v6 = vor.u32 %v1594_v0, %v1395_v62  ;;  %v1576_v9 = vld [vmem:[%s1995_s13 + $0x14] sm:$0xf0] }
  0x7c   : > { %1038 = vmatpush.bf16.msra.mxu1 %v1412_v46  ;;  %v1523_v3 = vld [vmem:[%s1995_s13 + $0x1a0] sm:$0xf]  ;;  %v1626_v4 = vld [vmem:[%s1995_s13 + $0x1a4] sm:$0xf0]  ;;  %v1460_v7 = vor.u32 %v1610_v2, %v1459_v1  ;;  %v1387_v10 = vld [vmem:[%s1995_s13 + $0x90] sm:$0xf]  ;;  %v1324_v17 = vor.u32 %v1576_v9, %v1323_v8 }
  0x7d   : > { %1051 = vmatpush.bf16.msra.mxu2 %v1476_v47  ;;  %v1524_v11 = vor.u32 %v1626_v4, %v1523_v3  ;;  %v1592_v12 = vld [vmem:[%s1995_s13 + $0x94] sm:$0xf0]  ;;  %v1451_v13 = vld [vmem:[%s1995_s13 + $0x110] sm:$0xf]  ;;  %v1315_v18 = vld [vmem:[%s1995_s13] sm:$0xf] }
  0x7e   : > { %1064 = vmatpush.bf16.msra.mxu3 %v1540_v51  ;;  %v1608_v14 = vld [vmem:[%s1995_s13 + $0x114] sm:$0xf0]  ;;  %v1515_v15 = vld [vmem:[%s1995_s13 + $0x190] sm:$0xf]  ;;  %v1574_v19 = vld [vmem:[%s1995_s13 + $0x4] sm:$0xf0]  ;;  %v1388_v21 = vor.u32 %v1592_v12, %v1387_v10 }
  0x7f   : > { %1026 = vmatpush.bf16.msra.mxu0 %v1340_v57  ;;  %v1624_v16 = vld [vmem:[%s1995_s13 + $0x194] sm:$0xf0]  ;;  %v1379_v20 = vld [vmem:[%s1995_s13 + $0x80] sm:$0xf]  ;;  %v1452_v22 = vor.u32 %v1608_v14, %v1451_v13  ;;  %v1590_v23 = vld [vmem:[%s1995_s13 + $0x84] sm:$0xf0]  ;;  %v1316_v33 = vor.u32 %v1574_v19, %v1315_v18 }
  0x80   : > { %1039 = vmatpush.bf16.msra.mxu1 %v1404_v58  ;;  %v1443_v24 = vld [vmem:[%s1995_s13 + $0x100] sm:$0xf]  ;;  %v1606_v25 = vld [vmem:[%s1995_s13 + $0x104] sm:$0xf0]  ;;  %v1516_v26 = vor.u32 %v1624_v16, %v1515_v15  ;;  %v1587_v29 = vld [vmem:[%s1995_s13 + $0x74] sm:$0xf]  ;;  %v1380_v38 = vor.u32 %v1590_v23, %v1379_v20 }
  0x81   : > { %1052 = vmatpush.bf16.msra.mxu2 %v1468_v59  ;;  %v1507_v27 = vld [vmem:[%s1995_s13 + $0x180] sm:$0xf]  ;;  %v1622_v28 = vld [vmem:[%s1995_s13 + $0x184] sm:$0xf0]  ;;  %v1373_v30 = vld [vmem:[%s1995_s13 + $0x78] sm:$0xf0]  ;;  %v1444_v39 = vor.u32 %v1606_v25, %v1443_v24 }
  0x82   : > { %1065 = vmatpush.bf16.msra.mxu3 %v1532_v63  ;;  %v1603_v31 = vld [vmem:[%s1995_s13 + $0xf4] sm:$0xf]  ;;  %v623_v32 = vld [vmem:[%s1976_s30 + $0x8] sm:$0xff]  ;;  %v1508_v43 = vor.u32 %v1622_v28, %v1507_v27  ;;  %v1376_v44 = vor.u32 %v1587_v29, %v1373_v30  ;;  %v1585_v48 = vld [vmem:[%s1995_s13 + $0x64] sm:$0xf]  ;;  %p1569_p13 = scmp.ne.s32.totalorder %s1732_s17, 8 }
  0x83   : > { %1027 = vmatpush.bf16.msra.mxu0 %v1332_v5  ;;  %v1437_v34 = vld [vmem:[%s1995_s13 + $0xf8] sm:$0xf0]  ;;  %v1619_v35 = vld [vmem:[%s1995_s13 + $0x174] sm:$0xf]  ;;  %v692_v37 = vunpack.c.l.b16 %v623_v32  ;;  %v693_v42 = vunpack.c.h.b16 %v623_v32  ;;  %v1365_v49 = vld [vmem:[%s1995_s13 + $0x68] sm:$0xf0] }
  0x84   : > { %1040 = vmatpush.bf16.msra.mxu1 %v1396_v6  ;;  %v1501_v36 = vld [vmem:[%s1995_s13 + $0x178] sm:$0xf0]  ;;  %v1635_v40 = vld [vmem:[%s1995_s13 + $0x1f4] sm:$0xf]  ;;  %v1440_v46 = vor.u32 %v1603_v31, %v1437_v34  ;;  %v1601_v50 = vld [vmem:[%s1995_s13 + $0xe4] sm:$0xf]  ;;  %v1368_v62 = vor.u32 %v1585_v48, %v1365_v49 }
  0x85   : > { %1053 = vmatpush.bf16.msra.mxu2 %v1460_v7  ;;  %v1565_v41 = vld [vmem:[%s1995_s13 + $0x1f8] sm:$0xf0]  ;;  %v622_v45 = vld [vmem:[%s1976_s30] sm:$0xff]  ;;  %v1504_v47 = vor.u32 %v1619_v35, %v1501_v36  ;;  %v1429_v54 = vld [vmem:[%s1995_s13 + $0xe8] sm:$0xf0]  ;;  %v2078_v57 = vpack.c.b16 %v692_v37, %v692_v37  ;;  %v2082_v60 = vpack.c.b16 %v693_v42, %v693_v42 }
  0x86   : > { %1066 = vmatpush.bf16.msra.mxu3 %v1524_v11  ;;  %v690_v51 = vunpack.c.l.b16 %v622_v45  ;;  %v691_v52 = vunpack.c.h.b16 %v622_v45  ;;  %v1568_v53 = vor.u32 %v1635_v40, %v1565_v41  ;;  %v1617_v55 = vld [vmem:[%s1995_s13 + $0x164] sm:$0xf]  ;;  %v1493_v56 = vld [vmem:[%s1995_s13 + $0x168] sm:$0xf0]  ;;  %v1432_v0 = vor.u32 %v1601_v50, %v1429_v54  ;;  %v1583_v2 = vld [vmem:[%s1995_s13 + $0x54] sm:$0xf] }
  0x87   : > { %1028 = vmatpush.bf16.msra.mxu0 %v1324_v17  ;;  %v1633_v58 = vld [vmem:[%s1995_s13 + $0x1e4] sm:$0xf]  ;;  %v1557_v59 = vld [vmem:[%s1995_s13 + $0x1e8] sm:$0xf0]  ;;  %v1496_v1 = vor.u32 %v1617_v55, %v1493_v56  ;;  %v1357_v3 = vld [vmem:[%s1995_s13 + $0x58] sm:$0xf0] }
  0x88   : > { %1041 = vmatpush.bf16.msra.mxu1 %v1388_v21  ;;  %v2084_v61 = vpack.c.b16 %v690_v51, %v690_v51  ;;  %v2086_v63 = vpack.c.b16 %v691_v52, %v691_v52  ;;  %v1599_v4 = vld [vmem:[%s1995_s13 + $0xd4] sm:$0xf]  ;;  %v1560_v5 = vor.u32 %v1633_v58, %v1557_v59  ;;  %v1421_v6 = vld [vmem:[%s1995_s13 + $0xd8] sm:$0xf0]  ;;  %v1360_v11 = vor.u32 %v1583_v2, %v1357_v3  ;;  %v1581_v14 = vld [vmem:[%s1995_s13 + $0x44] sm:$0xf] }
  0x89   : > { %1054 = vmatpush.bf16.msra.mxu2 %v1452_v22  ;;  %v1615_v7 = vld [vmem:[%s1995_s13 + $0x154] sm:$0xf]  ;;  %v1485_v8 = vld [vmem:[%s1995_s13 + $0x158] sm:$0xf0]  ;;  %v1424_v12 = vor.u32 %v1599_v4, %v1421_v6  ;;  %v1349_v15 = vld [vmem:[%s1995_s13 + $0x48] sm:$0xf0] }
  0x8a   : > { %1067 = vmatpush.bf16.msra.mxu3 %v1516_v26  ;;  %v1631_v9 = vld [vmem:[%s1995_s13 + $0x1d4] sm:$0xf]  ;;  %v1549_v10 = vld [vmem:[%s1995_s13 + $0x1d8] sm:$0xf0]  ;;  %v1488_v13 = vor.u32 %v1615_v7, %v1485_v8  ;;  %v1597_v16 = vld [vmem:[%s1995_s13 + $0xc4] sm:$0xf]  ;;  %v1352_v23 = vor.u32 %v1581_v14, %v1349_v15 }
  0x8b   : > { %1029 = vmatpush.bf16.msra.mxu0 %v1316_v33  ;;  %v1552_v17 = vor.u32 %v1631_v9, %v1549_v10  ;;  %v1413_v18 = vld [vmem:[%s1995_s13 + $0xc8] sm:$0xf0]  ;;  %v1613_v19 = vld [vmem:[%s1995_s13 + $0x144] sm:$0xf]  ;;  %v1579_v26 = vld [vmem:[%s1995_s13 + $0x34] sm:$0xf] }
  0x8c   : > { %1042 = vmatpush.bf16.msra.mxu1 %v1380_v38  ;;  %v1477_v20 = vld [vmem:[%s1995_s13 + $0x148] sm:$0xf0]  ;;  %v1629_v21 = vld [vmem:[%s1995_s13 + $0x1c4] sm:$0xf]  ;;  %v1416_v24 = vor.u32 %v1597_v16, %v1413_v18  ;;  %v1341_v27 = vld [vmem:[%s1995_s13 + $0x38] sm:$0xf0] }
  0x8d   : > { %1055 = vmatpush.bf16.msra.mxu2 %v1444_v39  ;;  %v1541_v22 = vld [vmem:[%s1995_s13 + $0x1c8] sm:$0xf0]  ;;  %v1480_v25 = vor.u32 %v1613_v19, %v1477_v20  ;;  %v1595_v28 = vld [vmem:[%s1995_s13 + $0xb4] sm:$0xf]  ;;  %v1405_v30 = vld [vmem:[%s1995_s13 + $0xb8] sm:$0xf0]  ;;  %v1344_v35 = vor.u32 %v1579_v26, %v1341_v27 }
  0x8e   : > { %1068 = vmatpush.bf16.msra.mxu3 %v1508_v43  ;;  %1030 = vmatmul.bf16.vlgmr.msra.gmra.mxu0 %v2084_v61  ;;  %v1544_v29 = vor.u32 %v1629_v21, %v1541_v22  ;;  %v1611_v31 = vld [vmem:[%s1995_s13 + $0x134] sm:$0xf]  ;;  %v1469_v32 = vld [vmem:[%s1995_s13 + $0x138] sm:$0xf0]  ;;  %v1408_v36 = vor.u32 %v1595_v28, %v1405_v30  ;;  %v1577_v38 = vld [vmem:[%s1995_s13 + $0x24] sm:$0xf] }
  0x8f   : > { %1074 = vmatpush.bf16.msrb.mxu0 %v1376_v44  ;;  %1043 = vmatmul.bf16.vlgmr.msra.gmra.mxu1 %v2086_v63  ;;  %v1627_v33 = vld [vmem:[%s1995_s13 + $0x1b4] sm:$0xf]  ;;  %v1533_v34 = vld [vmem:[%s1995_s13 + $0x1b8] sm:$0xf0]  ;;  %v1472_v37 = vor.u32 %v1611_v31, %v1469_v32  ;;  %v1333_v39 = vld [vmem:[%s1995_s13 + $0x28] sm:$0xf0] }
  0x90   : > { %1087 = vmatpush.bf16.msrb.mxu1 %v1440_v46  ;;  %1056 = vmatmul.bf16.vlgmr.msra.gmra.mxu2 %v2078_v57  ;;  %v1593_v40 = vld [vmem:[%s1995_s13 + $0xa4] sm:$0xf]  ;;  %v1536_v41 = vor.u32 %v1627_v33, %v1533_v34  ;;  %v1397_v42 = vld [vmem:[%s1995_s13 + $0xa8] sm:$0xf0]  ;;  %v1575_v50 = vld [vmem:[%s1995_s13 + $0x14] sm:$0xf] }
  0x91   : > { %1100 = vmatpush.bf16.msrb.mxu2 %v1504_v47  ;;  %1069 = vmatmul.bf16.vlgmr.msra.gmra.mxu3 %v2082_v60  ;;  %v1609_v43 = vld [vmem:[%s1995_s13 + $0x124] sm:$0xf]  ;;  %v1461_v44 = vld [vmem:[%s1995_s13 + $0x128] sm:$0xf0]  ;;  %v1336_v47 = vor.u32 %v1577_v38, %v1333_v39  ;;  %v1400_v48 = vor.u32 %v1593_v40, %v1397_v42  ;;  %v1325_v51 = vld [vmem:[%s1995_s13 + $0x18] sm:$0xf0] }
  0x92   : > { %1113 = vmatpush.bf16.msrb.mxu3 %v1568_v53  ;;  %v1625_v45 = vld [vmem:[%s1995_s13 + $0x1a4] sm:$0xf]  ;;  %v1525_v46 = vld [vmem:[%s1995_s13 + $0x1a8] sm:$0xf0]  ;;  %v1464_v49 = vor.u32 %v1609_v43, %v1461_v44  ;;  %v1591_v52 = vld [vmem:[%s1995_s13 + $0x94] sm:$0xf] }
  0x93   : > { %1075 = vmatpush.bf16.msrb.mxu0 %v1368_v62  ;;  %v1528_v53 = vor.u32 %v1625_v45, %v1525_v46  ;;  %v1389_v54 = vld [vmem:[%s1995_s13 + $0x98] sm:$0xf0]  ;;  %v1607_v55 = vld [vmem:[%s1995_s13 + $0x114] sm:$0xf]  ;;  %v1328_v62 = vor.u32 %v1575_v50, %v1325_v51  ;;  %v1573_v2 = vld [vmem:[%s1995_s13 + $0x4] sm:$0xf] }
  0x94   : > { %1088 = vmatpush.bf16.msrb.mxu1 %v1432_v0  ;;  %v1453_v56 = vld [vmem:[%s1995_s13 + $0x118] sm:$0xf0]  ;;  %v1623_v58 = vld [vmem:[%s1995_s13 + $0x194] sm:$0xf]  ;;  %v1392_v0 = vor.u32 %v1591_v52, %v1389_v54  ;;  %v1317_v3 = vld [vmem:[%s1995_s13 + $0x8] sm:$0xf0] }
  0x95   : > { %1101 = vmatpush.bf16.msrb.mxu2 %v1496_v1  ;;  %v1517_v59 = vld [vmem:[%s1995_s13 + $0x198] sm:$0xf0]  ;;  %v1456_v1 = vor.u32 %v1607_v55, %v1453_v56  ;;  %v1589_v4 = vld [vmem:[%s1995_s13 + $0x84] sm:$0xf]  ;;  %v1381_v6 = vld [vmem:[%s1995_s13 + $0x88] sm:$0xf0] }
  0x96   : > { %1114 = vmatpush.bf16.msrb.mxu3 %v1560_v5  ;;  %v1520_v5 = vor.u32 %v1623_v58, %v1517_v59  ;;  %v1605_v7 = vld [vmem:[%s1995_s13 + $0x104] sm:$0xf]  ;;  %v1445_v8 = vld [vmem:[%s1995_s13 + $0x108] sm:$0xf0]  ;;  %v620_v21 = vld [vmem:[#allocation2] sm:$0xff] }
  0x97   : > { %1076 = vmatpush.bf16.msrb.mxu0 %v1360_v11  ;;  %v1621_v9 = vld [vmem:[%s1995_s13 + $0x184] sm:$0xf]  ;;  %v1509_v10 = vld [vmem:[%s1995_s13 + $0x188] sm:$0xf0]  ;;  %v1320_v11 = vor.u32 %v1573_v2, %v1317_v3  ;;  %v621_v31 = vld [vmem:[#allocation2 + $0x8] sm:$0xff] }
  0x98   : > { %1089 = vmatpush.bf16.msrb.mxu1 %v1424_v12  ;;  %v1384_v12 = vor.u32 %v1589_v4, %v1381_v6  ;;  %v1512_v14 = vor.u32 %v1621_v9, %v1509_v10 }
  0x99   : > { %1102 = vmatpush.bf16.msrb.mxu2 %v1488_v13  ;;  %v1448_v13 = vor.u32 %v1605_v7, %v1445_v8 }
  0x9a   : > { %1115 = vmatpush.bf16.msrb.mxu3 %v1552_v17 }
  0x9b   : > { %1077 = vmatpush.bf16.msrb.mxu0 %v1352_v23 }
  0x9c   : > { %1090 = vmatpush.bf16.msrb.mxu1 %v1416_v24 }
  0x9d   : > { %1103 = vmatpush.bf16.msrb.mxu2 %v1480_v25 }
  0x9e   : > { %1116 = vmatpush.bf16.msrb.mxu3 %v1544_v29 }
  0x9f   : > { %1078 = vmatpush.bf16.msrb.mxu0 %v1344_v35 }
  0xa0   : > { %1091 = vmatpush.bf16.msrb.mxu1 %v1408_v36 }
  0xa1   : > { %1104 = vmatpush.bf16.msrb.mxu2 %v1472_v37 }
  0xa2   : > { %1117 = vmatpush.bf16.msrb.mxu3 %v1536_v41 }
  0xa3   : > { %1079 = vmatpush.bf16.msrb.mxu0 %v1336_v47 }
  0xa4   : > { %1092 = vmatpush.bf16.msrb.mxu1 %v1400_v48 }
  0xa5   : > { %1105 = vmatpush.bf16.msrb.mxu2 %v1464_v49 }
  0xa6   : > { %1118 = vmatpush.bf16.msrb.mxu3 %v1528_v53 }
  0xa7   : > { %1080 = vmatpush.bf16.msrb.mxu0 %v1328_v62 }
  0xa8   : > { %1093 = vmatpush.bf16.msrb.mxu1 %v1392_v0 }
  0xa9   : > { %1106 = vmatpush.bf16.msrb.mxu2 %v1456_v1 }
  0xaa   : > { %1119 = vmatpush.bf16.msrb.mxu3 %v1520_v5 }
  0xab   : > { %1081 = vmatpush.bf16.msrb.mxu0 %v1320_v11 }
  0xac   : > { %1094 = vmatpush.bf16.msrb.mxu1 %v1384_v12 }
  0xad   : > { %1107 = vmatpush.bf16.msrb.mxu2 %v1448_v13 }
  0xae   : > { %1120 = vmatpush.bf16.msrb.mxu3 %v1512_v14  ;;  %1082 = vmatmul.bf16.vlgmr.msrb.gmra.mxu0 %v2084_v61 }
  0xaf   : > { %1095 = vmatmul.bf16.vlgmr.msrb.gmra.mxu1 %v2086_v63 }
  0xb0   : > { %1108 = vmatmul.bf16.vlgmr.msrb.gmra.mxu2 %v2078_v57 }
  0xb1   : > { %1121 = vmatmul.bf16.vlgmr.msrb.gmra.mxu3 %v2082_v60 }
 0x10b   : > { %v1031_v15 = vpop.f32.mrf.mxu0 }
 0x10c   : > { %v1044_v16 = vpop.f32.mrf.mxu1 }
 0x10d   : > { %v1045_v17 = vadd.f32 %v1044_v16, %v1031_v15 }
 0x113   : > { %v1057_v18 = vpop.f32.mrf.mxu2  ;;  %v1033_v23 = vpop.f32.mrf.mxu0 }
 0x114   : > { %v1058_v19 = vadd.f32 %v1057_v18, %v1045_v17  ;;  %v1070_v20 = vpop.f32.mrf.mxu3  ;;  %v1046_v24 = vpop.f32.mrf.mxu1 }
 0x116   : > { %v1071_v22 = vadd.f32 %v1070_v20, %v1058_v19 }
 0x118   : > { %v1126_v25 = vadd.f32 %v1071_v22, %v620_v21 }
 0x11a   : > { %1128 = vst [vmem:[#allocation2] sm:$0xff] %v1126_v25 }
 0x11b   : > { %v1059_v26 = vpop.f32.mrf.mxu2 }
 0x11c   : > { %v1072_v61 = vpop.f32.mrf.mxu3 }
 0x12b   : > { %v1083_v27 = vpop.f32.mrf.mxu0 }
 0x12c   : > { %v1096_v63 = vpop.f32.mrf.mxu1 }
 0x12d   : > { %v1097_v28 = vadd.f32 %v1096_v63, %v1083_v27 }
 0x133   : > { %v1109_v57 = vpop.f32.mrf.mxu2  ;;  %v1085_v30 = vpop.f32.mrf.mxu0 }
 0x134   : > { %v1110_v29 = vadd.f32 %v1109_v57, %v1097_v28  ;;  %v1122_v60 = vpop.f32.mrf.mxu3  ;;  %v1098_v32 = vpop.f32.mrf.mxu1 }
 0x136   : > { %v1123_v33 = vadd.f32 %v1122_v60, %v1110_v29 }
 0x138   : > { %v1127_v34 = vadd.f32 %v1123_v33, %v621_v31  ;;  %1133 = sbr.rel (%p1569_p13) target bundleno = 331 (0x14b), region = 82 }
 0x13a   : > { %1129 = vst [vmem:[#allocation2 + $0x8] sm:$0xff] %v1127_v34 }
 0x13b   : > { %v1111_v35 = vpop.f32.mrf.mxu2 }
 0x13c   : > { %v1124_v36 = vpop.f32.mrf.mxu3 }
 0x13d   : > { %v1134_v37 = vld [vmem:[#allocation2] sm:$0xff] }
 0x13e   : > { %v1136_v39 = vld [vmem:[%s592_s15] sm:$0x3] }
 0x13f   : > { %v1138_v40 = vperm.slane %v1136_v39, 0  ;;  %v1139_v41 = vperm.slane %v1136_v39, 1  ;;  %v1144_v42 = vld [vmem:[%s1988_s18] sm:$0xff] }
 0x140   : > { %v1145_v43 = vunpack.c.l.bf16 %v1144_v42  ;;  %v1146_v44 = vunpack.c.h.bf16 %v1144_v42 }
 0x141   : > { %v1135_v38 = vld [vmem:[#allocation2 + $0x8] sm:$0xff]  ;;  %v1142_v45 = vadd.f32 %v1138_v40, %v1134_v37 }
 0x142   : > { %v1143_v46 = vadd.f32 %v1139_v41, %v1135_v38 }
 0x143   : > { %v1147_v47 = vadd.f32 %v1145_v43, %v1142_v45 }
 0x144   : > { %v1148_v48 = vadd.f32 %v1146_v44, %v1143_v46 }
 0x145   : > { %v1149_v49 = vmax.f32 %v1147_v47, 0.0 }
 0x146   : > { %v1150_v50 = vmax.f32 %v1148_v48, 0.0 }
 0x148   : > { %v1151_v51 = vpack.c.bf16 %v1150_v50, %v1149_v49 }
 0x14a   : > { %1152 = vst [vmem:[%s1993_s12] sm:$0xff] %v1151_v51 }
 0x14b PF: > { %s14_s21 = sadd.s32 1, %s1748_s21   ;;  %s2178_s15 = smov %s1728_s16 }
 0x14c   : > { %p11_p0 = scmp.ge.s32.totalorder %s14_s21, 20   ;;  %s2179_s16 = smov %s1827_s28 }
 0x14d   : > { %s2180_s17 = smov %s1740_s19  ;;  %s2181_s18 = smov %s1744_s20 }
 0x14e   : > { %s2182_s19 = smov %s2185_s22  ;;  %s2183_s20 = smov %s2189_s23 }
 0x14f   :  { %13 = sbr.rel (!%p11_p0) target bundleno = 4 (0x4), region = 126 }

// kernel: clsnet_forward.39
= control target key start
LH: loop header
LB: loop body
LE: loop exit
PB: predicated region body
PF: predicated region fallthrough
CT: control target
= control target key end

     0   :  { %8 = vsyncpa [#allocation4], 0  ;;  %s1768_s0 = inlined_call_operand.vmem [shape: bf16[8,4608], index: 0, kind: input, shape index: {}]   ;;  %s1769_s1 = inlined_call_operand.hbm [shape: bf16[4608,512], index: 1, kind: input, shape index: {}]   ;;  %s1770_s2 = inlined_call_operand.vmem [shape: f32[1,512], index: 2, kind: input, shape index: {}]   ;;  %s1771_s3 = inlined_call_operand.vmem [shape: bf16[8,512], index: 3, kind: output, shape index: {}]  }
   0x1   :  { %10 = vsyncpa [#allocation4 + $0x1], 0  ;;  %s1485_s12 = smov 0   ;;  %s1487_s13 = smov 0  }
   0x2   :  { %s1489_s14 = smov 0   ;;  %s1491_s15 = smov 0  }
   0x3   :  { %s1493_s16 = smov 0   ;;  %s1495_s17 = smov 0  }
   0x4   :  { %s1497_s18 = smov 0   ;;  %s1499_s19 = smov 0  }
   0x5 LB: > { %s947_s20 = sadd.s32 4294967295, %s1459_s19   ;;  %s28_s21 = sadd.s32 1, %s1451_s17  ;;  %s1459_s19 = sphi %s1499_s19, %s16_s19   ;;  %s1455_s18 = sphi %s1497_s18, %s1783_s18   ;;  %s1451_s17 = sphi %s1495_s17, %s1782_s17   ;;  %s1447_s16 = sphi %s1493_s16, %s1781_s16   ;;  %s1443_s15 = sphi %s1491_s15, %s1780_s15   ;;  %s1439_s14 = sphi %s1489_s14, %s1779_s14   ;;  %s1435_s13 = sphi %s1487_s13, %s1778_s13   ;;  %s1431_s12 = sphi %s1485_s12, %s1777_s12  }
   0x6   : > { %p29_p0 = scmp.ge.s32.totalorder %s28_s21, 9  ;;  %s31_s22 = sadd.s32 1, %s1455_s18 }
   0x7   : > { %s72_s23 = sadd.s32 1, %s1439_s14  ;;  %p79_p1 = scmp.ne.s32.totalorder %s1439_s14, %s1435_s13 }
   0x8   : > { %s1785_s21 = smov (%p29_p0, %s28_s21), 0  ;;  %s1787_s22 = smov (!%p29_p0, %s31_s22), %s1455_s18 }
   0x9   : > { %s67_s24 = ssub.s32 %s1451_s17, %s1785_s21  ;;  %p80_p2 = scmp.eq.s32.totalorder %s1459_s19, 0 }
   0xa   : > { %p33_p3 = scmp.ge.s32.totalorder %s1787_s22, 2  ;;  %p85_p4 = scmp.ne.s32.totalorder %s1435_s13, %s1431_s12 }
   0xb   : > { %p1536_p5 = por %p80_p2, %p79_p1  ;;  %p86_p6 = scmp.eq.s32.totalorder %s947_s20, 0 }
   0xc   : > { %s1789_s22 = smov (%p33_p3, %s1787_s22), 0  ;;  %p1294_p8 = scmp.lt.s32.totalorder %s1459_s19, 18 }
   0xd   : > { %1774 = sst [smem:[#allocation6_spill]] %s1789_s22  ;;  %p1542_p7 = por %p86_p6, %p85_p4 }
   0xe   : > { %s68_s27 = ssub.s32 %s1455_s18, %s1789_s22  ;;  %s176_s29 = sand.u32 1, %s1439_s14  }
   0xf   : > { %s69_s28 = sor.u32 %s68_s27, %s67_s24  ;;  %s951_s30 = sshll.u32 %s176_s29, 9 }
  0x10   : > { %p70_p9 = scmp.eq.s32.totalorder %s69_s28, 0  ;;  %s953_s4 = sshll.u32 %s1455_s18, 1 }
  0x11   : > { %s1223_s6 = sshll.u32 %s1451_s17, 8  ;;  %s180_s8 = scalar_lea.vmem [#allocation3], %s951_s30 }
  0x12   : > { %s1552_s5 = scalar_select %p70_p9, %s1439_s14, %s72_s23  }
  0x13   : > { %s186_s7 = sadd.s32 %s1223_s6, %s953_s4  ;;  %s191_s9 = sshll.u32 %s180_s8, 4  ;;  %s192_s9 = int_to_ptr.vmem [resolvable:$true] %s191_s9 }
  0x14   : > { %s955_s10 = sshll.u32 %s186_s7, 2  ;;  %p1291_p10 = pnand %p1294_p8, %p1536_p5 }
  0x15   : > { %s188_s20 = scalar_lea.hbm %s1769_s1, %s955_s10  ;;  %s177_s27 = scalar_lea.sflag [#allocation4], %s176_s29 }
  0x16   : > { %s189_s24 = sshll.u32 %s188_s20, 4  ;;  %s1461_s23 = smov 256   ;;  %s190_s24 = int_to_ptr.hbm [resolvable:$true] %s189_s24 }
  0x17   : > { %s1462_s28 = smov 128   ;;  %s1463_s22 = smov 8  }
  0x18   : > { %1293 = dma.hbm_to_vmem [thread:$0]  (!%p1291_p10), %s190_s24, 8192, %s192_s9, %s177_s27, %s1461_s23, %s1462_s28, %s1463_s22  }
  0x19   : > { %p956_p11 = scmp.ge.s32.totalorder %s1459_s19, 1  ;;  %p207_p12 = scmp.lt.s32.totalorder %s1459_s19, 19 }
  0x1b   : > { %p208_p13 = pnand %p956_p11, %p207_p12 }
  0x1c   : > { %s213_s30 = sand.u32 (!%p208_p13), 1, %s1435_s13  }
  0x1d   : > { %211 = sbr.rel (%p208_p13) target bundleno = 270 (0x10e), region = 32  ;;  %s957_s4 = sshll.u32 (!%p208_p13), %s213_s30, 9 }
  0x1e   : > { %s214_s6 = scalar_lea.sflag (!%p208_p13), [#allocation4], %s213_s30  ;;  %s1565_s7 = scalar_lea.vmem (!%p208_p13), [#allocation3], %s957_s4 }
  0x22   : > { %1426 = dma.done.wait (%p1542_p7), %s214_s6, 8192  }
  0x23   : > { %1428 = vsyncadd (%p1542_p7), %s214_s6, 4294959104  ;;  %s958_s25 = sshll.u32 %s1443_s15, 2  ;;  %s960_s22 = sshll.u32 %s1447_s16, 1 }
  0x24   : > { %p261_p0 = scmp.lt.s32.totalorder %s958_s25, 35  ;;  %p271_p1 = scmp.lt.s32.totalorder %s960_s22, 3 }
  0x25   : > { %p963_p2 = scmp.ne.s32.totalorder %s1443_s15, 0 }
  0x26   : > { %s1791_s25 = smov (!%p261_p0, %s958_s25), 35  ;;  %s1793_s22 = smov (!%p271_p1, %s960_s22), 3 }
  0x27   : > { %s959_s29 = sshll.u32 %s1791_s25, 2  ;;  %s273_s12 = scalar_lea.vmem %s1770_s2, %s1793_s22 }
  0x28   : > { %s1578_s10 = scalar_lea.vmem %s1768_s0, %s959_s29  ;;  %s962_s20 = sshll.u32 %s1793_s22, 2 }
  0x29   : > { %s1588_s27 = scalar_lea.vmem %s1771_s3, %s962_s20  ;;  %288 = sbr.rel (%p963_p2) target bundleno = 49 (0x31), region = 40 }
  0x2e   : > { %v1464_v0 = vmov 0.0  }
  0x2f   : > { %289 = vst [vmem:[#allocation2] sm:$0xff] %v1464_v0 }
  0x30   : > { %290 = vst [vmem:[#allocation2 + $0x8] sm:$0xff] %v1464_v0 }
  0x31 PF: > { %v1022_v1 = vld [vmem:[%s1565_s7 + $0x70] sm:$0xf]  ;;  %v1239_v2 = vld [vmem:[%s1565_s7 + $0x74] sm:$0xf0]  ;;  %v1014_v12 = vld [vmem:[%s1565_s7 + $0x60] sm:$0xf] }
  0x32   : > { %v1086_v3 = vld [vmem:[%s1565_s7 + $0xf0] sm:$0xf]  ;;  %v1023_v4 = vor.u32 %v1239_v2, %v1022_v1  ;;  %v1255_v5 = vld [vmem:[%s1565_s7 + $0xf4] sm:$0xf0]  ;;  %v1237_v14 = vld [vmem:[%s1565_s7 + $0x64] sm:$0xf0] }
  0x33   : > { %v1150_v6 = vld [vmem:[%s1565_s7 + $0x170] sm:$0xf]  ;;  %v1271_v7 = vld [vmem:[%s1565_s7 + $0x174] sm:$0xf0]  ;;  %v1087_v8 = vor.u32 %v1255_v5, %v1086_v3  ;;  %v1078_v15 = vld [vmem:[%s1565_s7 + $0xe0] sm:$0xf]  ;;  %v1015_v17 = vor.u32 %v1237_v14, %v1014_v12 }
  0x34   : > { %v1151_v9 = vor.u32 %v1271_v7, %v1150_v6  ;;  %v1214_v10 = vld [vmem:[%s1565_s7 + $0x1f0] sm:$0xf]  ;;  %v1287_v11 = vld [vmem:[%s1565_s7 + $0x1f4] sm:$0xf0]  ;;  %693 = vmatpush.bf16.msra.mxu0 %v1023_v4  ;;  %v1253_v16 = vld [vmem:[%s1565_s7 + $0xe4] sm:$0xf0] }
  0x35   : > { %v1215_v13 = vor.u32 %v1287_v11, %v1214_v10  ;;  %706 = vmatpush.bf16.msra.mxu1 %v1087_v8  ;;  %v1079_v18 = vor.u32 %v1253_v16, %v1078_v15  ;;  %v1142_v19 = vld [vmem:[%s1565_s7 + $0x160] sm:$0xf]  ;;  %v1269_v20 = vld [vmem:[%s1565_s7 + $0x164] sm:$0xf0]  ;;  %v1006_v24 = vld [vmem:[%s1565_s7 + $0x50] sm:$0xf] }
  0x36   : > { %719 = vmatpush.bf16.msra.mxu2 %v1151_v9  ;;  %v1206_v21 = vld [vmem:[%s1565_s7 + $0x1e0] sm:$0xf]  ;;  %v1143_v22 = vor.u32 %v1269_v20, %v1142_v19  ;;  %v1285_v23 = vld [vmem:[%s1565_s7 + $0x1e4] sm:$0xf0]  ;;  %v1235_v25 = vld [vmem:[%s1565_s7 + $0x54] sm:$0xf0] }
  0x37   : > { %732 = vmatpush.bf16.msra.mxu3 %v1215_v13  ;;  %v1207_v26 = vor.u32 %v1285_v23, %v1206_v21  ;;  %v1070_v27 = vld [vmem:[%s1565_s7 + $0xd0] sm:$0xf]  ;;  %v1251_v28 = vld [vmem:[%s1565_s7 + $0xd4] sm:$0xf0]  ;;  %v1007_v30 = vor.u32 %v1235_v25, %v1006_v24  ;;  %v998_v36 = vld [vmem:[%s1565_s7 + $0x40] sm:$0xf] }
  0x38   : > { %v1134_v29 = vld [vmem:[%s1565_s7 + $0x150] sm:$0xf]  ;;  %694 = vmatpush.bf16.msra.mxu0 %v1015_v17  ;;  %v1267_v31 = vld [vmem:[%s1565_s7 + $0x154] sm:$0xf0]  ;;  %v1071_v34 = vor.u32 %v1251_v28, %v1070_v27  ;;  %v1233_v37 = vld [vmem:[%s1565_s7 + $0x44] sm:$0xf0] }
  0x39   : > { %v1198_v32 = vld [vmem:[%s1565_s7 + $0x1d0] sm:$0xf]  ;;  %v1283_v33 = vld [vmem:[%s1565_s7 + $0x1d4] sm:$0xf0]  ;;  %707 = vmatpush.bf16.msra.mxu1 %v1079_v18  ;;  %v1135_v35 = vor.u32 %v1267_v31, %v1134_v29  ;;  %v1062_v38 = vld [vmem:[%s1565_s7 + $0xc0] sm:$0xf]  ;;  %v999_v45 = vor.u32 %v1233_v37, %v998_v36 }
  0x3a   : > { %720 = vmatpush.bf16.msra.mxu2 %v1143_v22  ;;  %v1199_v39 = vor.u32 %v1283_v33, %v1198_v32  ;;  %v1249_v40 = vld [vmem:[%s1565_s7 + $0xc4] sm:$0xf0]  ;;  %v1126_v41 = vld [vmem:[%s1565_s7 + $0x140] sm:$0xf]  ;;  %v990_v48 = vld [vmem:[%s1565_s7 + $0x30] sm:$0xf] }
  0x3b   : > { %733 = vmatpush.bf16.msra.mxu3 %v1207_v26  ;;  %v1265_v42 = vld [vmem:[%s1565_s7 + $0x144] sm:$0xf0]  ;;  %v1190_v43 = vld [vmem:[%s1565_s7 + $0x1c0] sm:$0xf]  ;;  %v1063_v46 = vor.u32 %v1249_v40, %v1062_v38  ;;  %v1231_v49 = vld [vmem:[%s1565_s7 + $0x34] sm:$0xf0] }
  0x3c   : > { %v1281_v44 = vld [vmem:[%s1565_s7 + $0x1c4] sm:$0xf0]  ;;  %695 = vmatpush.bf16.msra.mxu0 %v1007_v30  ;;  %v1127_v47 = vor.u32 %v1265_v42, %v1126_v41  ;;  %v1054_v50 = vld [vmem:[%s1565_s7 + $0xb0] sm:$0xf]  ;;  %v1247_v52 = vld [vmem:[%s1565_s7 + $0xb4] sm:$0xf0]  ;;  %v991_v57 = vor.u32 %v1231_v49, %v990_v48 }
  0x3d   : > { %708 = vmatpush.bf16.msra.mxu1 %v1071_v34  ;;  %v1191_v51 = vor.u32 %v1281_v44, %v1190_v43  ;;  %v1118_v53 = vld [vmem:[%s1565_s7 + $0x130] sm:$0xf]  ;;  %v1263_v54 = vld [vmem:[%s1565_s7 + $0x134] sm:$0xf0]  ;;  %v1055_v58 = vor.u32 %v1247_v52, %v1054_v50  ;;  %v982_v60 = vld [vmem:[%s1565_s7 + $0x20] sm:$0xf] }
  0x3e   : > { %721 = vmatpush.bf16.msra.mxu2 %v1135_v35  ;;  %v1182_v55 = vld [vmem:[%s1565_s7 + $0x1b0] sm:$0xf]  ;;  %v1279_v56 = vld [vmem:[%s1565_s7 + $0x1b4] sm:$0xf0]  ;;  %v1119_v59 = vor.u32 %v1263_v54, %v1118_v53  ;;  %v1229_v61 = vld [vmem:[%s1565_s7 + $0x24] sm:$0xf0] }
  0x3f   : > { %734 = vmatpush.bf16.msra.mxu3 %v1199_v39  ;;  %v1046_v62 = vld [vmem:[%s1565_s7 + $0xa0] sm:$0xf]  ;;  %v1183_v63 = vor.u32 %v1279_v56, %v1182_v55  ;;  %v1245_v0 = vld [vmem:[%s1565_s7 + $0xa4] sm:$0xf0]  ;;  %v983_v5 = vor.u32 %v1229_v61, %v982_v60  ;;  %v974_v8 = vld [vmem:[%s1565_s7 + $0x10] sm:$0xf] }
  0x40   : > { %696 = vmatpush.bf16.msra.mxu0 %v999_v45  ;;  %v1110_v1 = vld [vmem:[%s1565_s7 + $0x120] sm:$0xf]  ;;  %v1261_v2 = vld [vmem:[%s1565_s7 + $0x124] sm:$0xf0]  ;;  %v1047_v6 = vor.u32 %v1245_v0, %v1046_v62  ;;  %v1227_v9 = vld [vmem:[%s1565_s7 + $0x14] sm:$0xf0] }
  0x41   : > { %709 = vmatpush.bf16.msra.mxu1 %v1063_v46  ;;  %v1174_v3 = vld [vmem:[%s1565_s7 + $0x1a0] sm:$0xf]  ;;  %v1277_v4 = vld [vmem:[%s1565_s7 + $0x1a4] sm:$0xf0]  ;;  %v1111_v7 = vor.u32 %v1261_v2, %v1110_v1  ;;  %v1038_v10 = vld [vmem:[%s1565_s7 + $0x90] sm:$0xf]  ;;  %v975_v17 = vor.u32 %v1227_v9, %v974_v8 }
  0x42   : > { %722 = vmatpush.bf16.msra.mxu2 %v1127_v47  ;;  %v1175_v11 = vor.u32 %v1277_v4, %v1174_v3  ;;  %v1243_v12 = vld [vmem:[%s1565_s7 + $0x94] sm:$0xf0]  ;;  %v1102_v13 = vld [vmem:[%s1565_s7 + $0x110] sm:$0xf]  ;;  %v966_v18 = vld [vmem:[%s1565_s7] sm:$0xf] }
  0x43   : > { %735 = vmatpush.bf16.msra.mxu3 %v1191_v51  ;;  %v1259_v14 = vld [vmem:[%s1565_s7 + $0x114] sm:$0xf0]  ;;  %v1166_v15 = vld [vmem:[%s1565_s7 + $0x190] sm:$0xf]  ;;  %v1225_v19 = vld [vmem:[%s1565_s7 + $0x4] sm:$0xf0]  ;;  %v1039_v21 = vor.u32 %v1243_v12, %v1038_v10 }
  0x44   : > { %697 = vmatpush.bf16.msra.mxu0 %v991_v57  ;;  %v1275_v16 = vld [vmem:[%s1565_s7 + $0x194] sm:$0xf0]  ;;  %v1030_v20 = vld [vmem:[%s1565_s7 + $0x80] sm:$0xf]  ;;  %v1103_v22 = vor.u32 %v1259_v14, %v1102_v13  ;;  %v1241_v23 = vld [vmem:[%s1565_s7 + $0x84] sm:$0xf0]  ;;  %v967_v33 = vor.u32 %v1225_v19, %v966_v18 }
  0x45   : > { %710 = vmatpush.bf16.msra.mxu1 %v1055_v58  ;;  %v1094_v24 = vld [vmem:[%s1565_s7 + $0x100] sm:$0xf]  ;;  %v1257_v25 = vld [vmem:[%s1565_s7 + $0x104] sm:$0xf0]  ;;  %v1167_v26 = vor.u32 %v1275_v16, %v1166_v15  ;;  %v1238_v29 = vld [vmem:[%s1565_s7 + $0x74] sm:$0xf]  ;;  %v1031_v38 = vor.u32 %v1241_v23, %v1030_v20 }
  0x46   : > { %723 = vmatpush.bf16.msra.mxu2 %v1119_v59  ;;  %v1158_v27 = vld [vmem:[%s1565_s7 + $0x180] sm:$0xf]  ;;  %v1273_v28 = vld [vmem:[%s1565_s7 + $0x184] sm:$0xf0]  ;;  %v1024_v30 = vld [vmem:[%s1565_s7 + $0x78] sm:$0xf0]  ;;  %v1095_v39 = vor.u32 %v1257_v25, %v1094_v24 }
  0x47   : > { %736 = vmatpush.bf16.msra.mxu3 %v1183_v63  ;;  %v1254_v31 = vld [vmem:[%s1565_s7 + $0xf4] sm:$0xf]  ;;  %v294_v32 = vld [vmem:[%s1578_s10 + $0x8] sm:$0xff]  ;;  %v1159_v43 = vor.u32 %v1273_v28, %v1158_v27  ;;  %v1027_v44 = vor.u32 %v1238_v29, %v1024_v30  ;;  %v1236_v48 = vld [vmem:[%s1565_s7 + $0x64] sm:$0xf]  ;;  %p1220_p3 = scmp.ne.s32.totalorder %s1443_s15, 8 }
  0x48   : > { %698 = vmatpush.bf16.msra.mxu0 %v983_v5  ;;  %v1088_v34 = vld [vmem:[%s1565_s7 + $0xf8] sm:$0xf0]  ;;  %v1270_v35 = vld [vmem:[%s1565_s7 + $0x174] sm:$0xf]  ;;  %v363_v37 = vunpack.c.l.b16 %v294_v32  ;;  %v364_v42 = vunpack.c.h.b16 %v294_v32  ;;  %v1016_v49 = vld [vmem:[%s1565_s7 + $0x68] sm:$0xf0] }
  0x49   : > { %711 = vmatpush.bf16.msra.mxu1 %v1047_v6  ;;  %v1152_v36 = vld [vmem:[%s1565_s7 + $0x178] sm:$0xf0]  ;;  %v1286_v40 = vld [vmem:[%s1565_s7 + $0x1f4] sm:$0xf]  ;;  %v1091_v46 = vor.u32 %v1254_v31, %v1088_v34  ;;  %v1252_v50 = vld [vmem:[%s1565_s7 + $0xe4] sm:$0xf]  ;;  %v1019_v62 = vor.u32 %v1236_v48, %v1016_v49 }
  0x4a   : > { %724 = vmatpush.bf16.msra.mxu2 %v1111_v7  ;;  %v1216_v41 = vld [vmem:[%s1565_s7 + $0x1f8] sm:$0xf0]  ;;  %v293_v45 = vld [vmem:[%s1578_s10] sm:$0xff]  ;;  %v1155_v47 = vor.u32 %v1270_v35, %v1152_v36  ;;  %v1080_v54 = vld [vmem:[%s1565_s7 + $0xe8] sm:$0xf0]  ;;  %v1671_v57 = vpack.c.b16 %v363_v37, %v363_v37  ;;  %v1675_v60 = vpack.c.b16 %v364_v42, %v364_v42 }
  0x4b   : > { %737 = vmatpush.bf16.msra.mxu3 %v1175_v11  ;;  %v361_v51 = vunpack.c.l.b16 %v293_v45  ;;  %v362_v52 = vunpack.c.h.b16 %v293_v45  ;;  %v1219_v53 = vor.u32 %v1286_v40, %v1216_v41  ;;  %v1268_v55 = vld [vmem:[%s1565_s7 + $0x164] sm:$0xf]  ;;  %v1144_v56 = vld [vmem:[%s1565_s7 + $0x168] sm:$0xf0]  ;;  %v1083_v0 = vor.u32 %v1252_v50, %v1080_v54  ;;  %v1234_v2 = vld [vmem:[%s1565_s7 + $0x54] sm:$0xf] }
  0x4c   : > { %699 = vmatpush.bf16.msra.mxu0 %v975_v17  ;;  %v1284_v58 = vld [vmem:[%s1565_s7 + $0x1e4] sm:$0xf]  ;;  %v1208_v59 = vld [vmem:[%s1565_s7 + $0x1e8] sm:$0xf0]  ;;  %v1147_v1 = vor.u32 %v1268_v55, %v1144_v56  ;;  %v1008_v3 = vld [vmem:[%s1565_s7 + $0x58] sm:$0xf0] }
  0x4d   : > { %712 = vmatpush.bf16.msra.mxu1 %v1039_v21  ;;  %v1677_v61 = vpack.c.b16 %v361_v51, %v361_v51  ;;  %v1679_v63 = vpack.c.b16 %v362_v52, %v362_v52  ;;  %v1250_v4 = vld [vmem:[%s1565_s7 + $0xd4] sm:$0xf]  ;;  %v1211_v5 = vor.u32 %v1284_v58, %v1208_v59  ;;  %v1072_v6 = vld [vmem:[%s1565_s7 + $0xd8] sm:$0xf0]  ;;  %v1011_v11 = vor.u32 %v1234_v2, %v1008_v3  ;;  %v1232_v14 = vld [vmem:[%s1565_s7 + $0x44] sm:$0xf] }
  0x4e   : > { %725 = vmatpush.bf16.msra.mxu2 %v1103_v22  ;;  %v1266_v7 = vld [vmem:[%s1565_s7 + $0x154] sm:$0xf]  ;;  %v1136_v8 = vld [vmem:[%s1565_s7 + $0x158] sm:$0xf0]  ;;  %v1075_v12 = vor.u32 %v1250_v4, %v1072_v6  ;;  %v1000_v15 = vld [vmem:[%s1565_s7 + $0x48] sm:$0xf0] }
  0x4f   : > { %738 = vmatpush.bf16.msra.mxu3 %v1167_v26  ;;  %v1282_v9 = vld [vmem:[%s1565_s7 + $0x1d4] sm:$0xf]  ;;  %v1200_v10 = vld [vmem:[%s1565_s7 + $0x1d8] sm:$0xf0]  ;;  %v1139_v13 = vor.u32 %v1266_v7, %v1136_v8  ;;  %v1248_v16 = vld [vmem:[%s1565_s7 + $0xc4] sm:$0xf]  ;;  %v1003_v23 = vor.u32 %v1232_v14, %v1000_v15 }
  0x50   : > { %700 = vmatpush.bf16.msra.mxu0 %v967_v33  ;;  %v1203_v17 = vor.u32 %v1282_v9, %v1200_v10  ;;  %v1064_v18 = vld [vmem:[%s1565_s7 + $0xc8] sm:$0xf0]  ;;  %v1264_v19 = vld [vmem:[%s1565_s7 + $0x144] sm:$0xf]  ;;  %v1230_v26 = vld [vmem:[%s1565_s7 + $0x34] sm:$0xf] }
  0x51   : > { %713 = vmatpush.bf16.msra.mxu1 %v1031_v38  ;;  %v1128_v20 = vld [vmem:[%s1565_s7 + $0x148] sm:$0xf0]  ;;  %v1280_v21 = vld [vmem:[%s1565_s7 + $0x1c4] sm:$0xf]  ;;  %v1067_v24 = vor.u32 %v1248_v16, %v1064_v18  ;;  %v992_v27 = vld [vmem:[%s1565_s7 + $0x38] sm:$0xf0] }
  0x52   : > { %726 = vmatpush.bf16.msra.mxu2 %v1095_v39  ;;  %v1192_v22 = vld [vmem:[%s1565_s7 + $0x1c8] sm:$0xf0]  ;;  %v1131_v25 = vor.u32 %v1264_v19, %v1128_v20  ;;  %v1246_v28 = vld [vmem:[%s1565_s7 + $0xb4] sm:$0xf]  ;;  %v1056_v30 = vld [vmem:[%s1565_s7 + $0xb8] sm:$0xf0]  ;;  %v995_v35 = vor.u32 %v1230_v26, %v992_v27 }
  0x53   : > { %739 = vmatpush.bf16.msra.mxu3 %v1159_v43  ;;  %701 = vmatmul.bf16.vlgmr.msra.gmra.mxu0 %v1677_v61  ;;  %v1195_v29 = vor.u32 %v1280_v21, %v1192_v22  ;;  %v1262_v31 = vld [vmem:[%s1565_s7 + $0x134] sm:$0xf]  ;;  %v1120_v32 = vld [vmem:[%s1565_s7 + $0x138] sm:$0xf0]  ;;  %v1059_v36 = vor.u32 %v1246_v28, %v1056_v30  ;;  %v1228_v38 = vld [vmem:[%s1565_s7 + $0x24] sm:$0xf] }
  0x54   : > { %745 = vmatpush.bf16.msrb.mxu0 %v1027_v44  ;;  %714 = vmatmul.bf16.vlgmr.msra.gmra.mxu1 %v1679_v63  ;;  %v1278_v33 = vld [vmem:[%s1565_s7 + $0x1b4] sm:$0xf]  ;;  %v1184_v34 = vld [vmem:[%s1565_s7 + $0x1b8] sm:$0xf0]  ;;  %v1123_v37 = vor.u32 %v1262_v31, %v1120_v32  ;;  %v984_v39 = vld [vmem:[%s1565_s7 + $0x28] sm:$0xf0] }
  0x55   : > { %758 = vmatpush.bf16.msrb.mxu1 %v1091_v46  ;;  %727 = vmatmul.bf16.vlgmr.msra.gmra.mxu2 %v1671_v57  ;;  %v1244_v40 = vld [vmem:[%s1565_s7 + $0xa4] sm:$0xf]  ;;  %v1187_v41 = vor.u32 %v1278_v33, %v1184_v34  ;;  %v1048_v42 = vld [vmem:[%s1565_s7 + $0xa8] sm:$0xf0]  ;;  %v1226_v50 = vld [vmem:[%s1565_s7 + $0x14] sm:$0xf] }
  0x56   : > { %771 = vmatpush.bf16.msrb.mxu2 %v1155_v47  ;;  %740 = vmatmul.bf16.vlgmr.msra.gmra.mxu3 %v1675_v60  ;;  %v1260_v43 = vld [vmem:[%s1565_s7 + $0x124] sm:$0xf]  ;;  %v1112_v44 = vld [vmem:[%s1565_s7 + $0x128] sm:$0xf0]  ;;  %v987_v47 = vor.u32 %v1228_v38, %v984_v39  ;;  %v1051_v48 = vor.u32 %v1244_v40, %v1048_v42  ;;  %v976_v51 = vld [vmem:[%s1565_s7 + $0x18] sm:$0xf0] }
  0x57   : > { %784 = vmatpush.bf16.msrb.mxu3 %v1219_v53  ;;  %v1276_v45 = vld [vmem:[%s1565_s7 + $0x1a4] sm:$0xf]  ;;  %v1176_v46 = vld [vmem:[%s1565_s7 + $0x1a8] sm:$0xf0]  ;;  %v1115_v49 = vor.u32 %v1260_v43, %v1112_v44  ;;  %v1242_v52 = vld [vmem:[%s1565_s7 + $0x94] sm:$0xf] }
  0x58   : > { %746 = vmatpush.bf16.msrb.mxu0 %v1019_v62  ;;  %v1179_v53 = vor.u32 %v1276_v45, %v1176_v46  ;;  %v1040_v54 = vld [vmem:[%s1565_s7 + $0x98] sm:$0xf0]  ;;  %v1258_v55 = vld [vmem:[%s1565_s7 + $0x114] sm:$0xf]  ;;  %v979_v62 = vor.u32 %v1226_v50, %v976_v51  ;;  %v1224_v2 = vld [vmem:[%s1565_s7 + $0x4] sm:$0xf] }
  0x59   : > { %759 = vmatpush.bf16.msrb.mxu1 %v1083_v0  ;;  %v1104_v56 = vld [vmem:[%s1565_s7 + $0x118] sm:$0xf0]  ;;  %v1274_v58 = vld [vmem:[%s1565_s7 + $0x194] sm:$0xf]  ;;  %v1043_v0 = vor.u32 %v1242_v52, %v1040_v54  ;;  %v968_v3 = vld [vmem:[%s1565_s7 + $0x8] sm:$0xf0] }
  0x5a   : > { %772 = vmatpush.bf16.msrb.mxu2 %v1147_v1  ;;  %v1168_v59 = vld [vmem:[%s1565_s7 + $0x198] sm:$0xf0]  ;;  %v1107_v1 = vor.u32 %v1258_v55, %v1104_v56  ;;  %v1240_v4 = vld [vmem:[%s1565_s7 + $0x84] sm:$0xf]  ;;  %v1032_v6 = vld [vmem:[%s1565_s7 + $0x88] sm:$0xf0] }
  0x5b   : > { %785 = vmatpush.bf16.msrb.mxu3 %v1211_v5  ;;  %v1171_v5 = vor.u32 %v1274_v58, %v1168_v59  ;;  %v1256_v7 = vld [vmem:[%s1565_s7 + $0x104] sm:$0xf]  ;;  %v1096_v8 = vld [vmem:[%s1565_s7 + $0x108] sm:$0xf0]  ;;  %v291_v21 = vld [vmem:[#allocation2] sm:$0xff] }
  0x5c   : > { %747 = vmatpush.bf16.msrb.mxu0 %v1011_v11  ;;  %v1272_v9 = vld [vmem:[%s1565_s7 + $0x184] sm:$0xf]  ;;  %v1160_v10 = vld [vmem:[%s1565_s7 + $0x188] sm:$0xf0]  ;;  %v971_v11 = vor.u32 %v1224_v2, %v968_v3  ;;  %v292_v31 = vld [vmem:[#allocation2 + $0x8] sm:$0xff] }
  0x5d   : > { %760 = vmatpush.bf16.msrb.mxu1 %v1075_v12  ;;  %v1035_v12 = vor.u32 %v1240_v4, %v1032_v6  ;;  %v1163_v14 = vor.u32 %v1272_v9, %v1160_v10 }
  0x5e   : > { %773 = vmatpush.bf16.msrb.mxu2 %v1139_v13  ;;  %v1099_v13 = vor.u32 %v1256_v7, %v1096_v8 }
  0x5f   : > { %786 = vmatpush.bf16.msrb.mxu3 %v1203_v17 }
  0x60   : > { %748 = vmatpush.bf16.msrb.mxu0 %v1003_v23 }
  0x61   : > { %761 = vmatpush.bf16.msrb.mxu1 %v1067_v24 }
  0x62   : > { %774 = vmatpush.bf16.msrb.mxu2 %v1131_v25 }
  0x63   : > { %787 = vmatpush.bf16.msrb.mxu3 %v1195_v29 }
  0x64   : > { %749 = vmatpush.bf16.msrb.mxu0 %v995_v35 }
  0x65   : > { %762 = vmatpush.bf16.msrb.mxu1 %v1059_v36 }
  0x66   : > { %775 = vmatpush.bf16.msrb.mxu2 %v1123_v37 }
  0x67   : > { %788 = vmatpush.bf16.msrb.mxu3 %v1187_v41 }
  0x68   : > { %750 = vmatpush.bf16.msrb.mxu0 %v987_v47 }
  0x69   : > { %763 = vmatpush.bf16.msrb.mxu1 %v1051_v48 }
  0x6a   : > { %776 = vmatpush.bf16.msrb.mxu2 %v1115_v49 }
  0x6b   : > { %789 = vmatpush.bf16.msrb.mxu3 %v1179_v53 }
  0x6c   : > { %751 = vmatpush.bf16.msrb.mxu0 %v979_v62 }
  0x6d   : > { %764 = vmatpush.bf16.msrb.mxu1 %v1043_v0 }
  0x6e   : > { %777 = vmatpush.bf16.msrb.mxu2 %v1107_v1 }
  0x6f   : > { %790 = vmatpush.bf16.msrb.mxu3 %v1171_v5 }
  0x70   : > { %752 = vmatpush.bf16.msrb.mxu0 %v971_v11 }
  0x71   : > { %765 = vmatpush.bf16.msrb.mxu1 %v1035_v12 }
  0x72   : > { %778 = vmatpush.bf16.msrb.mxu2 %v1099_v13 }
  0x73   : > { %791 = vmatpush.bf16.msrb.mxu3 %v1163_v14  ;;  %753 = vmatmul.bf16.vlgmr.msrb.gmra.mxu0 %v1677_v61 }
  0x74   : > { %766 = vmatmul.bf16.vlgmr.msrb.gmra.mxu1 %v1679_v63 }
  0x75   : > { %779 = vmatmul.bf16.vlgmr.msrb.gmra.mxu2 %v1671_v57 }
  0x76   : > { %792 = vmatmul.bf16.vlgmr.msrb.gmra.mxu3 %v1675_v60 }
  0xd0   : > { %v702_v15 = vpop.f32.mrf.mxu0 }
  0xd1   : > { %v715_v16 = vpop.f32.mrf.mxu1 }
  0xd2   : > { %v716_v17 = vadd.f32 %v715_v16, %v702_v15 }
  0xd8   : > { %v728_v18 = vpop.f32.mrf.mxu2  ;;  %v704_v23 = vpop.f32.mrf.mxu0 }
  0xd9   : > { %v729_v19 = vadd.f32 %v728_v18, %v716_v17  ;;  %v741_v20 = vpop.f32.mrf.mxu3  ;;  %v717_v24 = vpop.f32.mrf.mxu1 }
  0xdb   : > { %v742_v22 = vadd.f32 %v741_v20, %v729_v19 }
  0xdd   : > { %v797_v25 = vadd.f32 %v742_v22, %v291_v21 }
  0xdf   : > { %799 = vst [vmem:[#allocation2] sm:$0xff] %v797_v25 }
  0xe0   : > { %v730_v26 = vpop.f32.mrf.mxu2 }
  0xe1   : > { %v743_v61 = vpop.f32.mrf.mxu3 }
  0xf0   : > { %v754_v27 = vpop.f32.mrf.mxu0 }
  0xf1   : > { %v767_v63 = vpop.f32.mrf.mxu1 }
  0xf2   : > { %v768_v28 = vadd.f32 %v767_v63, %v754_v27 }
  0xf8   : > { %v780_v57 = vpop.f32.mrf.mxu2  ;;  %v756_v30 = vpop.f32.mrf.mxu0 }
  0xf9   : > { %v781_v29 = vadd.f32 %v780_v57, %v768_v28  ;;  %v793_v60 = vpop.f32.mrf.mxu3  ;;  %v769_v32 = vpop.f32.mrf.mxu1 }
  0xfb   : > { %v794_v33 = vadd.f32 %v793_v60, %v781_v29 }
  0xfd   : > { %v798_v34 = vadd.f32 %v794_v33, %v292_v31  ;;  %804 = sbr.rel (%p1220_p3) target bundleno = 270 (0x10e), region = 44 }
  0xff   : > { %800 = vst [vmem:[#allocation2 + $0x8] sm:$0xff] %v798_v34 }
 0x100   : > { %v782_v35 = vpop.f32.mrf.mxu2 }
 0x101   : > { %v795_v36 = vpop.f32.mrf.mxu3 }
 0x102   : > { %v805_v37 = vld [vmem:[#allocation2] sm:$0xff] }
 0x103   : > { %v807_v39 = vld [vmem:[%s273_s12] sm:$0x3] }
 0x104   : > { %v809_v40 = vperm.slane %v807_v39, 0  ;;  %v810_v41 = vperm.slane %v807_v39, 1 }
 0x106   : > { %v806_v38 = vld [vmem:[#allocation2 + $0x8] sm:$0xff]  ;;  %v813_v42 = vadd.f32 %v809_v40, %v805_v37 }
 0x107   : > { %v814_v43 = vadd.f32 %v810_v41, %v806_v38 }
 0x108   : > { %v815_v44 = vmax.f32 %v813_v42, 0.0 }
 0x109   : > { %v816_v45 = vmax.f32 %v814_v43, 0.0 }
 0x10b   : > { %v817_v46 = vpack.c.bf16 %v816_v45, %v815_v44 }
 0x10d   : > { %818 = vst [vmem:[%s1588_s27] sm:$0xff] %v817_v46 }
 0x10e PF: > { %s16_s19 = sadd.s32 1, %s1459_s19   ;;  %s1776_s30 = sld [smem:[#allocation6_spill]] }
 0x10f   : > { %p13_p4 = scmp.ge.s32.totalorder %s16_s19, 20   ;;  %s1777_s12 = smov %s1435_s13 }
 0x110   : > { %s1778_s13 = smov %s1439_s14  ;;  %s1779_s14 = smov %s1552_s5 }
 0x111   : > { %s1780_s15 = smov %s1451_s17  ;;  %s1781_s16 = smov %s1455_s18 }
 0x112   : > { %s1782_s17 = smov %s1785_s21  ;;  %15 = sbr.rel (!%p13_p4) target bundleno = 5 (0x5), region = 86 }
 0x114   : > { %s1783_s18 = smov %s1776_s30 }
 0x117   :  { %849 = vsyncpa [#allocation4], 1 }
 0x118   :  { %851 = vsyncpa [#allocation4 + $0x1], 1 }

// kernel: clsnet_forward.40
= control target key start
LH: loop header
LB: loop body
LE: loop exit
PB: predicated region body
PF: predicated region fallthrough
CT: control target
= control target key end

     0   :  { %9 = vsyncpa [#allocation4], 0  ;;  %s1867_s0 = inlined_call_operand.vmem [shape: bf16[8,4608], index: 0, kind: input, shape index: {}]   ;;  %s1868_s1 = inlined_call_operand.hbm [shape: bf16[4608,512], index: 1, kind: input, shape index: {}]   ;;  %s1869_s2 = inlined_call_operand.vmem [shape: f32[1,512], index: 2, kind: input, shape index: {}]   ;;  %s1870_s3 = inlined_call_operand.vmem [shape: bf16[8,512], index: 3, kind: input, shape index: {}]   ;;  %s1871_s4 = inlined_call_operand.vmem [shape: bf16[8,512], index: 4, kind: output, shape index: {}]  }
   0x1   :  { %11 = vsyncpa [#allocation4 + $0x1], 0  ;;  %s1578_s15 = smov 0   ;;  %s1580_s16 = smov 0  }
   0x2   :  { %s1582_s17 = smov 0   ;;  %s1584_s18 = smov 0  }
   0x3   :  { %s1586_s19 = smov 0   ;;  %s1588_s20 = smov 0  }
   0x4   :  { %s1590_s21 = smov 0   ;;  %s1592_s22 = smov 0  }
   0x5 LB: > { %s1033_s23 = sadd.s32 4294967295, %s1547_s22   ;;  %s29_s24 = sadd.s32 1, %s1539_s20  ;;  %s1547_s22 = sphi %s1592_s22, %s17_s22   ;;  %s1543_s21 = sphi %s1590_s21, %s1886_s21   ;;  %s1539_s20 = sphi %s1588_s20, %s1885_s20   ;;  %s1535_s19 = sphi %s1586_s19, %s1884_s19   ;;  %s1531_s18 = sphi %s1584_s18, %s1883_s18   ;;  %s1527_s17 = sphi %s1582_s17, %s1882_s17   ;;  %s1523_s16 = sphi %s1580_s16, %s1881_s16   ;;  %s1519_s15 = sphi %s1578_s15, %s1880_s15  }
   0x6   : > { %p30_p0 = scmp.ge.s32.totalorder %s29_s24, 9  ;;  %s32_s25 = sadd.s32 1, %s1543_s21 }
   0x7   : > { %s73_s26 = sadd.s32 1, %s1527_s17  ;;  %p80_p1 = scmp.ne.s32.totalorder %s1527_s17, %s1523_s16 }
   0x8   : > { %s1888_s24 = smov (%p30_p0, %s29_s24), 0  ;;  %s1890_s25 = smov (!%p30_p0, %s32_s25), %s1543_s21 }
   0x9   : > { %1874 = sst [smem:[#allocation6_spill]] %s1888_s24  ;;  %s68_s27 = ssub.s32 %s1539_s20, %s1888_s24 }
   0xa   : > { %p81_p2 = scmp.eq.s32.totalorder %s1547_s22, 0  ;;  %p34_p3 = scmp.ge.s32.totalorder %s1890_s25, 2 }
   0xb   : > { %p86_p4 = scmp.ne.s32.totalorder %s1523_s16, %s1519_s15  ;;  %p87_p6 = scmp.eq.s32.totalorder %s1033_s23, 0 }
   0xc   : > { %p1629_p5 = por %p81_p2, %p80_p1  ;;  %s1892_s25 = smov (%p34_p3, %s1890_s25), 0 }
   0xd   : > { %1876 = sst [smem:[#allocation7_spill]] %s1892_s25  ;;  %p1635_p7 = por %p87_p6, %p86_p4 }
   0xe   : > { %s69_s30 = ssub.s32 %s1543_s21, %s1892_s25  ;;  %p1382_p8 = scmp.lt.s32.totalorder %s1547_s22, 18 }
   0xf   : > { %s70_s5 = sor.u32 %s69_s30, %s68_s27  ;;  %s205_s6 = sand.u32 1, %s1527_s17  }
  0x10   : > { %p71_p9 = scmp.eq.s32.totalorder %s70_s5, 0  ;;  %s1037_s7 = sshll.u32 %s205_s6, 9 }
  0x11   : > { %s1039_s8 = sshll.u32 %s1543_s21, 1  ;;  %s1311_s10 = sshll.u32 %s1539_s20, 8 }
  0x12   : > { %s1645_s9 = scalar_select %p71_p9, %s1527_s17, %s73_s26  }
  0x13   : > { %s215_s11 = sadd.s32 %s1311_s10, %s1039_s8  ;;  %s209_s12 = scalar_lea.vmem [#allocation3], %s1037_s7 }
  0x14   : > { %s220_s13 = sshll.u32 %s209_s12, 4  ;;  %s1041_s14 = sshll.u32 %s215_s11, 2  ;;  %s221_s13 = int_to_ptr.vmem [resolvable:$true] %s220_s13 }
  0x15   : > { %s217_s25 = scalar_lea.hbm %s1868_s1, %s1041_s14  ;;  %p1379_p10 = pnand %p1382_p8, %p1629_p5 }
  0x16   : > { %s218_s27 = sshll.u32 %s217_s25, 4  ;;  %s206_s30 = scalar_lea.sflag [#allocation4], %s205_s6  ;;  %s219_s27 = int_to_ptr.hbm [resolvable:$true] %s218_s27 }
  0x17   : > { %s1549_s26 = smov 256   ;;  %s1550_s5 = smov 128  }
  0x18   : > { %s1551_s24 = smov 8   ;;  %p1042_p11 = scmp.ge.s32.totalorder %s1547_s22, 1 }
  0x19   : > { %1381 = dma.hbm_to_vmem [thread:$0]  (!%p1379_p10), %s219_s27, 8192, %s221_s13, %s206_s30, %s1549_s26, %s1550_s5, %s1551_s24  }
  0x1a   : > { %p249_p12 = scmp.lt.s32.totalorder %s1547_s22, 19 }
  0x1c   : > { %p250_p13 = pnand %p1042_p11, %p249_p12 }
  0x1d   : > { %s255_s7 = sand.u32 (!%p250_p13), 1, %s1523_s16  }
  0x1e   : > { %253 = sbr.rel (%p250_p13) target bundleno = 274 (0x112), region = 36  ;;  %s1043_s8 = sshll.u32 (!%p250_p13), %s255_s7, 9 }
  0x1f   : > { %s256_s10 = scalar_lea.sflag (!%p250_p13), [#allocation4], %s255_s7  ;;  %s1658_s11 = scalar_lea.vmem (!%p250_p13), [#allocation3], %s1043_s8 }
  0x23   : > { %1514 = dma.done.wait (%p1635_p7), %s256_s10, 8192  }
  0x24   : > { %1516 = vsyncadd (%p1635_p7), %s256_s10, 4294959104  ;;  %s1044_s25 = sshll.u32 %s1531_s18, 2  ;;  %s1046_s24 = sshll.u32 %s1535_s19, 1 }
  0x25   : > { %p314_p0 = scmp.lt.s32.totalorder %s1044_s25, 35  ;;  %p324_p1 = scmp.lt.s32.totalorder %s1046_s24, 3 }
  0x26   : > { %p1051_p2 = scmp.ne.s32.totalorder %s1531_s18, 0 }
  0x27   : > { %s1894_s25 = smov (!%p314_p0, %s1044_s25), 35  ;;  %s1896_s24 = smov (!%p324_p1, %s1046_s24), 3 }
  0x28   : > { %s1045_s28 = sshll.u32 %s1894_s25, 2  ;;  %s326_s15 = scalar_lea.vmem %s1869_s2, %s1896_s24 }
  0x29   : > { %s1671_s13 = scalar_lea.vmem %s1867_s0, %s1045_s28  ;;  %s1048_s23 = sshll.u32 %s1896_s24, 2 }
  0x2a   : > { %s1681_s30 = scalar_lea.vmem %s1870_s3, %s1048_s23  ;;  %s1686_s7 = scalar_lea.vmem %s1871_s4, %s1048_s23 }
  0x2b   : > { %351 = sbr.rel (%p1051_p2) target bundleno = 51 (0x33), region = 44 }
  0x30   : > { %v1552_v0 = vmov 0.0  }
  0x31   : > { %352 = vst [vmem:[#allocation2] sm:$0xff] %v1552_v0 }
  0x32   : > { %353 = vst [vmem:[#allocation2 + $0x8] sm:$0xff] %v1552_v0 }
  0x33 PF: > { %v1110_v1 = vld [vmem:[%s1658_s11 + $0x70] sm:$0xf]  ;;  %v1327_v2 = vld [vmem:[%s1658_s11 + $0x74] sm:$0xf0]  ;;  %v1102_v12 = vld [vmem:[%s1658_s11 + $0x60] sm:$0xf] }
  0x34   : > { %v1174_v3 = vld [vmem:[%s1658_s11 + $0xf0] sm:$0xf]  ;;  %v1111_v4 = vor.u32 %v1327_v2, %v1110_v1  ;;  %v1343_v5 = vld [vmem:[%s1658_s11 + $0xf4] sm:$0xf0]  ;;  %v1325_v14 = vld [vmem:[%s1658_s11 + $0x64] sm:$0xf0] }
  0x35   : > { %v1238_v6 = vld [vmem:[%s1658_s11 + $0x170] sm:$0xf]  ;;  %v1359_v7 = vld [vmem:[%s1658_s11 + $0x174] sm:$0xf0]  ;;  %v1175_v8 = vor.u32 %v1343_v5, %v1174_v3  ;;  %v1166_v15 = vld [vmem:[%s1658_s11 + $0xe0] sm:$0xf]  ;;  %v1103_v17 = vor.u32 %v1325_v14, %v1102_v12 }
  0x36   : > { %v1239_v9 = vor.u32 %v1359_v7, %v1238_v6  ;;  %v1302_v10 = vld [vmem:[%s1658_s11 + $0x1f0] sm:$0xf]  ;;  %v1375_v11 = vld [vmem:[%s1658_s11 + $0x1f4] sm:$0xf0]  ;;  %756 = vmatpush.bf16.msra.mxu0 %v1111_v4  ;;  %v1341_v16 = vld [vmem:[%s1658_s11 + $0xe4] sm:$0xf0] }
  0x37   : > { %v1303_v13 = vor.u32 %v1375_v11, %v1302_v10  ;;  %769 = vmatpush.bf16.msra.mxu1 %v1175_v8  ;;  %v1167_v18 = vor.u32 %v1341_v16, %v1166_v15  ;;  %v1230_v19 = vld [vmem:[%s1658_s11 + $0x160] sm:$0xf]  ;;  %v1357_v20 = vld [vmem:[%s1658_s11 + $0x164] sm:$0xf0]  ;;  %v1094_v24 = vld [vmem:[%s1658_s11 + $0x50] sm:$0xf] }
  0x38   : > { %782 = vmatpush.bf16.msra.mxu2 %v1239_v9  ;;  %v1294_v21 = vld [vmem:[%s1658_s11 + $0x1e0] sm:$0xf]  ;;  %v1231_v22 = vor.u32 %v1357_v20, %v1230_v19  ;;  %v1373_v23 = vld [vmem:[%s1658_s11 + $0x1e4] sm:$0xf0]  ;;  %v1323_v25 = vld [vmem:[%s1658_s11 + $0x54] sm:$0xf0] }
  0x39   : > { %795 = vmatpush.bf16.msra.mxu3 %v1303_v13  ;;  %v1295_v26 = vor.u32 %v1373_v23, %v1294_v21  ;;  %v1158_v27 = vld [vmem:[%s1658_s11 + $0xd0] sm:$0xf]  ;;  %v1339_v28 = vld [vmem:[%s1658_s11 + $0xd4] sm:$0xf0]  ;;  %v1095_v30 = vor.u32 %v1323_v25, %v1094_v24  ;;  %v1086_v36 = vld [vmem:[%s1658_s11 + $0x40] sm:$0xf] }
  0x3a   : > { %v1222_v29 = vld [vmem:[%s1658_s11 + $0x150] sm:$0xf]  ;;  %757 = vmatpush.bf16.msra.mxu0 %v1103_v17  ;;  %v1355_v31 = vld [vmem:[%s1658_s11 + $0x154] sm:$0xf0]  ;;  %v1159_v34 = vor.u32 %v1339_v28, %v1158_v27  ;;  %v1321_v37 = vld [vmem:[%s1658_s11 + $0x44] sm:$0xf0] }
  0x3b   : > { %v1286_v32 = vld [vmem:[%s1658_s11 + $0x1d0] sm:$0xf]  ;;  %v1371_v33 = vld [vmem:[%s1658_s11 + $0x1d4] sm:$0xf0]  ;;  %770 = vmatpush.bf16.msra.mxu1 %v1167_v18  ;;  %v1223_v35 = vor.u32 %v1355_v31, %v1222_v29  ;;  %v1150_v38 = vld [vmem:[%s1658_s11 + $0xc0] sm:$0xf]  ;;  %v1087_v45 = vor.u32 %v1321_v37, %v1086_v36 }
  0x3c   : > { %783 = vmatpush.bf16.msra.mxu2 %v1231_v22  ;;  %v1287_v39 = vor.u32 %v1371_v33, %v1286_v32  ;;  %v1337_v40 = vld [vmem:[%s1658_s11 + $0xc4] sm:$0xf0]  ;;  %v1214_v41 = vld [vmem:[%s1658_s11 + $0x140] sm:$0xf]  ;;  %v1078_v48 = vld [vmem:[%s1658_s11 + $0x30] sm:$0xf] }
  0x3d   : > { %796 = vmatpush.bf16.msra.mxu3 %v1295_v26  ;;  %v1353_v42 = vld [vmem:[%s1658_s11 + $0x144] sm:$0xf0]  ;;  %v1278_v43 = vld [vmem:[%s1658_s11 + $0x1c0] sm:$0xf]  ;;  %v1151_v46 = vor.u32 %v1337_v40, %v1150_v38  ;;  %v1319_v49 = vld [vmem:[%s1658_s11 + $0x34] sm:$0xf0] }
  0x3e   : > { %v1369_v44 = vld [vmem:[%s1658_s11 + $0x1c4] sm:$0xf0]  ;;  %758 = vmatpush.bf16.msra.mxu0 %v1095_v30  ;;  %v1215_v47 = vor.u32 %v1353_v42, %v1214_v41  ;;  %v1142_v50 = vld [vmem:[%s1658_s11 + $0xb0] sm:$0xf]  ;;  %v1335_v52 = vld [vmem:[%s1658_s11 + $0xb4] sm:$0xf0]  ;;  %v1079_v57 = vor.u32 %v1319_v49, %v1078_v48 }
  0x3f   : > { %771 = vmatpush.bf16.msra.mxu1 %v1159_v34  ;;  %v1279_v51 = vor.u32 %v1369_v44, %v1278_v43  ;;  %v1206_v53 = vld [vmem:[%s1658_s11 + $0x130] sm:$0xf]  ;;  %v1351_v54 = vld [vmem:[%s1658_s11 + $0x134] sm:$0xf0]  ;;  %v1143_v58 = vor.u32 %v1335_v52, %v1142_v50  ;;  %v1070_v60 = vld [vmem:[%s1658_s11 + $0x20] sm:$0xf] }
  0x40   : > { %784 = vmatpush.bf16.msra.mxu2 %v1223_v35  ;;  %v1270_v55 = vld [vmem:[%s1658_s11 + $0x1b0] sm:$0xf]  ;;  %v1367_v56 = vld [vmem:[%s1658_s11 + $0x1b4] sm:$0xf0]  ;;  %v1207_v59 = vor.u32 %v1351_v54, %v1206_v53  ;;  %v1317_v61 = vld [vmem:[%s1658_s11 + $0x24] sm:$0xf0] }
  0x41   : > { %797 = vmatpush.bf16.msra.mxu3 %v1287_v39  ;;  %v1134_v62 = vld [vmem:[%s1658_s11 + $0xa0] sm:$0xf]  ;;  %v1271_v63 = vor.u32 %v1367_v56, %v1270_v55  ;;  %v1333_v0 = vld [vmem:[%s1658_s11 + $0xa4] sm:$0xf0]  ;;  %v1071_v5 = vor.u32 %v1317_v61, %v1070_v60  ;;  %v1062_v8 = vld [vmem:[%s1658_s11 + $0x10] sm:$0xf] }
  0x42   : > { %759 = vmatpush.bf16.msra.mxu0 %v1087_v45  ;;  %v1198_v1 = vld [vmem:[%s1658_s11 + $0x120] sm:$0xf]  ;;  %v1349_v2 = vld [vmem:[%s1658_s11 + $0x124] sm:$0xf0]  ;;  %v1135_v6 = vor.u32 %v1333_v0, %v1134_v62  ;;  %v1315_v9 = vld [vmem:[%s1658_s11 + $0x14] sm:$0xf0] }
  0x43   : > { %772 = vmatpush.bf16.msra.mxu1 %v1151_v46  ;;  %v1262_v3 = vld [vmem:[%s1658_s11 + $0x1a0] sm:$0xf]  ;;  %v1365_v4 = vld [vmem:[%s1658_s11 + $0x1a4] sm:$0xf0]  ;;  %v1199_v7 = vor.u32 %v1349_v2, %v1198_v1  ;;  %v1126_v10 = vld [vmem:[%s1658_s11 + $0x90] sm:$0xf]  ;;  %v1063_v17 = vor.u32 %v1315_v9, %v1062_v8 }
  0x44   : > { %785 = vmatpush.bf16.msra.mxu2 %v1215_v47  ;;  %v1263_v11 = vor.u32 %v1365_v4, %v1262_v3  ;;  %v1331_v12 = vld [vmem:[%s1658_s11 + $0x94] sm:$0xf0]  ;;  %v1190_v13 = vld [vmem:[%s1658_s11 + $0x110] sm:$0xf]  ;;  %v1054_v18 = vld [vmem:[%s1658_s11] sm:$0xf] }
  0x45   : > { %798 = vmatpush.bf16.msra.mxu3 %v1279_v51  ;;  %v1347_v14 = vld [vmem:[%s1658_s11 + $0x114] sm:$0xf0]  ;;  %v1254_v15 = vld [vmem:[%s1658_s11 + $0x190] sm:$0xf]  ;;  %v1313_v19 = vld [vmem:[%s1658_s11 + $0x4] sm:$0xf0]  ;;  %v1127_v21 = vor.u32 %v1331_v12, %v1126_v10 }
  0x46   : > { %760 = vmatpush.bf16.msra.mxu0 %v1079_v57  ;;  %v1363_v16 = vld [vmem:[%s1658_s11 + $0x194] sm:$0xf0]  ;;  %v1118_v20 = vld [vmem:[%s1658_s11 + $0x80] sm:$0xf]  ;;  %v1191_v22 = vor.u32 %v1347_v14, %v1190_v13  ;;  %v1329_v23 = vld [vmem:[%s1658_s11 + $0x84] sm:$0xf0]  ;;  %v1055_v33 = vor.u32 %v1313_v19, %v1054_v18 }
  0x47   : > { %773 = vmatpush.bf16.msra.mxu1 %v1143_v58  ;;  %v1182_v24 = vld [vmem:[%s1658_s11 + $0x100] sm:$0xf]  ;;  %v1345_v25 = vld [vmem:[%s1658_s11 + $0x104] sm:$0xf0]  ;;  %v1255_v26 = vor.u32 %v1363_v16, %v1254_v15  ;;  %v1326_v29 = vld [vmem:[%s1658_s11 + $0x74] sm:$0xf]  ;;  %v1119_v38 = vor.u32 %v1329_v23, %v1118_v20 }
  0x48   : > { %786 = vmatpush.bf16.msra.mxu2 %v1207_v59  ;;  %v1246_v27 = vld [vmem:[%s1658_s11 + $0x180] sm:$0xf]  ;;  %v1361_v28 = vld [vmem:[%s1658_s11 + $0x184] sm:$0xf0]  ;;  %v1112_v30 = vld [vmem:[%s1658_s11 + $0x78] sm:$0xf0]  ;;  %v1183_v39 = vor.u32 %v1345_v25, %v1182_v24 }
  0x49   : > { %799 = vmatpush.bf16.msra.mxu3 %v1271_v63  ;;  %v1342_v31 = vld [vmem:[%s1658_s11 + $0xf4] sm:$0xf]  ;;  %v357_v32 = vld [vmem:[%s1671_s13 + $0x8] sm:$0xff]  ;;  %v1247_v43 = vor.u32 %v1361_v28, %v1246_v27  ;;  %v1115_v44 = vor.u32 %v1326_v29, %v1112_v30  ;;  %v1324_v48 = vld [vmem:[%s1658_s11 + $0x64] sm:$0xf]  ;;  %p1308_p3 = scmp.ne.s32.totalorder %s1531_s18, 8 }
  0x4a   : > { %761 = vmatpush.bf16.msra.mxu0 %v1071_v5  ;;  %v1176_v34 = vld [vmem:[%s1658_s11 + $0xf8] sm:$0xf0]  ;;  %v1358_v35 = vld [vmem:[%s1658_s11 + $0x174] sm:$0xf]  ;;  %v426_v37 = vunpack.c.l.b16 %v357_v32  ;;  %v427_v42 = vunpack.c.h.b16 %v357_v32  ;;  %v1104_v49 = vld [vmem:[%s1658_s11 + $0x68] sm:$0xf0] }
  0x4b   : > { %774 = vmatpush.bf16.msra.mxu1 %v1135_v6  ;;  %v1240_v36 = vld [vmem:[%s1658_s11 + $0x178] sm:$0xf0]  ;;  %v1374_v40 = vld [vmem:[%s1658_s11 + $0x1f4] sm:$0xf]  ;;  %v1179_v46 = vor.u32 %v1342_v31, %v1176_v34  ;;  %v1340_v50 = vld [vmem:[%s1658_s11 + $0xe4] sm:$0xf]  ;;  %v1107_v62 = vor.u32 %v1324_v48, %v1104_v49 }
  0x4c   : > { %787 = vmatpush.bf16.msra.mxu2 %v1199_v7  ;;  %v1304_v41 = vld [vmem:[%s1658_s11 + $0x1f8] sm:$0xf0]  ;;  %v356_v45 = vld [vmem:[%s1671_s13] sm:$0xff]  ;;  %v1243_v47 = vor.u32 %v1358_v35, %v1240_v36  ;;  %v1168_v54 = vld [vmem:[%s1658_s11 + $0xe8] sm:$0xf0]  ;;  %v1769_v57 = vpack.c.b16 %v426_v37, %v426_v37  ;;  %v1773_v60 = vpack.c.b16 %v427_v42, %v427_v42 }
  0x4d   : > { %800 = vmatpush.bf16.msra.mxu3 %v1263_v11  ;;  %v424_v51 = vunpack.c.l.b16 %v356_v45  ;;  %v425_v52 = vunpack.c.h.b16 %v356_v45  ;;  %v1307_v53 = vor.u32 %v1374_v40, %v1304_v41  ;;  %v1356_v55 = vld [vmem:[%s1658_s11 + $0x164] sm:$0xf]  ;;  %v1232_v56 = vld [vmem:[%s1658_s11 + $0x168] sm:$0xf0]  ;;  %v1171_v0 = vor.u32 %v1340_v50, %v1168_v54  ;;  %v1322_v2 = vld [vmem:[%s1658_s11 + $0x54] sm:$0xf] }
  0x4e   : > { %762 = vmatpush.bf16.msra.mxu0 %v1063_v17  ;;  %v1372_v58 = vld [vmem:[%s1658_s11 + $0x1e4] sm:$0xf]  ;;  %v1296_v59 = vld [vmem:[%s1658_s11 + $0x1e8] sm:$0xf0]  ;;  %v1235_v1 = vor.u32 %v1356_v55, %v1232_v56  ;;  %v1096_v3 = vld [vmem:[%s1658_s11 + $0x58] sm:$0xf0] }
  0x4f   : > { %775 = vmatpush.bf16.msra.mxu1 %v1127_v21  ;;  %v1775_v61 = vpack.c.b16 %v424_v51, %v424_v51  ;;  %v1777_v63 = vpack.c.b16 %v425_v52, %v425_v52  ;;  %v1338_v4 = vld [vmem:[%s1658_s11 + $0xd4] sm:$0xf]  ;;  %v1299_v5 = vor.u32 %v1372_v58, %v1296_v59  ;;  %v1160_v6 = vld [vmem:[%s1658_s11 + $0xd8] sm:$0xf0]  ;;  %v1099_v11 = vor.u32 %v1322_v2, %v1096_v3  ;;  %v1320_v14 = vld [vmem:[%s1658_s11 + $0x44] sm:$0xf] }
  0x50   : > { %788 = vmatpush.bf16.msra.mxu2 %v1191_v22  ;;  %v1354_v7 = vld [vmem:[%s1658_s11 + $0x154] sm:$0xf]  ;;  %v1224_v8 = vld [vmem:[%s1658_s11 + $0x158] sm:$0xf0]  ;;  %v1163_v12 = vor.u32 %v1338_v4, %v1160_v6  ;;  %v1088_v15 = vld [vmem:[%s1658_s11 + $0x48] sm:$0xf0] }
  0x51   : > { %801 = vmatpush.bf16.msra.mxu3 %v1255_v26  ;;  %v1370_v9 = vld [vmem:[%s1658_s11 + $0x1d4] sm:$0xf]  ;;  %v1288_v10 = vld [vmem:[%s1658_s11 + $0x1d8] sm:$0xf0]  ;;  %v1227_v13 = vor.u32 %v1354_v7, %v1224_v8  ;;  %v1336_v16 = vld [vmem:[%s1658_s11 + $0xc4] sm:$0xf]  ;;  %v1091_v23 = vor.u32 %v1320_v14, %v1088_v15 }
  0x52   : > { %763 = vmatpush.bf16.msra.mxu0 %v1055_v33  ;;  %v1291_v17 = vor.u32 %v1370_v9, %v1288_v10  ;;  %v1152_v18 = vld [vmem:[%s1658_s11 + $0xc8] sm:$0xf0]  ;;  %v1352_v19 = vld [vmem:[%s1658_s11 + $0x144] sm:$0xf]  ;;  %v1318_v26 = vld [vmem:[%s1658_s11 + $0x34] sm:$0xf] }
  0x53   : > { %776 = vmatpush.bf16.msra.mxu1 %v1119_v38  ;;  %v1216_v20 = vld [vmem:[%s1658_s11 + $0x148] sm:$0xf0]  ;;  %v1368_v21 = vld [vmem:[%s1658_s11 + $0x1c4] sm:$0xf]  ;;  %v1155_v24 = vor.u32 %v1336_v16, %v1152_v18  ;;  %v1080_v27 = vld [vmem:[%s1658_s11 + $0x38] sm:$0xf0] }
  0x54   : > { %789 = vmatpush.bf16.msra.mxu2 %v1183_v39  ;;  %v1280_v22 = vld [vmem:[%s1658_s11 + $0x1c8] sm:$0xf0]  ;;  %v1219_v25 = vor.u32 %v1352_v19, %v1216_v20  ;;  %v1334_v28 = vld [vmem:[%s1658_s11 + $0xb4] sm:$0xf]  ;;  %v1144_v30 = vld [vmem:[%s1658_s11 + $0xb8] sm:$0xf0]  ;;  %v1083_v35 = vor.u32 %v1318_v26, %v1080_v27 }
  0x55   : > { %802 = vmatpush.bf16.msra.mxu3 %v1247_v43  ;;  %764 = vmatmul.bf16.vlgmr.msra.gmra.mxu0 %v1775_v61  ;;  %v1283_v29 = vor.u32 %v1368_v21, %v1280_v22  ;;  %v1350_v31 = vld [vmem:[%s1658_s11 + $0x134] sm:$0xf]  ;;  %v1208_v32 = vld [vmem:[%s1658_s11 + $0x138] sm:$0xf0]  ;;  %v1147_v36 = vor.u32 %v1334_v28, %v1144_v30  ;;  %v1316_v38 = vld [vmem:[%s1658_s11 + $0x24] sm:$0xf] }
  0x56   : > { %808 = vmatpush.bf16.msrb.mxu0 %v1115_v44  ;;  %777 = vmatmul.bf16.vlgmr.msra.gmra.mxu1 %v1777_v63  ;;  %v1366_v33 = vld [vmem:[%s1658_s11 + $0x1b4] sm:$0xf]  ;;  %v1272_v34 = vld [vmem:[%s1658_s11 + $0x1b8] sm:$0xf0]  ;;  %v1211_v37 = vor.u32 %v1350_v31, %v1208_v32  ;;  %v1072_v39 = vld [vmem:[%s1658_s11 + $0x28] sm:$0xf0] }
  0x57   : > { %821 = vmatpush.bf16.msrb.mxu1 %v1179_v46  ;;  %790 = vmatmul.bf16.vlgmr.msra.gmra.mxu2 %v1769_v57  ;;  %v1332_v40 = vld [vmem:[%s1658_s11 + $0xa4] sm:$0xf]  ;;  %v1275_v41 = vor.u32 %v1366_v33, %v1272_v34  ;;  %v1136_v42 = vld [vmem:[%s1658_s11 + $0xa8] sm:$0xf0]  ;;  %v1314_v50 = vld [vmem:[%s1658_s11 + $0x14] sm:$0xf] }
  0x58   : > { %834 = vmatpush.bf16.msrb.mxu2 %v1243_v47  ;;  %803 = vmatmul.bf16.vlgmr.msra.gmra.mxu3 %v1773_v60  ;;  %v1348_v43 = vld [vmem:[%s1658_s11 + $0x124] sm:$0xf]  ;;  %v1200_v44 = vld [vmem:[%s1658_s11 + $0x128] sm:$0xf0]  ;;  %v1075_v47 = vor.u32 %v1316_v38, %v1072_v39  ;;  %v1139_v48 = vor.u32 %v1332_v40, %v1136_v42  ;;  %v1064_v51 = vld [vmem:[%s1658_s11 + $0x18] sm:$0xf0] }
  0x59   : > { %847 = vmatpush.bf16.msrb.mxu3 %v1307_v53  ;;  %v1364_v45 = vld [vmem:[%s1658_s11 + $0x1a4] sm:$0xf]  ;;  %v1264_v46 = vld [vmem:[%s1658_s11 + $0x1a8] sm:$0xf0]  ;;  %v1203_v49 = vor.u32 %v1348_v43, %v1200_v44  ;;  %v1330_v52 = vld [vmem:[%s1658_s11 + $0x94] sm:$0xf] }
  0x5a   : > { %809 = vmatpush.bf16.msrb.mxu0 %v1107_v62  ;;  %v1267_v53 = vor.u32 %v1364_v45, %v1264_v46  ;;  %v1128_v54 = vld [vmem:[%s1658_s11 + $0x98] sm:$0xf0]  ;;  %v1346_v55 = vld [vmem:[%s1658_s11 + $0x114] sm:$0xf]  ;;  %v1067_v62 = vor.u32 %v1314_v50, %v1064_v51  ;;  %v1312_v2 = vld [vmem:[%s1658_s11 + $0x4] sm:$0xf] }
  0x5b   : > { %822 = vmatpush.bf16.msrb.mxu1 %v1171_v0  ;;  %v1192_v56 = vld [vmem:[%s1658_s11 + $0x118] sm:$0xf0]  ;;  %v1362_v58 = vld [vmem:[%s1658_s11 + $0x194] sm:$0xf]  ;;  %v1131_v0 = vor.u32 %v1330_v52, %v1128_v54  ;;  %v1056_v3 = vld [vmem:[%s1658_s11 + $0x8] sm:$0xf0] }
  0x5c   : > { %835 = vmatpush.bf16.msrb.mxu2 %v1235_v1  ;;  %v1256_v59 = vld [vmem:[%s1658_s11 + $0x198] sm:$0xf0]  ;;  %v1195_v1 = vor.u32 %v1346_v55, %v1192_v56  ;;  %v1328_v4 = vld [vmem:[%s1658_s11 + $0x84] sm:$0xf]  ;;  %v1120_v6 = vld [vmem:[%s1658_s11 + $0x88] sm:$0xf0] }
  0x5d   : > { %848 = vmatpush.bf16.msrb.mxu3 %v1299_v5  ;;  %v1259_v5 = vor.u32 %v1362_v58, %v1256_v59  ;;  %v1344_v7 = vld [vmem:[%s1658_s11 + $0x104] sm:$0xf]  ;;  %v1184_v8 = vld [vmem:[%s1658_s11 + $0x108] sm:$0xf0]  ;;  %v354_v21 = vld [vmem:[#allocation2] sm:$0xff] }
  0x5e   : > { %810 = vmatpush.bf16.msrb.mxu0 %v1099_v11  ;;  %v1360_v9 = vld [vmem:[%s1658_s11 + $0x184] sm:$0xf]  ;;  %v1248_v10 = vld [vmem:[%s1658_s11 + $0x188] sm:$0xf0]  ;;  %v1059_v11 = vor.u32 %v1312_v2, %v1056_v3  ;;  %v355_v31 = vld [vmem:[#allocation2 + $0x8] sm:$0xff] }
  0x5f   : > { %823 = vmatpush.bf16.msrb.mxu1 %v1163_v12  ;;  %v1123_v12 = vor.u32 %v1328_v4, %v1120_v6  ;;  %v1251_v14 = vor.u32 %v1360_v9, %v1248_v10 }
  0x60   : > { %836 = vmatpush.bf16.msrb.mxu2 %v1227_v13  ;;  %v1187_v13 = vor.u32 %v1344_v7, %v1184_v8 }
  0x61   : > { %849 = vmatpush.bf16.msrb.mxu3 %v1291_v17 }
  0x62   : > { %811 = vmatpush.bf16.msrb.mxu0 %v1091_v23 }
  0x63   : > { %824 = vmatpush.bf16.msrb.mxu1 %v1155_v24 }
  0x64   : > { %837 = vmatpush.bf16.msrb.mxu2 %v1219_v25 }
  0x65   : > { %850 = vmatpush.bf16.msrb.mxu3 %v1283_v29 }
  0x66   : > { %812 = vmatpush.bf16.msrb.mxu0 %v1083_v35 }
  0x67   : > { %825 = vmatpush.bf16.msrb.mxu1 %v1147_v36 }
  0x68   : > { %838 = vmatpush.bf16.msrb.mxu2 %v1211_v37 }
  0x69   : > { %851 = vmatpush.bf16.msrb.mxu3 %v1275_v41 }
  0x6a   : > { %813 = vmatpush.bf16.msrb.mxu0 %v1075_v47 }
  0x6b   : > { %826 = vmatpush.bf16.msrb.mxu1 %v1139_v48 }
  0x6c   : > { %839 = vmatpush.bf16.msrb.mxu2 %v1203_v49 }
  0x6d   : > { %852 = vmatpush.bf16.msrb.mxu3 %v1267_v53 }
  0x6e   : > { %814 = vmatpush.bf16.msrb.mxu0 %v1067_v62 }
  0x6f   : > { %827 = vmatpush.bf16.msrb.mxu1 %v1131_v0 }
  0x70   : > { %840 = vmatpush.bf16.msrb.mxu2 %v1195_v1 }
  0x71   : > { %853 = vmatpush.bf16.msrb.mxu3 %v1259_v5 }
  0x72   : > { %815 = vmatpush.bf16.msrb.mxu0 %v1059_v11 }
  0x73   : > { %828 = vmatpush.bf16.msrb.mxu1 %v1123_v12 }
  0x74   : > { %841 = vmatpush.bf16.msrb.mxu2 %v1187_v13 }
  0x75   : > { %854 = vmatpush.bf16.msrb.mxu3 %v1251_v14  ;;  %816 = vmatmul.bf16.vlgmr.msrb.gmra.mxu0 %v1775_v61 }
  0x76   : > { %829 = vmatmul.bf16.vlgmr.msrb.gmra.mxu1 %v1777_v63 }
  0x77   : > { %842 = vmatmul.bf16.vlgmr.msrb.gmra.mxu2 %v1769_v57 }
  0x78   : > { %855 = vmatmul.bf16.vlgmr.msrb.gmra.mxu3 %v1773_v60 }
  0xd2   : > { %v765_v15 = vpop.f32.mrf.mxu0 }
  0xd3   : > { %v778_v16 = vpop.f32.mrf.mxu1 }
  0xd4   : > { %v779_v17 = vadd.f32 %v778_v16, %v765_v15 }
  0xda   : > { %v791_v18 = vpop.f32.mrf.mxu2  ;;  %v767_v23 = vpop.f32.mrf.mxu0 }
  0xdb   : > { %v792_v19 = vadd.f32 %v791_v18, %v779_v17  ;;  %v804_v20 = vpop.f32.mrf.mxu3  ;;  %v780_v24 = vpop.f32.mrf.mxu1 }
  0xdd   : > { %v805_v22 = vadd.f32 %v804_v20, %v792_v19 }
  0xdf   : > { %v860_v25 = vadd.f32 %v805_v22, %v354_v21 }
  0xe1   : > { %862 = vst [vmem:[#allocation2] sm:$0xff] %v860_v25 }
  0xe2   : > { %v793_v26 = vpop.f32.mrf.mxu2 }
  0xe3   : > { %v806_v61 = vpop.f32.mrf.mxu3 }
  0xf2   : > { %v817_v27 = vpop.f32.mrf.mxu0 }
  0xf3   : > { %v830_v63 = vpop.f32.mrf.mxu1 }
  0xf4   : > { %v831_v28 = vadd.f32 %v830_v63, %v817_v27 }
  0xfa   : > { %v843_v57 = vpop.f32.mrf.mxu2  ;;  %v819_v30 = vpop.f32.mrf.mxu0 }
  0xfb   : > { %v844_v29 = vadd.f32 %v843_v57, %v831_v28  ;;  %v856_v60 = vpop.f32.mrf.mxu3  ;;  %v832_v32 = vpop.f32.mrf.mxu1 }
  0xfd   : > { %v857_v33 = vadd.f32 %v856_v60, %v844_v29 }
  0xff   : > { %v861_v34 = vadd.f32 %v857_v33, %v355_v31  ;;  %867 = sbr.rel (%p1308_p3) target bundleno = 274 (0x112), region = 48 }
 0x101   : > { %863 = vst [vmem:[#allocation2 + $0x8] sm:$0xff] %v861_v34 }
 0x102   : > { %v845_v35 = vpop.f32.mrf.mxu2 }
 0x103   : > { %v858_v36 = vpop.f32.mrf.mxu3 }
 0x104   : > { %v868_v37 = vld [vmem:[#allocation2] sm:$0xff] }
 0x105   : > { %v870_v39 = vld [vmem:[%s326_s15] sm:$0x3] }
 0x106   : > { %v872_v40 = vperm.slane %v870_v39, 0  ;;  %v873_v41 = vperm.slane %v870_v39, 1  ;;  %v878_v42 = vld [vmem:[%s1681_s30] sm:$0xff] }
 0x107   : > { %v879_v43 = vunpack.c.l.bf16 %v878_v42  ;;  %v880_v44 = vunpack.c.h.bf16 %v878_v42 }
 0x108   : > { %v869_v38 = vld [vmem:[#allocation2 + $0x8] sm:$0xff]  ;;  %v876_v45 = vadd.f32 %v872_v40, %v868_v37 }
 0x109   : > { %v877_v46 = vadd.f32 %v873_v41, %v869_v38 }
 0x10a   : > { %v881_v47 = vadd.f32 %v879_v43, %v876_v45 }
 0x10b   : > { %v882_v48 = vadd.f32 %v880_v44, %v877_v46 }
 0x10c   : > { %v883_v49 = vmax.f32 %v881_v47, 0.0 }
 0x10d   : > { %v884_v50 = vmax.f32 %v882_v48, 0.0 }
 0x10f   : > { %v885_v51 = vpack.c.bf16 %v884_v50, %v883_v49 }
 0x111   : > { %886 = vst [vmem:[%s1686_s7] sm:$0xff] %v885_v51 }
 0x112 PF: > { %s17_s22 = sadd.s32 1, %s1547_s22   ;;  %s1878_s11 = sld [smem:[#allocation6_spill]] }
 0x113   : > { %p14_p4 = scmp.ge.s32.totalorder %s17_s22, 20   ;;  %s1879_s25 = sld [smem:[#allocation7_spill]] }
 0x114   : > { %s1880_s15 = smov %s1523_s16  ;;  %s1881_s16 = smov %s1527_s17 }
 0x115   : > { %s1882_s17 = smov %s1645_s9  ;;  %s1883_s18 = smov %s1539_s20 }
 0x116   : > { %s1884_s19 = smov %s1543_s21  ;;  %16 = sbr.rel (!%p14_p4) target bundleno = 5 (0x5), region = 93 }
 0x118   : > { %s1885_s20 = smov %s1878_s11 }
 0x119   : > { %s1886_s21 = smov %s1879_s25 }
 0x11b   :  { %917 = vsyncpa [#allocation4], 1 }
 0x11c   :  { %919 = vsyncpa [#allocation4 + $0x1], 1 }

// kernel: clsnet_forward.41
= control target key start
LH: loop header
LB: loop body
LE: loop exit
PB: predicated region body
PF: predicated region fallthrough
CT: control target
= control target key end

     0   :  { %vm2671_vm0 = vcmask 261120   ;;  %s6193_s1 = inlined_call_operand.vmem [shape: bf16[512,1024], index: 1, kind: input, shape index: {}]   ;;  %s6194_s0 = inlined_call_operand.vmem [shape: bf16[8,512], index: 0, kind: input, shape index: {}]   ;;  %s6195_s2 = inlined_call_operand.vmem [shape: f32[1,1024], index: 2, kind: input, shape index: {}]   ;;  %s6196_s3 = inlined_call_operand.vmem [shape: bf16[1024,32], index: 3, kind: input, shape index: {}]   ;;  %s6197_s4 = inlined_call_operand.vmem [shape: f32[1,32], index: 4, kind: input, shape index: {}]   ;;  %s6198_s6 = inlined_call_operand.vmem [shape: f32[1,128], index: 6, kind: input, shape index: {}]   ;;  %s6199_s5 = inlined_call_operand.vmem [shape: bf16[32,128], index: 5, kind: input, shape index: {}]   ;;  %s6200_s7 = inlined_call_operand.vmem [shape: f32[8,128], index: 7, kind: output, shape index: {}]  }
   0x1   :  { %v2941_v0 = vld [vmem:[%s6193_s1 + $0x1c0] sm:$0xf] }
   0x2   :  { %v4064_v1 = vld [vmem:[%s6193_s1 + $0x1dc] sm:$0xf0] }
   0x3   :  { %v3197_v2 = vld [vmem:[%s6193_s1 + $0x3c0] sm:$0xf]  ;;  %v2942_v3 = vor.u32 %v4064_v1, %v2941_v0 }
   0x4   :  { %v4128_v4 = vld [vmem:[%s6193_s1 + $0x3dc] sm:$0xf0] }
   0x5   :  { %v3453_v5 = vld [vmem:[%s6193_s1 + $0x5c0] sm:$0xf]  ;;  %v3198_v7 = vor.u32 %v4128_v4, %v3197_v2  ;;  %1597 = vmatpush.bf16.msra.mxu0 %v2942_v3 }
   0x6   :  { %v4192_v6 = vld [vmem:[%s6193_s1 + $0x5dc] sm:$0xf0] }
   0x7   :  { %v3454_v8 = vor.u32 %v4192_v6, %v3453_v5  ;;  %v3709_v9 = vld [vmem:[%s6193_s1 + $0x7c0] sm:$0xf]  ;;  %1610 = vmatpush.bf16.msra.mxu1 %v3198_v7 }
   0x8   :  { %v4256_v10 = vld [vmem:[%s6193_s1 + $0x7dc] sm:$0xf0] }
   0x9   :  { %v2909_v11 = vld [vmem:[%s6193_s1 + $0x180] sm:$0xf]  ;;  %v3710_v12 = vor.u32 %v4256_v10, %v3709_v9  ;;  %1623 = vmatpush.bf16.msra.mxu2 %v3454_v8 }
   0xa   :  { %v4056_v13 = vld [vmem:[%s6193_s1 + $0x19c] sm:$0xf0] }
   0xb   :  { %v3165_v14 = vld [vmem:[%s6193_s1 + $0x380] sm:$0xf]  ;;  %v2910_v16 = vor.u32 %v4056_v13, %v2909_v11  ;;  %1636 = vmatpush.bf16.msra.mxu3 %v3710_v12 }
   0xc   :  { %v4120_v15 = vld [vmem:[%s6193_s1 + $0x39c] sm:$0xf0] }
   0xd   :  { %v3166_v17 = vor.u32 %v4120_v15, %v3165_v14  ;;  %v3421_v18 = vld [vmem:[%s6193_s1 + $0x580] sm:$0xf]  ;;  %1598 = vmatpush.bf16.msra.mxu0 %v2910_v16 }
   0xe   :  { %v4184_v19 = vld [vmem:[%s6193_s1 + $0x59c] sm:$0xf0] }
   0xf   :  { %v3677_v20 = vld [vmem:[%s6193_s1 + $0x780] sm:$0xf]  ;;  %v3422_v21 = vor.u32 %v4184_v19, %v3421_v18  ;;  %1611 = vmatpush.bf16.msra.mxu1 %v3166_v17 }
  0x10   :  { %v4248_v22 = vld [vmem:[%s6193_s1 + $0x79c] sm:$0xf0] }
  0x11   :  { %v2877_v23 = vld [vmem:[%s6193_s1 + $0x140] sm:$0xf]  ;;  %v3678_v25 = vor.u32 %v4248_v22, %v3677_v20  ;;  %1624 = vmatpush.bf16.msra.mxu2 %v3422_v21 }
  0x12   :  { %v4048_v24 = vld [vmem:[%s6193_s1 + $0x15c] sm:$0xf0] }
  0x13   :  { %v3133_v26 = vld [vmem:[%s6193_s1 + $0x340] sm:$0xf]  ;;  %v2878_v29 = vor.u32 %v4048_v24, %v2877_v23  ;;  %1637 = vmatpush.bf16.msra.mxu3 %v3678_v25 }
  0x14   :  { %v4112_v27 = vld [vmem:[%s6193_s1 + $0x35c] sm:$0xf0] }
  0x15   :  { %v3389_v28 = vld [vmem:[%s6193_s1 + $0x540] sm:$0xf]  ;;  %v3134_v33 = vor.u32 %v4112_v27, %v3133_v26  ;;  %1599 = vmatpush.bf16.msra.mxu0 %v2878_v29  ;;  %v2943_v29 = vld [vmem:[%s6193_s1 + $0x1e0] sm:$0xf0] }
  0x16   :  { %v4176_v30 = vld [vmem:[%s6193_s1 + $0x55c] sm:$0xf0] }
  0x17   :  { %v3645_v31 = vld [vmem:[%s6193_s1 + $0x740] sm:$0xf]  ;;  %v3390_v34 = vor.u32 %v4176_v30, %v3389_v28  ;;  %1612 = vmatpush.bf16.msra.mxu1 %v3134_v33  ;;  %v4060_v28 = vld [vmem:[%s6193_s1 + $0x1c4] sm:$0xf] }
  0x18   :  { %v4240_v32 = vld [vmem:[%s6193_s1 + $0x75c] sm:$0xf0]  ;;  %v4124_v30 = vld [vmem:[%s6193_s1 + $0x3c4] sm:$0xf] }
  0x19   :  { %v2845_v35 = vld [vmem:[%s6193_s1 + $0x100] sm:$0xf]  ;;  %v3646_v38 = vor.u32 %v4240_v32, %v3645_v31  ;;  %1625 = vmatpush.bf16.msra.mxu2 %v3390_v34  ;;  %v3199_v32 = vld [vmem:[%s6193_s1 + $0x3e0] sm:$0xf0] }
  0x1a   :  { %v4040_v36 = vld [vmem:[%s6193_s1 + $0x11c] sm:$0xf0]  ;;  %v4188_v33 = vld [vmem:[%s6193_s1 + $0x5c4] sm:$0xf] }
  0x1b   :  { %v3101_v37 = vld [vmem:[%s6193_s1 + $0x300] sm:$0xf]  ;;  %v2846_v44 = vor.u32 %v4040_v36, %v2845_v35  ;;  %1638 = vmatpush.bf16.msra.mxu3 %v3646_v38  ;;  %v3455_v34 = vld [vmem:[%s6193_s1 + $0x5e0] sm:$0xf0] }
  0x1c   :  { %v4104_v39 = vld [vmem:[%s6193_s1 + $0x31c] sm:$0xf0]  ;;  %v3711_v38 = vld [vmem:[%s6193_s1 + $0x7e0] sm:$0xf0] }
  0x1d   :  { %v3357_v40 = vld [vmem:[%s6193_s1 + $0x500] sm:$0xf]  ;;  %v3102_v45 = vor.u32 %v4104_v39, %v3101_v37  ;;  %1600 = vmatpush.bf16.msra.mxu0 %v2846_v44  ;;  %v4252_v37 = vld [vmem:[%s6193_s1 + $0x7c4] sm:$0xf] }
  0x1e   :  { %v4168_v41 = vld [vmem:[%s6193_s1 + $0x51c] sm:$0xf0]  ;;  %v2911_v44 = vld [vmem:[%s6193_s1 + $0x1a0] sm:$0xf0] }
  0x1f   :  { %v3613_v42 = vld [vmem:[%s6193_s1 + $0x700] sm:$0xf]  ;;  %v3358_v46 = vor.u32 %v4168_v41, %v3357_v40  ;;  %1613 = vmatpush.bf16.msra.mxu1 %v3102_v45  ;;  %v2946_v40 = vor.u32 %v4060_v28, %v2943_v29  ;;  %v3202_v41 = vor.u32 %v4124_v30, %v3199_v32  ;;  %v4116_v45 = vld [vmem:[%s6193_s1 + $0x384] sm:$0xf] }
  0x20   :  { %v4232_v43 = vld [vmem:[%s6193_s1 + $0x71c] sm:$0xf0]  ;;  %v3071_v29 = vld [vmem:[%s6193_s1 + $0x2e0] sm:$0xf0] }
  0x21   :  { %v2813_v47 = vld [vmem:[%s6193_s1 + $0xc0] sm:$0xf]  ;;  %v3614_v50 = vor.u32 %v4232_v43, %v3613_v42  ;;  %1626 = vmatpush.bf16.msra.mxu2 %v3358_v46  ;;  %v3458_v42 = vor.u32 %v4188_v33, %v3455_v34  ;;  %v4052_v43 = vld [vmem:[%s6193_s1 + $0x184] sm:$0xf]  ;;  %v3714_v46 = vor.u32 %v4252_v37, %v3711_v38 }
  0x22   :  { %v4032_v48 = vld [vmem:[%s6193_s1 + $0xdc] sm:$0xf0]  ;;  %v4156_v30 = vld [vmem:[%s6193_s1 + $0x4c4] sm:$0xf] }
  0x23   :  { %v3069_v49 = vld [vmem:[%s6193_s1 + $0x2c0] sm:$0xf]  ;;  %v2814_v56 = vor.u32 %v4032_v48, %v2813_v47  ;;  %1639 = vmatpush.bf16.msra.mxu3 %v3614_v50  ;;  %v3167_v47 = vld [vmem:[%s6193_s1 + $0x3a0] sm:$0xf0] }
  0x24   :  { %v4096_v51 = vld [vmem:[%s6193_s1 + $0x2dc] sm:$0xf0]  ;;  %v4180_v48 = vld [vmem:[%s6193_s1 + $0x584] sm:$0xf] }
  0x25   :  { %v3325_v52 = vld [vmem:[%s6193_s1 + $0x4c0] sm:$0xf]  ;;  %v3070_v57 = vor.u32 %v4096_v51, %v3069_v49  ;;  %1601 = vmatpush.bf16.msra.mxu0 %v2814_v56  ;;  %v3423_v49 = vld [vmem:[%s6193_s1 + $0x5a0] sm:$0xf0] }
  0x26   :  { %v4160_v53 = vld [vmem:[%s6193_s1 + $0x4dc] sm:$0xf0]  ;;  %v4244_v50 = vld [vmem:[%s6193_s1 + $0x784] sm:$0xf] }
  0x27   :  { %v3581_v54 = vld [vmem:[%s6193_s1 + $0x6c0] sm:$0xf]  ;;  %v3326_v58 = vor.u32 %v4160_v53, %v3325_v52  ;;  %1614 = vmatpush.bf16.msra.mxu1 %v3070_v57  ;;  %v3679_v51 = vld [vmem:[%s6193_s1 + $0x7a0] sm:$0xf0]  ;;  %v2914_v52 = vor.u32 %v4052_v43, %v2911_v44 }
  0x28   :  { %v4224_v55 = vld [vmem:[%s6193_s1 + $0x6dc] sm:$0xf0]  ;;  %v4044_v53 = vld [vmem:[%s6193_s1 + $0x144] sm:$0xf] }
  0x29   :  { %v2781_v59 = vld [vmem:[%s6193_s1 + $0x80] sm:$0xf]  ;;  %v3582_v62 = vor.u32 %v4224_v55, %v3581_v54  ;;  %1627 = vmatpush.bf16.msra.mxu2 %v3326_v58  ;;  %v3170_v54 = vor.u32 %v4116_v45, %v3167_v47  ;;  %v3426_v55 = vor.u32 %v4180_v48, %v3423_v49  ;;  %v2879_v56 = vld [vmem:[%s6193_s1 + $0x160] sm:$0xf0] }
  0x2a   :  { %v4024_v60 = vld [vmem:[%s6193_s1 + $0x9c] sm:$0xf0]  ;;  %v4108_v57 = vld [vmem:[%s6193_s1 + $0x344] sm:$0xf] }
  0x2b   :  { %v3037_v61 = vld [vmem:[%s6193_s1 + $0x280] sm:$0xf]  ;;  %v2782_v4 = vor.u32 %v4024_v60, %v2781_v59  ;;  %1640 = vmatpush.bf16.msra.mxu3 %v3582_v62  ;;  %v3135_v58 = vld [vmem:[%s6193_s1 + $0x360] sm:$0xf0]  ;;  %v3682_v59 = vor.u32 %v4244_v50, %v3679_v51 }
  0x2c   :  { %v4088_v63 = vld [vmem:[%s6193_s1 + $0x29c] sm:$0xf0]  ;;  %v4172_v60 = vld [vmem:[%s6193_s1 + $0x544] sm:$0xf] }
  0x2d   :  { %v3293_v0 = vld [vmem:[%s6193_s1 + $0x480] sm:$0xf]  ;;  %v3038_v5 = vor.u32 %v4088_v63, %v3037_v61  ;;  %1602 = vmatpush.bf16.msra.mxu0 %v2782_v4  ;;  %v3391_v61 = vld [vmem:[%s6193_s1 + $0x560] sm:$0xf0] }
  0x2e   :  { %v4152_v1 = vld [vmem:[%s6193_s1 + $0x49c] sm:$0xf0]  ;;  %v4236_v62 = vld [vmem:[%s6193_s1 + $0x744] sm:$0xf]  ;;  %v3394_v4 = vor.u32 %v4172_v60, %v3391_v61 }
  0x2f   :  { %v3549_v2 = vld [vmem:[%s6193_s1 + $0x680] sm:$0xf]  ;;  %v3294_v6 = vor.u32 %v4152_v1, %v3293_v0  ;;  %1615 = vmatpush.bf16.msra.mxu1 %v3038_v5  ;;  %v3647_v63 = vld [vmem:[%s6193_s1 + $0x760] sm:$0xf0]  ;;  %v2882_v0 = vor.u32 %v4044_v53, %v2879_v56  ;;  %v3138_v1 = vor.u32 %v4108_v57, %v3135_v58 }
  0x30   :  { %v4216_v3 = vld [vmem:[%s6193_s1 + $0x69c] sm:$0xf0]  ;;  %v4036_v5 = vld [vmem:[%s6193_s1 + $0x104] sm:$0xf] }
  0x31   :  { %v2749_v7 = vld [vmem:[%s6193_s1 + $0x40] sm:$0xf]  ;;  %v3550_v10 = vor.u32 %v4216_v3, %v3549_v2  ;;  %1628 = vmatpush.bf16.msra.mxu2 %v3294_v6  ;;  %v28_v2 = vld [vmem:[%s6194_s0 + $0x8] sm:$0xff]  ;;  %v2847_v6 = vld [vmem:[%s6193_s1 + $0x120] sm:$0xf0] }
  0x32   :  { %v4016_v8 = vld [vmem:[%s6193_s1 + $0x5c] sm:$0xf0]  ;;  %v4220_v32 = vld [vmem:[%s6193_s1 + $0x6c4] sm:$0xf] }
  0x33   :  { %v3005_v9 = vld [vmem:[%s6193_s1 + $0x240] sm:$0xf]  ;;  %v2750_v16 = vor.u32 %v4016_v8, %v2749_v7  ;;  %1641 = vmatpush.bf16.msra.mxu3 %v3550_v10  ;;  %v4100_v7 = vld [vmem:[%s6193_s1 + $0x304] sm:$0xf]  ;;  %v307_v8 = vunpack.c.l.b16 %v28_v2  ;;  %v308_v10 = vunpack.c.h.b16 %v28_v2 }
  0x34   :  { %v4080_v11 = vld [vmem:[%s6193_s1 + $0x25c] sm:$0xf0]  ;;  %v3583_v33 = vld [vmem:[%s6193_s1 + $0x6e0] sm:$0xf0] }
  0x35   :  { %v3261_v12 = vld [vmem:[%s6193_s1 + $0x440] sm:$0xf]  ;;  %v3006_v19 = vor.u32 %v4080_v11, %v3005_v9  ;;  %1603 = vmatpush.bf16.msra.mxu0 %v2750_v16  ;;  %v3650_v11 = vor.u32 %v4236_v62, %v3647_v63  ;;  %v4228_v16 = vld [vmem:[%s6193_s1 + $0x704] sm:$0xf] }
  0x36   :  { %v4144_v13 = vld [vmem:[%s6193_s1 + $0x45c] sm:$0xf0]  ;;  %v4020_v37 = vld [vmem:[%s6193_s1 + $0x84] sm:$0xf] }
  0x37   :  { %v3517_v14 = vld [vmem:[%s6193_s1 + $0x640] sm:$0xf]  ;;  %v3262_v20 = vor.u32 %v4144_v13, %v3261_v12  ;;  %1616 = vmatpush.bf16.msra.mxu1 %v3006_v19  ;;  %v3103_v12 = vld [vmem:[%s6193_s1 + $0x320] sm:$0xf0] }
  0x38   :  { %v4208_v15 = vld [vmem:[%s6193_s1 + $0x65c] sm:$0xf0]  ;;  %v4164_v13 = vld [vmem:[%s6193_s1 + $0x504] sm:$0xf] }
  0x39   :  { %v2717_v17 = vld [vmem:[%s6193_s1] sm:$0xf]  ;;  %v3518_v24 = vor.u32 %v4208_v15, %v3517_v14  ;;  %1629 = vmatpush.bf16.msra.mxu2 %v3262_v20  ;;  %v3359_v14 = vld [vmem:[%s6193_s1 + $0x520] sm:$0xf0]  ;;  %v4671_v20 = vpack.c.b16 %v308_v10, %v308_v10  ;;  %v4129_v10 = vld [vmem:[%s6193_s1 + $0x3e4] sm:$0xf0] }
  0x3a   :  { %v4008_v18 = vld [vmem:[%s6193_s1 + $0x1c] sm:$0xf0]  ;;  %v2783_v38 = vld [vmem:[%s6193_s1 + $0xa0] sm:$0xf0] }
  0x3b   :  { %v2973_v21 = vld [vmem:[%s6193_s1 + $0x200] sm:$0xf]  ;;  %v2718_v31 = vor.u32 %v4008_v18, %v2717_v17  ;;  %1642 = vmatpush.bf16.msra.mxu3 %v3518_v24  ;;  %v3615_v17 = vld [vmem:[%s6193_s1 + $0x720] sm:$0xf0]  ;;  %v4667_v18 = vpack.c.b16 %v307_v8, %v307_v8  ;;  %v3362_v24 = vor.u32 %v4164_v13, %v3359_v14  ;;  %v3205_v8 = vld [vmem:[%s6193_s1 + $0x3c8] sm:$0xf] }
  0x3c   :  { %v4072_v22 = vld [vmem:[%s6193_s1 + $0x21c] sm:$0xf0]  ;;  %v3618_v28 = vor.u32 %v4228_v16, %v3615_v17  ;;  %v3295_v43 = vld [vmem:[%s6193_s1 + $0x4a0] sm:$0xf0]  ;;  %v4257_v16 = vld [vmem:[%s6193_s1 + $0x7e4] sm:$0xf0] }
  0x3d   :  { %v3229_v23 = vld [vmem:[%s6193_s1 + $0x400] sm:$0xf]  ;;  %v2974_v35 = vor.u32 %v4072_v22, %v2973_v21  ;;  %1604 = vmatpush.bf16.msra.mxu0 %v2718_v31  ;;  %v2850_v21 = vor.u32 %v4036_v5, %v2847_v6  ;;  %v3327_v31 = vld [vmem:[%s6193_s1 + $0x4e0] sm:$0xf0]  ;;  %v2949_v6 = vld [vmem:[%s6193_s1 + $0x1c8] sm:$0xf] }
  0x3e   :  { %v4136_v25 = vld [vmem:[%s6193_s1 + $0x41c] sm:$0xf0]  ;;  %v4212_v44 = vld [vmem:[%s6193_s1 + $0x684] sm:$0xf] }
  0x3f   :  { %v3485_v26 = vld [vmem:[%s6193_s1 + $0x600] sm:$0xf]  ;;  %v3230_v36 = vor.u32 %v4136_v25, %v3229_v23  ;;  %1617 = vmatpush.bf16.msra.mxu1 %v2974_v35  ;;  %v3106_v23 = vor.u32 %v4100_v7, %v3103_v12  ;;  %v4028_v25 = vld [vmem:[%s6193_s1 + $0xc4] sm:$0xf]  ;;  %v4065_v7 = vld [vmem:[%s6193_s1 + $0x1e4] sm:$0xf0] }
  0x40   :  { %v4200_v27 = vld [vmem:[%s6193_s1 + $0x61c] sm:$0xf0]  ;;  %v3551_v45 = vld [vmem:[%s6193_s1 + $0x6a0] sm:$0xf0]  ;;  %v4193_v12 = vld [vmem:[%s6193_s1 + $0x5e4] sm:$0xf0] }
  0x41   :  { %v3486_v39 = vor.u32 %v4200_v27, %v3485_v26  ;;  %1630 = vmatpush.bf16.msra.mxu2 %v3230_v36  ;;  %1649 = vmatpush.bf16.msrb.mxu0 %v2946_v40  ;;  %v27_v3 = vld [vmem:[%s6194_s0] sm:$0xff]  ;;  %v3330_v36 = vor.u32 %v4156_v30, %v3327_v31  ;;  %v3586_v40 = vor.u32 %v4220_v32, %v3583_v33  ;;  %v3429_v30 = vld [vmem:[%s6193_s1 + $0x588] sm:$0xf] }
  0x42   :  { %v305_v9 = vunpack.c.l.b16 %v27_v3  ;;  %v306_v15 = vunpack.c.h.b16 %v27_v3  ;;  %v2815_v26 = vld [vmem:[%s6193_s1 + $0xe0] sm:$0xf0]  ;;  %v4185_v31 = vld [vmem:[%s6193_s1 + $0x5a4] sm:$0xf0] }
  0x43   :  { %1643 = vmatpush.bf16.msra.mxu3 %v3486_v39  ;;  %1662 = vmatpush.bf16.msrb.mxu1 %v3202_v41  ;;  %v4092_v27 = vld [vmem:[%s6193_s1 + $0x2c4] sm:$0xf]  ;;  %v2818_v34 = vor.u32 %v4028_v25, %v2815_v26  ;;  %v2917_v25 = vld [vmem:[%s6193_s1 + $0x188] sm:$0xf] }
  0x44   :  { %v4669_v19 = vpack.c.b16 %v305_v9, %v305_v9  ;;  %v4673_v22 = vpack.c.b16 %v306_v15, %v306_v15  ;;  %1631 = vmatmul.bf16.vlgmr.msra.gmra.mxu2 %v4667_v18  ;;  %v3074_v35 = vor.u32 %v4092_v27, %v3071_v29  ;;  %v4084_v39 = vld [vmem:[%s6193_s1 + $0x284] sm:$0xf]  ;;  %v3717_v15 = vld [vmem:[%s6193_s1 + $0x7c8] sm:$0xf] }
  0x45   :  { %1675 = vmatpush.bf16.msrb.mxu2 %v3458_v42  ;;  %1650 = vmatpush.bf16.msrb.mxu0 %v2914_v52  ;;  %v3039_v41 = vld [vmem:[%s6193_s1 + $0x2a0] sm:$0xf0]  ;;  %v3554_v52 = vor.u32 %v4212_v44, %v3551_v45  ;;  %v4057_v26 = vld [vmem:[%s6193_s1 + $0x1a4] sm:$0xf0] }
  0x46   :  { %1605 = vmatmul.bf16.vlgmr.msra.gmra.mxu0 %v4669_v19  ;;  %1644 = vmatmul.bf16.vlgmr.msra.gmra.mxu3 %v4671_v20  ;;  %v4148_v42 = vld [vmem:[%s6193_s1 + $0x484] sm:$0xf]  ;;  %v3042_v47 = vor.u32 %v4084_v39, %v3039_v41  ;;  %v3173_v27 = vld [vmem:[%s6193_s1 + $0x388] sm:$0xf] }
  0x47   :  { %1688 = vmatpush.bf16.msrb.mxu3 %v3714_v46  ;;  %1663 = vmatpush.bf16.msrb.mxu1 %v3170_v54  ;;  %v2786_v46 = vor.u32 %v4020_v37, %v2783_v38  ;;  %v3298_v48 = vor.u32 %v4148_v42, %v3295_v43  ;;  %v4012_v49 = vld [vmem:[%s6193_s1 + $0x44] sm:$0xf]  ;;  %v4121_v29 = vld [vmem:[%s6193_s1 + $0x3a4] sm:$0xf0] }
  0x48   :  { %1618 = vmatmul.bf16.vlgmr.msra.gmra.mxu1 %v4673_v22  ;;  %v2751_v50 = vld [vmem:[%s6193_s1 + $0x60] sm:$0xf0]  ;;  %v3685_v32 = vld [vmem:[%s6193_s1 + $0x788] sm:$0xf] }
  0x49   :  { %1676 = vmatpush.bf16.msrb.mxu2 %v3426_v55  ;;  %1651 = vmatpush.bf16.msrb.mxu0 %v2882_v0  ;;  %v4076_v51 = vld [vmem:[%s6193_s1 + $0x244] sm:$0xf]  ;;  %v2754_v58 = vor.u32 %v4012_v49, %v2751_v50  ;;  %v4249_v33 = vld [vmem:[%s6193_s1 + $0x7a4] sm:$0xf0] }
  0x4a   :  { %v3007_v53 = vld [vmem:[%s6193_s1 + $0x260] sm:$0xf0]  ;;  %v2885_v37 = vld [vmem:[%s6193_s1 + $0x148] sm:$0xf] }
  0x4b   :  { %1689 = vmatpush.bf16.msrb.mxu3 %v3682_v59  ;;  %1664 = vmatpush.bf16.msrb.mxu1 %v3138_v1  ;;  %v4140_v54 = vld [vmem:[%s6193_s1 + $0x444] sm:$0xf]  ;;  %v3010_v61 = vor.u32 %v4076_v51, %v3007_v53  ;;  %v4049_v38 = vld [vmem:[%s6193_s1 + $0x164] sm:$0xf0] }
  0x4c   :  { %v3263_v55 = vld [vmem:[%s6193_s1 + $0x460] sm:$0xf0]  ;;  %v3141_v39 = vld [vmem:[%s6193_s1 + $0x348] sm:$0xf] }
  0x4d   :  { %1677 = vmatpush.bf16.msrb.mxu2 %v3394_v4  ;;  %1652 = vmatpush.bf16.msrb.mxu0 %v2850_v21  ;;  %v4204_v56 = vld [vmem:[%s6193_s1 + $0x644] sm:$0xf]  ;;  %v3266_v62 = vor.u32 %v4140_v54, %v3263_v55  ;;  %v2950_v21 = vor.u32 %v4065_v7, %v2949_v6  ;;  %v4113_v41 = vld [vmem:[%s6193_s1 + $0x364] sm:$0xf0] }
  0x4e   :  { %v3519_v57 = vld [vmem:[%s6193_s1 + $0x660] sm:$0xf0]  ;;  %v3397_v42 = vld [vmem:[%s6193_s1 + $0x548] sm:$0xf] }
  0x4f   :  { %1690 = vmatpush.bf16.msrb.mxu3 %v3650_v11  ;;  %1665 = vmatpush.bf16.msrb.mxu1 %v3106_v23  ;;  %v4004_v59 = vld [vmem:[%s6193_s1 + $0x4] sm:$0xf]  ;;  %v3522_v2 = vor.u32 %v4204_v56, %v3519_v57  ;;  %v3461_v11 = vld [vmem:[%s6193_s1 + $0x5c8] sm:$0xf]  ;;  %v3206_v23 = vor.u32 %v4129_v10, %v3205_v8 }
  0x50   :  { %v2719_v60 = vld [vmem:[%s6193_s1 + $0x20] sm:$0xf0]  ;;  %v4177_v43 = vld [vmem:[%s6193_s1 + $0x564] sm:$0xf0] }
  0x51   :  { %1678 = vmatpush.bf16.msrb.mxu2 %v3362_v24  ;;  %1653 = vmatpush.bf16.msrb.mxu0 %v2818_v34  ;;  %v4068_v63 = vld [vmem:[%s6193_s1 + $0x204] sm:$0xf]  ;;  %v2722_v9 = vor.u32 %v4004_v59, %v2719_v60  ;;  %v3462_v24 = vor.u32 %v4193_v12, %v3461_v11  ;;  %v2918_v34 = vor.u32 %v4057_v26, %v2917_v25  ;;  %v3653_v44 = vld [vmem:[%s6193_s1 + $0x748] sm:$0xf] }
  0x52   :  { %v2975_v0 = vld [vmem:[%s6193_s1 + $0x220] sm:$0xf0]  ;;  %v4241_v45 = vld [vmem:[%s6193_s1 + $0x764] sm:$0xf0] }
  0x53   :  { %1691 = vmatpush.bf16.msrb.mxu3 %v3618_v28  ;;  %1666 = vmatpush.bf16.msrb.mxu1 %v3074_v35  ;;  %v4132_v1 = vld [vmem:[%s6193_s1 + $0x404] sm:$0xf]  ;;  %v2978_v13 = vor.u32 %v4068_v63, %v2975_v0  ;;  %v3718_v28 = vor.u32 %v4257_v16, %v3717_v15  ;;  %v3174_v35 = vor.u32 %v4121_v29, %v3173_v27  ;;  %v2853_v49 = vld [vmem:[%s6193_s1 + $0x108] sm:$0xf] }
  0x54   :  { %v3231_v3 = vld [vmem:[%s6193_s1 + $0x420] sm:$0xf0]  ;;  %v4041_v50 = vld [vmem:[%s6193_s1 + $0x124] sm:$0xf0] }
  0x55   :  { %1679 = vmatpush.bf16.msrb.mxu2 %v3330_v36  ;;  %1654 = vmatpush.bf16.msrb.mxu0 %v2786_v46  ;;  %v4196_v4 = vld [vmem:[%s6193_s1 + $0x604] sm:$0xf]  ;;  %v3234_v14 = vor.u32 %v4132_v1, %v3231_v3  ;;  %v3430_v36 = vor.u32 %v4185_v31, %v3429_v30  ;;  %v2886_v46 = vor.u32 %v4049_v38, %v2885_v37  ;;  %v3109_v51 = vld [vmem:[%s6193_s1 + $0x308] sm:$0xf] }
  0x56   :  { %v3487_v5 = vld [vmem:[%s6193_s1 + $0x620] sm:$0xf0]  ;;  %v4105_v53 = vld [vmem:[%s6193_s1 + $0x324] sm:$0xf0] }
  0x57   :  { %1692 = vmatpush.bf16.msrb.mxu3 %v3586_v40  ;;  %1667 = vmatpush.bf16.msrb.mxu1 %v3042_v47  ;;  %v3490_v17 = vor.u32 %v4196_v4, %v3487_v5  ;;  %v3686_v40 = vor.u32 %v4249_v33, %v3685_v32  ;;  %v3142_v47 = vor.u32 %v4113_v41, %v3141_v39  ;;  %v3365_v54 = vld [vmem:[%s6193_s1 + $0x508] sm:$0xf] }
  0x58   :  { %v4169_v55 = vld [vmem:[%s6193_s1 + $0x524] sm:$0xf0]  ;;  %v3110_v59 = vor.u32 %v4105_v53, %v3109_v51  ;;  %v4189_v51 = vld [vmem:[%s6193_s1 + $0x5cc] sm:$0xf] }
  0x59   :  { %1680 = vmatpush.bf16.msrb.mxu2 %v3298_v48  ;;  %1655 = vmatpush.bf16.msrb.mxu0 %v2754_v58  ;;  %v3398_v48 = vor.u32 %v4177_v43, %v3397_v42  ;;  %v3621_v56 = vld [vmem:[%s6193_s1 + $0x708] sm:$0xf]  ;;  %v2854_v58 = vor.u32 %v4041_v50, %v2853_v49  ;;  %v3366_v60 = vor.u32 %v4169_v55, %v3365_v54  ;;  %v3207_v50 = vld [vmem:[%s6193_s1 + $0x3e8] sm:$0xf0] }
  0x5a   :  { %v4233_v57 = vld [vmem:[%s6193_s1 + $0x724] sm:$0xf0]  ;;  %v4253_v55 = vld [vmem:[%s6193_s1 + $0x7cc] sm:$0xf] }
  0x5b   :  { %1693 = vmatpush.bf16.msrb.mxu3 %v3554_v52  ;;  %1668 = vmatpush.bf16.msrb.mxu1 %v3010_v61  ;;  %v3654_v52 = vor.u32 %v4241_v45, %v3653_v44  ;;  %v2821_v61 = vld [vmem:[%s6193_s1 + $0xc8] sm:$0xf]  ;;  %v3622_v0 = vor.u32 %v4233_v57, %v3621_v56  ;;  %v3719_v56 = vld [vmem:[%s6193_s1 + $0x7e8] sm:$0xf0] }
  0x5c   :  { %v3077_v63 = vld [vmem:[%s6193_s1 + $0x2c8] sm:$0xf] }
  0x5d   :  { %1681 = vmatpush.bf16.msrb.mxu2 %v3266_v62  ;;  %1656 = vmatpush.bf16.msrb.mxu0 %v2722_v9  ;;  %v4033_v62 = vld [vmem:[%s6193_s1 + $0xe4] sm:$0xf0] }
  0x5e   :  { %v4097_v1 = vld [vmem:[%s6193_s1 + $0x2e4] sm:$0xf0]  ;;  %v2822_v6 = vor.u32 %v4033_v62, %v2821_v61  ;;  %v4053_v61 = vld [vmem:[%s6193_s1 + $0x18c] sm:$0xf] }
  0x5f   :  { %1694 = vmatpush.bf16.msrb.mxu3 %v3522_v2  ;;  %1669 = vmatpush.bf16.msrb.mxu1 %v2978_v13  ;;  %v3333_v2 = vld [vmem:[%s6193_s1 + $0x4c8] sm:$0xf]  ;;  %v3078_v7 = vor.u32 %v4097_v1, %v3077_v63  ;;  %v2919_v62 = vld [vmem:[%s6193_s1 + $0x1a8] sm:$0xf0] }
  0x60   :  { %1657 = vmatmul.bf16.vlgmr.msrb.gmra.mxu0 %v4669_v19  ;;  %v4161_v3 = vld [vmem:[%s6193_s1 + $0x4e4] sm:$0xf0]  ;;  %v4117_v63 = vld [vmem:[%s6193_s1 + $0x38c] sm:$0xf] }
  0x61   :  { %1682 = vmatpush.bf16.msrb.mxu2 %v3234_v14  ;;  %1701 = vmatpush.bf16.msra.mxu0 %v2950_v21  ;;  %v3589_v4 = vld [vmem:[%s6193_s1 + $0x6c8] sm:$0xf]  ;;  %v3334_v8 = vor.u32 %v4161_v3, %v3333_v2  ;;  %v3175_v1 = vld [vmem:[%s6193_s1 + $0x3a8] sm:$0xf0] }
  0x62   :  { %1670 = vmatmul.bf16.vlgmr.msrb.gmra.mxu1 %v4673_v22  ;;  %v4225_v5 = vld [vmem:[%s6193_s1 + $0x6e4] sm:$0xf0]  ;;  %v4181_v2 = vld [vmem:[%s6193_s1 + $0x58c] sm:$0xf] }
  0x63   :  { %1695 = vmatpush.bf16.msrb.mxu3 %v3490_v17  ;;  %1714 = vmatpush.bf16.msra.mxu1 %v3206_v23  ;;  %v2789_v9 = vld [vmem:[%s6193_s1 + $0x88] sm:$0xf]  ;;  %v3590_v12 = vor.u32 %v4225_v5, %v3589_v4  ;;  %v3431_v3 = vld [vmem:[%s6193_s1 + $0x5a8] sm:$0xf0] }
  0x64   :  { %1683 = vmatmul.bf16.vlgmr.msrb.gmra.mxu2 %v4667_v18  ;;  %v4025_v10 = vld [vmem:[%s6193_s1 + $0xa4] sm:$0xf0]  ;;  %v4245_v4 = vld [vmem:[%s6193_s1 + $0x78c] sm:$0xf] }
  0x65   :  { %1727 = vmatpush.bf16.msra.mxu2 %v3462_v24  ;;  %1702 = vmatpush.bf16.msra.mxu0 %v2918_v34  ;;  %v3045_v11 = vld [vmem:[%s6193_s1 + $0x288] sm:$0xf]  ;;  %v2790_v21 = vor.u32 %v4025_v10, %v2789_v9  ;;  %v3687_v5 = vld [vmem:[%s6193_s1 + $0x7a8] sm:$0xf0] }
  0x66   :  { %1696 = vmatmul.bf16.vlgmr.msrb.gmra.mxu3 %v4671_v20  ;;  %v4089_v13 = vld [vmem:[%s6193_s1 + $0x2a4] sm:$0xf0]  ;;  %v4045_v9 = vld [vmem:[%s6193_s1 + $0x14c] sm:$0xf] }
  0x67   :  { %1740 = vmatpush.bf16.msra.mxu3 %v3718_v28  ;;  %1715 = vmatpush.bf16.msra.mxu1 %v3174_v35  ;;  %v3301_v14 = vld [vmem:[%s6193_s1 + $0x488] sm:$0xf]  ;;  %v3046_v23 = vor.u32 %v4089_v13, %v3045_v11  ;;  %v2887_v10 = vld [vmem:[%s6193_s1 + $0x168] sm:$0xf0] }
  0x68   :  { %v4153_v15 = vld [vmem:[%s6193_s1 + $0x4a4] sm:$0xf0]  ;;  %v4109_v11 = vld [vmem:[%s6193_s1 + $0x34c] sm:$0xf] }
  0x69   :  { %1728 = vmatpush.bf16.msra.mxu2 %v3430_v36  ;;  %1703 = vmatpush.bf16.msra.mxu0 %v2886_v46  ;;  %v3557_v16 = vld [vmem:[%s6193_s1 + $0x688] sm:$0xf]  ;;  %v3302_v24 = vor.u32 %v4153_v15, %v3301_v14  ;;  %v4061_v46 = vld [vmem:[%s6193_s1 + $0x1cc] sm:$0xf] }
  0x6a   :  { %v4217_v17 = vld [vmem:[%s6193_s1 + $0x6a4] sm:$0xf0]  ;;  %v3143_v13 = vld [vmem:[%s6193_s1 + $0x368] sm:$0xf0] }
  0x6b   :  { %1741 = vmatpush.bf16.msra.mxu3 %v3686_v40  ;;  %1716 = vmatpush.bf16.msra.mxu1 %v3142_v47  ;;  %v2757_v25 = vld [vmem:[%s6193_s1 + $0x48] sm:$0xf]  ;;  %v3558_v28 = vor.u32 %v4217_v17, %v3557_v16  ;;  %v2951_v47 = vld [vmem:[%s6193_s1 + $0x1e8] sm:$0xf0] }
  0x6c   :  { %v4017_v26 = vld [vmem:[%s6193_s1 + $0x64] sm:$0xf0]  ;;  %v4173_v14 = vld [vmem:[%s6193_s1 + $0x54c] sm:$0xf] }
  0x6d   :  { %1729 = vmatpush.bf16.msra.mxu2 %v3398_v48  ;;  %1704 = vmatpush.bf16.msra.mxu0 %v2854_v58  ;;  %v3013_v27 = vld [vmem:[%s6193_s1 + $0x248] sm:$0xf]  ;;  %v2758_v34 = vor.u32 %v4017_v26, %v2757_v25  ;;  %v4125_v48 = vld [vmem:[%s6193_s1 + $0x3cc] sm:$0xf]  ;;  %v2954_v58 = vor.u32 %v4061_v46, %v2951_v47 }
  0x6e   :  { %v4081_v29 = vld [vmem:[%s6193_s1 + $0x264] sm:$0xf0]  ;;  %v3399_v15 = vld [vmem:[%s6193_s1 + $0x568] sm:$0xf0] }
  0x6f   :  { %1742 = vmatpush.bf16.msra.mxu3 %v3654_v52  ;;  %1717 = vmatpush.bf16.msra.mxu1 %v3110_v59  ;;  %v3269_v30 = vld [vmem:[%s6193_s1 + $0x448] sm:$0xf]  ;;  %v3014_v37 = vor.u32 %v4081_v29, %v3013_v27  ;;  %v3463_v52 = vld [vmem:[%s6193_s1 + $0x5e8] sm:$0xf0]  ;;  %v3210_v59 = vor.u32 %v4125_v48, %v3207_v50 }
  0x70   :  { %v4145_v31 = vld [vmem:[%s6193_s1 + $0x464] sm:$0xf0]  ;;  %v4237_v16 = vld [vmem:[%s6193_s1 + $0x74c] sm:$0xf] }
  0x71   :  { %1730 = vmatpush.bf16.msra.mxu2 %v3366_v60  ;;  %1705 = vmatpush.bf16.msra.mxu0 %v2822_v6  ;;  %v3525_v32 = vld [vmem:[%s6193_s1 + $0x648] sm:$0xf]  ;;  %v3270_v38 = vor.u32 %v4145_v31, %v3269_v30  ;;  %v3466_v60 = vor.u32 %v4189_v51, %v3463_v52  ;;  %v2922_v6 = vor.u32 %v4053_v61, %v2919_v62  ;;  %v3655_v17 = vld [vmem:[%s6193_s1 + $0x768] sm:$0xf0] }
  0x72   :  { %v4209_v33 = vld [vmem:[%s6193_s1 + $0x664] sm:$0xf0]  ;;  %v4037_v25 = vld [vmem:[%s6193_s1 + $0x10c] sm:$0xf] }
  0x73   :  { %1743 = vmatpush.bf16.msra.mxu3 %v3622_v0  ;;  %1718 = vmatpush.bf16.msra.mxu1 %v3078_v7  ;;  %v2725_v35 = vld [vmem:[%s6193_s1 + $0x8] sm:$0xf]  ;;  %v3526_v42 = vor.u32 %v4209_v33, %v3525_v32  ;;  %v3722_v0 = vor.u32 %v4253_v55, %v3719_v56  ;;  %v3178_v7 = vor.u32 %v4117_v63, %v3175_v1  ;;  %v2855_v26 = vld [vmem:[%s6193_s1 + $0x128] sm:$0xf0] }
  0x74   :  { %v4009_v36 = vld [vmem:[%s6193_s1 + $0x24] sm:$0xf0]  ;;  %v4101_v27 = vld [vmem:[%s6193_s1 + $0x30c] sm:$0xf] }
  0x75   :  { %1731 = vmatpush.bf16.msra.mxu2 %v3334_v8  ;;  %1706 = vmatpush.bf16.msra.mxu0 %v2790_v21  ;;  %v2981_v39 = vld [vmem:[%s6193_s1 + $0x208] sm:$0xf]  ;;  %v2726_v49 = vor.u32 %v4009_v36, %v2725_v35  ;;  %v3434_v8 = vor.u32 %v4181_v2, %v3431_v3  ;;  %v2890_v21 = vor.u32 %v4045_v9, %v2887_v10  ;;  %v3111_v29 = vld [vmem:[%s6193_s1 + $0x328] sm:$0xf0] }
  0x76   :  { %v4073_v40 = vld [vmem:[%s6193_s1 + $0x224] sm:$0xf0]  ;;  %v4165_v30 = vld [vmem:[%s6193_s1 + $0x50c] sm:$0xf]  ;;  %v3114_v35 = vor.u32 %v4101_v27, %v3111_v29  ;;  %v3469_v27 = vld [vmem:[%s6193_s1 + $0x5d0] sm:$0xf] }
  0x77   :  { %1744 = vmatpush.bf16.msra.mxu3 %v3590_v12  ;;  %1719 = vmatpush.bf16.msra.mxu1 %v3046_v23  ;;  %v3237_v41 = vld [vmem:[%s6193_s1 + $0x408] sm:$0xf]  ;;  %v2982_v53 = vor.u32 %v4073_v40, %v2981_v39  ;;  %v3690_v12 = vor.u32 %v4245_v4, %v3687_v5  ;;  %v3146_v23 = vor.u32 %v4109_v11, %v3143_v13  ;;  %v3367_v31 = vld [vmem:[%s6193_s1 + $0x528] sm:$0xf0] }
  0x78   :  { %v4137_v43 = vld [vmem:[%s6193_s1 + $0x424] sm:$0xf0]  ;;  %v4229_v32 = vld [vmem:[%s6193_s1 + $0x70c] sm:$0xf]  ;;  %v3370_v36 = vor.u32 %v4165_v30, %v3367_v31  ;;  %v3725_v31 = vld [vmem:[%s6193_s1 + $0x7d0] sm:$0xf] }
  0x79   :  { %1732 = vmatpush.bf16.msra.mxu2 %v3302_v24  ;;  %v3493_v44 = vld [vmem:[%s6193_s1 + $0x608] sm:$0xf]  ;;  %1707 = vmatpush.bf16.msra.mxu0 %v2758_v34  ;;  %v3238_v54 = vor.u32 %v4137_v43, %v3237_v41  ;;  %v3402_v24 = vor.u32 %v4173_v14, %v3399_v15  ;;  %v3623_v33 = vld [vmem:[%s6193_s1 + $0x728] sm:$0xf0]  ;;  %v2858_v34 = vor.u32 %v4037_v25, %v2855_v26  ;;  %v4130_v26 = vld [vmem:[%s6193_s1 + $0x3ec] sm:$0xf0] }
  0x7a   :  { %v4201_v45 = vld [vmem:[%s6193_s1 + $0x624] sm:$0xf0]  ;;  %v4093_v39 = vld [vmem:[%s6193_s1 + $0x2cc] sm:$0xf]  ;;  %v3626_v40 = vor.u32 %v4229_v32, %v3623_v33  ;;  %v4258_v32 = vld [vmem:[%s6193_s1 + $0x7ec] sm:$0xf0] }
  0x7b   :  { %1745 = vmatpush.bf16.msra.mxu3 %v3558_v28  ;;  %1720 = vmatpush.bf16.msra.mxu1 %v3014_v37  ;;  %v3494_v57 = vor.u32 %v4201_v45, %v3493_v44  ;;  %v3658_v28 = vor.u32 %v4237_v16, %v3655_v17  ;;  %v4029_v37 = vld [vmem:[%s6193_s1 + $0xcc] sm:$0xf] }
  0x7c   :  { %v3079_v41 = vld [vmem:[%s6193_s1 + $0x2e8] sm:$0xf0] }
  0x7d   :  { %1733 = vmatpush.bf16.msra.mxu2 %v3270_v38  ;;  %1708 = vmatpush.bf16.msra.mxu0 %v2726_v49  ;;  %v2823_v38 = vld [vmem:[%s6193_s1 + $0xe8] sm:$0xf0]  ;;  %v3082_v47 = vor.u32 %v4093_v39, %v3079_v41  ;;  %v3181_v39 = vld [vmem:[%s6193_s1 + $0x390] sm:$0xf] }
  0x7e   :  { %v3335_v43 = vld [vmem:[%s6193_s1 + $0x4e8] sm:$0xf0]  ;;  %v2826_v46 = vor.u32 %v4029_v37, %v2823_v38  ;;  %v2925_v37 = vld [vmem:[%s6193_s1 + $0x190] sm:$0xf] }
  0x7f   :  { %1746 = vmatpush.bf16.msra.mxu3 %v3526_v42  ;;  %1721 = vmatpush.bf16.msra.mxu1 %v2982_v53  ;;  %v4157_v42 = vld [vmem:[%s6193_s1 + $0x4cc] sm:$0xf]  ;;  %v4058_v38 = vld [vmem:[%s6193_s1 + $0x1ac] sm:$0xf0] }
  0x80   :  { %1709 = vmatmul.bf16.vlgmr.msra.gmra.mxu0 %v4669_v19  ;;  %v4221_v44 = vld [vmem:[%s6193_s1 + $0x6cc] sm:$0xf]  ;;  %v3338_v48 = vor.u32 %v4157_v42, %v3335_v43  ;;  %v4122_v41 = vld [vmem:[%s6193_s1 + $0x3ac] sm:$0xf0] }
  0x81   :  { %1734 = vmatpush.bf16.msra.mxu2 %v3238_v54  ;;  %1753 = vmatpush.bf16.msrb.mxu0 %v2954_v58  ;;  %v3591_v45 = vld [vmem:[%s6193_s1 + $0x6e8] sm:$0xf0]  ;;  %v3437_v42 = vld [vmem:[%s6193_s1 + $0x590] sm:$0xf] }
  0x82   :  { %1722 = vmatmul.bf16.vlgmr.msra.gmra.mxu1 %v4673_v22  ;;  %v4021_v49 = vld [vmem:[%s6193_s1 + $0x8c] sm:$0xf]  ;;  %v3594_v52 = vor.u32 %v4221_v44, %v3591_v45  ;;  %v4186_v43 = vld [vmem:[%s6193_s1 + $0x5ac] sm:$0xf0] }
  0x83   :  { %1747 = vmatpush.bf16.msra.mxu3 %v3494_v57  ;;  %1766 = vmatpush.bf16.msrb.mxu1 %v3210_v59  ;;  %v2791_v50 = vld [vmem:[%s6193_s1 + $0xa8] sm:$0xf0]  ;;  %v3693_v44 = vld [vmem:[%s6193_s1 + $0x790] sm:$0xf] }
  0x84   :  { %1735 = vmatmul.bf16.vlgmr.msra.gmra.mxu2 %v4667_v18  ;;  %v4085_v51 = vld [vmem:[%s6193_s1 + $0x28c] sm:$0xf]  ;;  %v2794_v58 = vor.u32 %v4021_v49, %v2791_v50  ;;  %v4250_v45 = vld [vmem:[%s6193_s1 + $0x7ac] sm:$0xf0] }
  0x85   :  { %1779 = vmatpush.bf16.msrb.mxu2 %v3466_v60  ;;  %1754 = vmatpush.bf16.msrb.mxu0 %v2922_v6  ;;  %v3047_v53 = vld [vmem:[%s6193_s1 + $0x2a8] sm:$0xf0]  ;;  %v2893_v49 = vld [vmem:[%s6193_s1 + $0x150] sm:$0xf] }
  0x86   :  { %1748 = vmatmul.bf16.vlgmr.msra.gmra.mxu3 %v4671_v20  ;;  %v4149_v54 = vld [vmem:[%s6193_s1 + $0x48c] sm:$0xf]  ;;  %v3050_v59 = vor.u32 %v4085_v51, %v3047_v53  ;;  %v4050_v50 = vld [vmem:[%s6193_s1 + $0x16c] sm:$0xf0] }
  0x87   :  { %1792 = vmatpush.bf16.msrb.mxu3 %v3722_v0  ;;  %1767 = vmatpush.bf16.msrb.mxu1 %v3178_v7  ;;  %v3303_v55 = vld [vmem:[%s6193_s1 + $0x4a8] sm:$0xf0]  ;;  %v3149_v51 = vld [vmem:[%s6193_s1 + $0x350] sm:$0xf] }
  0x88   :  { %v4213_v56 = vld [vmem:[%s6193_s1 + $0x68c] sm:$0xf]  ;;  %v3306_v60 = vor.u32 %v4149_v54, %v3303_v55  ;;  %v4114_v53 = vld [vmem:[%s6193_s1 + $0x36c] sm:$0xf0] }
  0x89   :  { %1780 = vmatpush.bf16.msrb.mxu2 %v3434_v8  ;;  %1755 = vmatpush.bf16.msrb.mxu0 %v2890_v21  ;;  %v3559_v57 = vld [vmem:[%s6193_s1 + $0x6a8] sm:$0xf0]  ;;  %v2957_v21 = vld [vmem:[%s6193_s1 + $0x1d0] sm:$0xf] }
  0x8a   :  { %v4013_v61 = vld [vmem:[%s6193_s1 + $0x4c] sm:$0xf]  ;;  %v3562_v0 = vor.u32 %v4213_v56, %v3559_v57  ;;  %v3405_v54 = vld [vmem:[%s6193_s1 + $0x550] sm:$0xf] }
  0x8b   :  { %1793 = vmatpush.bf16.msrb.mxu3 %v3690_v12  ;;  %1768 = vmatpush.bf16.msrb.mxu1 %v3146_v23  ;;  %v2759_v62 = vld [vmem:[%s6193_s1 + $0x68] sm:$0xf0]  ;;  %v4066_v23 = vld [vmem:[%s6193_s1 + $0x1ec] sm:$0xf0] }
  0x8c   :  { %v4077_v63 = vld [vmem:[%s6193_s1 + $0x24c] sm:$0xf]  ;;  %v2762_v6 = vor.u32 %v4013_v61, %v2759_v62  ;;  %v4178_v55 = vld [vmem:[%s6193_s1 + $0x56c] sm:$0xf0] }
  0x8d   :  { %1781 = vmatpush.bf16.msrb.mxu2 %v3402_v24  ;;  %1756 = vmatpush.bf16.msrb.mxu0 %v2858_v34  ;;  %v3015_v1 = vld [vmem:[%s6193_s1 + $0x268] sm:$0xf0]  ;;  %v3213_v24 = vld [vmem:[%s6193_s1 + $0x3d0] sm:$0xf]  ;;  %v2958_v34 = vor.u32 %v4066_v23, %v2957_v21 }
  0x8e   :  { %v4141_v2 = vld [vmem:[%s6193_s1 + $0x44c] sm:$0xf]  ;;  %v3018_v9 = vor.u32 %v4077_v63, %v3015_v1  ;;  %v3661_v56 = vld [vmem:[%s6193_s1 + $0x750] sm:$0xf] }
  0x8f   :  { %1794 = vmatpush.bf16.msrb.mxu3 %v3658_v28  ;;  %1769 = vmatpush.bf16.msrb.mxu1 %v3114_v35  ;;  %v3271_v3 = vld [vmem:[%s6193_s1 + $0x468] sm:$0xf0]  ;;  %v4194_v28 = vld [vmem:[%s6193_s1 + $0x5ec] sm:$0xf0]  ;;  %v3214_v35 = vor.u32 %v4130_v26, %v3213_v24 }
  0x90   :  { %v4205_v4 = vld [vmem:[%s6193_s1 + $0x64c] sm:$0xf]  ;;  %v3274_v10 = vor.u32 %v4141_v2, %v3271_v3  ;;  %v4242_v57 = vld [vmem:[%s6193_s1 + $0x76c] sm:$0xf0] }
  0x91   :  { %1782 = vmatpush.bf16.msrb.mxu2 %v3370_v36  ;;  %1757 = vmatpush.bf16.msrb.mxu0 %v2826_v46  ;;  %v3527_v5 = vld [vmem:[%s6193_s1 + $0x668] sm:$0xf0]  ;;  %v3470_v36 = vor.u32 %v4194_v28, %v3469_v27  ;;  %v2926_v46 = vor.u32 %v4058_v38, %v2925_v37  ;;  %v2861_v61 = vld [vmem:[%s6193_s1 + $0x110] sm:$0xf] }
  0x92   :  { %v4005_v7 = vld [vmem:[%s6193_s1 + $0xc] sm:$0xf]  ;;  %v3530_v14 = vor.u32 %v4205_v4, %v3527_v5  ;;  %v4042_v62 = vld [vmem:[%s6193_s1 + $0x12c] sm:$0xf0] }
  0x93   :  { %1795 = vmatpush.bf16.msrb.mxu3 %v3626_v40  ;;  %1770 = vmatpush.bf16.msrb.mxu1 %v3082_v47  ;;  %v2727_v8 = vld [vmem:[%s6193_s1 + $0x28] sm:$0xf0]  ;;  %v3726_v40 = vor.u32 %v4258_v32, %v3725_v31  ;;  %v3182_v47 = vor.u32 %v4122_v41, %v3181_v39  ;;  %v3117_v63 = vld [vmem:[%s6193_s1 + $0x310] sm:$0xf] }
  0x94   :  { %v4069_v11 = vld [vmem:[%s6193_s1 + $0x20c] sm:$0xf]  ;;  %v2730_v25 = vor.u32 %v4005_v7, %v2727_v8  ;;  %v4106_v1 = vld [vmem:[%s6193_s1 + $0x32c] sm:$0xf0] }
  0x95   :  { %1783 = vmatpush.bf16.msrb.mxu2 %v3338_v48  ;;  %1758 = vmatpush.bf16.msrb.mxu0 %v2794_v58  ;;  %v2983_v12 = vld [vmem:[%s6193_s1 + $0x228] sm:$0xf0]  ;;  %v3438_v48 = vor.u32 %v4186_v43, %v3437_v42  ;;  %v2894_v58 = vor.u32 %v4050_v50, %v2893_v49  ;;  %v3373_v2 = vld [vmem:[%s6193_s1 + $0x510] sm:$0xf]  ;;  %v3118_v7 = vor.u32 %v4106_v1, %v3117_v63  ;;  %v4190_v63 = vld [vmem:[%s6193_s1 + $0x5d4] sm:$0xf] }
  0x96   :  { %v4133_v13 = vld [vmem:[%s6193_s1 + $0x40c] sm:$0xf]  ;;  %v2986_v29 = vor.u32 %v4069_v11, %v2983_v12  ;;  %v4170_v3 = vld [vmem:[%s6193_s1 + $0x52c] sm:$0xf0] }
  0x97   :  { %1796 = vmatpush.bf16.msrb.mxu3 %v3594_v52  ;;  %1771 = vmatpush.bf16.msrb.mxu1 %v3050_v59  ;;  %v3239_v15 = vld [vmem:[%s6193_s1 + $0x428] sm:$0xf0]  ;;  %v3694_v52 = vor.u32 %v4250_v45, %v3693_v44  ;;  %v3150_v59 = vor.u32 %v4114_v53, %v3149_v51  ;;  %v3629_v4 = vld [vmem:[%s6193_s1 + $0x710] sm:$0xf]  ;;  %v3374_v8 = vor.u32 %v4170_v3, %v3373_v2  ;;  %v4254_v3 = vld [vmem:[%s6193_s1 + $0x7d4] sm:$0xf] }
  0x98   :  { %v4197_v16 = vld [vmem:[%s6193_s1 + $0x60c] sm:$0xf]  ;;  %v3242_v30 = vor.u32 %v4133_v13, %v3239_v15  ;;  %v4234_v5 = vld [vmem:[%s6193_s1 + $0x72c] sm:$0xf0] }
  0x99   :  { %1784 = vmatpush.bf16.msrb.mxu2 %v3306_v60  ;;  %v3495_v17 = vld [vmem:[%s6193_s1 + $0x628] sm:$0xf0]  ;;  %1759 = vmatpush.bf16.msrb.mxu0 %v2762_v6  ;;  %v3406_v60 = vor.u32 %v4178_v55, %v3405_v54  ;;  %v2862_v6 = vor.u32 %v4042_v62, %v2861_v61  ;;  %v3085_v11 = vld [vmem:[%s6193_s1 + $0x2d0] sm:$0xf]  ;;  %v3630_v12 = vor.u32 %v4234_v5, %v3629_v4  ;;  %v3215_v62 = vld [vmem:[%s6193_s1 + $0x3f0] sm:$0xf0] }
  0x9a   :  { %v3498_v33 = vor.u32 %v4197_v16, %v3495_v17  ;;  %v4098_v13 = vld [vmem:[%s6193_s1 + $0x2ec] sm:$0xf0]  ;;  %v3727_v4 = vld [vmem:[%s6193_s1 + $0x7f0] sm:$0xf0] }
  0x9b   :  { %1797 = vmatpush.bf16.msrb.mxu3 %v3562_v0  ;;  %1772 = vmatpush.bf16.msrb.mxu1 %v3018_v9  ;;  %v3662_v0 = vor.u32 %v4242_v57, %v3661_v56  ;;  %v2829_v9 = vld [vmem:[%s6193_s1 + $0xd0] sm:$0xf]  ;;  %v3086_v23 = vor.u32 %v4098_v13, %v3085_v11  ;;  %v4118_v11 = vld [vmem:[%s6193_s1 + $0x394] sm:$0xf] }
  0x9c   :  { %v4162_v15 = vld [vmem:[%s6193_s1 + $0x4ec] sm:$0xf0]  ;;  %v3183_v13 = vld [vmem:[%s6193_s1 + $0x3b0] sm:$0xf0] }
  0x9d   :  { %1785 = vmatpush.bf16.msrb.mxu2 %v3274_v10  ;;  %1760 = vmatpush.bf16.msrb.mxu0 %v2730_v25  ;;  %v4034_v10 = vld [vmem:[%s6193_s1 + $0xec] sm:$0xf0] }
  0x9e   :  { %v3597_v16 = vld [vmem:[%s6193_s1 + $0x6d0] sm:$0xf]  ;;  %v2830_v21 = vor.u32 %v4034_v10, %v2829_v9  ;;  %v4054_v9 = vld [vmem:[%s6193_s1 + $0x194] sm:$0xf] }
  0x9f   :  { %1798 = vmatpush.bf16.msrb.mxu3 %v3530_v14  ;;  %1773 = vmatpush.bf16.msrb.mxu1 %v2986_v29  ;;  %v3341_v14 = vld [vmem:[%s6193_s1 + $0x4d0] sm:$0xf]  ;;  %v2927_v10 = vld [vmem:[%s6193_s1 + $0x1b0] sm:$0xf0] }
  0xa0   :  { %1761 = vmatmul.bf16.vlgmr.msrb.gmra.mxu0 %v4669_v19  ;;  %v4226_v17 = vld [vmem:[%s6193_s1 + $0x6ec] sm:$0xf0]  ;;  %v3342_v24 = vor.u32 %v4162_v15, %v3341_v14  ;;  %v4182_v14 = vld [vmem:[%s6193_s1 + $0x594] sm:$0xf] }
  0xa1   :  { %1786 = vmatpush.bf16.msrb.mxu2 %v3242_v30  ;;  %1805 = vmatpush.bf16.msra.mxu0 %v2958_v34  ;;  %v2797_v25 = vld [vmem:[%s6193_s1 + $0x90] sm:$0xf]  ;;  %v3598_v28 = vor.u32 %v4226_v17, %v3597_v16  ;;  %v3439_v15 = vld [vmem:[%s6193_s1 + $0x5b0] sm:$0xf0] }
  0xa2   :  { %1774 = vmatmul.bf16.vlgmr.msrb.gmra.mxu1 %v4673_v22  ;;  %v4026_v26 = vld [vmem:[%s6193_s1 + $0xac] sm:$0xf0]  ;;  %v4246_v16 = vld [vmem:[%s6193_s1 + $0x794] sm:$0xf] }
  0xa3   :  { %1799 = vmatpush.bf16.msrb.mxu3 %v3498_v33  ;;  %1818 = vmatpush.bf16.msra.mxu1 %v3214_v35  ;;  %v3053_v27 = vld [vmem:[%s6193_s1 + $0x290] sm:$0xf]  ;;  %v2798_v34 = vor.u32 %v4026_v26, %v2797_v25  ;;  %v3695_v17 = vld [vmem:[%s6193_s1 + $0x7b0] sm:$0xf0] }
  0xa4   :  { %1787 = vmatmul.bf16.vlgmr.msrb.gmra.mxu2 %v4667_v18  ;;  %v4090_v29 = vld [vmem:[%s6193_s1 + $0x2ac] sm:$0xf0]  ;;  %v4046_v25 = vld [vmem:[%s6193_s1 + $0x154] sm:$0xf] }
  0xa5   :  { %1831 = vmatpush.bf16.msra.mxu2 %v3470_v36  ;;  %1806 = vmatpush.bf16.msra.mxu0 %v2926_v46  ;;  %v3309_v30 = vld [vmem:[%s6193_s1 + $0x490] sm:$0xf]  ;;  %v3054_v35 = vor.u32 %v4090_v29, %v3053_v27  ;;  %v2895_v26 = vld [vmem:[%s6193_s1 + $0x170] sm:$0xf0] }
  0xa6   :  { %1800 = vmatmul.bf16.vlgmr.msrb.gmra.mxu3 %v4671_v20  ;;  %v4154_v31 = vld [vmem:[%s6193_s1 + $0x4ac] sm:$0xf0]  ;;  %v4110_v27 = vld [vmem:[%s6193_s1 + $0x354] sm:$0xf] }
  0xa7   :  { %1844 = vmatpush.bf16.msra.mxu3 %v3726_v40  ;;  %1819 = vmatpush.bf16.msra.mxu1 %v3182_v47  ;;  %v3565_v32 = vld [vmem:[%s6193_s1 + $0x690] sm:$0xf]  ;;  %v3310_v36 = vor.u32 %v4154_v31, %v3309_v30  ;;  %v3151_v29 = vld [vmem:[%s6193_s1 + $0x370] sm:$0xf0] }
  0xa8   :  { %v4218_v33 = vld [vmem:[%s6193_s1 + $0x6ac] sm:$0xf0]  ;;  %v4174_v30 = vld [vmem:[%s6193_s1 + $0x554] sm:$0xf] }
  0xa9   :  { %1832 = vmatpush.bf16.msra.mxu2 %v3438_v48  ;;  %1807 = vmatpush.bf16.msra.mxu0 %v2894_v58  ;;  %v2765_v37 = vld [vmem:[%s6193_s1 + $0x50] sm:$0xf]  ;;  %v3566_v40 = vor.u32 %v4218_v33, %v3565_v32  ;;  %v4062_v58 = vld [vmem:[%s6193_s1 + $0x1d4] sm:$0xf] }
  0xaa   :  { %v4018_v38 = vld [vmem:[%s6193_s1 + $0x6c] sm:$0xf0]  ;;  %v3407_v31 = vld [vmem:[%s6193_s1 + $0x570] sm:$0xf0] }
  0xab   :  { %1845 = vmatpush.bf16.msra.mxu3 %v3694_v52  ;;  %1820 = vmatpush.bf16.msra.mxu1 %v3150_v59  ;;  %v3021_v39 = vld [vmem:[%s6193_s1 + $0x250] sm:$0xf]  ;;  %v2766_v46 = vor.u32 %v4018_v38, %v2765_v37  ;;  %v2959_v59 = vld [vmem:[%s6193_s1 + $0x1f0] sm:$0xf0] }
  0xac   :  { %v4082_v41 = vld [vmem:[%s6193_s1 + $0x26c] sm:$0xf0]  ;;  %v4238_v32 = vld [vmem:[%s6193_s1 + $0x754] sm:$0xf] }
  0xad   :  { %1833 = vmatpush.bf16.msra.mxu2 %v3406_v60  ;;  %1808 = vmatpush.bf16.msra.mxu0 %v2862_v6  ;;  %v3277_v42 = vld [vmem:[%s6193_s1 + $0x450] sm:$0xf]  ;;  %v3022_v49 = vor.u32 %v4082_v41, %v3021_v39  ;;  %v4126_v60 = vld [vmem:[%s6193_s1 + $0x3d4] sm:$0xf]  ;;  %v2962_v6 = vor.u32 %v4062_v58, %v2959_v59 }
  0xae   :  { %v4146_v43 = vld [vmem:[%s6193_s1 + $0x46c] sm:$0xf0]  ;;  %v3663_v33 = vld [vmem:[%s6193_s1 + $0x770] sm:$0xf0] }
  0xaf   :  { %1846 = vmatpush.bf16.msra.mxu3 %v3662_v0  ;;  %1821 = vmatpush.bf16.msra.mxu1 %v3118_v7  ;;  %v3533_v44 = vld [vmem:[%s6193_s1 + $0x650] sm:$0xf]  ;;  %v3278_v50 = vor.u32 %v4146_v43, %v3277_v42  ;;  %v3471_v0 = vld [vmem:[%s6193_s1 + $0x5f0] sm:$0xf0]  ;;  %v3218_v7 = vor.u32 %v4126_v60, %v3215_v62 }
  0xb0   :  { %v4210_v45 = vld [vmem:[%s6193_s1 + $0x66c] sm:$0xf0]  ;;  %v4038_v37 = vld [vmem:[%s6193_s1 + $0x114] sm:$0xf] }
  0xb1   :  { %1834 = vmatpush.bf16.msra.mxu2 %v3374_v8  ;;  %1809 = vmatpush.bf16.msra.mxu0 %v2830_v21  ;;  %v2733_v47 = vld [vmem:[%s6193_s1 + $0x10] sm:$0xf]  ;;  %v3534_v54 = vor.u32 %v4210_v45, %v3533_v44  ;;  %v3474_v8 = vor.u32 %v4190_v63, %v3471_v0  ;;  %v2930_v21 = vor.u32 %v4054_v9, %v2927_v10  ;;  %v2863_v38 = vld [vmem:[%s6193_s1 + $0x130] sm:$0xf0] }
  0xb2   :  { %v4010_v48 = vld [vmem:[%s6193_s1 + $0x2c] sm:$0xf0]  ;;  %v4102_v39 = vld [vmem:[%s6193_s1 + $0x314] sm:$0xf] }
  0xb3   :  { %1847 = vmatpush.bf16.msra.mxu3 %v3630_v12  ;;  %1822 = vmatpush.bf16.msra.mxu1 %v3086_v23  ;;  %v2989_v51 = vld [vmem:[%s6193_s1 + $0x210] sm:$0xf]  ;;  %v2734_v61 = vor.u32 %v4010_v48, %v2733_v47  ;;  %v3730_v12 = vor.u32 %v4254_v3, %v3727_v4  ;;  %v3186_v23 = vor.u32 %v4118_v11, %v3183_v13  ;;  %v3119_v41 = vld [vmem:[%s6193_s1 + $0x330] sm:$0xf0] }
  0xb4   :  { %v4074_v52 = vld [vmem:[%s6193_s1 + $0x22c] sm:$0xf0]  ;;  %v4166_v42 = vld [vmem:[%s6193_s1 + $0x514] sm:$0xf]  ;;  %v3122_v48 = vor.u32 %v4102_v39, %v3119_v41 }
  0xb5   :  { %1835 = vmatpush.bf16.msra.mxu2 %v3342_v24  ;;  %1810 = vmatpush.bf16.msra.mxu0 %v2798_v34  ;;  %v3245_v53 = vld [vmem:[%s6193_s1 + $0x410] sm:$0xf]  ;;  %v2990_v1 = vor.u32 %v4074_v52, %v2989_v51  ;;  %v3442_v24 = vor.u32 %v4182_v14, %v3439_v15  ;;  %v2898_v34 = vor.u32 %v4046_v25, %v2895_v26  ;;  %v3375_v43 = vld [vmem:[%s6193_s1 + $0x530] sm:$0xf0] }
  0xb6   :  { %v4138_v55 = vld [vmem:[%s6193_s1 + $0x42c] sm:$0xf0]  ;;  %v4230_v44 = vld [vmem:[%s6193_s1 + $0x714] sm:$0xf] }
  0xb7   :  { %1848 = vmatpush.bf16.msra.mxu3 %v3598_v28  ;;  %1823 = vmatpush.bf16.msra.mxu1 %v3054_v35  ;;  %v3501_v56 = vld [vmem:[%s6193_s1 + $0x610] sm:$0xf]  ;;  %v3246_v2 = vor.u32 %v4138_v55, %v3245_v53  ;;  %v3698_v28 = vor.u32 %v4246_v16, %v3695_v17  ;;  %v3154_v35 = vor.u32 %v4110_v27, %v3151_v29  ;;  %v3631_v45 = vld [vmem:[%s6193_s1 + $0x730] sm:$0xf0] }
  0xb8   :  { %v4202_v57 = vld [vmem:[%s6193_s1 + $0x62c] sm:$0xf0]  ;;  %v4030_v47 = vld [vmem:[%s6193_s1 + $0xd4] sm:$0xf]  ;;  %v3634_v53 = vor.u32 %v4230_v44, %v3631_v45  ;;  %v4067_v44 = vld [vmem:[%s6193_s1 + $0x1f4] sm:$0xf0] }
  0xb9   :  { %1836 = vmatpush.bf16.msra.mxu2 %v3310_v36  ;;  %1811 = vmatpush.bf16.msra.mxu0 %v2766_v46  ;;  %v3502_v5 = vor.u32 %v4202_v57, %v3501_v56  ;;  %v3410_v36 = vor.u32 %v4174_v30, %v3407_v31  ;;  %v2866_v46 = vor.u32 %v4038_v37, %v2863_v38  ;;  %v4094_v51 = vld [vmem:[%s6193_s1 + $0x2d4] sm:$0xf]  ;;  %v5484_v56 = vld [vmem:[%s6195_s2] sm:$0xff]  ;;  %v3221_v45 = vld [vmem:[%s6193_s1 + $0x3d8] sm:$0xf] }
  0xba   :  { %v3087_v52 = vld [vmem:[%s6193_s1 + $0x2f0] sm:$0xf0] }
  0xbb   :  { %1849 = vmatpush.bf16.msra.mxu3 %v3566_v40  ;;  %1824 = vmatpush.bf16.msra.mxu1 %v3022_v49  ;;  %v3666_v40 = vor.u32 %v4238_v32, %v3663_v33  ;;  %v3378_v49 = vor.u32 %v4166_v42, %v3375_v43  ;;  %v3343_v55 = vld [vmem:[%s6193_s1 + $0x4f0] sm:$0xf0]  ;;  %v2965_v43 = vld [vmem:[%s6193_s1 + $0x1d8] sm:$0xf] }
  0xbc   :  { %v4222_v57 = vld [vmem:[%s6193_s1 + $0x6d4] sm:$0xf] }
  0xbd   :  { %1837 = vmatpush.bf16.msra.mxu2 %v3278_v50  ;;  %1812 = vmatpush.bf16.msra.mxu0 %v2734_v61  ;;  %v2831_v50 = vld [vmem:[%s6193_s1 + $0xf0] sm:$0xf0]  ;;  %v3090_v61 = vor.u32 %v4094_v51, %v3087_v52 }
  0xbe   :  { %v3599_v58 = vld [vmem:[%s6193_s1 + $0x6f0] sm:$0xf0]  ;;  %v2834_v59 = vor.u32 %v4030_v47, %v2831_v50  ;;  %v4131_v47 = vld [vmem:[%s6193_s1 + $0x3f4] sm:$0xf0] }
  0xbf   :  { %1850 = vmatpush.bf16.msra.mxu3 %v3534_v54  ;;  %1825 = vmatpush.bf16.msra.mxu1 %v2990_v1  ;;  %v4158_v54 = vld [vmem:[%s6193_s1 + $0x4d4] sm:$0xf]  ;;  %v287_v1 = vperm.slane %v5484_v56, 0 }
  0xc0   :  { %1813 = vmatmul.bf16.vlgmr.msra.gmra.mxu0 %v4669_v19  ;;  %v4022_v60 = vld [vmem:[%s6193_s1 + $0x94] sm:$0xf]  ;;  %v3346_v62 = vor.u32 %v4158_v54, %v3343_v55  ;;  %v3733_v54 = vld [vmem:[%s6193_s1 + $0x7d8] sm:$0xf] }
  0xc1   :  { %1838 = vmatpush.bf16.msra.mxu2 %v3246_v2  ;;  %1857 = vmatpush.bf16.msrb.mxu0 %v2962_v6  ;;  %v2799_v63 = vld [vmem:[%s6193_s1 + $0xb0] sm:$0xf0]  ;;  %v3602_v2 = vor.u32 %v4222_v57, %v3599_v58  ;;  %v4259_v55 = vld [vmem:[%s6193_s1 + $0x7f4] sm:$0xf0] }
  0xc2   :  { %1826 = vmatmul.bf16.vlgmr.msra.gmra.mxu1 %v4673_v22  ;;  %v4086_v0 = vld [vmem:[%s6193_s1 + $0x294] sm:$0xf] }
  0xc3   :  { %1851 = vmatpush.bf16.msra.mxu3 %v3502_v5  ;;  %1870 = vmatpush.bf16.msrb.mxu1 %v3218_v7  ;;  %v3055_v3 = vld [vmem:[%s6193_s1 + $0x2b0] sm:$0xf0]  ;;  %v1606_v9 = vpop.f32.mrf.mxu0 }
  0xc4   :  { %1839 = vmatmul.bf16.vlgmr.msra.gmra.mxu2 %v4667_v18  ;;  %v4150_v4 = vld [vmem:[%s6193_s1 + $0x494] sm:$0xf]  ;;  %v3058_v10 = vor.u32 %v4086_v0, %v3055_v3  ;;  %v1607_v15 = vadd.f32 %v1606_v9, %v287_v1  ;;  %v3189_v0 = vld [vmem:[%s6193_s1 + $0x398] sm:$0xf]  ;;  %v3734_v1 = vor.u32 %v4259_v55, %v3733_v54 }
  0xc5   :  { %1883 = vmatpush.bf16.msrb.mxu2 %v3474_v8  ;;  %1858 = vmatpush.bf16.msrb.mxu0 %v2930_v21  ;;  %v3311_v5 = vld [vmem:[%s6193_s1 + $0x4b0] sm:$0xf0]  ;;  %v2802_v8 = vor.u32 %v4022_v60, %v2799_v63  ;;  %v1619_v16 = vpop.f32.mrf.mxu1  ;;  %v3222_v60 = vor.u32 %v4131_v47, %v3221_v45  ;;  %v4059_v63 = vld [vmem:[%s6193_s1 + $0x1b4] sm:$0xf0] }
  0xc6   :  { %1852 = vmatmul.bf16.vlgmr.msra.gmra.mxu3 %v4671_v20  ;;  %v4214_v6 = vld [vmem:[%s6193_s1 + $0x694] sm:$0xf]  ;;  %v3314_v11 = vor.u32 %v4150_v4, %v3311_v5  ;;  %v1620_v27 = vadd.f32 %v1619_v16, %v1607_v15  ;;  %v3445_v3 = vld [vmem:[%s6193_s1 + $0x598] sm:$0xf] }
  0xc7   :  { %1896 = vmatpush.bf16.msrb.mxu3 %v3730_v12  ;;  %1871 = vmatpush.bf16.msrb.mxu1 %v3186_v23  ;;  %v3567_v7 = vld [vmem:[%s6193_s1 + $0x6b0] sm:$0xf0]  ;;  %v4187_v4 = vld [vmem:[%s6193_s1 + $0x5b4] sm:$0xf0] }
  0xc8   :  { %v4014_v12 = vld [vmem:[%s6193_s1 + $0x54] sm:$0xf]  ;;  %v3570_v17 = vor.u32 %v4214_v6, %v3567_v7  ;;  %v3701_v5 = vld [vmem:[%s6193_s1 + $0x798] sm:$0xf] }
  0xc9   :  { %1884 = vmatpush.bf16.msrb.mxu2 %v3442_v24  ;;  %1859 = vmatpush.bf16.msrb.mxu0 %v2898_v34  ;;  %v2767_v13 = vld [vmem:[%s6193_s1 + $0x70] sm:$0xf0]  ;;  %v1645_v42 = vpop.f32.mrf.mxu3  ;;  %v4251_v6 = vld [vmem:[%s6193_s1 + $0x7b4] sm:$0xf0] }
  0xca   :  { %v4078_v14 = vld [vmem:[%s6193_s1 + $0x254] sm:$0xf]  ;;  %v3702_v15 = vor.u32 %v4251_v6, %v3701_v5  ;;  %v4115_v16 = vld [vmem:[%s6193_s1 + $0x374] sm:$0xf0] }
  0xcb   :  { %1897 = vmatpush.bf16.msrb.mxu3 %v3698_v28  ;;  %1872 = vmatpush.bf16.msrb.mxu1 %v3154_v35  ;;  %v3023_v21 = vld [vmem:[%s6193_s1 + $0x270] sm:$0xf0]  ;;  %v2770_v28 = vor.u32 %v4014_v12, %v2767_v13  ;;  %v1608_v51 = vpop.f32.mrf.mxu0  ;;  %v2901_v12 = vld [vmem:[%s6193_s1 + $0x158] sm:$0xf] }
  0xcc   :  { %v4142_v23 = vld [vmem:[%s6193_s1 + $0x454] sm:$0xf]  ;;  %v3026_v31 = vor.u32 %v4078_v14, %v3023_v21  ;;  %v4051_v13 = vld [vmem:[%s6193_s1 + $0x174] sm:$0xf0] }
  0xcd   :  { %1885 = vmatpush.bf16.msrb.mxu2 %v3410_v36  ;;  %1860 = vmatpush.bf16.msrb.mxu0 %v2866_v46  ;;  %v3279_v24 = vld [vmem:[%s6193_s1 + $0x470] sm:$0xf0]  ;;  %v1632_v36 = vpop.f32.mrf.mxu2  ;;  %v1621_v57 = vpop.f32.mrf.mxu1  ;;  %v3157_v14 = vld [vmem:[%s6193_s1 + $0x358] sm:$0xf] }
  0xce   :  { %v4206_v25 = vld [vmem:[%s6193_s1 + $0x654] sm:$0xf]  ;;  %v3282_v32 = vor.u32 %v4142_v23, %v3279_v24  ;;  %v1633_v41 = vadd.f32 %v1632_v36, %v1620_v27  ;;  %v4179_v21 = vld [vmem:[%s6193_s1 + $0x574] sm:$0xf0]  ;;  %v3158_v27 = vor.u32 %v4115_v16, %v3157_v14 }
  0xcf   :  { %1898 = vmatpush.bf16.msrb.mxu3 %v3666_v40  ;;  %1873 = vmatpush.bf16.msrb.mxu1 %v3122_v48  ;;  %v3535_v26 = vld [vmem:[%s6193_s1 + $0x670] sm:$0xf0]  ;;  %v3477_v48 = vld [vmem:[%s6193_s1 + $0x5d8] sm:$0xf] }
  0xd0   :  { %v4006_v29 = vld [vmem:[%s6193_s1 + $0x14] sm:$0xf]  ;;  %v3538_v37 = vor.u32 %v4206_v25, %v3535_v26  ;;  %v5583_v50 = vadd.f32 %v1645_v42, %v1633_v41  ;;  %v3669_v23 = vld [vmem:[%s6193_s1 + $0x758] sm:$0xf]  ;;  %v2902_v25 = vor.u32 %v4051_v13, %v2901_v12 }
  0xd1   :  { %1886 = vmatpush.bf16.msrb.mxu2 %v3378_v49  ;;  %1861 = vmatpush.bf16.msrb.mxu0 %v2834_v59  ;;  %v2735_v30 = vld [vmem:[%s6193_s1 + $0x30] sm:$0xf0]  ;;  %v4195_v49 = vld [vmem:[%s6193_s1 + $0x5f4] sm:$0xf0]  ;;  %v2966_v59 = vor.u32 %v4067_v44, %v2965_v43  ;;  %v1647_v9 = vpop.f32.mrf.mxu3 }
  0xd2   :  { %v4070_v33 = vld [vmem:[%s6193_s1 + $0x214] sm:$0xf]  ;;  %v2738_v46 = vor.u32 %v4006_v29, %v2735_v30  ;;  %v4243_v24 = vld [vmem:[%s6193_s1 + $0x774] sm:$0xf0] }
  0xd3   :  { %1899 = vmatpush.bf16.msrb.mxu3 %v3634_v53  ;;  %1874 = vmatpush.bf16.msrb.mxu1 %v3090_v61  ;;  %v2991_v34 = vld [vmem:[%s6193_s1 + $0x230] sm:$0xf0]  ;;  %v3478_v61 = vor.u32 %v4195_v49, %v3477_v48  ;;  %v2869_v26 = vld [vmem:[%s6193_s1 + $0x118] sm:$0xf] }
  0xd4   :  { %v4134_v35 = vld [vmem:[%s6193_s1 + $0x414] sm:$0xf]  ;;  %v2994_v52 = vor.u32 %v4070_v33, %v2991_v34  ;;  %v4043_v29 = vld [vmem:[%s6193_s1 + $0x134] sm:$0xf0] }
  0xd5   :  { %1887 = vmatpush.bf16.msrb.mxu2 %v3346_v62  ;;  %1862 = vmatpush.bf16.msrb.mxu0 %v2802_v8  ;;  %v3247_v38 = vld [vmem:[%s6193_s1 + $0x430] sm:$0xf0]  ;;  %v2933_v62 = vld [vmem:[%s6193_s1 + $0x198] sm:$0xf]  ;;  %v1634_v7 = vpop.f32.mrf.mxu2 }
  0xd6   :  { %v4198_v39 = vld [vmem:[%s6193_s1 + $0x614] sm:$0xf]  ;;  %v3250_v53 = vor.u32 %v4134_v35, %v3247_v38  ;;  %v2934_v8 = vor.u32 %v4059_v63, %v2933_v62  ;;  %v3125_v30 = vld [vmem:[%s6193_s1 + $0x318] sm:$0xf]  ;;  %v2870_v38 = vor.u32 %v4043_v29, %v2869_v26 }
  0xd7   :  { %1900 = vmatpush.bf16.msrb.mxu3 %v3602_v2  ;;  %1875 = vmatpush.bf16.msrb.mxu1 %v3058_v10  ;;  %v3503_v40 = vld [vmem:[%s6193_s1 + $0x630] sm:$0xf0]  ;;  %v4123_v2 = vld [vmem:[%s6193_s1 + $0x3b4] sm:$0xf0] }
  0xd8   :  { %v3506_v58 = vor.u32 %v4198_v39, %v3503_v40  ;;  %v3190_v10 = vor.u32 %v4123_v2, %v3189_v0  ;;  %v4107_v33 = vld [vmem:[%s6193_s1 + $0x334] sm:$0xf0] }
  0xd9   :  { %1888 = vmatpush.bf16.msrb.mxu2 %v3314_v11  ;;  %1863 = vmatpush.bf16.msrb.mxu0 %v2770_v28  ;;  %v3446_v11 = vor.u32 %v4187_v4, %v3445_v3  ;;  %v3381_v34 = vld [vmem:[%s6193_s1 + $0x518] sm:$0xf]  ;;  %v3126_v40 = vor.u32 %v4107_v33, %v3125_v30 }
  0xda   :  { %v4171_v35 = vld [vmem:[%s6193_s1 + $0x534] sm:$0xf0] }
  0xdb   :  { %1901 = vmatpush.bf16.msrb.mxu3 %v3570_v17  ;;  %1876 = vmatpush.bf16.msrb.mxu1 %v3026_v31  ;;  %v3413_v17 = vld [vmem:[%s6193_s1 + $0x558] sm:$0xf]  ;;  %v288_v31 = vperm.slane %v5484_v56, 1  ;;  %v3382_v41 = vor.u32 %v4171_v35, %v3381_v34 }
  0xdc   :  { %v3414_v28 = vor.u32 %v4179_v21, %v3413_v17  ;;  %v3637_v36 = vld [vmem:[%s6193_s1 + $0x718] sm:$0xf] }
  0xdd   :  { %1889 = vmatpush.bf16.msrb.mxu2 %v3282_v32  ;;  %1864 = vmatpush.bf16.msrb.mxu0 %v2738_v46  ;;  %v3670_v32 = vor.u32 %v4243_v24, %v3669_v23  ;;  %v1658_v39 = vpop.f32.mrf.mxu0  ;;  %v2837_v42 = vld [vmem:[%s6193_s1 + $0xd8] sm:$0xf] }
  0xde   :  { %v4035_v43 = vld [vmem:[%s6193_s1 + $0xf4] sm:$0xf0]  ;;  %v1659_v45 = vadd.f32 %v1658_v39, %v288_v31 }
  0xdf   :  { %1902 = vmatpush.bf16.msrb.mxu3 %v3538_v37  ;;  %1877 = vmatpush.bf16.msrb.mxu1 %v2994_v52  ;;  %v4235_v37 = vld [vmem:[%s6193_s1 + $0x734] sm:$0xf0]  ;;  %v1671_v46 = vpop.f32.mrf.mxu1  ;;  %v2838_v55 = vor.u32 %v4035_v43, %v2837_v42  ;;  %v4127_v42 = vld [vmem:[%s6193_s1 + $0x3dc] sm:$0xf] }
  0xe0   :  { %1865 = vmatmul.bf16.vlgmr.msrb.gmra.mxu0 %v4669_v19  ;;  %v3093_v44 = vld [vmem:[%s6193_s1 + $0x2d8] sm:$0xf]  ;;  %v3638_v47 = vor.u32 %v4235_v37, %v3637_v36  ;;  %v1672_v54 = vadd.f32 %v1671_v46, %v1659_v45  ;;  %v4191_v45 = vld [vmem:[%s6193_s1 + $0x5dc] sm:$0xf] }
  0xe1   :  { %1890 = vmatpush.bf16.msrb.mxu2 %v3250_v53  ;;  %1909 = vmatpush.bf16.msra.mxu0 %v2966_v59  ;;  %v4099_v48 = vld [vmem:[%s6193_s1 + $0x2f4] sm:$0xf0]  ;;  %v3479_v46 = vld [vmem:[%s6193_s1 + $0x5f8] sm:$0xf0] }
  0xe2   :  { %1878 = vmatmul.bf16.vlgmr.msrb.gmra.mxu1 %v4673_v22  ;;  %v3349_v49 = vld [vmem:[%s6193_s1 + $0x4d8] sm:$0xf]  ;;  %v3094_v57 = vor.u32 %v4099_v48, %v3093_v44  ;;  %v3223_v44 = vld [vmem:[%s6193_s1 + $0x3f8] sm:$0xf0] }
  0xe3   :  { %1903 = vmatpush.bf16.msrb.mxu3 %v3506_v58  ;;  %1922 = vmatpush.bf16.msra.mxu1 %v3222_v60  ;;  %v4163_v51 = vld [vmem:[%s6193_s1 + $0x4f4] sm:$0xf0] }
  0xe4   :  { %1891 = vmatmul.bf16.vlgmr.msrb.gmra.mxu2 %v4667_v18  ;;  %v3605_v52 = vld [vmem:[%s6193_s1 + $0x6d8] sm:$0xf]  ;;  %v3350_v58 = vor.u32 %v4163_v51, %v3349_v49  ;;  %v4255_v49 = vld [vmem:[%s6193_s1 + $0x7dc] sm:$0xf] }
  0xe5   :  { %1935 = vmatpush.bf16.msra.mxu2 %v3478_v61  ;;  %1910 = vmatpush.bf16.msra.mxu0 %v2934_v8  ;;  %v4227_v53 = vld [vmem:[%s6193_s1 + $0x6f4] sm:$0xf0]  ;;  %v1660_v9 = vpop.f32.mrf.mxu0  ;;  %v3735_v51 = vld [vmem:[%s6193_s1 + $0x7f8] sm:$0xf0] }
  0xe6   :  { %1904 = vmatmul.bf16.vlgmr.msrb.gmra.mxu3 %v4671_v20  ;;  %v2805_v59 = vld [vmem:[%s6193_s1 + $0x98] sm:$0xf]  ;;  %v3606_v63 = vor.u32 %v4227_v53, %v3605_v52 }
  0xe7   :  { %1948 = vmatpush.bf16.msra.mxu3 %v3734_v1  ;;  %1923 = vmatpush.bf16.msra.mxu1 %v3190_v10  ;;  %v4027_v60 = vld [vmem:[%s6193_s1 + $0xb4] sm:$0xf0]  ;;  %v1684_v62 = vpop.f32.mrf.mxu2 }
  0xe8   :  { %v3061_v61 = vld [vmem:[%s6193_s1 + $0x298] sm:$0xf]  ;;  %v1685_v3 = vadd.f32 %v1684_v62, %v1672_v54  ;;  %v2806_v7 = vor.u32 %v4027_v60, %v2805_v59  ;;  %v3226_v54 = vor.u32 %v4127_v42, %v3223_v44  ;;  %v4119_v59 = vld [vmem:[%s6193_s1 + $0x39c] sm:$0xf]  ;;  %v3738_v60 = vor.u32 %v4255_v49, %v3735_v51 }
  0xe9   :  { %1936 = vmatpush.bf16.msra.mxu2 %v3446_v11  ;;  %1911 = vmatpush.bf16.msra.mxu0 %v2902_v25  ;;  %v4091_v0 = vld [vmem:[%s6193_s1 + $0x2b4] sm:$0xf0]  ;;  %v1697_v4 = vpop.f32.mrf.mxu3  ;;  %v4183_v62 = vld [vmem:[%s6193_s1 + $0x59c] sm:$0xf] }
  0xea   :  { %v3317_v1 = vld [vmem:[%s6193_s1 + $0x498] sm:$0xf]  ;;  %v5716_v8 = vadd.f32 %v1697_v4, %v1685_v3  ;;  %v3062_v10 = vor.u32 %v4091_v0, %v3061_v61  ;;  %v3191_v61 = vld [vmem:[%s6193_s1 + $0x3b8] sm:$0xf0] }
  0xeb   :  { %1949 = vmatpush.bf16.msra.mxu3 %v3702_v15  ;;  %1924 = vmatpush.bf16.msra.mxu1 %v3158_v27  ;;  %v4155_v2 = vld [vmem:[%s6193_s1 + $0x4b4] sm:$0xf0]  ;;  %v1673_v15 = vpop.f32.mrf.mxu1  ;;  %v4247_v0 = vld [vmem:[%s6193_s1 + $0x79c] sm:$0xf]  ;;  %v3194_v3 = vor.u32 %v4119_v59, %v3191_v61 }
  0xec   :  { %v3573_v5 = vld [vmem:[%s6193_s1 + $0x698] sm:$0xf]  ;;  %v3318_v11 = vor.u32 %v4155_v2, %v3317_v1  ;;  %v3703_v1 = vld [vmem:[%s6193_s1 + $0x7b8] sm:$0xf0] }
  0xed   :  { %1937 = vmatpush.bf16.msra.mxu2 %v3414_v28  ;;  %1912 = vmatpush.bf16.msra.mxu0 %v2870_v38  ;;  %v4219_v6 = vld [vmem:[%s6193_s1 + $0x6b4] sm:$0xf0]  ;;  %v3706_v9 = vor.u32 %v4247_v0, %v3703_v1  ;;  %v3351_v42 = vld [vmem:[%s6193_s1 + $0x4f8] sm:$0xf0] }
  0xee   :  { %v2773_v12 = vld [vmem:[%s6193_s1 + $0x58] sm:$0xf]  ;;  %v3574_v16 = vor.u32 %v4219_v6, %v3573_v5  ;;  %v4047_v5 = vld [vmem:[%s6193_s1 + $0x15c] sm:$0xf] }
  0xef   :  { %1950 = vmatpush.bf16.msra.mxu3 %v3670_v32  ;;  %1925 = vmatpush.bf16.msra.mxu1 %v3126_v40  ;;  %v4019_v13 = vld [vmem:[%s6193_s1 + $0x74] sm:$0xf0]  ;;  %v1686_v34 = vpop.f32.mrf.mxu2  ;;  %v4063_v40 = vld [vmem:[%s6193_s1 + $0x1dc] sm:$0xf] }
  0xf0   :  { %v3029_v14 = vld [vmem:[%s6193_s1 + $0x258] sm:$0xf]  ;;  %v2774_v26 = vor.u32 %v4019_v13, %v2773_v12  ;;  %v2903_v6 = vld [vmem:[%s6193_s1 + $0x178] sm:$0xf0] }
  0xf1   :  { %1938 = vmatpush.bf16.msra.mxu2 %v3382_v41  ;;  %1913 = vmatpush.bf16.msra.mxu0 %v2838_v55  ;;  %v4083_v17 = vld [vmem:[%s6193_s1 + $0x274] sm:$0xf0]  ;;  %v1699_v39 = vpop.f32.mrf.mxu3  ;;  %v2967_v41 = vld [vmem:[%s6193_s1 + $0x1f8] sm:$0xf0]  ;;  %v3482_v55 = vor.u32 %v4191_v45, %v3479_v46  ;;  %v2906_v15 = vor.u32 %v4047_v5, %v2903_v6 }
  0xf2   :  { %v3285_v21 = vld [vmem:[%s6193_s1 + $0x458] sm:$0xf]  ;;  %v3030_v29 = vor.u32 %v4083_v17, %v3029_v14  ;;  %v2970_v53 = vor.u32 %v4063_v40, %v2967_v41  ;;  %v3415_v12 = vld [vmem:[%s6193_s1 + $0x578] sm:$0xf0] }
  0xf3   :  { %1951 = vmatpush.bf16.msra.mxu3 %v3638_v47  ;;  %1926 = vmatpush.bf16.msra.mxu1 %v3094_v57  ;;  %v4147_v23 = vld [vmem:[%s6193_s1 + $0x474] sm:$0xf0]  ;;  %v4055_v57 = vld [vmem:[%s6193_s1 + $0x19c] sm:$0xf] }
  0xf4   :  { %v3541_v24 = vld [vmem:[%s6193_s1 + $0x658] sm:$0xf]  ;;  %v3286_v30 = vor.u32 %v4147_v23, %v3285_v21  ;;  %v4239_v13 = vld [vmem:[%s6193_s1 + $0x75c] sm:$0xf] }
  0xf5   :  { %1939 = vmatpush.bf16.msra.mxu2 %v3350_v58  ;;  %v4211_v25 = vld [vmem:[%s6193_s1 + $0x674] sm:$0xf0]  ;;  %1914 = vmatpush.bf16.msra.mxu0 %v2806_v7  ;;  %v2935_v58 = vld [vmem:[%s6193_s1 + $0x1b8] sm:$0xf0] }
  0xf6   :  { %v2741_v27 = vld [vmem:[%s6193_s1 + $0x18] sm:$0xf]  ;;  %v3542_v35 = vor.u32 %v4211_v25, %v3541_v24  ;;  %v2938_v2 = vor.u32 %v4055_v57, %v2935_v58  ;;  %v4111_v7 = vld [vmem:[%s6193_s1 + $0x35c] sm:$0xf] }
  0xf7   :  { %1952 = vmatpush.bf16.msra.mxu3 %v3606_v63  ;;  %v4011_v28 = vld [vmem:[%s6193_s1 + $0x34] sm:$0xf0]  ;;  %1927 = vmatpush.bf16.msra.mxu1 %v3062_v10  ;;  %v3447_v63 = vld [vmem:[%s6193_s1 + $0x5b8] sm:$0xf0] }
  0xf8   :  { %v2997_v31 = vld [vmem:[%s6193_s1 + $0x218] sm:$0xf]  ;;  %v2742_v43 = vor.u32 %v4011_v28, %v2741_v27  ;;  %v3450_v4 = vor.u32 %v4183_v62, %v3447_v63  ;;  %v3159_v10 = vld [vmem:[%s6193_s1 + $0x378] sm:$0xf0] }
  0xf9   :  { %1940 = vmatpush.bf16.msra.mxu2 %v3318_v11  ;;  %v4075_v32 = vld [vmem:[%s6193_s1 + $0x234] sm:$0xf0]  ;;  %1915 = vmatpush.bf16.msra.mxu0 %v2774_v26  ;;  %v4175_v11 = vld [vmem:[%s6193_s1 + $0x55c] sm:$0xf] }
  0xfa   :  { %v3253_v33 = vld [vmem:[%s6193_s1 + $0x418] sm:$0xf]  ;;  %v2998_v47 = vor.u32 %v4075_v32, %v2997_v31  ;;  %v3671_v14 = vld [vmem:[%s6193_s1 + $0x778] sm:$0xf0]  ;;  %v3418_v17 = vor.u32 %v4175_v11, %v3415_v12 }
  0xfb   :  { %1953 = vmatpush.bf16.msra.mxu3 %v3574_v16  ;;  %v4139_v36 = vld [vmem:[%s6193_s1 + $0x434] sm:$0xf0]  ;;  %1928 = vmatpush.bf16.msra.mxu1 %v3030_v29  ;;  %v3162_v16 = vor.u32 %v4111_v7, %v3159_v10  ;;  %v4039_v21 = vld [vmem:[%s6193_s1 + $0x11c] sm:$0xf]  ;;  %v3674_v25 = vor.u32 %v4239_v13, %v3671_v14 }
  0xfc   :  { %v3509_v37 = vld [vmem:[%s6193_s1 + $0x618] sm:$0xf]  ;;  %v3254_v48 = vor.u32 %v4139_v36, %v3253_v33  ;;  %v2871_v23 = vld [vmem:[%s6193_s1 + $0x138] sm:$0xf0] }
  0xfd   :  { %v4203_v38 = vld [vmem:[%s6193_s1 + $0x634] sm:$0xf0]  ;;  %1941 = vmatpush.bf16.msra.mxu2 %v3286_v30  ;;  %1916 = vmatpush.bf16.msra.mxu0 %v2742_v43  ;;  %v4103_v24 = vld [vmem:[%s6193_s1 + $0x31c] sm:$0xf]  ;;  %v2874_v31 = vor.u32 %v4039_v21, %v2871_v23  ;;  %v5866_v32 = vpop.f32.mrf.mxu0 }
  0xfe   :  { %v3510_v52 = vor.u32 %v4203_v38, %v3509_v37  ;;  %v3127_v26 = vld [vmem:[%s6193_s1 + $0x338] sm:$0xf0] }
  0xff   :  { %1954 = vmatpush.bf16.msra.mxu3 %v3542_v35  ;;  %1929 = vmatpush.bf16.msra.mxu1 %v2998_v47  ;;  %v4167_v27 = vld [vmem:[%s6193_s1 + $0x51c] sm:$0xf]  ;;  %v3130_v33 = vor.u32 %v4103_v24, %v3127_v26  ;;  %v5877_v38 = vpop.f32.mrf.mxu1 }
 0x100   :  { %1917 = vmatmul.bf16.vlgmr.msra.gmra.mxu0 %v4669_v19  ;;  %v3383_v28 = vld [vmem:[%s6193_s1 + $0x538] sm:$0xf0] }
 0x101   :  { %1942 = vmatpush.bf16.msra.mxu2 %v3254_v48  ;;  %1961 = vmatpush.bf16.msrb.mxu0 %v2970_v53  ;;  %v4231_v29 = vld [vmem:[%s6193_s1 + $0x71c] sm:$0xf]  ;;  %v3386_v34 = vor.u32 %v4167_v27, %v3383_v28 }
 0x102   :  { %1930 = vmatmul.bf16.vlgmr.msra.gmra.mxu1 %v4673_v22  ;;  %v3639_v30 = vld [vmem:[%s6193_s1 + $0x738] sm:$0xf0] }
 0x103   :  { %1955 = vmatpush.bf16.msra.mxu3 %v3510_v52  ;;  %1974 = vmatpush.bf16.msrb.mxu1 %v3226_v54  ;;  %v4031_v35 = vld [vmem:[%s6193_s1 + $0xdc] sm:$0xf]  ;;  %v3642_v39 = vor.u32 %v4231_v29, %v3639_v30 }
 0x104   :  { %1943 = vmatmul.bf16.vlgmr.msra.gmra.mxu2 %v4667_v18  ;;  %v2839_v36 = vld [vmem:[%s6193_s1 + $0xf8] sm:$0xf0] }
 0x105   :  { %1987 = vmatpush.bf16.msrb.mxu2 %v3482_v55  ;;  %1962 = vmatpush.bf16.msrb.mxu0 %v2938_v2  ;;  %v4095_v37 = vld [vmem:[%s6193_s1 + $0x2dc] sm:$0xf]  ;;  %v2842_v45 = vor.u32 %v4031_v35, %v2839_v36  ;;  %v1712_v62 = vpop.f32.mrf.mxu0 }
 0x106   :  { %1956 = vmatmul.bf16.vlgmr.msra.gmra.mxu3 %v4671_v20  ;;  %v3095_v40 = vld [vmem:[%s6193_s1 + $0x2f8] sm:$0xf0] }
 0x107   :  { %2000 = vmatpush.bf16.msrb.mxu3 %v3738_v60  ;;  %1975 = vmatpush.bf16.msrb.mxu1 %v3194_v3  ;;  %v4159_v41 = vld [vmem:[%s6193_s1 + $0x4dc] sm:$0xf]  ;;  %v3098_v46 = vor.u32 %v4095_v37, %v3095_v40  ;;  %v5903_v52 = vpop.f32.mrf.mxu2  ;;  %v4266_v40 = vld [vmem:[%s6196_s3 + $0x30] sm:$0xff] }
 0x108   :  { %v4223_v43 = vld [vmem:[%s6193_s1 + $0x6dc] sm:$0xf]  ;;  %v3354_v47 = vor.u32 %v4159_v41, %v3351_v42  ;;  %v4274_v41 = vld [vmem:[%s6196_s3 + $0x70] sm:$0xff] }
 0x109   :  { %1988 = vmatpush.bf16.msrb.mxu2 %v3450_v4  ;;  %1963 = vmatpush.bf16.msrb.mxu0 %v2906_v15  ;;  %v3607_v44 = vld [vmem:[%s6193_s1 + $0x6f8] sm:$0xf0]  ;;  %v5914_v58 = vpop.f32.mrf.mxu3  ;;  %v1725_v4 = vpop.f32.mrf.mxu1  ;;  %v4282_v42 = vld [vmem:[%s6196_s3 + $0xb0] sm:$0xff] }
 0x10a   :  { %v4023_v48 = vld [vmem:[%s6193_s1 + $0x9c] sm:$0xf]  ;;  %v3610_v53 = vor.u32 %v4223_v43, %v3607_v44  ;;  %v4290_v43 = vld [vmem:[%s6196_s3 + $0xf0] sm:$0xff]  ;;  %v4265_v44 = vld [vmem:[%s6196_s3 + $0x28] sm:$0xff] }
 0x10b   :  { %2001 = vmatpush.bf16.msrb.mxu3 %v3706_v9  ;;  %1976 = vmatpush.bf16.msrb.mxu1 %v3162_v16  ;;  %v2807_v49 = vld [vmem:[%s6193_s1 + $0xb8] sm:$0xf0] }
 0x10c   :  { %v4087_v51 = vld [vmem:[%s6193_s1 + $0x29c] sm:$0xf]  ;;  %v2810_v61 = vor.u32 %v4023_v48, %v2807_v49  ;;  %v4272_v48 = vld [vmem:[%s6196_s3 + $0x60] sm:$0xff] }
 0x10d   :  { %1989 = vmatpush.bf16.msrb.mxu2 %v3418_v17  ;;  %1964 = vmatpush.bf16.msrb.mxu0 %v2874_v31  ;;  %v3063_v54 = vld [vmem:[%s6193_s1 + $0x2b8] sm:$0xf0]  ;;  %v4280_v49 = vld [vmem:[%s6196_s3 + $0xa0] sm:$0xff] }
 0x10e   :  { %v4151_v55 = vld [vmem:[%s6193_s1 + $0x49c] sm:$0xf]  ;;  %v3066_v63 = vor.u32 %v4087_v51, %v3063_v54 }
 0x10f   :  { %2002 = vmatpush.bf16.msrb.mxu3 %v3674_v25  ;;  %1977 = vmatpush.bf16.msrb.mxu1 %v3130_v33  ;;  %v3319_v57 = vld [vmem:[%s6193_s1 + $0x4b8] sm:$0xf0]  ;;  %v1738_v21 = vpop.f32.mrf.mxu2 }
 0x110   :  { %v4215_v59 = vld [vmem:[%s6193_s1 + $0x69c] sm:$0xf]  ;;  %v3322_v0 = vor.u32 %v4151_v55, %v3319_v57  ;;  %v4288_v55 = vld [vmem:[%s6196_s3 + $0xe0] sm:$0xff] }
 0x111   :  { %1990 = vmatpush.bf16.msrb.mxu2 %v3386_v34  ;;  %v3575_v60 = vld [vmem:[%s6193_s1 + $0x6b8] sm:$0xf0]  ;;  %1965 = vmatpush.bf16.msrb.mxu0 %v2842_v45  ;;  %v1751_v27 = vpop.f32.mrf.mxu3  ;;  %v4289_v45 = vld [vmem:[%s6196_s3 + $0xe8] sm:$0xff]  ;;  %v4268_v21 = vld [vmem:[%s6196_s3 + $0x40] sm:$0xff] }
 0x112   :  { %v4015_v1 = vld [vmem:[%s6193_s1 + $0x5c] sm:$0xf]  ;;  %v3578_v5 = vor.u32 %v4215_v59, %v3575_v60  ;;  %v4284_v27 = vld [vmem:[%s6196_s3 + $0xc0] sm:$0xff] }
 0x113   :  { %2003 = vmatpush.bf16.msrb.mxu3 %v3642_v39  ;;  %1978 = vmatpush.bf16.msrb.mxu1 %v3098_v46  ;;  %v2775_v2 = vld [vmem:[%s6193_s1 + $0x78] sm:$0xf0]  ;;  %v4264_v46 = vld [vmem:[%s6196_s3 + $0x20] sm:$0xff] }
 0x114   :  { %v4079_v3 = vld [vmem:[%s6193_s1 + $0x25c] sm:$0xf]  ;;  %v2778_v12 = vor.u32 %v4015_v1, %v2775_v2  ;;  %v4262_v1 = vld [vmem:[%s6196_s3 + $0x10] sm:$0xff] }
 0x115   :  { %1991 = vmatpush.bf16.msrb.mxu2 %v3354_v47  ;;  %v3031_v6 = vld [vmem:[%s6193_s1 + $0x278] sm:$0xf0]  ;;  %1966 = vmatpush.bf16.msrb.mxu0 %v2810_v61 }
 0x116   :  { %v4143_v7 = vld [vmem:[%s6193_s1 + $0x45c] sm:$0xf]  ;;  %v3034_v13 = vor.u32 %v4079_v3, %v3031_v6  ;;  %v4270_v3 = vld [vmem:[%s6196_s3 + $0x50] sm:$0xff] }
 0x117   :  { %2004 = vmatpush.bf16.msrb.mxu3 %v3610_v53  ;;  %v3287_v9 = vld [vmem:[%s6193_s1 + $0x478] sm:$0xf0]  ;;  %1979 = vmatpush.bf16.msrb.mxu1 %v3066_v63 }
 0x118   :  { %v4207_v10 = vld [vmem:[%s6193_s1 + $0x65c] sm:$0xf]  ;;  %v3290_v14 = vor.u32 %v4143_v7, %v3287_v9  ;;  %v4286_v7 = vld [vmem:[%s6196_s3 + $0xd0] sm:$0xff]  ;;  %v4261_v9 = vld [vmem:[%s6196_s3 + $0x8] sm:$0xff] }
 0x119   :  { %v3543_v11 = vld [vmem:[%s6193_s1 + $0x678] sm:$0xf0]  ;;  %1992 = vmatpush.bf16.msrb.mxu2 %v3322_v0  ;;  %1967 = vmatpush.bf16.msrb.mxu0 %v2778_v12 }
 0x11a   :  { %v4007_v15 = vld [vmem:[%s6193_s1 + $0x1c] sm:$0xf]  ;;  %v3546_v23 = vor.u32 %v4207_v10, %v3543_v11  ;;  %v4269_v10 = vld [vmem:[%s6196_s3 + $0x48] sm:$0xff] }
 0x11b   :  { %v2743_v16 = vld [vmem:[%s6193_s1 + $0x38] sm:$0xf0]  ;;  %2005 = vmatpush.bf16.msrb.mxu3 %v3578_v5  ;;  %1980 = vmatpush.bf16.msrb.mxu1 %v3034_v13 }
 0x11c   :  { %v4071_v17 = vld [vmem:[%s6193_s1 + $0x21c] sm:$0xf]  ;;  %v2746_v30 = vor.u32 %v4007_v15, %v2743_v16  ;;  %v4285_v15 = vld [vmem:[%s6196_s3 + $0xc8] sm:$0xff]  ;;  %v4260_v16 = vld [vmem:[%s6196_s3] sm:$0xff] }
 0x11d   :  { %v2999_v24 = vld [vmem:[%s6193_s1 + $0x238] sm:$0xf0]  ;;  %1993 = vmatpush.bf16.msrb.mxu2 %v3290_v14  ;;  %v1762_v47 = vpop.f32.mrf.mxu0 }
 0x11e   :  { %v4135_v25 = vld [vmem:[%s6193_s1 + $0x41c] sm:$0xf]  ;;  %v3002_v31 = vor.u32 %v4071_v17, %v2999_v24  ;;  %1968 = vmatpush.bf16.msrb.mxu0 %v2746_v30  ;;  %v2013_v17 = vmax.f32 %v5583_v50, 0.0  ;;  %v4306_v30 = vld [vmem:[%s6196_s3 + $0x170] sm:$0xff] }
 0x11f   :  { %v3255_v26 = vld [vmem:[%s6193_s1 + $0x438] sm:$0xf0]  ;;  %2006 = vmatpush.bf16.msrb.mxu3 %v3546_v23  ;;  %v1775_v51 = vpop.f32.mrf.mxu1  ;;  %v2014_v23 = vmax.f32 %v5716_v8, 0.0 }
 0x120   :  { %v4199_v28 = vld [vmem:[%s6193_s1 + $0x61c] sm:$0xf]  ;;  %v3258_v33 = vor.u32 %v4135_v25, %v3255_v26  ;;  %1981 = vmatpush.bf16.msrb.mxu1 %v3002_v31 }
 0x121   :  { %v3511_v29 = vld [vmem:[%s6193_s1 + $0x638] sm:$0xf0]  ;;  %1969 = vmatmul.bf16.vlgmr.msrb.gmra.mxu0 %v4669_v19  ;;  %v4273_v19 = vld [vmem:[%s6196_s3 + $0x68] sm:$0xff]  ;;  %v2022_v8 = vpack.c.bf16 %v2014_v23, %v2014_v23 }
 0x122   :  { %v3514_v34 = vor.u32 %v4199_v28, %v3511_v29  ;;  %v4267_v35 = vld [vmem:[%s6196_s3 + $0x38] sm:$0xff]  ;;  %1994 = vmatpush.bf16.msrb.mxu2 %v3258_v33  ;;  %v2021_v28 = vpack.c.bf16 %v2013_v17, %v2013_v17  ;;  %v4298_v29 = vld [vmem:[%s6196_s3 + $0x130] sm:$0xff] }
 0x123   :  { %v4275_v36 = vld [vmem:[%s6196_s3 + $0x78] sm:$0xff]  ;;  %2545 = vmatpush.bf16.msra.mxu0 %v4267_v35  ;;  %1982 = vmatmul.bf16.vlgmr.msrb.gmra.mxu1 %v4673_v22  ;;  %v290_v22 = vperm.slane %v5484_v56, 3  ;;  %v4305_v35 = vld [vmem:[%s6196_s3 + $0x168] sm:$0xff] }
 0x124   :  { %v4283_v37 = vld [vmem:[%s6196_s3 + $0xb8] sm:$0xff]  ;;  %2007 = vmatpush.bf16.msrb.mxu3 %v3514_v34  ;;  %2558 = vmatpush.bf16.msra.mxu1 %v4275_v36  ;;  %v4297_v34 = vld [vmem:[%s6196_s3 + $0x128] sm:$0xff]  ;;  %v291_v36 = vperm.slane %v5484_v56, 4 }
 0x125   :  { %v4291_v39 = vld [vmem:[%s6196_s3 + $0xf8] sm:$0xff]  ;;  %1995 = vmatmul.bf16.vlgmr.msrb.gmra.mxu2 %v4667_v18  ;;  %v4281_v18 = vld [vmem:[%s6196_s3 + $0xa8] sm:$0xff]  ;;  %v1763_v54 = vadd.f32 %v1762_v47, %v290_v22  ;;  %v1764_v2 = vpop.f32.mrf.mxu0  ;;  %v4294_v22 = vld [vmem:[%s6196_s3 + $0x110] sm:$0xff] }
 0x126   :  { %2571 = vmatpush.bf16.msra.mxu2 %v4283_v37  ;;  %v4263_v57 = vld [vmem:[%s6196_s3 + $0x18] sm:$0xff]  ;;  %v4296_v37 = vld [vmem:[%s6196_s3 + $0x120] sm:$0xff] }
 0x127   :  { %2008 = vmatmul.bf16.vlgmr.msrb.gmra.mxu3 %v4671_v20  ;;  %2546 = vmatpush.bf16.msra.mxu0 %v4266_v40  ;;  %v289_v20 = vperm.slane %v5484_v56, 2  ;;  %v4271_v59 = vld [vmem:[%s6196_s3 + $0x58] sm:$0xff]  ;;  %v1788_v60 = vpop.f32.mrf.mxu2  ;;  %v1776_v63 = vadd.f32 %v1775_v51, %v1763_v54  ;;  %v1777_v4 = vpop.f32.mrf.mxu1  ;;  %v4304_v40 = vld [vmem:[%s6196_s3 + $0x160] sm:$0xff]  ;;  %v4293_v51 = vld [vmem:[%s6196_s3 + $0x108] sm:$0xff] }
 0x128   :  { %2584 = vmatpush.bf16.msra.mxu3 %v4291_v39  ;;  %2559 = vmatpush.bf16.msra.mxu1 %v4274_v41  ;;  %v4287_v0 = vld [vmem:[%s6196_s3 + $0xd8] sm:$0xff] }
 0x129   :  { %v1711_v53 = vadd.f32 %v5866_v32, %v289_v20  ;;  %v4279_v32 = vld [vmem:[%s6196_s3 + $0x98] sm:$0xff]  ;;  %v1801_v61 = vpop.f32.mrf.mxu3  ;;  %v1789_v6 = vadd.f32 %v1788_v60, %v1776_v63  ;;  %v4300_v60 = vld [vmem:[%s6196_s3 + $0x140] sm:$0xff] }
 0x12a   :  { %2572 = vmatpush.bf16.msra.mxu2 %v4282_v42  ;;  %v4299_v24 = vld [vmem:[%s6196_s3 + $0x138] sm:$0xff]  ;;  %v4312_v63 = vld [vmem:[%s6196_s3 + $0x1a0] sm:$0xff] }
 0x12b   :  { %2547 = vmatpush.bf16.msra.mxu0 %v4265_v44  ;;  %v1724_v62 = vadd.f32 %v5877_v38, %v1711_v53  ;;  %v4278_v38 = vld [vmem:[%s6196_s3 + $0x90] sm:$0xff]  ;;  %v1802_v14 = vadd.f32 %v1801_v61, %v1789_v6  ;;  %v4307_v50 = vld [vmem:[%s6196_s3 + $0x178] sm:$0xff]  ;;  %v4301_v53 = vld [vmem:[%s6196_s3 + $0x148] sm:$0xff] }
 0x12c   :  { %2585 = vmatpush.bf16.msra.mxu3 %v4290_v43  ;;  %2560 = vmatpush.bf16.msra.mxu1 %v4273_v19  ;;  %v4295_v44 = vld [vmem:[%s6196_s3 + $0x118] sm:$0xff]  ;;  %v4313_v61 = vld [vmem:[%s6196_s3 + $0x1a8] sm:$0xff] }
 0x12d   :  { %v1737_v5 = vadd.f32 %v5903_v52, %v1724_v62  ;;  %v4277_v52 = vld [vmem:[%s6196_s3 + $0x88] sm:$0xff]  ;;  %v2016_v26 = vmax.f32 %v1802_v14, 0.0  ;;  %v4303_v56 = vld [vmem:[%s6196_s3 + $0x158] sm:$0xff] }
 0x12e   :  { %2573 = vmatpush.bf16.msra.mxu2 %v4281_v18 }
 0x12f   :  { %2548 = vmatpush.bf16.msra.mxu0 %v4264_v46  ;;  %v1790_v11 = vpop.f32.mrf.mxu2  ;;  %v1750_v13 = vadd.f32 %v5914_v58, %v1737_v5  ;;  %v4276_v58 = vld [vmem:[%s6196_s3 + $0x80] sm:$0xff]  ;;  %v2024_v33 = vpack.c.bf16 %v2016_v26, %v2016_v26  ;;  %v4302_v46 = vld [vmem:[%s6196_s3 + $0x150] sm:$0xff]  ;;  %v4319_v26 = vld [vmem:[%s6196_s3 + $0x1d8] sm:$0xff] }
 0x130   :  { %2586 = vmatpush.bf16.msra.mxu3 %v4289_v45  ;;  %2561 = vmatpush.bf16.msra.mxu1 %v4272_v48  ;;  %v4315_v48 = vld [vmem:[%s6196_s3 + $0x1b8] sm:$0xff]  ;;  %v4310_v5 = vld [vmem:[%s6196_s3 + $0x190] sm:$0xff] }
 0x131   :  { %v1803_v12 = vpop.f32.mrf.mxu3  ;;  %v2015_v25 = vmax.f32 %v1750_v13, 0.0 }
 0x132   :  { %2574 = vmatpush.bf16.msra.mxu2 %v4280_v49 }
 0x133   :  { %2549 = vmatpush.bf16.msra.mxu0 %v4263_v57  ;;  %v2023_v31 = vpack.c.bf16 %v2015_v25, %v2015_v25 }
 0x134   :  { %2587 = vmatpush.bf16.msra.mxu3 %v4288_v55  ;;  %2562 = vmatpush.bf16.msra.mxu1 %v4271_v59  ;;  %v4314_v55 = vld [vmem:[%s6196_s3 + $0x1b0] sm:$0xff] }
 0x136   :  { %2575 = vmatpush.bf16.msra.mxu2 %v4279_v32  ;;  %v4292_v32 = vld [vmem:[%s6196_s3 + $0x100] sm:$0xff] }
 0x137   :  { %2550 = vmatpush.bf16.msra.mxu0 %v4262_v1  ;;  %v4332_v1 = vld [vmem:[%s6195_s2] sm:$0xff] }
 0x138   :  { %2588 = vmatpush.bf16.msra.mxu3 %v4287_v0  ;;  %2563 = vmatpush.bf16.msra.mxu1 %v4270_v3  ;;  %v4311_v0 = vld [vmem:[%s6196_s3 + $0x198] sm:$0xff]  ;;  %v292_v2 = vperm.slane %v4332_v1, 5  ;;  %v293_v25 = vperm.slane %v4332_v1, 6 }
 0x13a   :  { %2576 = vmatpush.bf16.msra.mxu2 %v4278_v38 }
 0x13b   :  { %2551 = vmatpush.bf16.msra.mxu0 %v4261_v9 }
 0x13c   :  { %2589 = vmatpush.bf16.msra.mxu3 %v4286_v7  ;;  %2564 = vmatpush.bf16.msra.mxu1 %v4269_v10 }
 0x13d   :  { %v1814_v39 = vpop.f32.mrf.mxu0 }
 0x13e   :  { %2577 = vmatpush.bf16.msra.mxu2 %v4277_v52  ;;  %v1815_v41 = vadd.f32 %v1814_v39, %v291_v36  ;;  %v4309_v52 = vld [vmem:[%s6196_s3 + $0x188] sm:$0xff] }
 0x13f   :  { %2552 = vmatpush.bf16.msra.mxu0 %v4260_v16  ;;  %v1827_v42 = vpop.f32.mrf.mxu1  ;;  %v4323_v16 = vld [vmem:[%s6196_s3 + $0x1f8] sm:$0xff] }
 0x140   :  { %2590 = vmatpush.bf16.msra.mxu3 %v4285_v15  ;;  %2565 = vmatpush.bf16.msra.mxu1 %v4268_v21  ;;  %v1828_v43 = vadd.f32 %v1827_v42, %v1815_v41  ;;  %v4308_v15 = vld [vmem:[%s6196_s3 + $0x180] sm:$0xff]  ;;  %v4322_v21 = vld [vmem:[%s6196_s3 + $0x1f0] sm:$0xff] }
 0x142   :  { %2578 = vmatpush.bf16.msra.mxu2 %v4276_v58  ;;  %2553 = vmatmul.bf16.vlgmr.msra.gmra.mxu0 %v2021_v28  ;;  %v4318_v28 = vld [vmem:[%s6196_s3 + $0x1d0] sm:$0xff] }
 0x143   :  { %2597 = vmatpush.bf16.msrb.mxu0 %v4299_v24  ;;  %2566 = vmatmul.bf16.vlgmr.msra.gmra.mxu1 %v2022_v8  ;;  %v4321_v24 = vld [vmem:[%s6196_s3 + $0x1e8] sm:$0xff] }
 0x144   :  { %2610 = vmatpush.bf16.msrb.mxu1 %v4307_v50  ;;  %2591 = vmatpush.bf16.msra.mxu3 %v4284_v27  ;;  %v4320_v50 = vld [vmem:[%s6196_s3 + $0x1e0] sm:$0xff] }
 0x145   :  { %2579 = vmatmul.bf16.vlgmr.msra.gmra.mxu2 %v2023_v31  ;;  %v1816_v45 = vpop.f32.mrf.mxu0 }
 0x146   :  { %2623 = vmatpush.bf16.msrb.mxu2 %v4315_v48 }
 0x147   :  { %2598 = vmatpush.bf16.msrb.mxu0 %v4298_v29  ;;  %2592 = vmatmul.bf16.vlgmr.msra.gmra.mxu3 %v2024_v33  ;;  %v1840_v19 = vpop.f32.mrf.mxu2  ;;  %v1829_v47 = vpop.f32.mrf.mxu1  ;;  %v4317_v33 = vld [vmem:[%s6196_s3 + $0x1c8] sm:$0xff] }
 0x148   :  { %2611 = vmatpush.bf16.msrb.mxu1 %v4306_v30  ;;  %v1841_v20 = vadd.f32 %v1840_v19, %v1828_v43  ;;  %2636 = vmatpush.bf16.msrb.mxu3 %v4323_v16 }
 0x149   :  { %v1853_v18 = vpop.f32.mrf.mxu3 }
 0x14a   :  { %v1854_v49 = vadd.f32 %v1853_v18, %v1841_v20  ;;  %2624 = vmatpush.bf16.msrb.mxu2 %v4314_v55 }
 0x14b   :  { %2599 = vmatpush.bf16.msrb.mxu0 %v4297_v34 }
 0x14c   :  { %2612 = vmatpush.bf16.msrb.mxu1 %v4305_v35  ;;  %v2017_v59 = vmax.f32 %v1854_v49, 0.0  ;;  %2637 = vmatpush.bf16.msrb.mxu3 %v4322_v21 }
 0x14e   :  { %v2025_v62 = vpack.c.bf16 %v2017_v59, %v2017_v59  ;;  %2625 = vmatpush.bf16.msrb.mxu2 %v4313_v61  ;;  %v4326_v59 = vld [vmem:[%s6197_s4] ss:$0 sm:$0xff] }
 0x14f   :  { %2600 = vmatpush.bf16.msrb.mxu0 %v4296_v37  ;;  %v1842_v54 = vpop.f32.mrf.mxu2 }
 0x150   :  { %2613 = vmatpush.bf16.msrb.mxu1 %v4304_v40  ;;  %2638 = vmatpush.bf16.msrb.mxu3 %v4321_v24  ;;  %v4316_v40 = vld [vmem:[%s6196_s3 + $0x1c0] sm:$0xff] }
 0x151   :  { %v1855_v57 = vpop.f32.mrf.mxu3 }
 0x152   :  { %2626 = vmatpush.bf16.msrb.mxu2 %v4312_v63 }
 0x153   :  { %2601 = vmatpush.bf16.msrb.mxu0 %v4295_v44 }
 0x154   :  { %2614 = vmatpush.bf16.msrb.mxu1 %v4303_v56  ;;  %2639 = vmatpush.bf16.msrb.mxu3 %v4320_v50  ;;  %v294_v56 = vperm.slane %v4332_v1, 7  ;;  %v4327_v50 = vld [vmem:[%s6198_s6] ss:$0 sm:$0xff] }
 0x156   :  { %2627 = vmatpush.bf16.msrb.mxu2 %v4311_v0 }
 0x157   :  { %2602 = vmatpush.bf16.msrb.mxu0 %v4294_v22 }
 0x158   :  { %2615 = vmatpush.bf16.msrb.mxu1 %v4302_v46  ;;  %2640 = vmatpush.bf16.msrb.mxu3 %v4319_v26 }
 0x15a   :  { %2628 = vmatpush.bf16.msrb.mxu2 %v4310_v5 }
 0x15b   :  { %2603 = vmatpush.bf16.msrb.mxu0 %v4293_v51 }
 0x15c   :  { %2616 = vmatpush.bf16.msrb.mxu1 %v4301_v53  ;;  %2641 = vmatpush.bf16.msrb.mxu3 %v4318_v28 }
 0x15d   :  { %v1866_v3 = vpop.f32.mrf.mxu0 }
 0x15e   :  { %v1867_v38 = vadd.f32 %v1866_v3, %v292_v2  ;;  %2629 = vmatpush.bf16.msrb.mxu2 %v4309_v52 }
 0x15f   :  { %2604 = vmatpush.bf16.msrb.mxu0 %v4292_v32  ;;  %v1879_v4 = vpop.f32.mrf.mxu1 }
 0x160   :  { %2617 = vmatpush.bf16.msrb.mxu1 %v4300_v60  ;;  %v1880_v6 = vadd.f32 %v1879_v4, %v1867_v38  ;;  %2642 = vmatpush.bf16.msrb.mxu3 %v4317_v33 }
 0x162   :  { %2605 = vmatmul.bf16.vlgmr.msrb.gmra.mxu0 %v2025_v62  ;;  %2630 = vmatpush.bf16.msrb.mxu2 %v4308_v15 }
 0x164   :  { %2643 = vmatpush.bf16.msrb.mxu3 %v4316_v40 }
 0x165   :  { %v1868_v12 = vpop.f32.mrf.mxu0 }
 0x166   :  { %v4324_v12 = vld [vmem:[%s6199_s5] sm:$0xff] }
 0x167   :  { %v1892_v7 = vpop.f32.mrf.mxu2  ;;  %v1881_v13 = vpop.f32.mrf.mxu1 }
 0x168   :  { %v1893_v9 = vadd.f32 %v1892_v7, %v1880_v6 }
 0x169   :  { %v1905_v10 = vpop.f32.mrf.mxu3 }
 0x16a   :  { %v1906_v11 = vadd.f32 %v1905_v10, %v1893_v9 }
 0x16c   :  { %v2018_v14 = vmax.f32 %v1906_v11, 0.0  ;;  %v4325_v11 = vld [vmem:[%s6199_s5 + $0x8] sm:$0xff] }
 0x16d   :  { %2681 = vmatpush.bf16.msra.mxu0 %v4325_v11 }
 0x16e   :  { %v2026_v17 = vpack.c.bf16 %v2018_v14, %v2018_v14 }
 0x16f   :  { %v1894_v58 = vpop.f32.mrf.mxu2 }
 0x170   :  { %2618 = vmatmul.bf16.vlgmr.msrb.gmra.mxu1 %v2026_v17 }
 0x171   :  { %v1907_v23 = vpop.f32.mrf.mxu3  ;;  %2682 = vmatpush.bf16.msra.mxu0 %v4324_v12 }
 0x17d   :  { %v1918_v27 = vpop.f32.mrf.mxu0 }
 0x17e   :  { %v1919_v8 = vadd.f32 %v1918_v27, %v293_v25 }
 0x17f   :  { %v1931_v29 = vpop.f32.mrf.mxu1 }
 0x180   :  { %v1932_v30 = vadd.f32 %v1931_v29, %v1919_v8 }
 0x185   :  { %v1920_v37 = vpop.f32.mrf.mxu0 }
 0x187   :  { %v1944_v31 = vpop.f32.mrf.mxu2  ;;  %v1933_v39 = vpop.f32.mrf.mxu1 }
 0x188   :  { %v1945_v34 = vadd.f32 %v1944_v31, %v1932_v30 }
 0x189   :  { %v1957_v35 = vpop.f32.mrf.mxu3 }
 0x18a   :  { %v1958_v36 = vadd.f32 %v1957_v35, %v1945_v34 }
 0x18c   :  { %v2019_v41 = vmax.f32 %v1958_v36, 0.0 }
 0x18e   :  { %v2027_v42 = vpack.c.bf16 %v2019_v41, %v2019_v41 }
 0x18f   :  { %v1946_v43 = vpop.f32.mrf.mxu2 }
 0x190   :  { %2631 = vmatmul.bf16.vlgmr.msrb.gmra.mxu2 %v2027_v42 }
 0x191   :  { %v1959_v44 = vpop.f32.mrf.mxu3 }
 0x19e   :  { %v1970_v19 = vpop.f32.mrf.mxu0 }
 0x19f   :  { %v1971_v20 = vadd.f32 %v1970_v19, %v294_v56 }
 0x1a0   :  { %v1983_v18 = vpop.f32.mrf.mxu1 }
 0x1a1   :  { %v1984_v22 = vadd.f32 %v1983_v18, %v1971_v20 }
 0x1a6   :  { %v1972_v48 = vpop.f32.mrf.mxu0 }
 0x1a8   :  { %v1996_v45 = vpop.f32.mrf.mxu2  ;;  %v1985_v49 = vpop.f32.mrf.mxu1 }
 0x1a9   :  { %v1997_v47 = vadd.f32 %v1996_v45, %v1984_v22 }
 0x1aa   :  { %v2009_v46 = vpop.f32.mrf.mxu3 }
 0x1ab   :  { %v2010_v51 = vadd.f32 %v2009_v46, %v1997_v47 }
 0x1ad   :  { %v2020_v53 = vmax.f32 %v2010_v51, 0.0 }
 0x1af   :  { %v2028_v54 = vpack.c.bf16 %v2020_v53, %v2020_v53 }
 0x1b0   :  { %v1998_v55 = vpop.f32.mrf.mxu2 }
 0x1b1   :  { %2644 = vmatmul.bf16.vlgmr.msrb.gmra.mxu3 %v2028_v54 }
 0x1b2   :  { %v2011_v57 = vpop.f32.mrf.mxu3 }
 0x1bf   :  { %v2554_v32 = vpop.f32.mrf.mxu0 }
 0x1c0   :  { %v2555_v60 = vadd.f32 %v4326_v59, %v2554_v32  ;;  %v2567_v61 = vpop.f32.mrf.mxu1 }
 0x1c2   :  { %v2568_v62 = vadd.f32 %v2567_v61, %v2555_v60 }
 0x1c7   :  { %v2556_v0 = vpop.f32.mrf.mxu0 }
 0x1c8   :  { %v2580_v63 = vpop.f32.mrf.mxu2  ;;  %v2569_v2 = vpop.f32.mrf.mxu1 }
 0x1c9   :  { %v2581_v1 = vadd.f32 %v2580_v63, %v2568_v62 }
 0x1ca   :  { %v2593_v3 = vpop.f32.mrf.mxu3 }
 0x1cb   :  { %v2594_v38 = vadd.f32 %v2593_v3, %v2581_v1 }
 0x1d0   :  { %v2582_v4 = vpop.f32.mrf.mxu2 }
 0x1d2   :  { %v2595_v5 = vpop.f32.mrf.mxu3 }
 0x1df   :  { %v2606_v6 = vpop.f32.mrf.mxu0 }
 0x1e0   :  { %v2607_v7 = vadd.f32 %v2606_v6, %v2594_v38 }
 0x1e7   :  { %v2608_v9 = vpop.f32.mrf.mxu0 }
 0x1ed   :  { %v2619_v10 = vpop.f32.mrf.mxu1 }
 0x1ee   :  { %v2620_v15 = vadd.f32 %v2619_v10, %v2607_v7 }
 0x1f5   :  { %v2621_v52 = vpop.f32.mrf.mxu1 }
 0x213   :  { %v2632_v13 = vpop.f32.mrf.mxu2 }
 0x214   :  { %v2633_v16 = vadd.f32 %v2632_v13, %v2620_v15 }
 0x21b   :  { %v2634_v14 = vpop.f32.mrf.mxu2 }
 0x234   :  { %v2645_v17 = vpop.f32.mrf.mxu3 }
 0x235   :  { %v2646_v21 = vadd.f32 %v2645_v17, %v2633_v16 }
 0x237   :  { %v2649_v58 = vmax.f32 %v2646_v21, 0.0 }
 0x239   :  { %v2650_v23 = vpack.c.bf16 %v2649_v58, %v2649_v58 }
 0x23b   :  { %4003 = vmatmul.msk.bf16.vlgmr.msra.gmra.mxu0 %vm2671_vm0, %v2650_v23 }
 0x23c   :  { %v2647_v24 = vpop.f32.mrf.mxu3 }
 0x2b8   :  { %v2684_v25 = vpop.f32.mrf.mxu0 }
 0x2b9   :  { %v2685_v26 = vadd.f32 %v4327_v50, %v2684_v25 }
 0x2bb   :  { %2688 = vmax.xlane.f32.xlu0 %v2685_v26 }
 0x2c0   :  { %v2686_v27 = vpop.f32.mrf.mxu0 }
 0x32e   :  { %v2689_v28 = vpop.xlane.xlu0 %2688 }
 0x32f   :  { %v2690_v8 = vsub.f32 %v2685_v26, %v2689_v28 }
 0x331   :  { %v2691_v29 = vmul.f32 1.442695, %v2690_v8 }
 0x333   :  { %4328 = vpow2.f32 %v2691_v29 }
 0x339   :  { %v4329_v30 = vpop.eup %4328 }
 0x33a   :  { %2693 = vadd.xlane.f32.xlu0 %v4329_v30 }
 0x3ad   :  { %v2694_v31 = vpop.xlane.xlu0 %2693 }
 0x3ae   :  { %4330 = vrcp.f32 %v2694_v31  ;;  %v2706_v36 = vand.u32 2147483648, %v2694_v31  ;;  %v2704_v39 = vand.u32 2147483647, %v2694_v31  ;;  %vm2700_vm2 = vweird.f32 %v2694_v31 }
 0x3b0   :  { %v2707_v41 = vor.u32 1.1754944e-38, %v2706_v36  ;;  %vm2705_vm4 = vcmp.eq.f32.partialorder %v2704_v39, 8.507059e+37 }
 0x3b4   :  { %v4331_v33 = vpop.eup %4330 }
 0x3b5   :  { %v2696_v34 = vmul.f32 %v4331_v33, %v2694_v31  ;;  %vm2701_vm1 = vweird.f32 %v4331_v33 }
 0x3b6   :  { %vm2702_vm3 = vmor %vm2700_vm2, %vm2701_vm1 }
 0x3b7   :  { %v2697_v35 = vsub.f32 1.0, %v2696_v34 }
 0x3b9   :  { %v2698_v37 = vmul.f32 %v4331_v33, %v2697_v35 }
 0x3bb   :  { %v2699_v40 = vadd.f32 %v4331_v33, %v2698_v37 }
 0x3bd   :  { %v2703_v42 = vsel %vm2702_vm3, %v4331_v33, %v2699_v40 }
 0x3be   :  { %v2708_v43 = vsel %vm2705_vm4, %v2707_v41, %v2703_v42 }
 0x3bf   :  { %v2709_v44 = vmul.f32 %v4329_v30, %v2708_v43 }
 0x3c1   :  { %2710 = vst [vmem:[%s6200_s7] sm:$0xff] %v2709_v44 }

</bundles_post_ra>
